<compile_context>
chip_gen: v5e
topology: v5e:2x2
jax: 0.10.0
libtpu: 0.0.40
codegen_flags: <defaults>
</compile_context>

<pallas_src>
import jax
import jax.numpy as jnp
from jax.experimental import pallas as pl
from jax.experimental.pallas import tpu as pltpu

# ----------------------- small synthetic ViT-B-16 config -----------------------
B = 2
IMG = 64                  # cfg.INPUT.SIZE_TRAIN
PATCH = 16                # ViT-B/16 patch size
STRIDE = 16               # cfg.MODEL.STRIDE_SIZE
HP = WP = (IMG - PATCH) // STRIDE + 1       # 4  (h_resolution / w_resolution)
NUM_PATCH = HP * WP                         # 16
L = NUM_PATCH + 1                           # 17 tokens (cls + patches)
LP = 24                   # tokens padded to a multiple of 8 sublanes
D = 64                    # in_planes        (768 in real ViT-B-16)
DP = 32                   # in_planes_proj   (512 in real ViT-B-16)
HEADS = 4
HEAD_DIM = D // HEADS
LAYERS = 2                # "resblocks[:11]" + "resblocks[11]" -> here 1 + 1
NUM_CLASSES = 10
PAD_CLASSES = 128         # lane-dense classifier output width
CAMERA_NUM = 3            # SIE_CAMERA only
SIE_COE = 1.0
EPS = 1e-5
CK = 3 * PATCH * PATCH    # flattened conv patch size
OUT_W = 5 * 128           # packed output lanes

assert LAYERS >= 2

# --------------------- packed f32 parameter-slab row layout ---------------------
R_CLS = 0                                   # class_embedding           [0:D]
R_POS = 1                                   # pos_embedding rows 0..L-1 [0:D]
R_LNPRE_G = R_POS + L                       # ln_pre gamma              [0:D]
R_LNPRE_B = R_LNPRE_G + 1                   # ln_pre beta               [0:D]
R_LAYER0 = R_LNPRE_B + 1
ROWS_PER_LAYER = 8                          # ln1_g ln1_b ln2_g ln2_b bqkv bo b1 b2
R_LNPOST_G = R_LAYER0 + LAYERS * ROWS_PER_LAYER
R_LNPOST_B = R_LNPOST_G + 1
R_BN_G = R_LNPOST_B + 1
R_BN_B = R_BN_G + 1
R_BNP_G = R_BN_B + 1
R_BNP_B = R_BNP_G + 1
VEC_ROWS = ((R_BNP_B + 1 + 7) // 8) * 8     # 48 (sublane aligned)
VEC_W = 4 * D                               # 256 lanes (fits b1 = 4D)


# ------------------------------ in-kernel helpers -------------------------------
def _ln(x, g, b):
    mu = jnp.mean(x, axis=-1, keepdims=True)
    var = jnp.mean(jnp.square(x - mu), axis=-1, keepdims=True)
    return (x - mu) * jax.lax.rsqrt(var + EPS) * g + b


def _bn_train(x, g, b):
    # BatchNorm1d in training mode: biased batch statistics over axis 0.
    mu = jnp.mean(x, axis=0, keepdims=True)
    var = jnp.mean(jnp.square(x - mu), axis=0, keepdims=True)
    return (x - mu) * jax.lax.rsqrt(var + EPS) * g + b


# ------------------------------ fused forward kernel ----------------------------
def _fused_forward_kernel(
        patches_ref, conv1_ref, cv_ref, vec_ref,
        wqkv_ref, wo_ref, w1_ref, w2_ref,
        proj_ref, clsw_ref, clspw_ref,
        out_ref):
    f32 = jnp.float32
    bf16 = jnp.bfloat16

    def vrow(r, w=D):
        # one packed parameter row as a (1, w) f32 value (static slice)
        return vec_ref[r:r + 1, 0:w]

    # ---- patch embedding: conv1 (16x16, stride 16, no bias) as one MXU matmul ----
    pe = jnp.dot(patches_ref[...], conv1_ref[...], preferred_element_type=f32)  # (B*NP, D)
    pe3 = pe.reshape(B, NUM_PATCH, D)

    # ---- token assembly (pure values, no scratch round-trip) ----
    cls_e = vrow(R_CLS)                                     # (1, D)
    pos0 = vrow(R_POS)                                      # (1, D)
    posr = vec_ref[R_POS + 1:R_POS + L, 0:D]                # (NUM_PATCH, D)
    cls_tok = (cls_e + pos0)[None, :, :] + cv_ref[...][:, None, :]   # (B, 1, D)
    patch_tok = pe3 + posr[None, :, :]                               # (B, NP, D)
    pad_tok = jnp.zeros((B, LP - L, D), f32)                         # pad rows (finite)
    x3 = jnp.concatenate([cls_tok, patch_tok, pad_tok], axis=1)      # (B, LP, D)
    x2d = x3.reshape(B * LP, D)

    # ---- ln_pre ----
    x2d = _ln(x2d, vrow(R_LNPRE_G), vrow(R_LNPRE_B))

    # additive key mask (padded tokens never attended to), hoisted out of loops
    kpos = jax.lax.broadcasted_iota(jnp.int32, (1, 1, LP), 2)
    amask = jnp.where(kpos < L, jnp.float32(0.0), jnp.float32(-1e30))  # (1,1,LP)
    scale = jnp.float32(1.0 / (HEAD_DIM ** 0.5))

    x11_2d = x2d
    for l in range(LAYERS):
        base = R_LAYER0 + l * ROWS_PER_LAYER
        # ---- pre-LN multi-head self-attention ----
        xn = _ln(x2d, vrow(base + 0), vrow(base + 1))
        qkv = jnp.dot(xn.astype(bf16), wqkv_ref[l],
                      preferred_element_type=f32) + vrow(base + 4, 3 * D)   # (B*LP, 3D)
        qkv3 = qkv.reshape(B, LP, 3 * D)                                    # layout-free

        heads = []
        for h in range(HEADS):
            # Mosaic dot_general supports one leading batch dim, so heads stay
            # a Python loop; per-head slices come straight from the reshaped qkv.
            q = qkv3[:, :, h * HEAD_DIM:(h + 1) * HEAD_DIM].astype(bf16)
            k = qkv3[:, :, D + h * HEAD_DIM:D + (h + 1) * HEAD_DIM].astype(bf16)
            v = qkv3[:, :, 2 * D + h * HEAD_DIM:2 * D + (h + 1) * HEAD_DIM].astype(bf16)
            s = jnp.einsum('bqd,bkd->bqk', q, k,
                           preferred_element_type=f32) * scale + amask
            m = jnp.max(s, axis=-1, keepdims=True)
            e = jnp.exp(s - m)
            p = (e * pl.reciprocal(jnp.sum(e, axis=-1, keepdims=True),
                                   approx=True)).astype(bf16)
            heads.append(jnp.einsum('bqk,bkd->bqd', p, v, preferred_element_type=f32))

        attn2d = jnp.concatenate(heads, axis=-1).reshape(B * LP, D)
        attn2d = jnp.dot(attn2d.astype(bf16), wo_ref[l],
                         preferred_element_type=f32) + vrow(base + 5)
        x2d = x2d + attn2d

        # ---- pre-LN MLP with QuickGELU ----
        xn2 = _ln(x2d, vrow(base + 2), vrow(base + 3))
        h1 = jnp.dot(xn2.astype(bf16), w1_ref[l],
                     preferred_element_type=f32) + vrow(base + 6, 4 * D)
        h1 = h1 * jax.nn.sigmoid(1.702 * h1)                # CLIP QuickGELU
        h2 = jnp.dot(h1.astype(bf16), w2_ref[l],
                     preferred_element_type=f32) + vrow(base + 7)
        x2d = x2d + h2

        if l == LAYERS - 2:                                  # output of resblocks[:-1]
            x11_2d = x2d

    # ---- cls-token features via true reshape (no slice-and-stack) ----
    cls11 = x11_2d.reshape(B, LP, D)[:, 0, :]                # (B, D) img_feature_last
    cls12 = x2d.reshape(B, LP, D)[:, 0, :]                   # (B, D) img_feature

    # ---- ln_post + proj epilogue (cls rows only), BN bottlenecks, classifiers ----
    cls_post = _ln(cls12, vrow(R_LNPOST_G), vrow(R_LNPOST_B))
    feat_proj = jnp.dot(cls_post.astype(bf16), proj_ref[...],
                        preferred_element_type=f32)          # (B, DP)

    feat_bn = _bn_train(cls12, vrow(R_BN_G), vrow(R_BN_B))
    featp_bn = _bn_train(feat_proj, vrow(R_BNP_G, DP), vrow(R_BNP_B, DP))
    score = jnp.dot(feat_bn.astype(bf16), clsw_ref[...],
                    preferred_element_type=f32)              # (B, 128)
    score_p = jnp.dot(featp_bn.astype(bf16), clspw_ref[...],
                      preferred_element_type=f32)            # (B, 128)

    # ---- lane-dense packed output: five 128-wide slots ----
    pad_d = jnp.zeros((B, 128 - D), f32)
    pad_dp = jnp.zeros((B, 128 - DP), f32)
    out_ref[:, 0:128] = jnp.concatenate([cls11, pad_d], axis=-1)        # img_feature_last
    out_ref[:, 128:256] = jnp.concatenate([cls12, pad_d], axis=-1)      # img_feature
    out_ref[:, 256:384] = jnp.concatenate([feat_proj, pad_dp], axis=-1)  # img_feature_proj
    out_ref[:, 384:512] = score                                         # cls_score (padded)
    out_ref[:, 512:640] = score_p                                       # cls_score_proj (padded)


def _fullspec(shape):
    n = len(shape)
    return pl.BlockSpec(shape, lambda i, _n=n: (0,) * _n)


# --------------------------- parameters (deterministic) -------------------------
def init_params(key):
    keys = iter(jax.random.split(key, 16))

    def nrm(shape, std):
        return std * jax.random.normal(next(keys), shape, dtype=jnp.float32)

    p = {}
    # big matmul weights stay separate, stored bf16
    p["conv1_w"] = nrm((CK, D), 0.02).astype(jnp.bfloat16)
    p["wqkv"] = nrm((LAYERS, D, 3 * D), 0.02).astype(jnp.bfloat16)
    p["wo"] = nrm((LAYERS, D, D), 0.02).astype(jnp.bfloat16)
    p["w1"] = nrm((LAYERS, D, 4 * D), 0.02).astype(jnp.bfloat16)
    p["w2"] = nrm((LAYERS, 4 * D, D), 0.02).astype(jnp.bfloat16)
    p["proj"] = nrm((D, DP), 0.02).astype(jnp.bfloat16)

    # bias-free classifiers (weight.T), zero-padded to 128 output lanes
    cls_w = nrm((D, NUM_CLASSES), 0.001)
    clsp_w = nrm((DP, NUM_CLASSES), 0.001)
    p["cls_w_pad"] = jnp.pad(
        cls_w, ((0, 0), (0, PAD_CLASSES - NUM_CLASSES))).astype(jnp.bfloat16)
    p["clsp_w_pad"] = jnp.pad(
        clsp_w, ((0, 0), (0, PAD_CLASSES - NUM_CLASSES))).astype(jnp.bfloat16)

    # SIE camera embedding (indexed in the wrapper by cam_label)
    p["cv_embed"] = nrm((CAMERA_NUM, D), 0.02)

    # ---- all tiny norm / bias / embedding params packed into ONE f32 slab ----
    class_embedding = nrm((D,), 0.02)
    pos_embedding = nrm((L, D), 0.01)

    vec = jnp.zeros((VEC_ROWS, VEC_W), jnp.float32)
    vec = vec.at[R_CLS, :D].set(class_embedding)
    vec = vec.at[R_POS:R_POS + L, :D].set(pos_embedding)
    vec = vec.at[R_LNPRE_G, :D].set(1.0)          # ln_pre gamma (beta stays 0)
    for l in range(LAYERS):
        base = R_LAYER0 + l * ROWS_PER_LAYER
        vec = vec.at[base + 0, :D].set(1.0)       # ln1 gamma
        vec = vec.at[base + 2, :D].set(1.0)       # ln2 gamma
        # ln1/ln2 beta, bqkv, bo, b1, b2 are zero-initialized (default torch init)
    vec = vec.at[R_LNPOST_G, :D].set(1.0)         # ln_post gamma
    vec = vec.at[R_BN_G, :D].set(1.0)             # bottleneck gamma
    vec = vec.at[R_BNP_G, :DP].set(1.0)           # bottleneck_proj gamma
    p["vec"] = vec
    return p


def extract_patches(x):
    # NCHW -> [B*num_patches, C*kh*kw] with (c, kh, kw) flattening (matches conv weight)
    Bb = x.shape[0]
    x = x.reshape(Bb, 3, HP, PATCH, WP, PATCH)
    x = x.transpose(0, 2, 4, 1, 3, 5)
    return x.reshape(Bb * NUM_PATCH, CK)


# ----------------------------------- forward ------------------------------------
def forward(params, x, cam_label):
    assert x.shape[0] == B
    patches = extract_patches(x).astype(jnp.bfloat16)
    cv = (SIE_COE * params["cv_embed"][cam_label]).astype(jnp.float32)   # (B, D)

    args = (patches, params["conv1_w"], cv, params["vec"],
            params["wqkv"], params["wo"], params["w1"], params["w2"],
            params["proj"], params["cls_w_pad"], params["clsp_w_pad"])

    out = pl.pallas_call(
        _fused_forward_kernel,
        out_shape=jax.ShapeDtypeStruct((B, OUT_W), jnp.float32),
        grid=(1,),
        in_specs=[_fullspec(a.shape) for a in args],
        out_specs=pl.BlockSpec((B, OUT_W), lambda i: (0, 0)),
        compiler_params=pltpu.CompilerParams(dimension_semantics=("arbitrary",)),
    )(*args)

    img_feature_last = out[:, 0:D]
    img_feature = out[:, 128:128 + D]
    img_feature_proj = out[:, 256:256 + DP]
    cls_score = out[:, 384:384 + NUM_CLASSES]
    cls_score_proj = out[:, 512:512 + NUM_CLASSES]

    return ([cls_score, cls_score_proj],
            [img_feature_last, img_feature, img_feature_proj],
            img_feature_proj)


# ------------------------------------- main --------------------------------------
if __name__ == "__main__":
    key = jax.random.PRNGKey(0)
    k_param, k_x = jax.random.split(key)
    params = init_params(k_param)
    x = jax.random.normal(k_x, (B, 3, IMG, IMG), dtype=jnp.float32)   # NCHW like PyTorch
    cam_label = jnp.array([0, 2], dtype=jnp.int32)

    fwd = jax.jit(forward)
    scores, feats, feat_proj = fwd(params, x, cam_label)
    jax.block_until_ready(scores)
    jax.block_until_ready(feats)
    jax.block_until_ready(feat_proj)

    assert scores[0].shape == (B, NUM_CLASSES) and scores[1].shape == (B, NUM_CLASSES)
    assert feats[0].shape == (B, D) and feats[1].shape == (B, D) and feats[2].shape == (B, DP)
    assert feat_proj.shape == (B, DP)
    assert bool(jnp.all(jnp.isfinite(scores[0]))) and bool(jnp.all(jnp.isfinite(scores[1])))
    assert bool(jnp.all(jnp.isfinite(feats[0]))) and bool(jnp.all(jnp.isfinite(feats[1])))
    assert bool(jnp.all(jnp.isfinite(feats[2])))
    print("KERNEL_OK")
</pallas_src>

<mosaic_0001>
module attributes {stable_mosaic.version = 11 : i64} {
  func.func @_fused_forward_kernel(%arg0: i32, %arg1: memref<32x768xbf16, #tpu.memory_space<vmem>>, %arg2: memref<768x64xbf16, #tpu.memory_space<vmem>>, %arg3: memref<2x64xf32, #tpu.memory_space<vmem>>, %arg4: memref<48x256xf32, #tpu.memory_space<vmem>>, %arg5: memref<2x64x192xbf16, #tpu.memory_space<vmem>>, %arg6: memref<2x64x64xbf16, #tpu.memory_space<vmem>>, %arg7: memref<2x64x256xbf16, #tpu.memory_space<vmem>>, %arg8: memref<2x256x64xbf16, #tpu.memory_space<vmem>>, %arg9: memref<64x32xbf16, #tpu.memory_space<vmem>>, %arg10: memref<64x128xbf16, #tpu.memory_space<vmem>>, %arg11: memref<32x128xbf16, #tpu.memory_space<vmem>>, %arg12: memref<2x640xf32, #tpu.memory_space<vmem>>) attributes {dimension_semantics = [#tpu.dimension_semantics<arbitrary>], iteration_bounds = array<i64: 1>, scalar_prefetch = 0 : i64, scratch_operands = 0 : i64, tpu.core_type = #tpu.core_type<tc>, window_params = [{pipeline_mode = #tpu.pipeline_mode<synchronous>, transform_indices = @transform_0, window_bounds = array<i64: 32, 768>}, {pipeline_mode = #tpu.pipeline_mode<synchronous>, transform_indices = @transform_1, window_bounds = array<i64: 768, 64>}, {pipeline_mode = #tpu.pipeline_mode<synchronous>, transform_indices = @transform_2, window_bounds = array<i64: 2, 64>}, {pipeline_mode = #tpu.pipeline_mode<synchronous>, transform_indices = @transform_3, window_bounds = array<i64: 48, 256>}, {pipeline_mode = #tpu.pipeline_mode<synchronous>, transform_indices = @transform_4, window_bounds = array<i64: 2, 64, 192>}, {pipeline_mode = #tpu.pipeline_mode<synchronous>, transform_indices = @transform_5, window_bounds = array<i64: 2, 64, 64>}, {pipeline_mode = #tpu.pipeline_mode<synchronous>, transform_indices = @transform_6, window_bounds = array<i64: 2, 64, 256>}, {pipeline_mode = #tpu.pipeline_mode<synchronous>, transform_indices = @transform_7, window_bounds = array<i64: 2, 256, 64>}, {pipeline_mode = #tpu.pipeline_mode<synchronous>, transform_indices = @transform_8, window_bounds = array<i64: 64, 32>}, {pipeline_mode = #tpu.pipeline_mode<synchronous>, transform_indices = @transform_9, window_bounds = array<i64: 64, 128>}, {pipeline_mode = #tpu.pipeline_mode<synchronous>, transform_indices = @transform_10, window_bounds = array<i64: 32, 128>}, {pipeline_mode = #tpu.pipeline_mode<synchronous>, transform_indices = @transform_11, window_bounds = array<i64: 2, 640>}]} {
    %c0 = arith.constant 0 : index
    %c0_0 = arith.constant 0 : index
    %0 = vector.load %arg1[%c0, %c0_0] : memref<32x768xbf16, #tpu.memory_space<vmem>>, vector<32x768xbf16>
    %c0_1 = arith.constant 0 : index
    %c0_2 = arith.constant 0 : index
    %1 = vector.load %arg2[%c0_1, %c0_2] : memref<768x64xbf16, #tpu.memory_space<vmem>>, vector<768x64xbf16>
    %cst = arith.constant dense<0.000000e+00> : vector<32x64xf32>
    %2 = tpu.matmul %0, %1, %cst {dimension_numbers = #tpu.dot_dimension_numbers<[1], [0], [0], [1], [0, 0, 1, 1], [], []>} : vector<32x768xbf16>, vector<768x64xbf16>, vector<32x64xf32> -> vector<32x64xf32>
    %3 = vector.shape_cast %2 : vector<32x64xf32> to vector<2x16x64xf32>
    %c0_3 = arith.constant 0 : index
    %c0_4 = arith.constant 0 : index
    %4 = vector.load %arg4[%c0_3, %c0_4] : memref<48x256xf32, #tpu.memory_space<vmem>>, vector<1x64xf32>
    %c1 = arith.constant 1 : index
    %c0_5 = arith.constant 0 : index
    %5 = vector.load %arg4[%c1, %c0_5] : memref<48x256xf32, #tpu.memory_space<vmem>>, vector<1x64xf32>
    %c2 = arith.constant 2 : index
    %c0_6 = arith.constant 0 : index
    %6 = vector.load %arg4[%c2, %c0_6] : memref<48x256xf32, #tpu.memory_space<vmem>>, vector<16x64xf32>
    %7 = arith.addf %4, %5 : vector<1x64xf32>
    %8 = vector.shape_cast %7 : vector<1x64xf32> to vector<1x1x64xf32>
    %c0_7 = arith.constant 0 : index
    %c0_8 = arith.constant 0 : index
    %9 = vector.load %arg3[%c0_7, %c0_8] : memref<2x64xf32, #tpu.memory_space<vmem>>, vector<2x64xf32>
    %10 = vector.shape_cast %9 : vector<2x64xf32> to vector<2x1x64xf32>
    %11 = vector.broadcast %8 : vector<1x1x64xf32> to vector<2x1x64xf32>
    %12 = arith.addf %11, %10 : vector<2x1x64xf32>
    %13 = vector.shape_cast %6 : vector<16x64xf32> to vector<1x16x64xf32>
    %14 = vector.broadcast %13 : vector<1x16x64xf32> to vector<2x16x64xf32>
    %15 = arith.addf %3, %14 : vector<2x16x64xf32>
    %cst_9 = arith.constant 0.000000e+00 : f32
    %16 = vector.broadcast %cst_9 : f32 to vector<2x7x64xf32>
    %17 = tpu.concatenate %12, %15, %16 in 1 : vector<2x1x64xf32>, vector<2x16x64xf32>, vector<2x7x64xf32> -> vector<2x24x64xf32>
    %18 = vector.shape_cast %17 : vector<2x24x64xf32> to vector<48x64xf32>
    %c18 = arith.constant 18 : index
    %c0_10 = arith.constant 0 : index
    %19 = vector.load %arg4[%c18, %c0_10] : memref<48x256xf32, #tpu.memory_space<vmem>>, vector<1x64xf32>
    %c19 = arith.constant 19 : index
    %c0_11 = arith.constant 0 : index
    %20 = vector.load %arg4[%c19, %c0_11] : memref<48x256xf32, #tpu.memory_space<vmem>>, vector<1x64xf32>
    %cst_12 = arith.constant dense<0.000000e+00> : vector<48xf32>
    %21 = vector.multi_reduction <add>, %18, %cst_12 [1] : vector<48x64xf32> to vector<48xf32>
    %22 = vector.shape_cast %21 : vector<48xf32> to vector<48x1xf32>
    %cst_13 = arith.constant 6.400000e+01 : f32
    %23 = vector.broadcast %cst_13 : f32 to vector<48x1xf32>
    %24 = arith.divf %22, %23 : vector<48x1xf32>
    %25 = vector.broadcast %24 : vector<48x1xf32> to vector<48x64xf32>
    %26 = arith.subf %18, %25 : vector<48x64xf32>
    %27 = arith.mulf %26, %26 : vector<48x64xf32>
    %cst_14 = arith.constant dense<0.000000e+00> : vector<48xf32>
    %28 = vector.multi_reduction <add>, %27, %cst_14 [1] : vector<48x64xf32> to vector<48xf32>
    %29 = vector.shape_cast %28 : vector<48xf32> to vector<48x1xf32>
    %cst_15 = arith.constant 6.400000e+01 : f32
    %30 = vector.broadcast %cst_15 : f32 to vector<48x1xf32>
    %31 = arith.divf %29, %30 : vector<48x1xf32>
    %32 = vector.broadcast %24 : vector<48x1xf32> to vector<48x64xf32>
    %33 = arith.subf %18, %32 : vector<48x64xf32>
    %cst_16 = arith.constant 9.99999974E-6 : f32
    %34 = vector.broadcast %cst_16 : f32 to vector<48x1xf32>
    %35 = arith.addf %31, %34 : vector<48x1xf32>
    %36 = math.rsqrt %35 : vector<48x1xf32>
    %37 = vector.broadcast %36 : vector<48x1xf32> to vector<48x64xf32>
    %38 = arith.mulf %33, %37 : vector<48x64xf32>
    %39 = vector.broadcast %19 : vector<1x64xf32> to vector<48x64xf32>
    %40 = arith.mulf %38, %39 : vector<48x64xf32>
    %41 = vector.broadcast %20 : vector<1x64xf32> to vector<48x64xf32>
    %42 = arith.addf %40, %41 : vector<48x64xf32>
    %43 = tpu.iota {dimensions = array<i32: 2>} : vector<1x1x24xi32>
    %c17_i32 = arith.constant 17 : i32
    %44 = vector.broadcast %c17_i32 : i32 to vector<1x1x24xi32>
    %45 = arith.cmpi slt, %43, %44 : vector<1x1x24xi32>
    %cst_17 = arith.constant 0.000000e+00 : f32
    %cst_18 = arith.constant -1.000000e+30 : f32
    %46 = vector.broadcast %cst_17 : f32 to vector<1x1x24xf32>
    %47 = vector.broadcast %cst_18 : f32 to vector<1x1x24xf32>
    %48 = arith.select %45, %46, %47 : vector<1x1x24xi1>, vector<1x1x24xf32>
    %c20 = arith.constant 20 : index
    %c0_19 = arith.constant 0 : index
    %49 = vector.load %arg4[%c20, %c0_19] : memref<48x256xf32, #tpu.memory_space<vmem>>, vector<1x64xf32>
    %c21 = arith.constant 21 : index
    %c0_20 = arith.constant 0 : index
    %50 = vector.load %arg4[%c21, %c0_20] : memref<48x256xf32, #tpu.memory_space<vmem>>, vector<1x64xf32>
    %cst_21 = arith.constant dense<0.000000e+00> : vector<48xf32>
    %51 = vector.multi_reduction <add>, %42, %cst_21 [1] : vector<48x64xf32> to vector<48xf32>
    %52 = vector.shape_cast %51 : vector<48xf32> to vector<48x1xf32>
    %cst_22 = arith.constant 6.400000e+01 : f32
    %53 = vector.broadcast %cst_22 : f32 to vector<48x1xf32>
    %54 = arith.divf %52, %53 : vector<48x1xf32>
    %55 = vector.broadcast %54 : vector<48x1xf32> to vector<48x64xf32>
    %56 = arith.subf %42, %55 : vector<48x64xf32>
    %57 = arith.mulf %56, %56 : vector<48x64xf32>
    %cst_23 = arith.constant dense<0.000000e+00> : vector<48xf32>
    %58 = vector.multi_reduction <add>, %57, %cst_23 [1] : vector<48x64xf32> to vector<48xf32>
    %59 = vector.shape_cast %58 : vector<48xf32> to vector<48x1xf32>
    %cst_24 = arith.constant 6.400000e+01 : f32
    %60 = vector.broadcast %cst_24 : f32 to vector<48x1xf32>
    %61 = arith.divf %59, %60 : vector<48x1xf32>
    %62 = vector.broadcast %54 : vector<48x1xf32> to vector<48x64xf32>
    %63 = arith.subf %42, %62 : vector<48x64xf32>
    %cst_25 = arith.constant 9.99999974E-6 : f32
    %64 = vector.broadcast %cst_25 : f32 to vector<48x1xf32>
    %65 = arith.addf %61, %64 : vector<48x1xf32>
    %66 = math.rsqrt %65 : vector<48x1xf32>
    %67 = vector.broadcast %66 : vector<48x1xf32> to vector<48x64xf32>
    %68 = arith.mulf %63, %67 : vector<48x64xf32>
    %69 = vector.broadcast %49 : vector<1x64xf32> to vector<48x64xf32>
    %70 = arith.mulf %68, %69 : vector<48x64xf32>
    %71 = vector.broadcast %50 : vector<1x64xf32> to vector<48x64xf32>
    %72 = arith.addf %70, %71 : vector<48x64xf32>
    %73 = arith.truncf %72 : vector<48x64xf32> to vector<48x64xbf16>
    %c0_26 = arith.constant 0 : index
    %c0_27 = arith.constant 0 : index
    %c0_28 = arith.constant 0 : index
    %74 = vector.load %arg5[%c0_26, %c0_27, %c0_28] : memref<2x64x192xbf16, #tpu.memory_space<vmem>>, vector<1x64x192xbf16>
    %75 = vector.shape_cast %74 : vector<1x64x192xbf16> to vector<64x192xbf16>
    %cst_29 = arith.constant dense<0.000000e+00> : vector<48x192xf32>
    %76 = tpu.matmul %73, %75, %cst_29 {dimension_numbers = #tpu.dot_dimension_numbers<[1], [0], [0], [1], [0, 0, 1, 1], [], []>} : vector<48x64xbf16>, vector<64x192xbf16>, vector<48x192xf32> -> vector<48x192xf32>
    %c24 = arith.constant 24 : index
    %c0_30 = arith.constant 0 : index
    %77 = vector.load %arg4[%c24, %c0_30] : memref<48x256xf32, #tpu.memory_space<vmem>>, vector<1x192xf32>
    %78 = vector.broadcast %77 : vector<1x192xf32> to vector<48x192xf32>
    %79 = arith.addf %76, %78 : vector<48x192xf32>
    %80 = vector.shape_cast %79 : vector<48x192xf32> to vector<2x24x192xf32>
    %81 = vector.extract_strided_slice %80 {offsets = [0, 0, 0], sizes = [2, 24, 16], strides = [1, 1, 1]} : vector<2x24x192xf32> to vector<2x24x16xf32>
    %82 = arith.truncf %81 : vector<2x24x16xf32> to vector<2x24x16xbf16>
    %83 = vector.extract_strided_slice %80 {offsets = [0, 0, 64], sizes = [2, 24, 16], strides = [1, 1, 1]} : vector<2x24x192xf32> to vector<2x24x16xf32>
    %84 = arith.truncf %83 : vector<2x24x16xf32> to vector<2x24x16xbf16>
    %85 = vector.extract_strided_slice %80 {offsets = [0, 0, 128], sizes = [2, 24, 16], strides = [1, 1, 1]} : vector<2x24x192xf32> to vector<2x24x16xf32>
    %86 = arith.truncf %85 : vector<2x24x16xf32> to vector<2x24x16xbf16>
    "tpu.trace_start"() <{level = 10 : i32, message = "bqd,bkd->bqk"}> : () -> ()
    %cst_31 = arith.constant dense<0.000000e+00> : vector<2x24x24xf32>
    %87 = tpu.matmul %82, %84, %cst_31 {dimension_numbers = #tpu.dot_dimension_numbers<[2], [2], [1], [1], [0, 0, 0, 1, 1, 1], [0], [0]>} : vector<2x24x16xbf16>, vector<2x24x16xbf16>, vector<2x24x24xf32> -> vector<2x24x24xf32>
    "tpu.trace_stop"() : () -> ()
    %cst_32 = arith.constant 2.500000e-01 : f32
    %88 = vector.broadcast %cst_32 : f32 to vector<2x24x24xf32>
    %89 = arith.mulf %87, %88 : vector<2x24x24xf32>
    %90 = vector.broadcast %48 : vector<1x1x24xf32> to vector<2x24x24xf32>
    %91 = arith.addf %89, %90 : vector<2x24x24xf32>
    %cst_33 = arith.constant dense<0xFF800000> : vector<2x24xf32>
    %92 = vector.multi_reduction <maximumf>, %91, %cst_33 [2] : vector<2x24x24xf32> to vector<2x24xf32>
    %93 = vector.shape_cast %92 : vector<2x24xf32> to vector<2x24x1xf32>
    %94 = vector.broadcast %93 : vector<2x24x1xf32> to vector<2x24x24xf32>
    %95 = arith.subf %91, %94 : vector<2x24x24xf32>
    %96 = math.exp %95 : vector<2x24x24xf32>
    %cst_34 = arith.constant dense<0.000000e+00> : vector<2x24xf32>
    %97 = vector.multi_reduction <add>, %96, %cst_34 [2] : vector<2x24x24xf32> to vector<2x24xf32>
    %98 = vector.shape_cast %97 : vector<2x24xf32> to vector<2x24x1xf32>
    %99 = tpu.reciprocal %98 {approx = true} : vector<2x24x1xf32> -> vector<2x24x1xf32>
    %100 = vector.broadcast %99 : vector<2x24x1xf32> to vector<2x24x24xf32>
    %101 = arith.mulf %96, %100 : vector<2x24x24xf32>
    %102 = arith.truncf %101 : vector<2x24x24xf32> to vector<2x24x24xbf16>
    "tpu.trace_start"() <{level = 10 : i32, message = "bqk,bkd->bqd"}> : () -> ()
    %cst_35 = arith.constant dense<0.000000e+00> : vector<2x24x16xf32>
    %103 = tpu.matmul %102, %86, %cst_35 {dimension_numbers = #tpu.dot_dimension_numbers<[2], [1], [1], [2], [0, 0, 0, 1, 1, 2], [0], [0]>} : vector<2x24x24xbf16>, vector<2x24x16xbf16>, vector<2x24x16xf32> -> vector<2x24x16xf32>
    "tpu.trace_stop"() : () -> ()
    %104 = vector.extract_strided_slice %80 {offsets = [0, 0, 16], sizes = [2, 24, 16], strides = [1, 1, 1]} : vector<2x24x192xf32> to vector<2x24x16xf32>
    %105 = arith.truncf %104 : vector<2x24x16xf32> to vector<2x24x16xbf16>
    %106 = vector.extract_strided_slice %80 {offsets = [0, 0, 80], sizes = [2, 24, 16], strides = [1, 1, 1]} : vector<2x24x192xf32> to vector<2x24x16xf32>
    %107 = arith.truncf %106 : vector<2x24x16xf32> to vector<2x24x16xbf16>
    %108 = vector.extract_strided_slice %80 {offsets = [0, 0, 144], sizes = [2, 24, 16], strides = [1, 1, 1]} : vector<2x24x192xf32> to vector<2x24x16xf32>
    %109 = arith.truncf %108 : vector<2x24x16xf32> to vector<2x24x16xbf16>
    "tpu.trace_start"() <{level = 10 : i32, message = "bqd,bkd->bqk"}> : () -> ()
    %cst_36 = arith.constant dense<0.000000e+00> : vector<2x24x24xf32>
    %110 = tpu.matmul %105, %107, %cst_36 {dimension_numbers = #tpu.dot_dimension_numbers<[2], [2], [1], [1], [0, 0, 0, 1, 1, 1], [0], [0]>} : vector<2x24x16xbf16>, vector<2x24x16xbf16>, vector<2x24x24xf32> -> vector<2x24x24xf32>
    "tpu.trace_stop"() : () -> ()
    %cst_37 = arith.constant 2.500000e-01 : f32
    %111 = vector.broadcast %cst_37 : f32 to vector<2x24x24xf32>
    %112 = arith.mulf %110, %111 : vector<2x24x24xf32>
    %113 = vector.broadcast %48 : vector<1x1x24xf32> to vector<2x24x24xf32>
    %114 = arith.addf %112, %113 : vector<2x24x24xf32>
    %cst_38 = arith.constant dense<0xFF800000> : vector<2x24xf32>
    %115 = vector.multi_reduction <maximumf>, %114, %cst_38 [2] : vector<2x24x24xf32> to vector<2x24xf32>
    %116 = vector.shape_cast %115 : vector<2x24xf32> to vector<2x24x1xf32>
    %117 = vector.broadcast %116 : vector<2x24x1xf32> to vector<2x24x24xf32>
    %118 = arith.subf %114, %117 : vector<2x24x24xf32>
    %119 = math.exp %118 : vector<2x24x24xf32>
    %cst_39 = arith.constant dense<0.000000e+00> : vector<2x24xf32>
    %120 = vector.multi_reduction <add>, %119, %cst_39 [2] : vector<2x24x24xf32> to vector<2x24xf32>
    %121 = vector.shape_cast %120 : vector<2x24xf32> to vector<2x24x1xf32>
    %122 = tpu.reciprocal %121 {approx = true} : vector<2x24x1xf32> -> vector<2x24x1xf32>
    %123 = vector.broadcast %122 : vector<2x24x1xf32> to vector<2x24x24xf32>
    %124 = arith.mulf %119, %123 : vector<2x24x24xf32>
    %125 = arith.truncf %124 : vector<2x24x24xf32> to vector<2x24x24xbf16>
    "tpu.trace_start"() <{level = 10 : i32, message = "bqk,bkd->bqd"}> : () -> ()
    %cst_40 = arith.constant dense<0.000000e+00> : vector<2x24x16xf32>
    %126 = tpu.matmul %125, %109, %cst_40 {dimension_numbers = #tpu.dot_dimension_numbers<[2], [1], [1], [2], [0, 0, 0, 1, 1, 2], [0], [0]>} : vector<2x24x24xbf16>, vector<2x24x16xbf16>, vector<2x24x16xf32> -> vector<2x24x16xf32>
    "tpu.trace_stop"() : () -> ()
    %127 = vector.extract_strided_slice %80 {offsets = [0, 0, 32], sizes = [2, 24, 16], strides = [1, 1, 1]} : vector<2x24x192xf32> to vector<2x24x16xf32>
    %128 = arith.truncf %127 : vector<2x24x16xf32> to vector<2x24x16xbf16>
    %129 = vector.extract_strided_slice %80 {offsets = [0, 0, 96], sizes = [2, 24, 16], strides = [1, 1, 1]} : vector<2x24x192xf32> to vector<2x24x16xf32>
    %130 = arith.truncf %129 : vector<2x24x16xf32> to vector<2x24x16xbf16>
    %131 = vector.extract_strided_slice %80 {offsets = [0, 0, 160], sizes = [2, 24, 16], strides = [1, 1, 1]} : vector<2x24x192xf32> to vector<2x24x16xf32>
    %132 = arith.truncf %131 : vector<2x24x16xf32> to vector<2x24x16xbf16>
    "tpu.trace_start"() <{level = 10 : i32, message = "bqd,bkd->bqk"}> : () -> ()
    %cst_41 = arith.constant dense<0.000000e+00> : vector<2x24x24xf32>
    %133 = tpu.matmul %128, %130, %cst_41 {dimension_numbers = #tpu.dot_dimension_numbers<[2], [2], [1], [1], [0, 0, 0, 1, 1, 1], [0], [0]>} : vector<2x24x16xbf16>, vector<2x24x16xbf16>, vector<2x24x24xf32> -> vector<2x24x24xf32>
    "tpu.trace_stop"() : () -> ()
    %cst_42 = arith.constant 2.500000e-01 : f32
    %134 = vector.broadcast %cst_42 : f32 to vector<2x24x24xf32>
    %135 = arith.mulf %133, %134 : vector<2x24x24xf32>
    %136 = vector.broadcast %48 : vector<1x1x24xf32> to vector<2x24x24xf32>
    %137 = arith.addf %135, %136 : vector<2x24x24xf32>
    %cst_43 = arith.constant dense<0xFF800000> : vector<2x24xf32>
    %138 = vector.multi_reduction <maximumf>, %137, %cst_43 [2] : vector<2x24x24xf32> to vector<2x24xf32>
    %139 = vector.shape_cast %138 : vector<2x24xf32> to vector<2x24x1xf32>
    %140 = vector.broadcast %139 : vector<2x24x1xf32> to vector<2x24x24xf32>
    %141 = arith.subf %137, %140 : vector<2x24x24xf32>
    %142 = math.exp %141 : vector<2x24x24xf32>
    %cst_44 = arith.constant dense<0.000000e+00> : vector<2x24xf32>
    %143 = vector.multi_reduction <add>, %142, %cst_44 [2] : vector<2x24x24xf32> to vector<2x24xf32>
    %144 = vector.shape_cast %143 : vector<2x24xf32> to vector<2x24x1xf32>
    %145 = tpu.reciprocal %144 {approx = true} : vector<2x24x1xf32> -> vector<2x24x1xf32>
    %146 = vector.broadcast %145 : vector<2x24x1xf32> to vector<2x24x24xf32>
    %147 = arith.mulf %142, %146 : vector<2x24x24xf32>
    %148 = arith.truncf %147 : vector<2x24x24xf32> to vector<2x24x24xbf16>
    "tpu.trace_start"() <{level = 10 : i32, message = "bqk,bkd->bqd"}> : () -> ()
    %cst_45 = arith.constant dense<0.000000e+00> : vector<2x24x16xf32>
    %149 = tpu.matmul %148, %132, %cst_45 {dimension_numbers = #tpu.dot_dimension_numbers<[2], [1], [1], [2], [0, 0, 0, 1, 1, 2], [0], [0]>} : vector<2x24x24xbf16>, vector<2x24x16xbf16>, vector<2x24x16xf32> -> vector<2x24x16xf32>
    "tpu.trace_stop"() : () -> ()
    %150 = vector.extract_strided_slice %80 {offsets = [0, 0, 48], sizes = [2, 24, 16], strides = [1, 1, 1]} : vector<2x24x192xf32> to vector<2x24x16xf32>
    %151 = arith.truncf %150 : vector<2x24x16xf32> to vector<2x24x16xbf16>
    %152 = vector.extract_strided_slice %80 {offsets = [0, 0, 112], sizes = [2, 24, 16], strides = [1, 1, 1]} : vector<2x24x192xf32> to vector<2x24x16xf32>
    %153 = arith.truncf %152 : vector<2x24x16xf32> to vector<2x24x16xbf16>
    %154 = vector.extract_strided_slice %80 {offsets = [0, 0, 176], sizes = [2, 24, 16], strides = [1, 1, 1]} : vector<2x24x192xf32> to vector<2x24x16xf32>
    %155 = arith.truncf %154 : vector<2x24x16xf32> to vector<2x24x16xbf16>
    "tpu.trace_start"() <{level = 10 : i32, message = "bqd,bkd->bqk"}> : () -> ()
    %cst_46 = arith.constant dense<0.000000e+00> : vector<2x24x24xf32>
    %156 = tpu.matmul %151, %153, %cst_46 {dimension_numbers = #tpu.dot_dimension_numbers<[2], [2], [1], [1], [0, 0, 0, 1, 1, 1], [0], [0]>} : vector<2x24x16xbf16>, vector<2x24x16xbf16>, vector<2x24x24xf32> -> vector<2x24x24xf32>
    "tpu.trace_stop"() : () -> ()
    %cst_47 = arith.constant 2.500000e-01 : f32
    %157 = vector.broadcast %cst_47 : f32 to vector<2x24x24xf32>
    %158 = arith.mulf %156, %157 : vector<2x24x24xf32>
    %159 = vector.broadcast %48 : vector<1x1x24xf32> to vector<2x24x24xf32>
    %160 = arith.addf %158, %159 : vector<2x24x24xf32>
    %cst_48 = arith.constant dense<0xFF800000> : vector<2x24xf32>
    %161 = vector.multi_reduction <maximumf>, %160, %cst_48 [2] : vector<2x24x24xf32> to vector<2x24xf32>
    %162 = vector.shape_cast %161 : vector<2x24xf32> to vector<2x24x1xf32>
    %163 = vector.broadcast %162 : vector<2x24x1xf32> to vector<2x24x24xf32>
    %164 = arith.subf %160, %163 : vector<2x24x24xf32>
    %165 = math.exp %164 : vector<2x24x24xf32>
    %cst_49 = arith.constant dense<0.000000e+00> : vector<2x24xf32>
    %166 = vector.multi_reduction <add>, %165, %cst_49 [2] : vector<2x24x24xf32> to vector<2x24xf32>
    %167 = vector.shape_cast %166 : vector<2x24xf32> to vector<2x24x1xf32>
    %168 = tpu.reciprocal %167 {approx = true} : vector<2x24x1xf32> -> vector<2x24x1xf32>
    %169 = vector.broadcast %168 : vector<2x24x1xf32> to vector<2x24x24xf32>
    %170 = arith.mulf %165, %169 : vector<2x24x24xf32>
    %171 = arith.truncf %170 : vector<2x24x24xf32> to vector<2x24x24xbf16>
    "tpu.trace_start"() <{level = 10 : i32, message = "bqk,bkd->bqd"}> : () -> ()
    %cst_50 = arith.constant dense<0.000000e+00> : vector<2x24x16xf32>
    %172 = tpu.matmul %171, %155, %cst_50 {dimension_numbers = #tpu.dot_dimension_numbers<[2], [1], [1], [2], [0, 0, 0, 1, 1, 2], [0], [0]>} : vector<2x24x24xbf16>, vector<2x24x16xbf16>, vector<2x24x16xf32> -> vector<2x24x16xf32>
    "tpu.trace_stop"() : () -> ()
    %173 = tpu.concatenate %103, %126, %149, %172 in 2 : vector<2x24x16xf32>, vector<2x24x16xf32>, vector<2x24x16xf32>, vector<2x24x16xf32> -> vector<2x24x64xf32>
    %174 = vector.shape_cast %173 : vector<2x24x64xf32> to vector<48x64xf32>
    %175 = arith.truncf %174 : vector<48x64xf32> to vector<48x64xbf16>
    %c0_51 = arith.constant 0 : index
    %c0_52 = arith.constant 0 : index
    %c0_53 = arith.constant 0 : index
    %176 = vector.load %arg6[%c0_51, %c0_52, %c0_53] : memref<2x64x64xbf16, #tpu.memory_space<vmem>>, vector<1x64x64xbf16>
    %177 = vector.shape_cast %176 : vector<1x64x64xbf16> to vector<64x64xbf16>
    %cst_54 = arith.constant dense<0.000000e+00> : vector<48x64xf32>
    %178 = tpu.matmul %175, %177, %cst_54 {dimension_numbers = #tpu.dot_dimension_numbers<[1], [0], [0], [1], [0, 0, 1, 1], [], []>} : vector<48x64xbf16>, vector<64x64xbf16>, vector<48x64xf32> -> vector<48x64xf32>
    %c25 = arith.constant 25 : index
    %c0_55 = arith.constant 0 : index
    %179 = vector.load %arg4[%c25, %c0_55] : memref<48x256xf32, #tpu.memory_space<vmem>>, vector<1x64xf32>
    %180 = vector.broadcast %179 : vector<1x64xf32> to vector<48x64xf32>
    %181 = arith.addf %178, %180 : vector<48x64xf32>
    %182 = arith.addf %42, %181 : vector<48x64xf32>
    %c22 = arith.constant 22 : index
    %c0_56 = arith.constant 0 : index
    %183 = vector.load %arg4[%c22, %c0_56] : memref<48x256xf32, #tpu.memory_space<vmem>>, vector<1x64xf32>
    %c23 = arith.constant 23 : index
    %c0_57 = arith.constant 0 : index
    %184 = vector.load %arg4[%c23, %c0_57] : memref<48x256xf32, #tpu.memory_space<vmem>>, vector<1x64xf32>
    %cst_58 = arith.constant dense<0.000000e+00> : vector<48xf32>
    %185 = vector.multi_reduction <add>, %182, %cst_58 [1] : vector<48x64xf32> to vector<48xf32>
    %186 = vector.shape_cast %185 : vector<48xf32> to vector<48x1xf32>
    %cst_59 = arith.constant 6.400000e+01 : f32
    %187 = vector.broadcast %cst_59 : f32 to vector<48x1xf32>
    %188 = arith.divf %186, %187 : vector<48x1xf32>
    %189 = vector.broadcast %188 : vector<48x1xf32> to vector<48x64xf32>
    %190 = arith.subf %182, %189 : vector<48x64xf32>
    %191 = arith.mulf %190, %190 : vector<48x64xf32>
    %cst_60 = arith.constant dense<0.000000e+00> : vector<48xf32>
    %192 = vector.multi_reduction <add>, %191, %cst_60 [1] : vector<48x64xf32> to vector<48xf32>
    %193 = vector.shape_cast %192 : vector<48xf32> to vector<48x1xf32>
    %cst_61 = arith.constant 6.400000e+01 : f32
    %194 = vector.broadcast %cst_61 : f32 to vector<48x1xf32>
    %195 = arith.divf %193, %194 : vector<48x1xf32>
    %196 = vector.broadcast %188 : vector<48x1xf32> to vector<48x64xf32>
    %197 = arith.subf %182, %196 : vector<48x64xf32>
    %cst_62 = arith.constant 9.99999974E-6 : f32
    %198 = vector.broadcast %cst_62 : f32 to vector<48x1xf32>
    %199 = arith.addf %195, %198 : vector<48x1xf32>
    %200 = math.rsqrt %199 : vector<48x1xf32>
    %201 = vector.broadcast %200 : vector<48x1xf32> to vector<48x64xf32>
    %202 = arith.mulf %197, %201 : vector<48x64xf32>
    %203 = vector.broadcast %183 : vector<1x64xf32> to vector<48x64xf32>
    %204 = arith.mulf %202, %203 : vector<48x64xf32>
    %205 = vector.broadcast %184 : vector<1x64xf32> to vector<48x64xf32>
    %206 = arith.addf %204, %205 : vector<48x64xf32>
    %207 = arith.truncf %206 : vector<48x64xf32> to vector<48x64xbf16>
    %c0_63 = arith.constant 0 : index
    %c0_64 = arith.constant 0 : index
    %c0_65 = arith.constant 0 : index
    %208 = vector.load %arg7[%c0_63, %c0_64, %c0_65] : memref<2x64x256xbf16, #tpu.memory_space<vmem>>, vector<1x64x256xbf16>
    %209 = vector.shape_cast %208 : vector<1x64x256xbf16> to vector<64x256xbf16>
    %cst_66 = arith.constant dense<0.000000e+00> : vector<48x256xf32>
    %210 = tpu.matmul %207, %209, %cst_66 {dimension_numbers = #tpu.dot_dimension_numbers<[1], [0], [0], [1], [0, 0, 1, 1], [], []>} : vector<48x64xbf16>, vector<64x256xbf16>, vector<48x256xf32> -> vector<48x256xf32>
    %c26 = arith.constant 26 : index
    %c0_67 = arith.constant 0 : index
    %211 = vector.load %arg4[%c26, %c0_67] : memref<48x256xf32, #tpu.memory_space<vmem>>, vector<1x256xf32>
    %212 = vector.broadcast %211 : vector<1x256xf32> to vector<48x256xf32>
    %213 = arith.addf %210, %212 : vector<48x256xf32>
    %cst_68 = arith.constant 1.702000e+00 : f32
    %214 = vector.broadcast %cst_68 : f32 to vector<48x256xf32>
    %215 = arith.mulf %214, %213 : vector<48x256xf32>
    %216 = arith.negf %215 : vector<48x256xf32>
    %217 = math.exp %216 : vector<48x256xf32>
    %cst_69 = arith.constant 1.000000e+00 : f32
    %218 = vector.broadcast %cst_69 : f32 to vector<48x256xf32>
    %219 = arith.addf %218, %217 : vector<48x256xf32>
    %220 = arith.divf %218, %219 : vector<48x256xf32>
    %221 = arith.mulf %213, %220 : vector<48x256xf32>
    %222 = arith.truncf %221 : vector<48x256xf32> to vector<48x256xbf16>
    %c0_70 = arith.constant 0 : index
    %c0_71 = arith.constant 0 : index
    %c0_72 = arith.constant 0 : index
    %223 = vector.load %arg8[%c0_70, %c0_71, %c0_72] : memref<2x256x64xbf16, #tpu.memory_space<vmem>>, vector<1x256x64xbf16>
    %224 = vector.shape_cast %223 : vector<1x256x64xbf16> to vector<256x64xbf16>
    %cst_73 = arith.constant dense<0.000000e+00> : vector<48x64xf32>
    %225 = tpu.matmul %222, %224, %cst_73 {dimension_numbers = #tpu.dot_dimension_numbers<[1], [0], [0], [1], [0, 0, 1, 1], [], []>} : vector<48x256xbf16>, vector<256x64xbf16>, vector<48x64xf32> -> vector<48x64xf32>
    %c27 = arith.constant 27 : index
    %c0_74 = arith.constant 0 : index
    %226 = vector.load %arg4[%c27, %c0_74] : memref<48x256xf32, #tpu.memory_space<vmem>>, vector<1x64xf32>
    %227 = vector.broadcast %226 : vector<1x64xf32> to vector<48x64xf32>
    %228 = arith.addf %225, %227 : vector<48x64xf32>
    %229 = arith.addf %182, %228 : vector<48x64xf32>
    %c28 = arith.constant 28 : index
    %c0_75 = arith.constant 0 : index
    %230 = vector.load %arg4[%c28, %c0_75] : memref<48x256xf32, #tpu.memory_space<vmem>>, vector<1x64xf32>
    %c29 = arith.constant 29 : index
    %c0_76 = arith.constant 0 : index
    %231 = vector.load %arg4[%c29, %c0_76] : memref<48x256xf32, #tpu.memory_space<vmem>>, vector<1x64xf32>
    %cst_77 = arith.constant dense<0.000000e+00> : vector<48xf32>
    %232 = vector.multi_reduction <add>, %229, %cst_77 [1] : vector<48x64xf32> to vector<48xf32>
    %233 = vector.shape_cast %232 : vector<48xf32> to vector<48x1xf32>
    %cst_78 = arith.constant 6.400000e+01 : f32
    %234 = vector.broadcast %cst_78 : f32 to vector<48x1xf32>
    %235 = arith.divf %233, %234 : vector<48x1xf32>
    %236 = vector.broadcast %235 : vector<48x1xf32> to vector<48x64xf32>
    %237 = arith.subf %229, %236 : vector<48x64xf32>
    %238 = arith.mulf %237, %237 : vector<48x64xf32>
    %cst_79 = arith.constant dense<0.000000e+00> : vector<48xf32>
    %239 = vector.multi_reduction <add>, %238, %cst_79 [1] : vector<48x64xf32> to vector<48xf32>
    %240 = vector.shape_cast %239 : vector<48xf32> to vector<48x1xf32>
    %cst_80 = arith.constant 6.400000e+01 : f32
    %241 = vector.broadcast %cst_80 : f32 to vector<48x1xf32>
    %242 = arith.divf %240, %241 : vector<48x1xf32>
    %243 = vector.broadcast %235 : vector<48x1xf32> to vector<48x64xf32>
    %244 = arith.subf %229, %243 : vector<48x64xf32>
    %cst_81 = arith.constant 9.99999974E-6 : f32
    %245 = vector.broadcast %cst_81 : f32 to vector<48x1xf32>
    %246 = arith.addf %242, %245 : vector<48x1xf32>
    %247 = math.rsqrt %246 : vector<48x1xf32>
    %248 = vector.broadcast %247 : vector<48x1xf32> to vector<48x64xf32>
    %249 = arith.mulf %244, %248 : vector<48x64xf32>
    %250 = vector.broadcast %230 : vector<1x64xf32> to vector<48x64xf32>
    %251 = arith.mulf %249, %250 : vector<48x64xf32>
    %252 = vector.broadcast %231 : vector<1x64xf32> to vector<48x64xf32>
    %253 = arith.addf %251, %252 : vector<48x64xf32>
    %254 = arith.truncf %253 : vector<48x64xf32> to vector<48x64xbf16>
    %c1_82 = arith.constant 1 : index
    %c0_83 = arith.constant 0 : index
    %c0_84 = arith.constant 0 : index
    %255 = vector.load %arg5[%c1_82, %c0_83, %c0_84] : memref<2x64x192xbf16, #tpu.memory_space<vmem>>, vector<1x64x192xbf16>
    %256 = vector.shape_cast %255 : vector<1x64x192xbf16> to vector<64x192xbf16>
    %cst_85 = arith.constant dense<0.000000e+00> : vector<48x192xf32>
    %257 = tpu.matmul %254, %256, %cst_85 {dimension_numbers = #tpu.dot_dimension_numbers<[1], [0], [0], [1], [0, 0, 1, 1], [], []>} : vector<48x64xbf16>, vector<64x192xbf16>, vector<48x192xf32> -> vector<48x192xf32>
    %c32 = arith.constant 32 : index
    %c0_86 = arith.constant 0 : index
    %258 = vector.load %arg4[%c32, %c0_86] : memref<48x256xf32, #tpu.memory_space<vmem>>, vector<1x192xf32>
    %259 = vector.broadcast %258 : vector<1x192xf32> to vector<48x192xf32>
    %260 = arith.addf %257, %259 : vector<48x192xf32>
    %261 = vector.shape_cast %260 : vector<48x192xf32> to vector<2x24x192xf32>
    %262 = vector.extract_strided_slice %261 {offsets = [0, 0, 0], sizes = [2, 24, 16], strides = [1, 1, 1]} : vector<2x24x192xf32> to vector<2x24x16xf32>
    %263 = arith.truncf %262 : vector<2x24x16xf32> to vector<2x24x16xbf16>
    %264 = vector.extract_strided_slice %261 {offsets = [0, 0, 64], sizes = [2, 24, 16], strides = [1, 1, 1]} : vector<2x24x192xf32> to vector<2x24x16xf32>
    %265 = arith.truncf %264 : vector<2x24x16xf32> to vector<2x24x16xbf16>
    %266 = vector.extract_strided_slice %261 {offsets = [0, 0, 128], sizes = [2, 24, 16], strides = [1, 1, 1]} : vector<2x24x192xf32> to vector<2x24x16xf32>
    %267 = arith.truncf %266 : vector<2x24x16xf32> to vector<2x24x16xbf16>
    "tpu.trace_start"() <{level = 10 : i32, message = "bqd,bkd->bqk"}> : () -> ()
    %cst_87 = arith.constant dense<0.000000e+00> : vector<2x24x24xf32>
    %268 = tpu.matmul %263, %265, %cst_87 {dimension_numbers = #tpu.dot_dimension_numbers<[2], [2], [1], [1], [0, 0, 0, 1, 1, 1], [0], [0]>} : vector<2x24x16xbf16>, vector<2x24x16xbf16>, vector<2x24x24xf32> -> vector<2x24x24xf32>
    "tpu.trace_stop"() : () -> ()
    %cst_88 = arith.constant 2.500000e-01 : f32
    %269 = vector.broadcast %cst_88 : f32 to vector<2x24x24xf32>
    %270 = arith.mulf %268, %269 : vector<2x24x24xf32>
    %271 = vector.broadcast %48 : vector<1x1x24xf32> to vector<2x24x24xf32>
    %272 = arith.addf %270, %271 : vector<2x24x24xf32>
    %cst_89 = arith.constant dense<0xFF800000> : vector<2x24xf32>
    %273 = vector.multi_reduction <maximumf>, %272, %cst_89 [2] : vector<2x24x24xf32> to vector<2x24xf32>
    %274 = vector.shape_cast %273 : vector<2x24xf32> to vector<2x24x1xf32>
    %275 = vector.broadcast %274 : vector<2x24x1xf32> to vector<2x24x24xf32>
    %276 = arith.subf %272, %275 : vector<2x24x24xf32>
    %277 = math.exp %276 : vector<2x24x24xf32>
    %cst_90 = arith.constant dense<0.000000e+00> : vector<2x24xf32>
    %278 = vector.multi_reduction <add>, %277, %cst_90 [2] : vector<2x24x24xf32> to vector<2x24xf32>
    %279 = vector.shape_cast %278 : vector<2x24xf32> to vector<2x24x1xf32>
    %280 = tpu.reciprocal %279 {approx = true} : vector<2x24x1xf32> -> vector<2x24x1xf32>
    %281 = vector.broadcast %280 : vector<2x24x1xf32> to vector<2x24x24xf32>
    %282 = arith.mulf %277, %281 : vector<2x24x24xf32>
    %283 = arith.truncf %282 : vector<2x24x24xf32> to vector<2x24x24xbf16>
    "tpu.trace_start"() <{level = 10 : i32, message = "bqk,bkd->bqd"}> : () -> ()
    %cst_91 = arith.constant dense<0.000000e+00> : vector<2x24x16xf32>
    %284 = tpu.matmul %283, %267, %cst_91 {dimension_numbers = #tpu.dot_dimension_numbers<[2], [1], [1], [2], [0, 0, 0, 1, 1, 2], [0], [0]>} : vector<2x24x24xbf16>, vector<2x24x16xbf16>, vector<2x24x16xf32> -> vector<2x24x16xf32>
    "tpu.trace_stop"() : () -> ()
    %285 = vector.extract_strided_slice %261 {offsets = [0, 0, 16], sizes = [2, 24, 16], strides = [1, 1, 1]} : vector<2x24x192xf32> to vector<2x24x16xf32>
    %286 = arith.truncf %285 : vector<2x24x16xf32> to vector<2x24x16xbf16>
    %287 = vector.extract_strided_slice %261 {offsets = [0, 0, 80], sizes = [2, 24, 16], strides = [1, 1, 1]} : vector<2x24x192xf32> to vector<2x24x16xf32>
    %288 = arith.truncf %287 : vector<2x24x16xf32> to vector<2x24x16xbf16>
    %289 = vector.extract_strided_slice %261 {offsets = [0, 0, 144], sizes = [2, 24, 16], strides = [1, 1, 1]} : vector<2x24x192xf32> to vector<2x24x16xf32>
    %290 = arith.truncf %289 : vector<2x24x16xf32> to vector<2x24x16xbf16>
    "tpu.trace_start"() <{level = 10 : i32, message = "bqd,bkd->bqk"}> : () -> ()
    %cst_92 = arith.constant dense<0.000000e+00> : vector<2x24x24xf32>
    %291 = tpu.matmul %286, %288, %cst_92 {dimension_numbers = #tpu.dot_dimension_numbers<[2], [2], [1], [1], [0, 0, 0, 1, 1, 1], [0], [0]>} : vector<2x24x16xbf16>, vector<2x24x16xbf16>, vector<2x24x24xf32> -> vector<2x24x24xf32>
    "tpu.trace_stop"() : () -> ()
    %cst_93 = arith.constant 2.500000e-01 : f32
    %292 = vector.broadcast %cst_93 : f32 to vector<2x24x24xf32>
    %293 = arith.mulf %291, %292 : vector<2x24x24xf32>
    %294 = vector.broadcast %48 : vector<1x1x24xf32> to vector<2x24x24xf32>
    %295 = arith.addf %293, %294 : vector<2x24x24xf32>
    %cst_94 = arith.constant dense<0xFF800000> : vector<2x24xf32>
    %296 = vector.multi_reduction <maximumf>, %295, %cst_94 [2] : vector<2x24x24xf32> to vector<2x24xf32>
    %297 = vector.shape_cast %296 : vector<2x24xf32> to vector<2x24x1xf32>
    %298 = vector.broadcast %297 : vector<2x24x1xf32> to vector<2x24x24xf32>
    %299 = arith.subf %295, %298 : vector<2x24x24xf32>
    %300 = math.exp %299 : vector<2x24x24xf32>
    %cst_95 = arith.constant dense<0.000000e+00> : vector<2x24xf32>
    %301 = vector.multi_reduction <add>, %300, %cst_95 [2] : vector<2x24x24xf32> to vector<2x24xf32>
    %302 = vector.shape_cast %301 : vector<2x24xf32> to vector<2x24x1xf32>
    %303 = tpu.reciprocal %302 {approx = true} : vector<2x24x1xf32> -> vector<2x24x1xf32>
    %304 = vector.broadcast %303 : vector<2x24x1xf32> to vector<2x24x24xf32>
    %305 = arith.mulf %300, %304 : vector<2x24x24xf32>
    %306 = arith.truncf %305 : vector<2x24x24xf32> to vector<2x24x24xbf16>
    "tpu.trace_start"() <{level = 10 : i32, message = "bqk,bkd->bqd"}> : () -> ()
    %cst_96 = arith.constant dense<0.000000e+00> : vector<2x24x16xf32>
    %307 = tpu.matmul %306, %290, %cst_96 {dimension_numbers = #tpu.dot_dimension_numbers<[2], [1], [1], [2], [0, 0, 0, 1, 1, 2], [0], [0]>} : vector<2x24x24xbf16>, vector<2x24x16xbf16>, vector<2x24x16xf32> -> vector<2x24x16xf32>
    "tpu.trace_stop"() : () -> ()
    %308 = vector.extract_strided_slice %261 {offsets = [0, 0, 32], sizes = [2, 24, 16], strides = [1, 1, 1]} : vector<2x24x192xf32> to vector<2x24x16xf32>
    %309 = arith.truncf %308 : vector<2x24x16xf32> to vector<2x24x16xbf16>
    %310 = vector.extract_strided_slice %261 {offsets = [0, 0, 96], sizes = [2, 24, 16], strides = [1, 1, 1]} : vector<2x24x192xf32> to vector<2x24x16xf32>
    %311 = arith.truncf %310 : vector<2x24x16xf32> to vector<2x24x16xbf16>
    %312 = vector.extract_strided_slice %261 {offsets = [0, 0, 160], sizes = [2, 24, 16], strides = [1, 1, 1]} : vector<2x24x192xf32> to vector<2x24x16xf32>
    %313 = arith.truncf %312 : vector<2x24x16xf32> to vector<2x24x16xbf16>
    "tpu.trace_start"() <{level = 10 : i32, message = "bqd,bkd->bqk"}> : () -> ()
    %cst_97 = arith.constant dense<0.000000e+00> : vector<2x24x24xf32>
    %314 = tpu.matmul %309, %311, %cst_97 {dimension_numbers = #tpu.dot_dimension_numbers<[2], [2], [1], [1], [0, 0, 0, 1, 1, 1], [0], [0]>} : vector<2x24x16xbf16>, vector<2x24x16xbf16>, vector<2x24x24xf32> -> vector<2x24x24xf32>
    "tpu.trace_stop"() : () -> ()
    %cst_98 = arith.constant 2.500000e-01 : f32
    %315 = vector.broadcast %cst_98 : f32 to vector<2x24x24xf32>
    %316 = arith.mulf %314, %315 : vector<2x24x24xf32>
    %317 = vector.broadcast %48 : vector<1x1x24xf32> to vector<2x24x24xf32>
    %318 = arith.addf %316, %317 : vector<2x24x24xf32>
    %cst_99 = arith.constant dense<0xFF800000> : vector<2x24xf32>
    %319 = vector.multi_reduction <maximumf>, %318, %cst_99 [2] : vector<2x24x24xf32> to vector<2x24xf32>
    %320 = vector.shape_cast %319 : vector<2x24xf32> to vector<2x24x1xf32>
    %321 = vector.broadcast %320 : vector<2x24x1xf32> to vector<2x24x24xf32>
    %322 = arith.subf %318, %321 : vector<2x24x24xf32>
    %323 = math.exp %322 : vector<2x24x24xf32>
    %cst_100 = arith.constant dense<0.000000e+00> : vector<2x24xf32>
    %324 = vector.multi_reduction <add>, %323, %cst_100 [2] : vector<2x24x24xf32> to vector<2x24xf32>
    %325 = vector.shape_cast %324 : vector<2x24xf32> to vector<2x24x1xf32>
    %326 = tpu.reciprocal %325 {approx = true} : vector<2x24x1xf32> -> vector<2x24x1xf32>
    %327 = vector.broadcast %326 : vector<2x24x1xf32> to vector<2x24x24xf32>
    %328 = arith.mulf %323, %327 : vector<2x24x24xf32>
    %329 = arith.truncf %328 : vector<2x24x24xf32> to vector<2x24x24xbf16>
    "tpu.trace_start"() <{level = 10 : i32, message = "bqk,bkd->bqd"}> : () -> ()
    %cst_101 = arith.constant dense<0.000000e+00> : vector<2x24x16xf32>
    %330 = tpu.matmul %329, %313, %cst_101 {dimension_numbers = #tpu.dot_dimension_numbers<[2], [1], [1], [2], [0, 0, 0, 1, 1, 2], [0], [0]>} : vector<2x24x24xbf16>, vector<2x24x16xbf16>, vector<2x24x16xf32> -> vector<2x24x16xf32>
    "tpu.trace_stop"() : () -> ()
    %331 = vector.extract_strided_slice %261 {offsets = [0, 0, 48], sizes = [2, 24, 16], strides = [1, 1, 1]} : vector<2x24x192xf32> to vector<2x24x16xf32>
    %332 = arith.truncf %331 : vector<2x24x16xf32> to vector<2x24x16xbf16>
    %333 = vector.extract_strided_slice %261 {offsets = [0, 0, 112], sizes = [2, 24, 16], strides = [1, 1, 1]} : vector<2x24x192xf32> to vector<2x24x16xf32>
    %334 = arith.truncf %333 : vector<2x24x16xf32> to vector<2x24x16xbf16>
    %335 = vector.extract_strided_slice %261 {offsets = [0, 0, 176], sizes = [2, 24, 16], strides = [1, 1, 1]} : vector<2x24x192xf32> to vector<2x24x16xf32>
    %336 = arith.truncf %335 : vector<2x24x16xf32> to vector<2x24x16xbf16>
    "tpu.trace_start"() <{level = 10 : i32, message = "bqd,bkd->bqk"}> : () -> ()
    %cst_102 = arith.constant dense<0.000000e+00> : vector<2x24x24xf32>
    %337 = tpu.matmul %332, %334, %cst_102 {dimension_numbers = #tpu.dot_dimension_numbers<[2], [2], [1], [1], [0, 0, 0, 1, 1, 1], [0], [0]>} : vector<2x24x16xbf16>, vector<2x24x16xbf16>, vector<2x24x24xf32> -> vector<2x24x24xf32>
    "tpu.trace_stop"() : () -> ()
    %cst_103 = arith.constant 2.500000e-01 : f32
    %338 = vector.broadcast %cst_103 : f32 to vector<2x24x24xf32>
    %339 = arith.mulf %337, %338 : vector<2x24x24xf32>
    %340 = vector.broadcast %48 : vector<1x1x24xf32> to vector<2x24x24xf32>
    %341 = arith.addf %339, %340 : vector<2x24x24xf32>
    %cst_104 = arith.constant dense<0xFF800000> : vector<2x24xf32>
    %342 = vector.multi_reduction <maximumf>, %341, %cst_104 [2] : vector<2x24x24xf32> to vector<2x24xf32>
    %343 = vector.shape_cast %342 : vector<2x24xf32> to vector<2x24x1xf32>
    %344 = vector.broadcast %343 : vector<2x24x1xf32> to vector<2x24x24xf32>
    %345 = arith.subf %341, %344 : vector<2x24x24xf32>
    %346 = math.exp %345 : vector<2x24x24xf32>
    %cst_105 = arith.constant dense<0.000000e+00> : vector<2x24xf32>
    %347 = vector.multi_reduction <add>, %346, %cst_105 [2] : vector<2x24x24xf32> to vector<2x24xf32>
    %348 = vector.shape_cast %347 : vector<2x24xf32> to vector<2x24x1xf32>
    %349 = tpu.reciprocal %348 {approx = true} : vector<2x24x1xf32> -> vector<2x24x1xf32>
    %350 = vector.broadcast %349 : vector<2x24x1xf32> to vector<2x24x24xf32>
    %351 = arith.mulf %346, %350 : vector<2x24x24xf32>
    %352 = arith.truncf %351 : vector<2x24x24xf32> to vector<2x24x24xbf16>
    "tpu.trace_start"() <{level = 10 : i32, message = "bqk,bkd->bqd"}> : () -> ()
    %cst_106 = arith.constant dense<0.000000e+00> : vector<2x24x16xf32>
    %353 = tpu.matmul %352, %336, %cst_106 {dimension_numbers = #tpu.dot_dimension_numbers<[2], [1], [1], [2], [0, 0, 0, 1, 1, 2], [0], [0]>} : vector<2x24x24xbf16>, vector<2x24x16xbf16>, vector<2x24x16xf32> -> vector<2x24x16xf32>
    "tpu.trace_stop"() : () -> ()
    %354 = tpu.concatenate %284, %307, %330, %353 in 2 : vector<2x24x16xf32>, vector<2x24x16xf32>, vector<2x24x16xf32>, vector<2x24x16xf32> -> vector<2x24x64xf32>
    %355 = vector.shape_cast %354 : vector<2x24x64xf32> to vector<48x64xf32>
    %356 = arith.truncf %355 : vector<48x64xf32> to vector<48x64xbf16>
    %c1_107 = arith.constant 1 : index
    %c0_108 = arith.constant 0 : index
    %c0_109 = arith.constant 0 : index
    %357 = vector.load %arg6[%c1_107, %c0_108, %c0_109] : memref<2x64x64xbf16, #tpu.memory_space<vmem>>, vector<1x64x64xbf16>
    %358 = vector.shape_cast %357 : vector<1x64x64xbf16> to vector<64x64xbf16>
    %cst_110 = arith.constant dense<0.000000e+00> : vector<48x64xf32>
    %359 = tpu.matmul %356, %358, %cst_110 {dimension_numbers = #tpu.dot_dimension_numbers<[1], [0], [0], [1], [0, 0, 1, 1], [], []>} : vector<48x64xbf16>, vector<64x64xbf16>, vector<48x64xf32> -> vector<48x64xf32>
    %c33 = arith.constant 33 : index
    %c0_111 = arith.constant 0 : index
    %360 = vector.load %arg4[%c33, %c0_111] : memref<48x256xf32, #tpu.memory_space<vmem>>, vector<1x64xf32>
    %361 = vector.broadcast %360 : vector<1x64xf32> to vector<48x64xf32>
    %362 = arith.addf %359, %361 : vector<48x64xf32>
    %363 = arith.addf %229, %362 : vector<48x64xf32>
    %c30 = arith.constant 30 : index
    %c0_112 = arith.constant 0 : index
    %364 = vector.load %arg4[%c30, %c0_112] : memref<48x256xf32, #tpu.memory_space<vmem>>, vector<1x64xf32>
    %c31 = arith.constant 31 : index
    %c0_113 = arith.constant 0 : index
    %365 = vector.load %arg4[%c31, %c0_113] : memref<48x256xf32, #tpu.memory_space<vmem>>, vector<1x64xf32>
    %cst_114 = arith.constant dense<0.000000e+00> : vector<48xf32>
    %366 = vector.multi_reduction <add>, %363, %cst_114 [1] : vector<48x64xf32> to vector<48xf32>
    %367 = vector.shape_cast %366 : vector<48xf32> to vector<48x1xf32>
    %cst_115 = arith.constant 6.400000e+01 : f32
    %368 = vector.broadcast %cst_115 : f32 to vector<48x1xf32>
    %369 = arith.divf %367, %368 : vector<48x1xf32>
    %370 = vector.broadcast %369 : vector<48x1xf32> to vector<48x64xf32>
    %371 = arith.subf %363, %370 : vector<48x64xf32>
    %372 = arith.mulf %371, %371 : vector<48x64xf32>
    %cst_116 = arith.constant dense<0.000000e+00> : vector<48xf32>
    %373 = vector.multi_reduction <add>, %372, %cst_116 [1] : vector<48x64xf32> to vector<48xf32>
    %374 = vector.shape_cast %373 : vector<48xf32> to vector<48x1xf32>
    %cst_117 = arith.constant 6.400000e+01 : f32
    %375 = vector.broadcast %cst_117 : f32 to vector<48x1xf32>
    %376 = arith.divf %374, %375 : vector<48x1xf32>
    %377 = vector.broadcast %369 : vector<48x1xf32> to vector<48x64xf32>
    %378 = arith.subf %363, %377 : vector<48x64xf32>
    %cst_118 = arith.constant 9.99999974E-6 : f32
    %379 = vector.broadcast %cst_118 : f32 to vector<48x1xf32>
    %380 = arith.addf %376, %379 : vector<48x1xf32>
    %381 = math.rsqrt %380 : vector<48x1xf32>
    %382 = vector.broadcast %381 : vector<48x1xf32> to vector<48x64xf32>
    %383 = arith.mulf %378, %382 : vector<48x64xf32>
    %384 = vector.broadcast %364 : vector<1x64xf32> to vector<48x64xf32>
    %385 = arith.mulf %383, %384 : vector<48x64xf32>
    %386 = vector.broadcast %365 : vector<1x64xf32> to vector<48x64xf32>
    %387 = arith.addf %385, %386 : vector<48x64xf32>
    %388 = arith.truncf %387 : vector<48x64xf32> to vector<48x64xbf16>
    %c1_119 = arith.constant 1 : index
    %c0_120 = arith.constant 0 : index
    %c0_121 = arith.constant 0 : index
    %389 = vector.load %arg7[%c1_119, %c0_120, %c0_121] : memref<2x64x256xbf16, #tpu.memory_space<vmem>>, vector<1x64x256xbf16>
    %390 = vector.shape_cast %389 : vector<1x64x256xbf16> to vector<64x256xbf16>
    %cst_122 = arith.constant dense<0.000000e+00> : vector<48x256xf32>
    %391 = tpu.matmul %388, %390, %cst_122 {dimension_numbers = #tpu.dot_dimension_numbers<[1], [0], [0], [1], [0, 0, 1, 1], [], []>} : vector<48x64xbf16>, vector<64x256xbf16>, vector<48x256xf32> -> vector<48x256xf32>
    %c34 = arith.constant 34 : index
    %c0_123 = arith.constant 0 : index
    %392 = vector.load %arg4[%c34, %c0_123] : memref<48x256xf32, #tpu.memory_space<vmem>>, vector<1x256xf32>
    %393 = vector.broadcast %392 : vector<1x256xf32> to vector<48x256xf32>
    %394 = arith.addf %391, %393 : vector<48x256xf32>
    %cst_124 = arith.constant 1.702000e+00 : f32
    %395 = vector.broadcast %cst_124 : f32 to vector<48x256xf32>
    %396 = arith.mulf %395, %394 : vector<48x256xf32>
    %397 = arith.negf %396 : vector<48x256xf32>
    %398 = math.exp %397 : vector<48x256xf32>
    %cst_125 = arith.constant 1.000000e+00 : f32
    %399 = vector.broadcast %cst_125 : f32 to vector<48x256xf32>
    %400 = arith.addf %399, %398 : vector<48x256xf32>
    %401 = arith.divf %399, %400 : vector<48x256xf32>
    %402 = arith.mulf %394, %401 : vector<48x256xf32>
    %403 = arith.truncf %402 : vector<48x256xf32> to vector<48x256xbf16>
    %c1_126 = arith.constant 1 : index
    %c0_127 = arith.constant 0 : index
    %c0_128 = arith.constant 0 : index
    %404 = vector.load %arg8[%c1_126, %c0_127, %c0_128] : memref<2x256x64xbf16, #tpu.memory_space<vmem>>, vector<1x256x64xbf16>
    %405 = vector.shape_cast %404 : vector<1x256x64xbf16> to vector<256x64xbf16>
    %cst_129 = arith.constant dense<0.000000e+00> : vector<48x64xf32>
    %406 = tpu.matmul %403, %405, %cst_129 {dimension_numbers = #tpu.dot_dimension_numbers<[1], [0], [0], [1], [0, 0, 1, 1], [], []>} : vector<48x256xbf16>, vector<256x64xbf16>, vector<48x64xf32> -> vector<48x64xf32>
    %c35 = arith.constant 35 : index
    %c0_130 = arith.constant 0 : index
    %407 = vector.load %arg4[%c35, %c0_130] : memref<48x256xf32, #tpu.memory_space<vmem>>, vector<1x64xf32>
    %408 = vector.broadcast %407 : vector<1x64xf32> to vector<48x64xf32>
    %409 = arith.addf %406, %408 : vector<48x64xf32>
    %410 = arith.addf %363, %409 : vector<48x64xf32>
    %411 = vector.shape_cast %229 : vector<48x64xf32> to vector<2x24x64xf32>
    %412 = vector.extract_strided_slice %411 {offsets = [0, 0, 0], sizes = [2, 1, 64], strides = [1, 1, 1]} : vector<2x24x64xf32> to vector<2x1x64xf32>
    %413 = vector.shape_cast %412 : vector<2x1x64xf32> to vector<2x64xf32>
    %414 = vector.shape_cast %410 : vector<48x64xf32> to vector<2x24x64xf32>
    %415 = vector.extract_strided_slice %414 {offsets = [0, 0, 0], sizes = [2, 1, 64], strides = [1, 1, 1]} : vector<2x24x64xf32> to vector<2x1x64xf32>
    %416 = vector.shape_cast %415 : vector<2x1x64xf32> to vector<2x64xf32>
    %c36 = arith.constant 36 : index
    %c0_131 = arith.constant 0 : index
    %417 = vector.load %arg4[%c36, %c0_131] : memref<48x256xf32, #tpu.memory_space<vmem>>, vector<1x64xf32>
    %c37 = arith.constant 37 : index
    %c0_132 = arith.constant 0 : index
    %418 = vector.load %arg4[%c37, %c0_132] : memref<48x256xf32, #tpu.memory_space<vmem>>, vector<1x64xf32>
    %cst_133 = arith.constant dense<0.000000e+00> : vector<2xf32>
    %419 = vector.multi_reduction <add>, %416, %cst_133 [1] : vector<2x64xf32> to vector<2xf32>
    %420 = vector.shape_cast %419 : vector<2xf32> to vector<2x1xf32>
    %cst_134 = arith.constant 6.400000e+01 : f32
    %421 = vector.broadcast %cst_134 : f32 to vector<2x1xf32>
    %422 = arith.divf %420, %421 : vector<2x1xf32>
    %423 = vector.broadcast %422 : vector<2x1xf32> to vector<2x64xf32>
    %424 = arith.subf %416, %423 : vector<2x64xf32>
    %425 = arith.mulf %424, %424 : vector<2x64xf32>
    %cst_135 = arith.constant dense<0.000000e+00> : vector<2xf32>
    %426 = vector.multi_reduction <add>, %425, %cst_135 [1] : vector<2x64xf32> to vector<2xf32>
    %427 = vector.shape_cast %426 : vector<2xf32> to vector<2x1xf32>
    %cst_136 = arith.constant 6.400000e+01 : f32
    %428 = vector.broadcast %cst_136 : f32 to vector<2x1xf32>
    %429 = arith.divf %427, %428 : vector<2x1xf32>
    %430 = vector.broadcast %422 : vector<2x1xf32> to vector<2x64xf32>
    %431 = arith.subf %416, %430 : vector<2x64xf32>
    %cst_137 = arith.constant 9.99999974E-6 : f32
    %432 = vector.broadcast %cst_137 : f32 to vector<2x1xf32>
    %433 = arith.addf %429, %432 : vector<2x1xf32>
    %434 = math.rsqrt %433 : vector<2x1xf32>
    %435 = vector.broadcast %434 : vector<2x1xf32> to vector<2x64xf32>
    %436 = arith.mulf %431, %435 : vector<2x64xf32>
    %437 = vector.broadcast %417 : vector<1x64xf32> to vector<2x64xf32>
    %438 = arith.mulf %436, %437 : vector<2x64xf32>
    %439 = vector.broadcast %418 : vector<1x64xf32> to vector<2x64xf32>
    %440 = arith.addf %438, %439 : vector<2x64xf32>
    %441 = arith.truncf %440 : vector<2x64xf32> to vector<2x64xbf16>
    %c0_138 = arith.constant 0 : index
    %c0_139 = arith.constant 0 : index
    %442 = vector.load %arg9[%c0_138, %c0_139] : memref<64x32xbf16, #tpu.memory_space<vmem>>, vector<64x32xbf16>
    %cst_140 = arith.constant dense<0.000000e+00> : vector<2x32xf32>
    %443 = tpu.matmul %441, %442, %cst_140 {dimension_numbers = #tpu.dot_dimension_numbers<[1], [0], [0], [1], [0, 0, 1, 1], [], []>} : vector<2x64xbf16>, vector<64x32xbf16>, vector<2x32xf32> -> vector<2x32xf32>
    %c38 = arith.constant 38 : index
    %c0_141 = arith.constant 0 : index
    %444 = vector.load %arg4[%c38, %c0_141] : memref<48x256xf32, #tpu.memory_space<vmem>>, vector<1x64xf32>
    %c39 = arith.constant 39 : index
    %c0_142 = arith.constant 0 : index
    %445 = vector.load %arg4[%c39, %c0_142] : memref<48x256xf32, #tpu.memory_space<vmem>>, vector<1x64xf32>
    %cst_143 = arith.constant dense<0.000000e+00> : vector<64xf32>
    %446 = vector.multi_reduction <add>, %416, %cst_143 [0] : vector<2x64xf32> to vector<64xf32>
    %447 = vector.shape_cast %446 : vector<64xf32> to vector<1x64xf32>
    %cst_144 = arith.constant 2.000000e+00 : f32
    %448 = vector.broadcast %cst_144 : f32 to vector<1x64xf32>
    %449 = arith.divf %447, %448 : vector<1x64xf32>
    %450 = vector.broadcast %449 : vector<1x64xf32> to vector<2x64xf32>
    %451 = arith.subf %416, %450 : vector<2x64xf32>
    %452 = arith.mulf %451, %451 : vector<2x64xf32>
    %cst_145 = arith.constant dense<0.000000e+00> : vector<64xf32>
    %453 = vector.multi_reduction <add>, %452, %cst_145 [0] : vector<2x64xf32> to vector<64xf32>
    %454 = vector.shape_cast %453 : vector<64xf32> to vector<1x64xf32>
    %cst_146 = arith.constant 2.000000e+00 : f32
    %455 = vector.broadcast %cst_146 : f32 to vector<1x64xf32>
    %456 = arith.divf %454, %455 : vector<1x64xf32>
    %457 = vector.broadcast %449 : vector<1x64xf32> to vector<2x64xf32>
    %458 = arith.subf %416, %457 : vector<2x64xf32>
    %cst_147 = arith.constant 9.99999974E-6 : f32
    %459 = vector.broadcast %cst_147 : f32 to vector<1x64xf32>
    %460 = arith.addf %456, %459 : vector<1x64xf32>
    %461 = math.rsqrt %460 : vector<1x64xf32>
    %462 = vector.broadcast %461 : vector<1x64xf32> to vector<2x64xf32>
    %463 = arith.mulf %458, %462 : vector<2x64xf32>
    %464 = vector.broadcast %444 : vector<1x64xf32> to vector<2x64xf32>
    %465 = arith.mulf %463, %464 : vector<2x64xf32>
    %466 = vector.broadcast %445 : vector<1x64xf32> to vector<2x64xf32>
    %467 = arith.addf %465, %466 : vector<2x64xf32>
    %c40 = arith.constant 40 : index
    %c0_148 = arith.constant 0 : index
    %468 = vector.load %arg4[%c40, %c0_148] : memref<48x256xf32, #tpu.memory_space<vmem>>, vector<1x32xf32>
    %c41 = arith.constant 41 : index
    %c0_149 = arith.constant 0 : index
    %469 = vector.load %arg4[%c41, %c0_149] : memref<48x256xf32, #tpu.memory_space<vmem>>, vector<1x32xf32>
    %cst_150 = arith.constant dense<0.000000e+00> : vector<32xf32>
    %470 = vector.multi_reduction <add>, %443, %cst_150 [0] : vector<2x32xf32> to vector<32xf32>
    %471 = vector.shape_cast %470 : vector<32xf32> to vector<1x32xf32>
    %cst_151 = arith.constant 2.000000e+00 : f32
    %472 = vector.broadcast %cst_151 : f32 to vector<1x32xf32>
    %473 = arith.divf %471, %472 : vector<1x32xf32>
    %474 = vector.broadcast %473 : vector<1x32xf32> to vector<2x32xf32>
    %475 = arith.subf %443, %474 : vector<2x32xf32>
    %476 = arith.mulf %475, %475 : vector<2x32xf32>
    %cst_152 = arith.constant dense<0.000000e+00> : vector<32xf32>
    %477 = vector.multi_reduction <add>, %476, %cst_152 [0] : vector<2x32xf32> to vector<32xf32>
    %478 = vector.shape_cast %477 : vector<32xf32> to vector<1x32xf32>
    %cst_153 = arith.constant 2.000000e+00 : f32
    %479 = vector.broadcast %cst_153 : f32 to vector<1x32xf32>
    %480 = arith.divf %478, %479 : vector<1x32xf32>
    %481 = vector.broadcast %473 : vector<1x32xf32> to vector<2x32xf32>
    %482 = arith.subf %443, %481 : vector<2x32xf32>
    %cst_154 = arith.constant 9.99999974E-6 : f32
    %483 = vector.broadcast %cst_154 : f32 to vector<1x32xf32>
    %484 = arith.addf %480, %483 : vector<1x32xf32>
    %485 = math.rsqrt %484 : vector<1x32xf32>
    %486 = vector.broadcast %485 : vector<1x32xf32> to vector<2x32xf32>
    %487 = arith.mulf %482, %486 : vector<2x32xf32>
    %488 = vector.broadcast %468 : vector<1x32xf32> to vector<2x32xf32>
    %489 = arith.mulf %487, %488 : vector<2x32xf32>
    %490 = vector.broadcast %469 : vector<1x32xf32> to vector<2x32xf32>
    %491 = arith.addf %489, %490 : vector<2x32xf32>
    %492 = arith.truncf %467 : vector<2x64xf32> to vector<2x64xbf16>
    %c0_155 = arith.constant 0 : index
    %c0_156 = arith.constant 0 : index
    %493 = vector.load %arg10[%c0_155, %c0_156] : memref<64x128xbf16, #tpu.memory_space<vmem>>, vector<64x128xbf16>
    %cst_157 = arith.constant dense<0.000000e+00> : vector<2x128xf32>
    %494 = tpu.matmul %492, %493, %cst_157 {dimension_numbers = #tpu.dot_dimension_numbers<[1], [0], [0], [1], [0, 0, 1, 1], [], []>} : vector<2x64xbf16>, vector<64x128xbf16>, vector<2x128xf32> -> vector<2x128xf32>
    %495 = arith.truncf %491 : vector<2x32xf32> to vector<2x32xbf16>
    %c0_158 = arith.constant 0 : index
    %c0_159 = arith.constant 0 : index
    %496 = vector.load %arg11[%c0_158, %c0_159] : memref<32x128xbf16, #tpu.memory_space<vmem>>, vector<32x128xbf16>
    %cst_160 = arith.constant dense<0.000000e+00> : vector<2x128xf32>
    %497 = tpu.matmul %495, %496, %cst_160 {dimension_numbers = #tpu.dot_dimension_numbers<[1], [0], [0], [1], [0, 0, 1, 1], [], []>} : vector<2x32xbf16>, vector<32x128xbf16>, vector<2x128xf32> -> vector<2x128xf32>
    %cst_161 = arith.constant 0.000000e+00 : f32
    %498 = vector.broadcast %cst_161 : f32 to vector<2x64xf32>
    %cst_162 = arith.constant 0.000000e+00 : f32
    %499 = vector.broadcast %cst_162 : f32 to vector<2x96xf32>
    %500 = tpu.concatenate %413, %498 in 1 : vector<2x64xf32>, vector<2x64xf32> -> vector<2x128xf32>
    %c0_163 = arith.constant 0 : index
    %c0_164 = arith.constant 0 : index
    %501 = vector.load %arg12[%c0_163, %c0_164] : memref<2x640xf32, #tpu.memory_space<vmem>>, vector<2x128xf32>
    tpu.vector_store %arg12[%c0_163, %c0_164], %500 {strides = array<i32>} : memref<2x640xf32, #tpu.memory_space<vmem>>, vector<2x128xf32>,
    %502 = tpu.concatenate %416, %498 in 1 : vector<2x64xf32>, vector<2x64xf32> -> vector<2x128xf32>
    %c0_165 = arith.constant 0 : index
    %c128 = arith.constant 128 : index
    %503 = vector.load %arg12[%c0_165, %c128] : memref<2x640xf32, #tpu.memory_space<vmem>>, vector<2x128xf32>
    tpu.vector_store %arg12[%c0_165, %c128], %502 {strides = array<i32>} : memref<2x640xf32, #tpu.memory_space<vmem>>, vector<2x128xf32>,
    %504 = tpu.concatenate %443, %499 in 1 : vector<2x32xf32>, vector<2x96xf32> -> vector<2x128xf32>
    %c0_166 = arith.constant 0 : index
    %c256 = arith.constant 256 : index
    %505 = vector.load %arg12[%c0_166, %c256] : memref<2x640xf32, #tpu.memory_space<vmem>>, vector<2x128xf32>
    tpu.vector_store %arg12[%c0_166, %c256], %504 {strides = array<i32>} : memref<2x640xf32, #tpu.memory_space<vmem>>, vector<2x128xf32>,
    %c0_167 = arith.constant 0 : index
    %c384 = arith.constant 384 : index
    %506 = vector.load %arg12[%c0_167, %c384] : memref<2x640xf32, #tpu.memory_space<vmem>>, vector<2x128xf32>
    tpu.vector_store %arg12[%c0_167, %c384], %494 {strides = array<i32>} : memref<2x640xf32, #tpu.memory_space<vmem>>, vector<2x128xf32>,
    %c0_168 = arith.constant 0 : index
    %c512 = arith.constant 512 : index
    %507 = vector.load %arg12[%c0_168, %c512] : memref<2x640xf32, #tpu.memory_space<vmem>>, vector<2x128xf32>
    tpu.vector_store %arg12[%c0_168, %c512], %497 {strides = array<i32>} : memref<2x640xf32, #tpu.memory_space<vmem>>, vector<2x128xf32>,
    return
  }
  func.func @transform_0(%arg0: i32) -> (i32, i32) {
    %c0_i32 = arith.constant 0 : i32
    %c0_i32_0 = arith.constant 0 : i32
    %c0_i32_1 = arith.constant 0 : i32
    return %c0_i32, %c0_i32_0 : i32, i32
  }
  func.func @transform_1(%arg0: i32) -> (i32, i32) {
    %c0_i32 = arith.constant 0 : i32
    %c0_i32_0 = arith.constant 0 : i32
    %c0_i32_1 = arith.constant 0 : i32
    return %c0_i32, %c0_i32_0 : i32, i32
  }
  func.func @transform_2(%arg0: i32) -> (i32, i32) {
    %c0_i32 = arith.constant 0 : i32
    %c0_i32_0 = arith.constant 0 : i32
    %c0_i32_1 = arith.constant 0 : i32
    return %c0_i32, %c0_i32_0 : i32, i32
  }
  func.func @transform_3(%arg0: i32) -> (i32, i32) {
    %c0_i32 = arith.constant 0 : i32
    %c0_i32_0 = arith.constant 0 : i32
    %c0_i32_1 = arith.constant 0 : i32
    return %c0_i32, %c0_i32_0 : i32, i32
  }
  func.func @transform_4(%arg0: i32) -> (i32, i32, i32) {
    %c0_i32 = arith.constant 0 : i32
    %c0_i32_0 = arith.constant 0 : i32
    %c0_i32_1 = arith.constant 0 : i32
    %c0_i32_2 = arith.constant 0 : i32
    return %c0_i32, %c0_i32_0, %c0_i32_1 : i32, i32, i32
  }
  func.func @transform_5(%arg0: i32) -> (i32, i32, i32) {
    %c0_i32 = arith.constant 0 : i32
    %c0_i32_0 = arith.constant 0 : i32
    %c0_i32_1 = arith.constant 0 : i32
    %c0_i32_2 = arith.constant 0 : i32
    return %c0_i32, %c0_i32_0, %c0_i32_1 : i32, i32, i32
  }
  func.func @transform_6(%arg0: i32) -> (i32, i32, i32) {
    %c0_i32 = arith.constant 0 : i32
    %c0_i32_0 = arith.constant 0 : i32
    %c0_i32_1 = arith.constant 0 : i32
    %c0_i32_2 = arith.constant 0 : i32
    return %c0_i32, %c0_i32_0, %c0_i32_1 : i32, i32, i32
  }
  func.func @transform_7(%arg0: i32) -> (i32, i32, i32) {
    %c0_i32 = arith.constant 0 : i32
    %c0_i32_0 = arith.constant 0 : i32
    %c0_i32_1 = arith.constant 0 : i32
    %c0_i32_2 = arith.constant 0 : i32
    return %c0_i32, %c0_i32_0, %c0_i32_1 : i32, i32, i32
  }
  func.func @transform_8(%arg0: i32) -> (i32, i32) {
    %c0_i32 = arith.constant 0 : i32
    %c0_i32_0 = arith.constant 0 : i32
    %c0_i32_1 = arith.constant 0 : i32
    return %c0_i32, %c0_i32_0 : i32, i32
  }
  func.func @transform_9(%arg0: i32) -> (i32, i32) {
    %c0_i32 = arith.constant 0 : i32
    %c0_i32_0 = arith.constant 0 : i32
    %c0_i32_1 = arith.constant 0 : i32
    return %c0_i32, %c0_i32_0 : i32, i32
  }
  func.func @transform_10(%arg0: i32) -> (i32, i32) {
    %c0_i32 = arith.constant 0 : i32
    %c0_i32_0 = arith.constant 0 : i32
    %c0_i32_1 = arith.constant 0 : i32
    return %c0_i32, %c0_i32_0 : i32, i32
  }
  func.func @transform_11(%arg0: i32) -> (i32, i32) {
    %c0_i32 = arith.constant 0 : i32
    %c0_i32_0 = arith.constant 0 : i32
    %c0_i32_1 = arith.constant 0 : i32
    return %c0_i32, %c0_i32_0 : i32, i32
  }
}

</mosaic_0001>

<bundles_post_ra>
// kernel: forward.1
= control target key start
LH: loop header
LB: loop body
LE: loop exit
PB: predicated region body
PF: predicated region fallthrough
CT: control target
= control target key end

     0   :  { %vm624_vm0 = vcmask 1045504   ;;  %vm640_vm1 = vcmask 1040384   ;;  %vm659_vm2 = vcmask 523264   ;;  %s6696_s17 = smov 64   ;;  %s6697_s18 = smov 48   ;;  %s9257_s1 = inlined_call_operand.vmem [shape: bf16[768,64], index: 1, kind: input, shape index: {}]   ;;  %s9258_s0 = inlined_call_operand.vmem [shape: bf16[32,768], index: 0, kind: input, shape index: {}]   ;;  %s9259_s3 = inlined_call_operand.vmem [shape: f32[48,256], index: 3, kind: input, shape index: {}]   ;;  %s9260_s2 = inlined_call_operand.vmem [shape: f32[2,64], index: 2, kind: input, shape index: {}]   ;;  %s9261_s4 = inlined_call_operand.vmem [shape: bf16[2,64,192], index: 4, kind: input, shape index: {}]   ;;  %s9262_s5 = inlined_call_operand.vmem [shape: bf16[2,64,64], index: 5, kind: input, shape index: {}]   ;;  %s9263_s6 = inlined_call_operand.vmem [shape: bf16[2,64,256], index: 6, kind: input, shape index: {}]   ;;  %s9264_s7 = inlined_call_operand.vmem [shape: bf16[2,256,64], index: 7, kind: input, shape index: {}]   ;;  %s9265_s11 = inlined_call_operand.vmem [shape: f32[2,640], index: 11, kind: output, shape index: {}]   ;;  %s9266_s9 = inlined_call_operand.vmem [shape: bf16[64,128], index: 9, kind: input, shape index: {}]   ;;  %s9267_s8 = inlined_call_operand.vmem [shape: bf16[64,32], index: 8, kind: input, shape index: {}]   ;;  %s9268_s10 = inlined_call_operand.vmem [shape: bf16[32,128], index: 10, kind: input, shape index: {}]  }
   0x1   :  { %v6114_v0 = vld [vmem:[%s9257_s1 + $0x38] sm:$0xff]  ;;  %v6113_v4 = vld [vmem:[%s9257_s1 + $0x30] sm:$0xff]  ;;  %v6112_v8 = vld [vmem:[%s9257_s1 + $0x28] sm:$0xff]  ;;  %s6699_s19 = smov 32   ;;  %s6701_s20 = smov 80  }
   0x2   :  { %v6122_v1 = vld [vmem:[%s9257_s1 + $0x78] sm:$0xff]  ;;  %495 = vmatpush.bf16.msra.mxu0 %v6114_v0  ;;  %v6121_v5 = vld [vmem:[%s9257_s1 + $0x70] sm:$0xff]  ;;  %v6120_v9 = vld [vmem:[%s9257_s1 + $0x68] sm:$0xff]  ;;  %s6702_s21 = smov 96  }
   0x3   :  { %v6130_v2 = vld [vmem:[%s9257_s1 + $0xb8] sm:$0xff]  ;;  %514 = vmatpush.bf16.msra.mxu1 %v6122_v1  ;;  %v6129_v6 = vld [vmem:[%s9257_s1 + $0xb0] sm:$0xff]  ;;  %v6128_v10 = vld [vmem:[%s9257_s1 + $0xa8] sm:$0xff] }
   0x4   :  { %v6138_v3 = vld [vmem:[%s9257_s1 + $0xf8] sm:$0xff]  ;;  %533 = vmatpush.bf16.msra.mxu2 %v6130_v2  ;;  %v6137_v7 = vld [vmem:[%s9257_s1 + $0xf0] sm:$0xff]  ;;  %v6136_v11 = vld [vmem:[%s9257_s1 + $0xe8] sm:$0xff] }
   0x5   :  { %552 = vmatpush.bf16.msra.mxu3 %v6138_v3  ;;  %v6111_v12 = vld [vmem:[%s9257_s1 + $0x20] sm:$0xff]  ;;  %v6110_v16 = vld [vmem:[%s9257_s1 + $0x18] sm:$0xff]  ;;  %v6109_v20 = vld [vmem:[%s9257_s1 + $0x10] sm:$0xff] }
   0x6   :  { %496 = vmatpush.bf16.msra.mxu0 %v6113_v4  ;;  %v6119_v13 = vld [vmem:[%s9257_s1 + $0x60] sm:$0xff]  ;;  %v6118_v17 = vld [vmem:[%s9257_s1 + $0x58] sm:$0xff]  ;;  %v6117_v21 = vld [vmem:[%s9257_s1 + $0x50] sm:$0xff] }
   0x7   :  { %515 = vmatpush.bf16.msra.mxu1 %v6121_v5  ;;  %v6127_v14 = vld [vmem:[%s9257_s1 + $0xa0] sm:$0xff]  ;;  %v6126_v18 = vld [vmem:[%s9257_s1 + $0x98] sm:$0xff]  ;;  %v6125_v22 = vld [vmem:[%s9257_s1 + $0x90] sm:$0xff] }
   0x8   :  { %534 = vmatpush.bf16.msra.mxu2 %v6129_v6  ;;  %v6135_v15 = vld [vmem:[%s9257_s1 + $0xe0] sm:$0xff]  ;;  %v6134_v19 = vld [vmem:[%s9257_s1 + $0xd8] sm:$0xff]  ;;  %v6133_v23 = vld [vmem:[%s9257_s1 + $0xd0] sm:$0xff] }
   0x9   :  { %553 = vmatpush.bf16.msra.mxu3 %v6137_v7  ;;  %v6108_v24 = vld [vmem:[%s9257_s1 + $0x8] sm:$0xff]  ;;  %v6107_v28 = vld [vmem:[%s9257_s1] sm:$0xff]  ;;  %v6098_v33 = vld [vmem:[%s9258_s0 + $0x14] sm:$0xf0] }
   0xa   :  { %497 = vmatpush.bf16.msra.mxu0 %v6112_v8  ;;  %v6116_v25 = vld [vmem:[%s9257_s1 + $0x48] sm:$0xff]  ;;  %v6115_v29 = vld [vmem:[%s9257_s1 + $0x40] sm:$0xff]  ;;  %v5350_v35 = vld [vmem:[%s9258_s0 + $0x18] sm:$0xf0] }
   0xb   :  { %516 = vmatpush.bf16.msra.mxu1 %v6120_v9  ;;  %v6124_v26 = vld [vmem:[%s9257_s1 + $0x88] sm:$0xff]  ;;  %v6123_v30 = vld [vmem:[%s9257_s1 + $0x80] sm:$0xff]  ;;  %v6146_v40 = vld [vmem:[%s9257_s1 + $0x138] sm:$0xff] }
   0xc   :  { %535 = vmatpush.bf16.msra.mxu2 %v6128_v10  ;;  %v6132_v27 = vld [vmem:[%s9257_s1 + $0xc8] sm:$0xff]  ;;  %v6131_v31 = vld [vmem:[%s9257_s1 + $0xc0] sm:$0xff]  ;;  %v6154_v41 = vld [vmem:[%s9257_s1 + $0x178] sm:$0xff] }
   0xd   :  { %554 = vmatpush.bf16.msra.mxu3 %v6136_v11  ;;  %v5348_v32 = vld [vmem:[%s9258_s0] sm:$0xf]  ;;  %v6095_v34 = vld [vmem:[%s9258_s0 + $0x4] sm:$0xf]  ;;  %v5356_v36 = vld [vmem:[%s9258_s0 + $0x8] sm:$0xf] }
   0xe   :  { %498 = vmatpush.bf16.msra.mxu0 %v6111_v12  ;;  %v6099_v37 = vld [vmem:[%s9258_s0 + $0x1c] sm:$0xf0]  ;;  %v6096_v38 = vld [vmem:[%s9258_s0 + $0xc] sm:$0xf]  ;;  %v5358_v39 = vld [vmem:[%s9258_s0 + $0x20] sm:$0xf0]  ;;  %v5349_v42 = vor.u32 %v6098_v33, %v5348_v32  ;;  %v5353_v43 = vor.u32 %v6095_v34, %v5350_v35 }
   0xf   :  { %517 = vmatpush.bf16.msra.mxu1 %v6119_v13  ;;  %v5357_v44 = vor.u32 %v6099_v37, %v5356_v36  ;;  %v5361_v45 = vor.u32 %v6096_v38, %v5358_v39  ;;  %v6145_v46 = vld [vmem:[%s9257_s1 + $0x130] sm:$0xff]  ;;  %v6144_v48 = vld [vmem:[%s9257_s1 + $0x128] sm:$0xff]  ;;  %v6143_v50 = vld [vmem:[%s9257_s1 + $0x120] sm:$0xff] }
  0x10   :  { %536 = vmatpush.bf16.msra.mxu2 %v6127_v14  ;;  %v6153_v47 = vld [vmem:[%s9257_s1 + $0x170] sm:$0xff]  ;;  %v6152_v49 = vld [vmem:[%s9257_s1 + $0x168] sm:$0xff]  ;;  %v6151_v51 = vld [vmem:[%s9257_s1 + $0x160] sm:$0xff] }
  0x11   :  { %555 = vmatpush.bf16.msra.mxu3 %v6135_v15  ;;  %v5372_v52 = vld [vmem:[%s9258_s0 + $0x30] sm:$0xf]  ;;  %v6104_v53 = vld [vmem:[%s9258_s0 + $0x44] sm:$0xf0]  ;;  %v6101_v54 = vld [vmem:[%s9258_s0 + $0x34] sm:$0xf] }
  0x12   :  { %499 = vmatpush.bf16.msra.mxu0 %v6110_v16  ;;  %v5374_v55 = vld [vmem:[%s9258_s0 + $0x48] sm:$0xf0]  ;;  %v5380_v56 = vld [vmem:[%s9258_s0 + $0x38] sm:$0xf]  ;;  %v6105_v57 = vld [vmem:[%s9258_s0 + $0x4c] sm:$0xf0]  ;;  %v5373_v62 = vor.u32 %v6104_v53, %v5372_v52 }
  0x13   :  { %518 = vmatpush.bf16.msra.mxu1 %v6118_v17  ;;  %v6102_v58 = vld [vmem:[%s9258_s0 + $0x3c] sm:$0xf]  ;;  %v5382_v59 = vld [vmem:[%s9258_s0 + $0x50] sm:$0xf0]  ;;  %v5377_v63 = vor.u32 %v6101_v54, %v5374_v55  ;;  %v5381_v0 = vor.u32 %v6105_v57, %v5380_v56  ;;  %v6140_v4 = vld [vmem:[%s9257_s1 + $0x108] sm:$0xff] }
  0x14   :  { %537 = vmatpush.bf16.msra.mxu2 %v6126_v18  ;;  %v6142_v60 = vld [vmem:[%s9257_s1 + $0x118] sm:$0xff]  ;;  %v5385_v1 = vor.u32 %v6102_v58, %v5382_v59  ;;  %v6141_v2 = vld [vmem:[%s9257_s1 + $0x110] sm:$0xff]  ;;  %v6148_v5 = vld [vmem:[%s9257_s1 + $0x148] sm:$0xff] }
  0x15   :  { %556 = vmatpush.bf16.msra.mxu3 %v6134_v19  ;;  %v6150_v61 = vld [vmem:[%s9257_s1 + $0x158] sm:$0xff]  ;;  %v6149_v3 = vld [vmem:[%s9257_s1 + $0x150] sm:$0xff]  ;;  %v6139_v6 = vld [vmem:[%s9257_s1 + $0x100] sm:$0xff] }
  0x16   :  { %500 = vmatpush.bf16.msra.mxu0 %v6109_v20  ;;  %v6147_v7 = vld [vmem:[%s9257_s1 + $0x140] sm:$0xff]  ;;  %v5364_v8 = vld [vmem:[%s9258_s0 + $0x10] sm:$0xf]  ;;  %v6100_v9 = vld [vmem:[%s9258_s0 + $0x24] sm:$0xf0]  ;;  %s6700_s1 = smov 16  }
  0x17   :  { %519 = vmatpush.bf16.msra.mxu1 %v6117_v21  ;;  %v6097_v10 = vld [vmem:[%s9258_s0 + $0x14] sm:$0xf]  ;;  %v5366_v11 = vld [vmem:[%s9258_s0 + $0x28] sm:$0xf0]  ;;  %v5365_v12 = vor.u32 %v6100_v9, %v5364_v8  ;;  %v5388_v14 = vld [vmem:[%s9258_s0 + $0x40] sm:$0xf] }
  0x18   :  { %538 = vmatpush.bf16.msra.mxu2 %v6125_v22  ;;  %v5369_v13 = vor.u32 %v6097_v10, %v5366_v11  ;;  %v6106_v15 = vld [vmem:[%s9258_s0 + $0x54] sm:$0xf0]  ;;  %v6103_v16 = vld [vmem:[%s9258_s0 + $0x44] sm:$0xf]  ;;  %v5390_v17 = vld [vmem:[%s9258_s0 + $0x58] sm:$0xf0] }
  0x19   :  { %557 = vmatpush.bf16.msra.mxu3 %v6133_v23  ;;  %v5389_v18 = vor.u32 %v6106_v15, %v5388_v14  ;;  %v5393_v19 = vor.u32 %v6103_v16, %v5390_v17  ;;  %v611_v33 = vld [vmem:[%s9259_s3] sm:$0xfc]  ;;  %v612_v34 = vld [vmem:[%s9259_s3 + $0x10] sm:$0xff]  ;;  %v609_v37 = vld [vmem:[%s9259_s3] ss:$0 sm:$0xff] }
  0x1a   :  { %501 = vmatpush.bf16.msra.mxu0 %v6108_v24  ;;  %v625_v35 = vrot.slane %v611_v33, 2  ;;  %v626_v36 = vrot.slane %v612_v34, 2  ;;  %v610_v38 = vld [vmem:[%s9259_s3 + $0x1] ss:$0 sm:$0xff] }
  0x1b   :  { %520 = vmatpush.bf16.msra.mxu1 %v6116_v25 }
  0x1c   :  { %539 = vmatpush.bf16.msra.mxu2 %v6124_v26 }
  0x1d   :  { %558 = vmatpush.bf16.msra.mxu3 %v6132_v27 }
  0x1e   :  { %502 = vmatpush.bf16.msra.mxu0 %v6107_v28 }
  0x1f   :  { %521 = vmatpush.bf16.msra.mxu1 %v6115_v29 }
  0x20   :  { %540 = vmatpush.bf16.msra.mxu2 %v6123_v30 }
  0x21   :  { %559 = vmatpush.bf16.msra.mxu3 %v6131_v31  ;;  %503 = vmatmul.bf16.vlgmr.msra.gmra.mxu0 %v5349_v42 }
  0x22   :  { %571 = vmatpush.bf16.msrb.mxu0 %v6146_v40  ;;  %522 = vmatmul.bf16.vlgmr.msra.gmra.mxu1 %v5353_v43 }
  0x23   :  { %590 = vmatpush.bf16.msrb.mxu1 %v6154_v41  ;;  %541 = vmatmul.bf16.vlgmr.msra.gmra.mxu2 %v5357_v44 }
  0x24   :  { %560 = vmatmul.bf16.vlgmr.msra.gmra.mxu3 %v5361_v45  ;;  %v614_v45 = vadd.f32 %v610_v38, %v609_v37 }
  0x26   :  { %572 = vmatpush.bf16.msrb.mxu0 %v6145_v46  ;;  %v627_v46 = vsel %vm624_vm0, %v625_v35, %v626_v36  ;;  %v6695_v35 = vmov 64.0  }
  0x27   :  { %591 = vmatpush.bf16.msrb.mxu1 %v6153_v47  ;;  %v615_v47 = vld [vmem:[%s9260_s2] sm:$0x3]  ;;  %6337 = vrcp.f32 %v6695_v35  ;;  %s6698_s2 = smov 112  }
  0x28   :  { %v619_v53 = vadd.f32 %v615_v47, %v614_v45 }
  0x2a   :  { %573 = vmatpush.bf16.msrb.mxu0 %v6144_v48 }
  0x2b   :  { %592 = vmatpush.bf16.msrb.mxu1 %v6152_v49 }
  0x2e   :  { %574 = vmatpush.bf16.msrb.mxu0 %v6143_v50  ;;  %v613_v50 = vld [vmem:[%s9259_s3 + $0x20] sm:$0x3] }
  0x2f   :  { %593 = vmatpush.bf16.msrb.mxu1 %v6151_v51  ;;  %v628_v54 = vrot.slane %v613_v50, 2 }
  0x31   :  { %508 = vmatmul.bf16.gmra.mxu0 %v5373_v62 }
  0x32   :  { %575 = vmatpush.bf16.msrb.mxu0 %v6142_v60  ;;  %527 = vmatmul.bf16.gmra.mxu1 %v5377_v63 }
  0x33   :  { %594 = vmatpush.bf16.msrb.mxu1 %v6150_v61  ;;  %546 = vmatmul.bf16.gmra.mxu2 %v5381_v0  ;;  %v629_v0 = vsel %vm624_vm0, %v626_v36, %v628_v54  ;;  %v6338_v36 = vpop.eup %6337 }
  0x34   :  { %565 = vmatmul.bf16.gmra.mxu3 %v5385_v1  ;;  %v679_v37 = vmul.f32 64.0, %v6338_v36  ;;  %vm683_vm3 = vweird.f32 %v6338_v36 }
  0x36   :  { %576 = vmatpush.bf16.msrb.mxu0 %v6141_v2  ;;  %v680_v38 = vsub.f32 1.0, %v679_v37  ;;  %v7064_v37 = vld [vmem:[%s9259_s3 + $0x23] ss:$0 sm:$0xff] }
  0x37   :  { %595 = vmatpush.bf16.msrb.mxu1 %v6149_v3 }
  0x3a   :  { %577 = vmatpush.bf16.msrb.mxu0 %v6140_v4 }
  0x3b   :  { %596 = vmatpush.bf16.msrb.mxu1 %v6148_v5 }
  0x3e   :  { %578 = vmatpush.bf16.msrb.mxu0 %v6139_v6 }
  0x3f   :  { %597 = vmatpush.bf16.msrb.mxu1 %v6147_v7  ;;  %v617_v7 = vrot.slane %v615_v47, 1 }
  0x41   :  { %579 = vmatmul.bf16.vlgmr.msrb.gmra.mxu0 %v5365_v12 }
  0x42   :  { %598 = vmatmul.bf16.vlgmr.msrb.gmra.mxu1 %v5369_v13 }
  0x51   :  { %584 = vmatmul.bf16.gmra.mxu0 %v5389_v18 }
  0x52   :  { %603 = vmatmul.bf16.gmra.mxu1 %v5393_v19 }
  0x9e   :  { %v504_v20 = vpop.f32.mrf.mxu0 }
  0x9f   :  { %v523_v21 = vpop.f32.mrf.mxu1 }
  0xa0   :  { %v524_v30 = vadd.f32 %v523_v21, %v504_v20  ;;  %v620_v20 = vadd.f32 %v617_v7, %v614_v45 }
  0xa6   :  { %v506_v22 = vpop.f32.mrf.mxu0  ;;  %v542_v26 = vpop.f32.mrf.mxu2 }
  0xa7   :  { %v525_v23 = vpop.f32.mrf.mxu1  ;;  %v561_v27 = vpop.f32.mrf.mxu3  ;;  %v543_v31 = vadd.f32 %v542_v26, %v524_v30 }
  0xa8   :  { %v526_v43 = vadd.f32 %v525_v23, %v506_v22 }
  0xa9   :  { %v562_v39 = vadd.f32 %v561_v27, %v543_v31 }
  0xae   :  { %v509_v24 = vpop.f32.mrf.mxu0  ;;  %v544_v32 = vpop.f32.mrf.mxu2 }
  0xaf   :  { %v528_v25 = vpop.f32.mrf.mxu1  ;;  %v563_v40 = vpop.f32.mrf.mxu3  ;;  %v545_v48 = vadd.f32 %v544_v32, %v526_v43 }
  0xb0   :  { %v529_v59 = vadd.f32 %v528_v25, %v509_v24 }
  0xb1   :  { %v564_v55 = vadd.f32 %v563_v40, %v545_v48 }
  0xb6   :  { %v511_v28 = vpop.f32.mrf.mxu0  ;;  %v547_v51 = vpop.f32.mrf.mxu2 }
  0xb7   :  { %v530_v29 = vpop.f32.mrf.mxu1  ;;  %v566_v62 = vpop.f32.mrf.mxu3  ;;  %v548_v1 = vadd.f32 %v547_v51, %v529_v59 }
  0xb8   :  { %v531_v10 = vadd.f32 %v530_v29, %v511_v28 }
  0xb9   :  { %v567_v4 = vadd.f32 %v566_v62, %v548_v1 }
  0xbe   :  { %v580_v41 = vpop.f32.mrf.mxu0  ;;  %v549_v5 = vpop.f32.mrf.mxu2 }
  0xbf   :  { %v599_v42 = vpop.f32.mrf.mxu1  ;;  %v581_v44 = vadd.f32 %v580_v41, %v562_v39  ;;  %v550_v16 = vadd.f32 %v549_v5, %v531_v10  ;;  %v568_v18 = vpop.f32.mrf.mxu3  ;;  %v681_v39 = vmul.f32 %v6338_v36, %v680_v38 }
  0xc1   :  { %v600_v49 = vadd.f32 %v599_v42, %v581_v44  ;;  %v569_v21 = vadd.f32 %v568_v18, %v550_v16  ;;  %v682_v40 = vadd.f32 %v6338_v36, %v681_v39 }
  0xc3   :  { %v632_v52 = vadd.f32 %v627_v46, %v600_v49  ;;  %v7013_v41 = vsel %vm683_vm3, %v6338_v36, %v682_v40 }
  0xc5   :  { %v641_v56 = vrot.slane %v632_v52, 7 }
  0xc6   :  { %v582_v57 = vpop.f32.mrf.mxu0 }
  0xc7   :  { %v601_v58 = vpop.f32.mrf.mxu1  ;;  %v583_v60 = vadd.f32 %v582_v57, %v564_v55  ;;  %v653_v61 = vsel %vm640_vm1, %v619_v53, %v641_v56 }
  0xc8   :  { %v660_v63 = vsel %vm659_vm2, %v653_v61, 0.0 }
  0xc9   :  { %v602_v2 = vadd.f32 %v601_v58, %v583_v60  ;;  %661 = vadd.xlane.f32.xlu0 %v660_v63 }
  0xcb   :  { %v633_v3 = vadd.f32 %v629_v0, %v602_v2 }
  0xcd   :  { %v642_v6 = vrot.slane %v633_v3, 7 }
  0xce   :  { %v585_v8 = vpop.f32.mrf.mxu0 }
  0xcf   :  { %v604_v9 = vpop.f32.mrf.mxu1  ;;  %v586_v11 = vadd.f32 %v585_v8, %v567_v4  ;;  %v655_v12 = vsel %vm640_vm1, %v642_v6, 0.0  ;;  %v643_v13 = vsel %vm640_vm1, %v641_v56, %v642_v6 }
  0xd0   :  { %v666_v14 = vsel %vm659_vm2, %v655_v12, 0.0  ;;  %v663_v15 = vsel %vm659_vm2, %v643_v13, 0.0 }
  0xd1   :  { %v605_v17 = vadd.f32 %v604_v9, %v586_v11  ;;  %667 = vadd.xlane.f32.xlu1 %v666_v14  ;;  %664 = vadd.xlane.f32.xlu0 %v663_v15 }
  0xd3   :  { %v634_v19 = vadd.f32 %v627_v46, %v605_v17 }
  0xd5   :  { %v644_v22 = vrot.slane %v634_v19, 7 }
  0xd6   :  { %v587_v23 = vpop.f32.mrf.mxu0 }
  0xd7   :  { %v606_v24 = vpop.f32.mrf.mxu1  ;;  %v588_v25 = vadd.f32 %v587_v23, %v569_v21  ;;  %v654_v26 = vsel %vm640_vm1, %v620_v20, %v644_v22 }
  0xd8   :  { %v669_v27 = vsel %vm659_vm2, %v654_v26, 0.0 }
  0xd9   :  { %v607_v28 = vadd.f32 %v606_v24, %v588_v25  ;;  %670 = vadd.xlane.f32.xlu1 %v669_v27 }
  0xdb   :  { %v635_v29 = vadd.f32 %v629_v0, %v607_v28 }
  0xdd   :  { %v645_v30 = vrot.slane %v635_v29, 7 }
  0xdf   :  { %v646_v31 = vsel %vm640_vm1, %v644_v22, %v645_v30  ;;  %v656_v33 = vsel %vm640_vm1, %v645_v30, 0.0 }
  0xe0   :  { %v672_v32 = vsel %vm659_vm2, %v646_v31, 0.0  ;;  %v675_v34 = vsel %vm659_vm2, %v656_v33, 0.0 }
  0xe1   :  { %673 = vadd.xlane.f32.xlu2 %v672_v32 }
  0xe9   :  { %676 = vadd.xlane.f32.xlu2 %v675_v34 }
 0x13c   :  { %v662_v42 = vpop.xlane.xlu0 %661 }
 0x13d   :  { %v685_v43 = vmul.f32 %v7013_v41, %v662_v42 }
 0x13f   :  { %v7016_v44 = vsub.f32 %v653_v61, %v685_v43 }
 0x141   :  { %v697_v45 = vmul.f32 %v7016_v44, %v7016_v44 }
 0x143   :  { %v703_v46 = vsel %vm659_vm2, %v697_v45, 0.0 }
 0x144   :  { %v668_v47 = vpop.xlane.xlu1 %667  ;;  %704 = vadd.xlane.f32.xlu0 %v703_v46  ;;  %v665_v48 = vpop.xlane.xlu0 %664 }
 0x145   :  { %v687_v49 = vmul.f32 %v7013_v41, %v668_v47  ;;  %v686_v50 = vmul.f32 %v7013_v41, %v665_v48 }
 0x147   :  { %v7023_v51 = vsub.f32 %v655_v12, %v687_v49  ;;  %v7025_v52 = vsub.f32 %v643_v13, %v686_v50 }
 0x149   :  { %v699_v53 = vmul.f32 %v7023_v51, %v7023_v51  ;;  %v698_v54 = vmul.f32 %v7025_v52, %v7025_v52 }
 0x14b   :  { %v709_v55 = vsel %vm659_vm2, %v699_v53, 0.0  ;;  %v706_v56 = vsel %vm659_vm2, %v698_v54, 0.0 }
 0x14c   :  { %710 = vadd.xlane.f32.xlu2 %v709_v55  ;;  %v671_v57 = vpop.xlane.xlu1 %670  ;;  %707 = vadd.xlane.f32.xlu1 %v706_v56 }
 0x14d   :  { %v688_v58 = vmul.f32 %v7013_v41, %v671_v57 }
 0x14f   :  { %v7034_v59 = vsub.f32 %v654_v26, %v688_v58 }
 0x151   :  { %v700_v60 = vmul.f32 %v7034_v59, %v7034_v59 }
 0x153   :  { %v712_v61 = vsel %vm659_vm2, %v700_v60, 0.0 }
 0x154   :  { %v674_v62 = vpop.xlane.xlu2 %673  ;;  %713 = vadd.xlane.f32.xlu0 %v712_v61 }
 0x155   :  { %v689_v63 = vmul.f32 %v7013_v41, %v674_v62 }
 0x157   :  { %v7040_v0 = vsub.f32 %v646_v31, %v689_v63  ;;  %v7058_v31 = vld [vmem:[%s9259_s3 + $0x22] ss:$0 sm:$0xff] }
 0x159   :  { %v701_v1 = vmul.f32 %v7040_v0, %v7040_v0 }
 0x15b   :  { %v715_v2 = vsel %vm659_vm2, %v701_v1, 0.0 }
 0x15c   :  { %v677_v3 = vpop.xlane.xlu2 %676  ;;  %716 = vadd.xlane.f32.xlu1 %v715_v2 }
 0x15d   :  { %v690_v4 = vmul.f32 %v7013_v41, %v677_v3 }
 0x15f   :  { %v7046_v5 = vsub.f32 %v656_v33, %v690_v4 }
 0x161   :  { %v702_v6 = vmul.f32 %v7046_v5, %v7046_v5 }
 0x163   :  { %v718_v7 = vsel %vm659_vm2, %v702_v6, 0.0 }
 0x164   :  { %719 = vadd.xlane.f32.xlu2 %v718_v7 }
 0x1b7   :  { %v705_v8 = vpop.xlane.xlu0 %704 }
 0x1b8   :  { %v721_v9 = vmul.f32 %v705_v8, %v7013_v41 }
 0x1ba   :  { %v727_v10 = vadd.f32 1e-05, %v721_v9 }
 0x1bc   :  { %6339 = vrsqrt.f32 %v727_v10  ;;  %vm739_vm5 = vweird.f32 %v727_v10 }
 0x1bf   :  { %v711_v11 = vpop.xlane.xlu2 %710  ;;  %v708_v12 = vpop.xlane.xlu1 %707 }
 0x1c0   :  { %v723_v13 = vmul.f32 %v711_v11, %v7013_v41  ;;  %v722_v14 = vmul.f32 %v708_v12, %v7013_v41 }
 0x1c2   :  { %v6340_v15 = vpop.eup %6339  ;;  %v729_v16 = vadd.f32 1e-05, %v723_v13  ;;  %v728_v17 = vadd.f32 1e-05, %v722_v14 }
 0x1c3   :  { %v734_v18 = vmul.f32 %v6340_v15, %v727_v10  ;;  %vm740_vm4 = vweird.f32 %v6340_v15 }
 0x1c4   :  { %6341 = vrsqrt.f32 %v729_v16  ;;  %vm741_vm6 = vmor %vm739_vm5, %vm740_vm4  ;;  %vm759_vm9 = vweird.f32 %v729_v16  ;;  %vm749_vm11 = vweird.f32 %v728_v17 }
 0x1c5   :  { %v735_v19 = vmul.f32 %v6340_v15, %v734_v18  ;;  %6343 = vrsqrt.f32 %v728_v17 }
 0x1c7   :  { %v736_v20 = vmul.f32 0.5, %v735_v19  ;;  %v714_v21 = vpop.xlane.xlu0 %713 }
 0x1c8   :  { %v724_v22 = vmul.f32 %v714_v21, %v7013_v41 }
 0x1c9   :  { %v737_v23 = vsub.f32 1.5, %v736_v20 }
 0x1ca   :  { %v6342_v24 = vpop.eup %6341  ;;  %v730_v25 = vadd.f32 1e-05, %v724_v22 }
 0x1cb   :  { %v6344_v26 = vpop.eup %6343  ;;  %v738_v27 = vmul.f32 %v6340_v15, %v737_v23  ;;  %v754_v28 = vmul.f32 %v6342_v24, %v729_v16  ;;  %vm760_vm7 = vweird.f32 %v6342_v24 }
 0x1cc   :  { %v744_v29 = vmul.f32 %v6344_v26, %v728_v17  ;;  %6345 = vrsqrt.f32 %v730_v25  ;;  %vm750_vm8 = vweird.f32 %v6344_v26  ;;  %vm761_vm10 = vmor %vm759_vm9, %vm760_vm7  ;;  %vm769_vm14 = vweird.f32 %v730_v25 }
 0x1cd   :  { %v755_v30 = vmul.f32 %v6342_v24, %v754_v28  ;;  %v742_v32 = vsel %vm741_vm6, %v6340_v15, %v738_v27  ;;  %vm751_vm12 = vmor %vm749_vm11, %vm750_vm8 }
 0x1ce   :  { %v745_v33 = vmul.f32 %v6344_v26, %v744_v29  ;;  %v793_v34 = vmul.f32 %v742_v32, %v7016_v44 }
 0x1cf   :  { %v756_v35 = vmul.f32 0.5, %v755_v30  ;;  %v717_v36 = vpop.xlane.xlu1 %716 }
 0x1d0   :  { %v746_v38 = vmul.f32 0.5, %v745_v33  ;;  %v725_v39 = vmul.f32 %v717_v36, %v7013_v41  ;;  %v799_v40 = vmul.f32 %v793_v34, %v7058_v31 }
 0x1d1   :  { %v757_v42 = vsub.f32 1.5, %v756_v35 }
 0x1d2   :  { %v6346_v43 = vpop.eup %6345  ;;  %v747_v45 = vsub.f32 1.5, %v746_v38  ;;  %v731_v46 = vadd.f32 1e-05, %v725_v39  ;;  %v7069_v44 = vadd.f32 %v799_v40, %v7064_v37 }
 0x1d3   :  { %v758_v47 = vmul.f32 %v6342_v24, %v757_v42  ;;  %v764_v48 = vmul.f32 %v6346_v43, %v730_v25  ;;  %vm770_vm13 = vweird.f32 %v6346_v43 }
 0x1d4   :  { %v748_v49 = vmul.f32 %v6344_v26, %v747_v45  ;;  %6347 = vrsqrt.f32 %v731_v46  ;;  %v817_v50 = vsel %vm659_vm2, %v7069_v44, 0.0  ;;  %vm771_vm15 = vmor %vm769_vm14, %vm770_vm13  ;;  %vm779_vm1 = vweird.f32 %v731_v46 }
 0x1d5   :  { %v765_v53 = vmul.f32 %v6346_v43, %v764_v48  ;;  %818 = vadd.xlane.f32.xlu0 %v817_v50  ;;  %v762_v54 = vsel %vm761_vm10, %v6342_v24, %v758_v47 }
 0x1d6   :  { %v795_v55 = vmul.f32 %v762_v54, %v7023_v51  ;;  %v752_v56 = vsel %vm751_vm12, %v6344_v26, %v748_v49 }
 0x1d7   :  { %v766_v57 = vmul.f32 0.5, %v765_v53  ;;  %v720_v58 = vpop.xlane.xlu2 %719  ;;  %v794_v60 = vmul.f32 %v752_v56, %v7025_v52 }
 0x1d8   :  { %v726_v61 = vmul.f32 %v720_v58, %v7013_v41  ;;  %v801_v62 = vmul.f32 %v795_v55, %v7058_v31 }
 0x1d9   :  { %v767_v63 = vsub.f32 1.5, %v766_v57  ;;  %v800_v1 = vmul.f32 %v794_v60, %v7058_v31 }
 0x1da   :  { %v6348_v2 = vpop.eup %6347  ;;  %v732_v3 = vadd.f32 1e-05, %v726_v61  ;;  %v7079_v4 = vadd.f32 %v801_v62, %v7064_v37 }
 0x1db   :  { %v768_v6 = vmul.f32 %v6346_v43, %v767_v63  ;;  %v774_v51 = vmul.f32 %v6348_v2, %v731_v46  ;;  %v7082_v7 = vadd.f32 %v800_v1, %v7064_v37  ;;  %vm780_vm0 = vweird.f32 %v6348_v2 }
 0x1dc   :  { %6349 = vrsqrt.f32 %v732_v3  ;;  %v823_v52 = vsel %vm659_vm2, %v7079_v4, 0.0  ;;  %vm781_vm3 = vmor %vm779_vm1, %vm780_vm0  ;;  %vm789_vm5 = vweird.f32 %v732_v3 }
 0x1dd   :  { %v775_v8 = vmul.f32 %v6348_v2, %v774_v51  ;;  %824 = vadd.xlane.f32.xlu2 %v823_v52  ;;  %v820_v9 = vsel %vm659_vm2, %v7082_v7, 0.0  ;;  %v772_v10 = vsel %vm771_vm15, %v6346_v43, %v768_v6  ;;  %v6162_v6 = vld [vmem:[%s9261_s4 + $0x34] sm:$0xf0]  ;;  %v6161_v51 = vld [vmem:[%s9261_s4 + $0x34] sm:$0xf] }
 0x1de   :  { %821 = vadd.xlane.f32.xlu1 %v820_v9  ;;  %v796_v11 = vmul.f32 %v772_v10, %v7034_v59  ;;  %v5605_v10 = vld [vmem:[%s9261_s4 + $0x20] sm:$0xf] }
 0x1df   :  { %v776_v12 = vmul.f32 0.5, %v775_v8  ;;  %v5615_v8 = vld [vmem:[%s9261_s4 + $0x38] sm:$0xf0] }
 0x1e0   :  { %v802_v13 = vmul.f32 %v796_v11, %v7058_v31  ;;  %v5618_v9 = vor.u32 %v6161_v51, %v5615_v8  ;;  %v6160_v11 = vld [vmem:[%s9261_s4 + $0x24] sm:$0xf0] }
 0x1e1   :  { %v777_v14 = vsub.f32 1.5, %v776_v12  ;;  %v6159_v12 = vld [vmem:[%s9261_s4 + $0x24] sm:$0xf] }
 0x1e2   :  { %v6350_v15 = vpop.eup %6349  ;;  %v7091_v16 = vadd.f32 %v802_v13, %v7064_v37  ;;  %1056 = vmatpush.bf16.msrb.mxu3 %v5618_v9  ;;  %v5606_v13 = vor.u32 %v6160_v11, %v5605_v10 }
 0x1e3   :  { %v778_v17 = vmul.f32 %v6348_v2, %v777_v14  ;;  %v784_v18 = vmul.f32 %v6350_v15, %v732_v3  ;;  %vm790_vm4 = vweird.f32 %v6350_v15  ;;  %v5613_v3 = vld [vmem:[%s9261_s4 + $0x30] sm:$0xf]  ;;  %v5607_v14 = vld [vmem:[%s9261_s4 + $0x28] sm:$0xf0] }
 0x1e4   :  { %v826_v19 = vsel %vm659_vm2, %v7091_v16, 0.0  ;;  %vm791_vm6 = vmor %vm789_vm5, %vm790_vm4  ;;  %v5614_v52 = vor.u32 %v6162_v6, %v5613_v3 }
 0x1e5   :  { %v785_v20 = vmul.f32 %v6350_v15, %v784_v18  ;;  %827 = vadd.xlane.f32.xlu0 %v826_v19  ;;  %v782_v21 = vsel %vm781_vm3, %v6348_v2, %v778_v17  ;;  %v5597_v17 = vld [vmem:[%s9261_s4 + $0x10] sm:$0xf]  ;;  %v6158_v18 = vld [vmem:[%s9261_s4 + $0x14] sm:$0xf0]  ;;  %v6157_v19 = vld [vmem:[%s9261_s4 + $0x14] sm:$0xf] }
 0x1e6   :  { %v797_v59 = vmul.f32 %v782_v21, %v7040_v0  ;;  %1032 = vmatpush.bf16.msrb.mxu2 %v5614_v52  ;;  %v5599_v21 = vld [vmem:[%s9261_s4 + $0x18] sm:$0xf0] }
 0x1e7   :  { %v786_v22 = vmul.f32 0.5, %v785_v20  ;;  %v5598_v20 = vor.u32 %v6158_v18, %v5597_v17 }
 0x1e8   :  { %v803_v23 = vmul.f32 %v797_v59, %v7058_v31 }
 0x1e9   :  { %v787_v24 = vsub.f32 1.5, %v786_v22  ;;  %v5602_v22 = vor.u32 %v6157_v19, %v5599_v21  ;;  %v816_v21 = vld [vmem:[%s9259_s3 + $0x25] ss:$0 sm:$0xff] }
 0x1ea   :  { %v7098_v25 = vadd.f32 %v803_v23, %v7064_v37  ;;  %1033 = vmatpush.bf16.msrb.mxu2 %v5606_v13 }
 0x1eb   :  { %v788_v26 = vmul.f32 %v6350_v15, %v787_v24  ;;  %v5589_v24 = vld [vmem:[%s9261_s4] sm:$0xf] }
 0x1ec   :  { %v829_v27 = vsel %vm659_vm2, %v7098_v25, 0.0 }
 0x1ed   :  { %830 = vadd.xlane.f32.xlu1 %v829_v27  ;;  %v792_v28 = vsel %vm791_vm6, %v6350_v15, %v788_v26  ;;  %v5610_v15 = vor.u32 %v6159_v12, %v5607_v14  ;;  %v6156_v26 = vld [vmem:[%s9261_s4 + $0x4] sm:$0xf0]  ;;  %v6155_v27 = vld [vmem:[%s9261_s4 + $0x4] sm:$0xf] }
 0x1ee   :  { %v798_v29 = vmul.f32 %v792_v28, %v7046_v5  ;;  %1034 = vmatpush.bf16.msrb.mxu2 %v5598_v20  ;;  %v815_v12 = vld [vmem:[%s9259_s3 + $0x24] ss:$0 sm:$0xff] }
 0x1ef   :  { %1057 = vmatpush.bf16.msrb.mxu3 %v5610_v15 }
 0x1f0   :  { %v804_v0 = vmul.f32 %v798_v29, %v7058_v31  ;;  %v5590_v29 = vor.u32 %v6156_v26, %v5589_v24 }
 0x1f2   :  { %v7105_v30 = vadd.f32 %v804_v0, %v7064_v37  ;;  %v5591_v0 = vld [vmem:[%s9261_s4 + $0x8] sm:$0xf0]  ;;  %1035 = vmatpush.bf16.msrb.mxu2 %v5590_v29 }
 0x1f3   :  { %1058 = vmatpush.bf16.msrb.mxu3 %v5602_v22 }
 0x1f4   :  { %v832_v32 = vsel %vm659_vm2, %v7105_v30, 0.0 }
 0x1f5   :  { %833 = vadd.xlane.f32.xlu2 %v832_v32  ;;  %v5594_v32 = vor.u32 %v6155_v27, %v5591_v0 }
 0x1f7   :  { %1059 = vmatpush.bf16.msrb.mxu3 %v5594_v32 }
 0x248   :  { %v819_v33 = vpop.xlane.xlu0 %818 }
 0x249   :  { %v835_v34 = vmul.f32 %v819_v33, %v7013_v41 }
 0x24b   :  { %v7111_v35 = vsub.f32 %v7069_v44, %v835_v34 }
 0x24d   :  { %v847_v36 = vmul.f32 %v7111_v35, %v7111_v35 }
 0x24f   :  { %v853_v5 = vsel %vm659_vm2, %v847_v36, 0.0 }
 0x250   :  { %v825_v38 = vpop.xlane.xlu2 %824  ;;  %854 = vadd.xlane.f32.xlu0 %v853_v5 }
 0x251   :  { %v837_v31 = vmul.f32 %v825_v38, %v7013_v41  ;;  %v822_v37 = vpop.xlane.xlu1 %821 }
 0x252   :  { %v836_v39 = vmul.f32 %v822_v37, %v7013_v41 }
 0x253   :  { %v7119_v40 = vsub.f32 %v7079_v4, %v837_v31 }
 0x254   :  { %v7122_v42 = vsub.f32 %v7082_v7, %v836_v39 }
 0x255   :  { %v849_v43 = vmul.f32 %v7119_v40, %v7119_v40 }
 0x256   :  { %v848_v45 = vmul.f32 %v7122_v42, %v7122_v42 }
 0x257   :  { %v859_v46 = vsel %vm659_vm2, %v849_v43, 0.0 }
 0x258   :  { %860 = vadd.xlane.f32.xlu2 %v859_v46  ;;  %v856_v47 = vsel %vm659_vm2, %v848_v45, 0.0  ;;  %v828_v48 = vpop.xlane.xlu0 %827 }
 0x259   :  { %857 = vadd.xlane.f32.xlu1 %v856_v47  ;;  %v838_v49 = vmul.f32 %v828_v48, %v7013_v41 }
 0x25b   :  { %v7132_v50 = vsub.f32 %v7091_v16, %v838_v49 }
 0x25d   :  { %v850_v53 = vmul.f32 %v7132_v50, %v7132_v50 }
 0x25f   :  { %v862_v54 = vsel %vm659_vm2, %v850_v53, 0.0 }
 0x260   :  { %v831_v55 = vpop.xlane.xlu1 %830  ;;  %863 = vadd.xlane.f32.xlu0 %v862_v54 }
 0x261   :  { %v839_v56 = vmul.f32 %v831_v55, %v7013_v41 }
 0x263   :  { %v7139_v57 = vsub.f32 %v7098_v25, %v839_v56 }
 0x265   :  { %v851_v58 = vmul.f32 %v7139_v57, %v7139_v57 }
 0x267   :  { %v865_v60 = vsel %vm659_vm2, %v851_v58, 0.0 }
 0x268   :  { %v834_v61 = vpop.xlane.xlu2 %833  ;;  %866 = vadd.xlane.f32.xlu1 %v865_v60 }
 0x269   :  { %v840_v62 = vmul.f32 %v834_v61, %v7013_v41 }
 0x26b   :  { %v7146_v63 = vsub.f32 %v7105_v30, %v840_v62 }
 0x26d   :  { %v852_v1 = vmul.f32 %v7146_v63, %v7146_v63 }
 0x26f   :  { %v868_v2 = vsel %vm659_vm2, %v852_v1, 0.0 }
 0x270   :  { %869 = vadd.xlane.f32.xlu2 %v868_v2 }
 0x2c3   :  { %v855_v59 = vpop.xlane.xlu0 %854 }
 0x2c4   :  { %v871_v23 = vmul.f32 %v855_v59, %v7013_v41 }
 0x2c6   :  { %v877_v28 = vadd.f32 1e-05, %v871_v23 }
 0x2c8   :  { %6351 = vrsqrt.f32 %v877_v28  ;;  %vm889_vm8 = vweird.f32 %v877_v28 }
 0x2cb   :  { %v861_v33 = vpop.xlane.xlu2 %860 }
 0x2cc   :  { %v873_v34 = vmul.f32 %v861_v33, %v7013_v41  ;;  %v858_v36 = vpop.xlane.xlu1 %857 }
 0x2cd   :  { %v872_v5 = vmul.f32 %v858_v36, %v7013_v41 }
 0x2ce   :  { %v6352_v38 = vpop.eup %6351  ;;  %v7202_v31 = vadd.f32 1e-05, %v873_v34 }
 0x2cf   :  { %v884_v37 = vmul.f32 %v6352_v38, %v877_v28  ;;  %v878_v39 = vadd.f32 1e-05, %v872_v5  ;;  %vm890_vm7 = vweird.f32 %v6352_v38 }
 0x2d0   :  { %6353 = vrsqrt.f32 %v7202_v31  ;;  %vm891_vm9 = vmor %vm889_vm8, %vm890_vm7  ;;  %vm909_vm1 = vweird.f32 %v7202_v31 }
 0x2d1   :  { %v885_v43 = vmul.f32 %v6352_v38, %v884_v37  ;;  %6355 = vrsqrt.f32 %v878_v39  ;;  %vm899_vm11 = vweird.f32 %v878_v39 }
 0x2d3   :  { %v886_v45 = vmul.f32 0.5, %v885_v43  ;;  %v864_v46 = vpop.xlane.xlu0 %863 }
 0x2d4   :  { %v874_v47 = vmul.f32 %v864_v46, %v7013_v41 }
 0x2d5   :  { %v887_v48 = vsub.f32 1.5, %v886_v45 }
 0x2d6   :  { %v7206_v49 = vpop.eup %6353  ;;  %v880_v53 = vadd.f32 1e-05, %v874_v47 }
 0x2d7   :  { %v6356_v54 = vpop.eup %6355  ;;  %v888_v55 = vmul.f32 %v6352_v38, %v887_v48  ;;  %v904_v56 = vmul.f32 %v7206_v49, %v7202_v31  ;;  %vm910_vm14 = vweird.f32 %v7206_v49 }
 0x2d8   :  { %v894_v58 = vmul.f32 %v6356_v54, %v878_v39  ;;  %6357 = vrsqrt.f32 %v880_v53  ;;  %vm900_vm10 = vweird.f32 %v6356_v54  ;;  %vm919_vm15 = vweird.f32 %v880_v53  ;;  %vm911_vm3 = vmor %vm909_vm1, %vm910_vm14 }
 0x2d9   :  { %v892_v62 = vsel %vm891_vm9, %v6352_v38, %v888_v55  ;;  %v905_v1 = vmul.f32 %v7206_v49, %v904_v56  ;;  %vm901_vm12 = vmor %vm899_vm11, %vm900_vm10  ;;  %vm1281_vm10 = vcmask 1043456   ;;  %vm1100_vm11 = vcmask 130048  }
 0x2da   :  { %v895_v60 = vmul.f32 %v6356_v54, %v894_v58  ;;  %v943_v8 = vmul.f32 %v892_v62, %v7111_v35  ;;  %vm2145_vm14 = vcmask 261120  }
 0x2db   :  { %v867_v61 = vpop.xlane.xlu1 %866  ;;  %v906_v10 = vmul.f32 0.5, %v905_v1 }
 0x2dc   :  { %v896_v2 = vmul.f32 0.5, %v895_v60  ;;  %v875_v3 = vmul.f32 %v867_v61, %v7013_v41  ;;  %v949_v19 = vmul.f32 %v943_v8, %v815_v12 }
 0x2dd   :  { %v907_v20 = vsub.f32 1.5, %v906_v10 }
 0x2de   :  { %v6358_v6 = vpop.eup %6357  ;;  %v897_v51 = vsub.f32 1.5, %v896_v2  ;;  %v7212_v52 = vadd.f32 1e-05, %v875_v3  ;;  %v955_v27 = vadd.f32 %v949_v19, %v816_v21 }
 0x2df   :  { %v914_v9 = vmul.f32 %v6358_v6, %v880_v53  ;;  %vm920_vm13 = vweird.f32 %v6358_v6  ;;  %v908_v28 = vmul.f32 %v7206_v49, %v907_v20 }
 0x2e0   :  { %v898_v11 = vmul.f32 %v6356_v54, %v897_v51  ;;  %6359 = vrsqrt.f32 %v7212_v52  ;;  %vm921_vm0 = vmor %vm919_vm15, %vm920_vm13  ;;  %vm929_vm8 = vweird.f32 %v7212_v52  ;;  %vm1185_vm13 = vcmask 195584  }
 0x2e1   :  { %v915_v13 = vmul.f32 %v6358_v6, %v914_v9  ;;  %v912_v33 = vsel %vm911_vm3, %v7206_v49, %v908_v28  ;;  %vm2152_vm15 = vcmask 392192  }
 0x2e2   :  { %v902_v14 = vsel %vm901_vm12, %v6356_v54, %v898_v11  ;;  %v945_v37 = vmul.f32 %v912_v33, %v7119_v40 }
 0x2e3   :  { %v944_v15 = vmul.f32 %v902_v14, %v7122_v42  ;;  %v916_v17 = vmul.f32 0.5, %v915_v13  ;;  %v870_v18 = vpop.xlane.xlu2 %869 }
 0x2e4   :  { %v876_v35 = vmul.f32 %v870_v18, %v7013_v41  ;;  %v951_v31 = vmul.f32 %v945_v37, %v815_v12 }
 0x2e5   :  { %v917_v59 = vsub.f32 1.5, %v916_v17  ;;  %v950_v22 = vmul.f32 %v944_v15, %v815_v12 }
 0x2e6   :  { %v6360_v23 = vpop.eup %6359  ;;  %v882_v24 = vadd.f32 1e-05, %v876_v35  ;;  %v957_v55 = vadd.f32 %v951_v31, %v816_v21 }
 0x2e7   :  { %v918_v26 = vmul.f32 %v6358_v6, %v917_v59  ;;  %v956_v42 = vadd.f32 %v950_v22, %v816_v21  ;;  %v924_v29 = vmul.f32 %v6360_v23, %v7212_v52  ;;  %vm930_vm5 = vweird.f32 %v6360_v23 }
 0x2e8   :  { %6361 = vrsqrt.f32 %v882_v24  ;;  %vm939_vm6 = vweird.f32 %v882_v24  ;;  %vm931_vm9 = vmor %vm929_vm8, %vm930_vm5 }
 0x2e9   :  { %v961_v0 = vpack.c.bf16 %v956_v42, %v955_v27  ;;  %v922_v32 = vsel %vm921_vm0, %v6358_v6, %v918_v26  ;;  %v925_v34 = vmul.f32 %v6360_v23, %v924_v29  ;;  %v5586_v6 = vld [vmem:[%s9259_s3 + $0x30] ss:$8 sm:$0x3] }
 0x2ea   :  { %v946_v36 = vmul.f32 %v922_v32, %v7132_v50  ;;  %v975_v8 = vperm.slane %v5586_v6, 0  ;;  %v976_v15 = vperm.slane %v5586_v6, 1 }
 0x2eb   :  { %5619 = vmatmul.msk.bf16.vlgmr.msrb.gmra.mxu2 %vm659_vm2, %v961_v0  ;;  %5622 = vmatmul.msk.bf16.vlgmr.msrb.gmra.mxu3 %vm659_vm2, %v961_v0  ;;  %v926_v39 = vmul.f32 0.5, %v925_v34 }
 0x2ec   :  { %v952_v45 = vmul.f32 %v946_v36, %v815_v12 }
 0x2ed   :  { %v927_v47 = vsub.f32 1.5, %v926_v39 }
 0x2ee   :  { %v6362_v5 = vpop.eup %6361  ;;  %v958_v53 = vadd.f32 %v952_v45, %v816_v21 }
 0x2ef   :  { %v934_v38 = vmul.f32 %v6362_v5, %v882_v24  ;;  %vm940_vm4 = vweird.f32 %v6362_v5  ;;  %v928_v56 = vmul.f32 %v6360_v23, %v927_v47 }
 0x2f0   :  { %vm941_vm7 = vmor %vm939_vm6, %vm940_vm4  ;;  %v962_v50 = vpack.c.bf16 %v958_v53, %v957_v55 }
 0x2f1   :  { %v935_v43 = vmul.f32 %v6362_v5, %v934_v38  ;;  %v932_v40 = vsel %vm931_vm9, %v6360_v23, %v928_v56 }
 0x2f2   :  { %v947_v60 = vmul.f32 %v932_v40, %v7139_v57 }
 0x2f3   :  { %v936_v46 = vmul.f32 0.5, %v935_v43 }
 0x2f4   :  { %v953_v62 = vmul.f32 %v947_v60, %v815_v12 }
 0x2f5   :  { %v937_v48 = vsub.f32 1.5, %v936_v46 }
 0x2f6   :  { %v959_v2 = vadd.f32 %v953_v62, %v816_v21 }
 0x2f7   :  { %v938_v54 = vmul.f32 %v6362_v5, %v937_v48 }
 0x2f9   :  { %v942_v49 = vsel %vm941_vm7, %v6362_v5, %v938_v54 }
 0x2fa   :  { %v948_v58 = vmul.f32 %v942_v49, %v7146_v63 }
 0x2fb   :  { %5620 = vmatmul.msk.bf16.gmra.mxu2 %vm659_vm2, %v962_v50  ;;  %5623 = vmatmul.msk.bf16.gmra.mxu3 %vm659_vm2, %v962_v50 }
 0x2fc   :  { %v954_v61 = vmul.f32 %v948_v58, %v815_v12 }
 0x2fe   :  { %v960_v1 = vadd.f32 %v954_v61, %v816_v21 }
 0x300   :  { %v963_v3 = vpack.c.bf16 %v960_v1, %v959_v2 }
 0x30b   :  { %5621 = vmatmul.msk.bf16.gmra.mxu2 %vm659_vm2, %v963_v3  ;;  %5624 = vmatmul.msk.bf16.gmra.mxu3 %vm659_vm2, %v963_v3 }
 0x36e   :  { %v1037_v51 = vpop.f32.mrf.mxu2  ;;  %v1061_v52 = vpop.f32.mrf.mxu3 }
 0x36f   :  { %v1038_v9 = vadd.f32 %v1037_v51, %v975_v8  ;;  %v1062_v59 = vadd.f32 %v1061_v52, %v976_v15 }
 0x371   :  { %v1076_v57 = vpack.c.bf16 %v1038_v9, %v1038_v9  ;;  %v1082_v42 = vpack.c.bf16 %v1062_v59, %v1062_v59 }
 0x373   :  { %v1091_v13 = vunpack.c.l.b16 %v1076_v57  ;;  %v1269_v36 = vunpack.c.l.b16 %v1082_v42 }
 0x376   :  { %v1039_v63 = vpop.f32.mrf.mxu2  ;;  %v1063_v10 = vpop.f32.mrf.mxu3 }
 0x377   :  { %v1040_v11 = vadd.f32 %v1039_v63, %v975_v8  ;;  %v1064_v18 = vadd.f32 %v1063_v10, %v976_v15 }
 0x379   :  { %v1077_v12 = vpack.c.bf16 %v1040_v11, %v1040_v11  ;;  %v1083_v24 = vpack.c.bf16 %v1064_v18, %v1064_v18 }
 0x37b   :  { %v1092_v14 = vunpack.c.l.b16 %v1077_v12  ;;  %v1270_v0 = vunpack.c.l.b16 %v1083_v24 }
 0x37d   :  { %v7243_v17 = vpack.c.b16 %v1092_v14, %v1091_v13  ;;  %v7257_v5 = vpack.c.b16 %v1270_v0, %v1269_v36 }
 0x37e   :  { %v1042_v19 = vpop.f32.mrf.mxu2  ;;  %v1066_v20 = vpop.f32.mrf.mxu3 }
 0x37f   :  { %v1043_v35 = vadd.f32 %v1042_v19, %v975_v8  ;;  %v1067_v21 = vadd.f32 %v1066_v20, %v976_v15  ;;  %1096 = vrot.lane.b32.xlu1 %v7243_v17, %s6696_s17 }
 0x381   :  { %v1078_v22 = vpack.c.bf16 %v1043_v35, %v1043_v35  ;;  %v1084_v23 = vpack.c.bf16 %v1067_v21, %v1067_v21 }
 0x383   :  { %v1093_v26 = vunpack.c.l.b16 %v1078_v22  ;;  %v1271_v27 = vunpack.c.l.b16 %v1084_v23 }
 0x385   :  { %v7247_v28 = vpack.c.b16 %v1093_v26, %v1093_v26  ;;  %v7249_v29 = vpack.c.b16 %v1271_v27, %v1271_v27 }
 0x386   :  { %v1044_v32 = vpop.f32.mrf.mxu2  ;;  %v1068_v33 = vpop.f32.mrf.mxu3 }
 0x387   :  { %1351 = vrot.lane.b32.xlu1 %v7243_v17, %s6697_s18  ;;  %1098 = vrot.lane.b32.xlu0 %v7247_v28, %s6696_s17  ;;  %v1283_v34 = vsel %vm1281_vm10, %v7249_v29, 0  ;;  %v1045_v38 = vadd.f32 %v1044_v32, %v975_v8  ;;  %v1069_v49 = vadd.f32 %v1068_v33, %v976_v15 }
 0x388   :  { %1291 = vmatpush.bf16.msra.mxu2 %v1283_v34 }
 0x389   :  { %v1079_v43 = vpack.c.bf16 %v1045_v38, %v1045_v38  ;;  %v1085_v1 = vpack.c.bf16 %v1069_v49, %v1069_v49 }
 0x38b   :  { %v1134_v31 = vunpack.c.l.b16 %v1079_v43  ;;  %v1314_v52 = vunpack.c.l.b16 %v1085_v1 }
 0x38c   :  { %1292 = vmatpush.bf16.msra.mxu2 %v7257_v5 }
 0x38e   :  { %v1047_v37 = vpop.f32.mrf.mxu2  ;;  %v1071_v39 = vpop.f32.mrf.mxu3 }
 0x38f   :  { %v1048_v45 = vadd.f32 %v1047_v37, %v975_v8  ;;  %1349 = vrot.lane.b32.xlu1 %v7247_v28, %s6698_s2  ;;  %v1072_v53 = vadd.f32 %v1071_v39, %v976_v15 }
 0x391   :  { %v1080_v46 = vpack.c.bf16 %v1048_v45, %v1048_v45  ;;  %v1086_v60 = vpack.c.bf16 %v1072_v53, %v1072_v53 }
 0x393   :  { %v1135_v47 = vunpack.c.l.b16 %v1080_v46  ;;  %v1315_v6 = vunpack.c.l.b16 %v1086_v60 }
 0x395   :  { %v7262_v48 = vpack.c.b16 %v1135_v47, %v1134_v31 }
 0x396   :  { %v1049_v54 = vpop.f32.mrf.mxu2  ;;  %v1073_v55 = vpop.f32.mrf.mxu3 }
 0x397   :  { %v1050_v56 = vadd.f32 %v1049_v54, %v975_v8  ;;  %v1074_v50 = vadd.f32 %v1073_v55, %v976_v15  ;;  %1385 = vrot.lane.b32.xlu1 %v7262_v48, %s6698_s2  ;;  %1139 = vrot.lane.b32.xlu0 %v7262_v48, %s6696_s17  ;;  %v7280_v8 = vpack.c.b16 %v1315_v6, %v1314_v52 }
 0x399   :  { %v1081_v40 = vpack.c.bf16 %v1050_v56, %v1050_v56  ;;  %v1087_v58 = vpack.c.bf16 %v1074_v50, %v1074_v50 }
 0x39b   :  { %v1136_v61 = vunpack.c.l.b16 %v1081_v40  ;;  %v1316_v62 = vunpack.c.l.b16 %v1087_v58 }
 0x39d   :  { %v7268_v2 = vpack.c.b16 %v1136_v61, %v1136_v61  ;;  %v7270_v3 = vpack.c.b16 %v1316_v62, %v1316_v62 }
 0x39f   :  { %1141 = vrot.lane.b32.xlu2 %v7268_v2, %s6696_s17  ;;  %1387 = vrot.lane.b32.xlu1 %v7268_v2, %s6698_s2  ;;  %v1327_v51 = vsel %vm1281_vm10, %v7270_v3, 0 }
 0x3a0   :  { %1347 = vrot.lane.b32.xlu0 %v7243_v17, %s6698_s2  ;;  %1335 = vmatpush.bf16.msra.mxu3 %v1327_v51  ;;  %v811_v51 = vlaneseq }
 0x3a2   :  { %v812_v52 = vand.u32 127, %v811_v51 }
 0x3a4   :  { %1336 = vmatpush.bf16.msra.mxu3 %v7280_v8  ;;  %vm813_vm12 = vcmp.lt.s32.totalorder %v812_v52, 17 }
 0x3a7   :  { %1629 = vrot.lane.b32.xlu1 %v7262_v48, %s6699_s19  ;;  %1353 = vrot.lane.b32.xlu2 %v7247_v28, %s6697_s18 }
 0x3a8   :  { %1389 = vrot.lane.b32.xlu0 %v7262_v48, %s6697_s18 }
 0x3af   :  { %1831 = vrot.lane.b32.xlu1 %v7243_v17, %s6700_s1  ;;  %1391 = vrot.lane.b32.xlu2 %v7268_v2, %s6697_s18 }
 0x3b0   :  { %1591 = vrot.lane.b32.xlu0 %v7243_v17, %s6699_s19 }
 0x3b7   :  { %1871 = vrot.lane.b32.xlu1 %v7268_v2, %s6700_s1  ;;  %1593 = vrot.lane.b32.xlu2 %v7247_v28, %s6699_s19 }
 0x3b8   :  { %1631 = vrot.lane.b32.xlu0 %v7268_v2, %s6699_s19 }
 0x3bf   :  { %1829 = vrot.lane.b32.xlu1 %v7247_v28, %s6701_s20  ;;  %1587 = vrot.lane.b32.xlu2 %v7243_v17, %s6702_s21 }
 0x3c0   :  { %1833 = vrot.lane.b32.xlu0 %v7247_v28, %s6700_s1 }
 0x3c7   :  { %1517 = vrot.lane.b32.xlu1 %v7249_v29, %s6698_s2  ;;  %1589 = vrot.lane.b32.xlu2 %v7247_v28, %s6702_s21 }
 0x3c8   :  { %1827 = vrot.lane.b32.xlu0 %v7243_v17, %s6701_s20 }
 0x3cf   :  { %1555 = vrot.lane.b32.xlu1 %v7280_v8, %s6698_s2  ;;  %1625 = vrot.lane.b32.xlu2 %v7262_v48, %s6702_s21 }
 0x3d0   :  { %1869 = vrot.lane.b32.xlu0 %v7262_v48, %s6700_s1 }
 0x3d7   :  { %1797 = vrot.lane.b32.xlu1 %v7270_v3, %s6702_s21  ;;  %1627 = vrot.lane.b32.xlu2 %v7268_v2, %s6702_s21 }
 0x3d8   :  { %1515 = vrot.lane.b32.xlu0 %v7257_v5, %s6698_s2 }
 0x3df   :  { %1865 = vrot.lane.b32.xlu2 %v7262_v48, %s6701_s20 }
 0x3e0   :  { %1755 = vrot.lane.b32.xlu0 %v7257_v5, %s6702_s21 }
 0x3e7   :  { %1757 = vrot.lane.b32.xlu2 %v7249_v29, %s6702_s21 }
 0x3e8   :  { %1867 = vrot.lane.b32.xlu0 %v7268_v2, %s6701_s20 }
 0x3f0   :  { %1557 = vrot.lane.b32.xlu0 %v7270_v3, %s6698_s2 }
 0x3f1   :  { %v1097_v9 = vpop.permute.xlu1 %1096 }
 0x3f2   :  { %v1108_v18 = vsel %vm1100_vm11, %v1097_v9, 0 }
 0x3f9   :  { %v1352_v63 = vpop.permute.xlu1 %1351  ;;  %v1142_v10 = vpop.permute.xlu2 %1141 }
 0x3fa   :  { %v1153_v57 = vsel %vm1100_vm11, %v1142_v10, 0  ;;  %v1099_v11 = vpop.permute.xlu0 %1098  ;;  %v1362_v22 = vsel %vm1100_vm11, %v1352_v63, 0  ;;  %v6703_v63 = vmov -1e+30  }
 0x3fb   :  { %v1111_v12 = vsel %vm1100_vm11, %v1099_v11, 0  ;;  %1161 = vmatpush.bf16.xpose.msra.mxu1 %v1153_v57  ;;  %v7375_v10 = vsel %vm813_vm12, 0.0, %v6703_v63 }
 0x3fc   :  { %1119 = vmatpush.bf16.xpose.msra.mxu0 %v1111_v12 }
 0x401   :  { %v1350_v13 = vpop.permute.xlu1 %1349  ;;  %v1354_v14 = vpop.permute.xlu2 %1353 }
 0x402   :  { %v1365_v15 = vsel %vm1100_vm11, %v1354_v14, 0 }
 0x404   :  { %1120 = vmatpush.bf16.xpose.msra.mxu0 %v1108_v18 }
 0x409   :  { %v1386_v19 = vpop.permute.xlu1 %1385  ;;  %v1392_v20 = vpop.permute.xlu2 %1391 }
 0x40a   :  { %v1403_v35 = vsel %vm1100_vm11, %v1392_v20, 0  ;;  %v1140_v21 = vpop.permute.xlu0 %1139 }
 0x40b   :  { %5625 = vmatmul.msk.bf16.vlgmr.msra.gmra.mxu0 %vm1100_vm11, %v7243_v17  ;;  %v1150_v59 = vsel %vm1100_vm11, %v1140_v21, 0 }
 0x40c   :  { %1373 = vmatpush.bf16.xpose.msrb.mxu0 %v1365_v15  ;;  %1162 = vmatpush.bf16.xpose.msra.mxu1 %v1150_v59 }
 0x411   :  { %v1388_v23 = vpop.permute.xlu1 %1387  ;;  %v1594_v24 = vpop.permute.xlu2 %1593 }
 0x412   :  { %v1605_v26 = vsel %vm1100_vm11, %v1594_v24, 0  ;;  %v1348_v27 = vpop.permute.xlu0 %1347 }
 0x413   :  { %5627 = vmatmul.msk.bf16.vlgmr.msra.gmra.mxu1 %vm1100_vm11, %v7262_v48 }
 0x414   :  { %1374 = vmatpush.bf16.xpose.msrb.mxu0 %v1362_v22  ;;  %1411 = vmatpush.bf16.xpose.msrb.mxu1 %v1403_v35 }
 0x419   :  { %v1630_v42 = vpop.permute.xlu1 %1629  ;;  %v1588_v54 = vpop.permute.xlu2 %1587 }
 0x41a   :  { %v1390_v0 = vpop.permute.xlu0 %1389  ;;  %v1640_v45 = vsel %vm1100_vm11, %v1630_v42, 0 }
 0x41b   :  { %5626 = vmatmul.msk.bf16.gmra.mxu0 %vm1100_vm11, %v7247_v28  ;;  %v1400_v17 = vsel %vm1100_vm11, %v1390_v0, 0 }
 0x41c   :  { %1613 = vmatpush.bf16.xpose.msra.mxu0 %v1605_v26  ;;  %1412 = vmatpush.bf16.xpose.msrb.mxu1 %v1400_v17 }
 0x421   :  { %v1832_v32 = vpop.permute.xlu1 %1831  ;;  %v1590_v50 = vpop.permute.xlu2 %1589 }
 0x422   :  { %v1592_v33 = vpop.permute.xlu0 %1591  ;;  %v1842_v53 = vsel %vm1100_vm11, %v1832_v32, 0 }
 0x423   :  { %5628 = vmatmul.msk.bf16.gmra.mxu1 %vm1100_vm11, %v7268_v2  ;;  %v1602_v34 = vsel %vm1100_vm11, %v1592_v33, 0 }
 0x424   :  { %1614 = vmatpush.bf16.xpose.msra.mxu0 %v1602_v34 }
 0x429   :  { %v1872_v36 = vpop.permute.xlu1 %1871  ;;  %v1626_v40 = vpop.permute.xlu2 %1625 }
 0x42a   :  { %v1632_v38 = vpop.permute.xlu0 %1631  ;;  %v1883_v46 = vsel %vm1100_vm11, %v1872_v36, 0 }
 0x42b   :  { %v1643_v37 = vsel %vm1100_vm11, %v1632_v38, 0  ;;  %5633 = vmatmul.msk.bf16.vlgmr.msrb.gmra.mxu0 %vm1100_vm11, %v1348_v27 }
 0x42c   :  { %1651 = vmatpush.bf16.xpose.msra.mxu1 %v1643_v37 }
 0x431   :  { %v1830_v39 = vpop.permute.xlu1 %1829  ;;  %v1628_v61 = vpop.permute.xlu2 %1627 }
 0x432   :  { %v1834_v28 = vpop.permute.xlu0 %1833 }
 0x433   :  { %v1845_v43 = vsel %vm1100_vm11, %v1834_v28, 0  ;;  %5635 = vmatmul.msk.bf16.vlgmr.msrb.gmra.mxu1 %vm1100_vm11, %v1386_v19 }
 0x434   :  { %1652 = vmatpush.bf16.xpose.msra.mxu1 %v1640_v45  ;;  %1853 = vmatpush.bf16.xpose.msrb.mxu0 %v1845_v43 }
 0x439   :  { %v1518_v31 = vpop.permute.xlu1 %1517  ;;  %v1866_v6 = vpop.permute.xlu2 %1865 }
 0x43a   :  { %v1527_v47 = vsel %vm1281_vm10, %v1518_v31, 0  ;;  %v1828_v48 = vpop.permute.xlu0 %1827 }
 0x43b   :  { %5634 = vmatmul.msk.bf16.gmra.mxu0 %vm1100_vm11, %v1350_v13  ;;  %1535 = vmatpush.bf16.msrb.mxu2 %v1527_v47 }
 0x43c   :  { %1891 = vmatpush.bf16.xpose.msrb.mxu1 %v1883_v46  ;;  %1854 = vmatpush.bf16.xpose.msrb.mxu0 %v1842_v53 }
 0x441   :  { %v1556_v2 = vpop.permute.xlu1 %1555 }
 0x442   :  { %v1870_v55 = vpop.permute.xlu0 %1869 }
 0x443   :  { %5636 = vmatmul.msk.bf16.gmra.mxu1 %vm1100_vm11, %v1388_v23  ;;  %v1880_v56 = vsel %vm1100_vm11, %v1870_v55, 0 }
 0x444   :  { %1892 = vmatpush.bf16.xpose.msrb.mxu1 %v1880_v56 }
 0x44a   :  { %v1516_v49 = vpop.permute.xlu0 %1515 }
 0x44b   :  { %1536 = vmatpush.bf16.msrb.mxu2 %v1516_v49  ;;  %5641 = vmatmul.msk.bf16.vlgmr.msra.gmra.mxu0 %vm1100_vm11, %v1588_v54 }
 0x452   :  { %v7365_v58 = vpop.permute.xlu0 %1755 }
 0x453   :  { %5643 = vmatmul.msk.bf16.vlgmr.msra.gmra.mxu1 %vm1100_vm11, %v1626_v40 }
 0x45a   :  { %v1868_v60 = vpop.permute.xlu0 %1867 }
 0x45b   :  { %5642 = vmatmul.msk.bf16.gmra.mxu0 %vm1100_vm11, %v1590_v50 }
 0x462   :  { %v1558_v62 = vpop.permute.xlu0 %1557 }
 0x463   :  { %v1567_v1 = vsel %vm1281_vm10, %v1558_v62, 0  ;;  %5644 = vmatmul.msk.bf16.gmra.mxu1 %vm1100_vm11, %v1628_v61 }
 0x464   :  { %1575 = vmatpush.bf16.msrb.mxu3 %v1567_v1 }
 0x468   :  { %1576 = vmatpush.bf16.msrb.mxu3 %v1556_v2 }
 0x46b   :  { %5649 = vmatmul.msk.bf16.vlgmr.msrb.gmra.mxu0 %vm1100_vm11, %v1828_v48 }
 0x473   :  { %5651 = vmatmul.msk.bf16.vlgmr.msrb.gmra.mxu1 %vm1100_vm11, %v1866_v6 }
 0x47b   :  { %5650 = vmatmul.msk.bf16.gmra.mxu0 %vm1100_vm11, %v1830_v39 }
 0x483   :  { %5652 = vmatmul.msk.bf16.gmra.mxu1 %vm1100_vm11, %v1868_v60 }
 0x488   :  { %v1122_v9 = vpop.f32.mrf.mxu0 }
 0x489   :  { %v1173_v57 = vmul.f32 0.25, %v1122_v9 }
 0x48b   :  { %v7378_v11 = vadd.f32 %v1173_v57, %v7375_v10 }
 0x48d   :  { %v1186_v12 = vsel %vm1185_vm13, %v7378_v11, -inf }
 0x48e   :  { %1187 = vmax.xlane.f32.xlu2 %v1186_v12 }
 0x490   :  { %v1124_v13 = vpop.f32.mrf.mxu0  ;;  %v1164_v14 = vpop.f32.mrf.mxu1 }
 0x491   :  { %v1174_v15 = vmul.f32 0.25, %v1124_v13  ;;  %v1176_v18 = vmul.f32 0.25, %v1164_v14 }
 0x493   :  { %v7383_v19 = vadd.f32 %v1174_v15, %v7375_v10  ;;  %v7386_v20 = vadd.f32 %v1176_v18, %v7375_v10 }
 0x495   :  { %v1189_v35 = vsel %vm1185_vm13, %v7383_v19, -inf  ;;  %v1195_v21 = vsel %vm1185_vm13, %v7386_v20, -inf }
 0x496   :  { %1190 = vmax.xlane.f32.xlu1 %v1189_v35  ;;  %1196 = vmax.xlane.f32.xlu2 %v1195_v21 }
 0x498   :  { %v1127_v59 = vpop.f32.mrf.mxu0  ;;  %v1166_v22 = vpop.f32.mrf.mxu1 }
 0x499   :  { %v1175_v23 = vmul.f32 0.25, %v1127_v59  ;;  %v1177_v24 = vmul.f32 0.25, %v1166_v22 }
 0x49b   :  { %v7393_v26 = vadd.f32 %v1175_v23, %v7375_v10  ;;  %v7396_v27 = vadd.f32 %v1177_v24, %v7375_v10 }
 0x49d   :  { %v1192_v42 = vsel %vm1185_vm13, %v7393_v26, -inf  ;;  %v1198_v0 = vsel %vm1185_vm13, %v7396_v27, -inf }
 0x49e   :  { %1193 = vmax.xlane.f32.xlu0 %v1192_v42  ;;  %1199 = vmax.xlane.f32.xlu1 %v1198_v0 }
 0x4a0   :  { %v1129_v17 = vpop.f32.mrf.mxu0  ;;  %v1169_v32 = vpop.f32.mrf.mxu1 }
 0x4a1   :  { %v1178_v33 = vmul.f32 0.25, %v1169_v32 }
 0x4a3   :  { %v7403_v34 = vadd.f32 %v1178_v33, %v7375_v10 }
 0x4a5   :  { %v1201_v36 = vsel %vm1185_vm13, %v7403_v34, -inf }
 0x4a6   :  { %1202 = vmax.xlane.f32.xlu1 %v1201_v36 }
 0x4a8   :  { %v1171_v38 = vpop.f32.mrf.mxu1  ;;  %v1376_v37 = vpop.f32.mrf.mxu0 }
 0x4a9   :  { %v1423_v39 = vmul.f32 0.25, %v1376_v37 }
 0x4ab   :  { %v7408_v28 = vadd.f32 %v1423_v39, %v7375_v10 }
 0x4ad   :  { %v1435_v43 = vsel %vm1185_vm13, %v7408_v28, -inf }
 0x4ae   :  { %1436 = vmax.xlane.f32.xlu0 %v1435_v43 }
 0x4b0   :  { %v1378_v45 = vpop.f32.mrf.mxu0  ;;  %v1414_v46 = vpop.f32.mrf.mxu1 }
 0x4b1   :  { %v1424_v31 = vmul.f32 0.25, %v1378_v45  ;;  %v1426_v40 = vmul.f32 0.25, %v1414_v46 }
 0x4b3   :  { %v7413_v47 = vadd.f32 %v1424_v31, %v7375_v10  ;;  %v7428_v2 = vadd.f32 %v1426_v40, %v7375_v10 }
 0x4b5   :  { %v1438_v48 = vsel %vm1185_vm13, %v7413_v47, -inf  ;;  %v1444_v6 = vsel %vm1185_vm13, %v7428_v2, -inf }
 0x4b6   :  { %1439 = vmax.xlane.f32.xlu2 %v1438_v48 }
 0x4b8   :  { %v1381_v53 = vpop.f32.mrf.mxu0  ;;  %v1416_v54 = vpop.f32.mrf.mxu1 }
 0x4b9   :  { %v1425_v55 = vmul.f32 0.25, %v1381_v53  ;;  %v1427_v56 = vmul.f32 0.25, %v1416_v54 }
 0x4bb   :  { %v7418_v50 = vadd.f32 %v1425_v55, %v7375_v10  ;;  %v7421_v49 = vadd.f32 %v1427_v56, %v7375_v10 }
 0x4bd   :  { %v1441_v60 = vsel %vm1185_vm13, %v7418_v50, -inf  ;;  %v1447_v61 = vsel %vm1185_vm13, %v7421_v49, -inf }
 0x4be   :  { %1442 = vmax.xlane.f32.xlu0 %v1441_v60  ;;  %1448 = vmax.xlane.f32.xlu2 %v1447_v61 }
 0x4c0   :  { %v1383_v62 = vpop.f32.mrf.mxu0  ;;  %v1419_v1 = vpop.f32.mrf.mxu1 }
 0x4c1   :  { %v1428_v57 = vmul.f32 0.25, %v1419_v1 }
 0x4c3   :  { %v7438_v18 = vadd.f32 %v1428_v57, %v7375_v10 }
 0x4c5   :  { %v1450_v21 = vsel %vm1185_vm13, %v7438_v18, -inf }
 0x4c6   :  { %1445 = vmax.xlane.f32.xlu0 %v1444_v6  ;;  %v7472_v6 = vpop.permute.xlu2 %1757 }
 0x4c8   :  { %v1421_v51 = vpop.f32.mrf.mxu1  ;;  %v1616_v52 = vpop.f32.mrf.mxu0 }
 0x4c9   :  { %v1663_v9 = vmul.f32 0.25, %v1616_v52 }
 0x4cb   :  { %v7433_v63 = vadd.f32 %v1663_v9, %v7375_v10 }
 0x4cd   :  { %v1675_v12 = vsel %vm1185_vm13, %v7433_v63, -inf }
 0x4ce   :  { %1676 = vmax.xlane.f32.xlu1 %v1675_v12 }
 0x4d0   :  { %v1618_v13 = vpop.f32.mrf.mxu0  ;;  %v1654_v14 = vpop.f32.mrf.mxu1 }
 0x4d1   :  { %v1664_v15 = vmul.f32 0.25, %v1618_v13  ;;  %v1666_v32 = vmul.f32 0.25, %v1654_v14  ;;  %v7479_v13 = vpop.permute.xlu1 %1797 }
 0x4d3   :  { %v7441_v35 = vadd.f32 %v1664_v15, %v7375_v10  ;;  %v7458_v39 = vadd.f32 %v1666_v32, %v7375_v10 }
 0x4d5   :  { %v1678_v59 = vsel %vm1185_vm13, %v7441_v35, -inf  ;;  %v1684_v43 = vsel %vm1185_vm13, %v7458_v39, -inf }
 0x4d6   :  { %1451 = vmax.xlane.f32.xlu1 %v1450_v21  ;;  %1679 = vmax.xlane.f32.xlu0 %v1678_v59 }
 0x4d8   :  { %v1621_v22 = vpop.f32.mrf.mxu0  ;;  %v1656_v23 = vpop.f32.mrf.mxu1 }
 0x4d9   :  { %v1665_v24 = vmul.f32 0.25, %v1621_v22  ;;  %v1667_v42 = vmul.f32 0.25, %v1656_v23 }
 0x4db   :  { %v7448_v0 = vadd.f32 %v1665_v24, %v7375_v10  ;;  %v7451_v17 = vadd.f32 %v1667_v42, %v7375_v10 }
 0x4dd   :  { %v1681_v33 = vsel %vm1185_vm13, %v7448_v0, -inf  ;;  %v1687_v36 = vsel %vm1185_vm13, %v7451_v17, -inf }
 0x4de   :  { %1682 = vmax.xlane.f32.xlu1 %v1681_v33  ;;  %1688 = vmax.xlane.f32.xlu0 %v1687_v36 }
 0x4e0   :  { %v1623_v38 = vpop.f32.mrf.mxu0  ;;  %v1659_v37 = vpop.f32.mrf.mxu1 }
 0x4e1   :  { %v1668_v60 = vmul.f32 0.25, %v1659_v37 }
 0x4e3   :  { %v7475_v51 = vadd.f32 %v1668_v60, %v7375_v10 }
 0x4e5   :  { %v1690_v9 = vsel %vm1185_vm13, %v7475_v51, -inf }
 0x4e6   :  { %1685 = vmax.xlane.f32.xlu1 %v1684_v43 }
 0x4e8   :  { %v1661_v45 = vpop.f32.mrf.mxu1  ;;  %v1856_v46 = vpop.f32.mrf.mxu0 }
 0x4e9   :  { %v1903_v31 = vmul.f32 0.25, %v1856_v46 }
 0x4eb   :  { %v7463_v48 = vadd.f32 %v1903_v31, %v7375_v10 }
 0x4ed   :  { %v1915_v53 = vsel %vm1185_vm13, %v7463_v48, -inf }
 0x4ee   :  { %1916 = vmax.xlane.f32.xlu0 %v1915_v53 }
 0x4f0   :  { %v1858_v54 = vpop.f32.mrf.mxu0  ;;  %v1894_v55 = vpop.f32.mrf.mxu1 }
 0x4f1   :  { %v1904_v56 = vmul.f32 0.25, %v1858_v54  ;;  %v1906_v23 = vmul.f32 0.25, %v1894_v55 }
 0x4f3   :  { %v7468_v40 = vadd.f32 %v1904_v56, %v7375_v10  ;;  %v7493_v37 = vadd.f32 %v1906_v23, %v7375_v10 }
 0x4f5   :  { %v1918_v61 = vsel %vm1185_vm13, %v7468_v40, -inf  ;;  %v1924_v31 = vsel %vm1185_vm13, %v7493_v37, -inf }
 0x4f6   :  { %1919 = vmax.xlane.f32.xlu2 %v1918_v61 }
 0x4f8   :  { %v1861_v62 = vpop.f32.mrf.mxu0  ;;  %v1896_v1 = vpop.f32.mrf.mxu1 }
 0x4f9   :  { %v1905_v52 = vmul.f32 0.25, %v1861_v62 }
 0x4fb   :  { %v7482_v21 = vadd.f32 %v1905_v52, %v7375_v10 }
 0x4fd   :  { %v1921_v24 = vsel %vm1185_vm13, %v7482_v21, -inf }
 0x4fe   :  { %1691 = vmax.xlane.f32.xlu2 %v1690_v9 }
 0x500   :  { %v1863_v57 = vpop.f32.mrf.mxu0  ;;  %v1899_v12 = vpop.f32.mrf.mxu1 }
 0x501   :  { %v1908_v14 = vmul.f32 0.25, %v1899_v12  ;;  %v1188_v15 = vpop.xlane.xlu2 %1187 }
 0x502   :  { %v1204_v22 = vsub.f32 %v7378_v11, %v1188_v15 }
 0x503   :  { %v7485_v59 = vadd.f32 %v1908_v14, %v7375_v10 }
 0x504   :  { %v1210_v32 = vmul.f32 1.442695, %v1204_v22 }
 0x505   :  { %v1930_v42 = vsel %vm1185_vm13, %v7485_v59, -inf }
 0x506   :  { %1922 = vmax.xlane.f32.xlu2 %v1921_v24  ;;  %1931 = vmax.xlane.f32.xlu0 %v1930_v42  ;;  %6363 = vpow2.f32 %v1210_v32 }
 0x508   :  { %v1901_v33 = vpop.f32.mrf.mxu1 }
 0x509   :  { %v1191_v36 = vpop.xlane.xlu1 %1190  ;;  %v1197_v38 = vpop.xlane.xlu2 %1196 }
 0x50a   :  { %v1205_v43 = vsub.f32 %v7383_v19, %v1191_v36  ;;  %v1207_v11 = vsub.f32 %v7386_v20, %v1197_v38  ;;  %v1907_v19 = vmul.f32 0.25, %v1896_v1 }
 0x50c   :  { %v1212_v45 = vmul.f32 1.442695, %v1205_v43  ;;  %v1216_v46 = vmul.f32 1.442695, %v1207_v11  ;;  %v7499_v54 = vpop.eup %6363  ;;  %v7513_v57 = vadd.f32 %v1907_v19, %v7375_v10 }
 0x50d   :  { %v1222_v61 = vsel %vm1185_vm13, %v7499_v54, 0.0 }
 0x50e   :  { %6365 = vpow2.f32 %v1212_v45  ;;  %1925 = vmax.xlane.f32.xlu2 %v1924_v31  ;;  %v1927_v1 = vsel %vm1185_vm13, %v7513_v57, -inf }
 0x50f   :  { %6367 = vpow2.f32 %v1216_v46 }
 0x511   :  { %v1194_v53 = vpop.xlane.xlu0 %1193  ;;  %v1200_v9 = vpop.xlane.xlu1 %1199 }
 0x512   :  { %v1206_v56 = vsub.f32 %v7393_v26, %v1194_v53  ;;  %v1208_v26 = vsub.f32 %v7396_v27, %v1200_v9 }
 0x514   :  { %v7501_v55 = vpop.eup %6365  ;;  %v1214_v52 = vmul.f32 1.442695, %v1206_v56  ;;  %v1218_v12 = vmul.f32 1.442695, %v1208_v26 }
 0x515   :  { %v7504_v60 = vpop.eup %6367  ;;  %v1225_v20 = vsel %vm1185_vm13, %v7501_v55, 0.0 }
 0x516   :  { %1226 = vadd.xlane.f32.xlu1 %v1225_v20  ;;  %1223 = vadd.xlane.f32.xlu2 %v1222_v61  ;;  %v1231_v62 = vsel %vm1185_vm13, %v7504_v60, 0.0  ;;  %6369 = vpow2.f32 %v1214_v52 }
 0x517   :  { %1232 = vadd.xlane.f32.xlu0 %v1231_v62  ;;  %6371 = vpow2.f32 %v1218_v12 }
 0x519   :  { %v1203_v42 = vpop.xlane.xlu1 %1202 }
 0x51a   :  { %v1209_v38 = vsub.f32 %v7403_v34, %v1203_v42 }
 0x51c   :  { %v7518_v15 = vpop.eup %6369  ;;  %v1220_v45 = vmul.f32 1.442695, %v1209_v38 }
 0x51d   :  { %v1228_v24 = vsel %vm1185_vm13, %v7518_v15, 0.0  ;;  %v7523_v32 = vpop.eup %6371 }
 0x51e   :  { %1928 = vmax.xlane.f32.xlu2 %v1927_v1 }
 0x521   :  { %v1437_v14 = vpop.xlane.xlu0 %1436 }
 0x522   :  { %v1453_v22 = vsub.f32 %v7408_v28, %v1437_v14  ;;  %v1234_v28 = vsel %vm1185_vm13, %v7523_v32, 0.0 }
 0x524   :  { %v1459_v23 = vmul.f32 1.442695, %v1453_v22 }
 0x526   :  { %6373 = vpow2.f32 %v1459_v23  ;;  %1229 = vadd.xlane.f32.xlu2 %v1228_v24 }
 0x529   :  { %v1440_v27 = vpop.xlane.xlu2 %1439 }
 0x52a   :  { %v1454_v33 = vsub.f32 %v7413_v47, %v1440_v27 }
 0x52c   :  { %v7526_v36 = vpop.eup %6373  ;;  %v1461_v43 = vmul.f32 1.442695, %v1454_v33 }
 0x52d   :  { %v1471_v11 = vsel %vm1185_vm13, %v7526_v36, 0.0 }
 0x52e   :  { %6375 = vpow2.f32 %v1461_v43  ;;  %1235 = vadd.xlane.f32.xlu2 %v1234_v28  ;;  %1472 = vadd.xlane.f32.xlu0 %v1471_v11 }
 0x52f   :  { %6377 = vpow2.f32 %v1220_v45 }
 0x531   :  { %v1443_v46 = vpop.xlane.xlu0 %1442  ;;  %v1449_v56 = vpop.xlane.xlu2 %1448 }
 0x532   :  { %v1455_v47 = vsub.f32 %v7418_v50, %v1443_v46  ;;  %v1457_v62 = vsub.f32 %v7421_v49, %v1449_v56 }
 0x534   :  { %v7533_v31 = vpop.eup %6375  ;;  %v1463_v53 = vmul.f32 1.442695, %v1455_v47  ;;  %v1467_v50 = vmul.f32 1.442695, %v1457_v62 }
 0x535   :  { %v1474_v34 = vsel %vm1185_vm13, %v7533_v31, 0.0  ;;  %v7538_v20 = vpop.eup %6377 }
 0x536   :  { %1475 = vadd.xlane.f32.xlu2 %v1474_v34  ;;  %6379 = vpow2.f32 %v1463_v53  ;;  %v1237_v9 = vsel %vm1185_vm13, %v7538_v20, 0.0 }
 0x539   :  { %v1446_v19 = vpop.xlane.xlu0 %1445 }
 0x53a   :  { %v1456_v61 = vsub.f32 %v7428_v2, %v1446_v19 }
 0x53c   :  { %v1465_v52 = vmul.f32 1.442695, %v1456_v61  ;;  %v7544_v1 = vpop.eup %6379 }
 0x53d   :  { %v1477_v2 = vsel %vm1185_vm13, %v7544_v1, 0.0 }
 0x53e   :  { %6381 = vpow2.f32 %v1465_v52  ;;  %1238 = vadd.xlane.f32.xlu2 %v1237_v9 }
 0x53f   :  { %6383 = vpow2.f32 %v1467_v50 }
 0x541   :  { %v1677_v26 = vpop.xlane.xlu1 %1676 }
 0x542   :  { %v1693_v14 = vsub.f32 %v7433_v63, %v1677_v26 }
 0x544   :  { %v7546_v12 = vpop.eup %6381  ;;  %v1699_v22 = vmul.f32 1.442695, %v1693_v14 }
 0x545   :  { %v1480_v49 = vsel %vm1185_vm13, %v7546_v12, 0.0  ;;  %v7553_v42 = vpop.eup %6383 }
 0x546   :  { %1478 = vadd.xlane.f32.xlu2 %v1477_v2  ;;  %1481 = vadd.xlane.f32.xlu1 %v1480_v49  ;;  %6385 = vpow2.f32 %v1699_v22  ;;  %v1483_v63 = vsel %vm1185_vm13, %v7553_v42, 0.0 }
 0x549   :  { %v1452_v23 = vpop.xlane.xlu1 %1451  ;;  %v1680_v24 = vpop.xlane.xlu0 %1679 }
 0x54a   :  { %v1694_v27 = vsub.f32 %v7441_v35, %v1680_v24  ;;  %v1458_v33 = vsub.f32 %v7438_v18, %v1452_v23 }
 0x54c   :  { %v1701_v38 = vmul.f32 1.442695, %v1694_v27  ;;  %v1469_v43 = vmul.f32 1.442695, %v1458_v33  ;;  %v7559_v45 = vpop.eup %6385 }
 0x54d   :  { %v1711_v18 = vsel %vm1185_vm13, %v7559_v45, 0.0 }
 0x54e   :  { %1484 = vadd.xlane.f32.xlu2 %v1483_v63  ;;  %6387 = vpow2.f32 %v1701_v38 }
 0x54f   :  { %6389 = vpow2.f32 %v1469_v43 }
 0x551   :  { %v1683_v28 = vpop.xlane.xlu1 %1682  ;;  %v1689_v11 = vpop.xlane.xlu0 %1688 }
 0x552   :  { %v1695_v46 = vsub.f32 %v7448_v0, %v1683_v28  ;;  %v1697_v35 = vsub.f32 %v7451_v17, %v1689_v11 }
 0x554   :  { %v1703_v47 = vmul.f32 1.442695, %v1695_v46  ;;  %v7563_v34 = vpop.eup %6387  ;;  %v1707_v56 = vmul.f32 1.442695, %v1697_v35 }
 0x555   :  { %v1714_v53 = vsel %vm1185_vm13, %v7563_v34, 0.0  ;;  %v7569_v61 = vpop.eup %6389 }
 0x556   :  { %6391 = vpow2.f32 %v1703_v47  ;;  %1712 = vadd.xlane.f32.xlu2 %v1711_v18  ;;  %1715 = vadd.xlane.f32.xlu0 %v1714_v53  ;;  %v1486_v52 = vsel %vm1185_vm13, %v7569_v61, 0.0 }
 0x557   :  { %6393 = vpow2.f32 %v1707_v56 }
 0x559   :  { %v1686_v19 = vpop.xlane.xlu1 %1685 }
 0x55a   :  { %v1696_v0 = vsub.f32 %v7458_v39, %v1686_v19 }
 0x55c   :  { %v7572_v62 = vpop.eup %6391  ;;  %v1705_v17 = vmul.f32 1.442695, %v1696_v0 }
 0x55d   :  { %v1717_v9 = vsel %vm1185_vm13, %v7572_v62, 0.0  ;;  %v7578_v50 = vpop.eup %6393 }
 0x55e   :  { %6395 = vpow2.f32 %v1705_v17  ;;  %1487 = vadd.xlane.f32.xlu2 %v1486_v52  ;;  %1718 = vadd.xlane.f32.xlu1 %v1717_v9  ;;  %v1723_v14 = vsel %vm1185_vm13, %v7578_v50, 0.0 }
 0x561   :  { %v1917_v28 = vpop.xlane.xlu0 %1916 }
 0x564   :  { %v7580_v26 = vpop.eup %6395 }
 0x565   :  { %v1720_v39 = vsel %vm1185_vm13, %v7580_v26, 0.0 }
 0x566   :  { %1721 = vadd.xlane.f32.xlu2 %v1720_v39  ;;  %1724 = vadd.xlane.f32.xlu1 %v1723_v14 }
 0x569   :  { %v1920_v2 = vpop.xlane.xlu2 %1919 }
 0x56a   :  { %v1934_v49 = vsub.f32 %v7468_v40, %v1920_v2  ;;  %1795 = vrot.lane.b32.xlu0 %v7280_v8, %s6702_s21 }
 0x56c   :  { %v1941_v22 = vmul.f32 1.442695, %v1934_v49 }
 0x56e   :  { %6397 = vpow2.f32 %v1941_v22 }
 0x571   :  { %v1692_v23 = vpop.xlane.xlu2 %1691 }
 0x572   :  { %v1698_v24 = vsub.f32 %v7475_v51, %v1692_v23  ;;  %v1933_v51 = vsub.f32 %v7463_v48, %v1917_v28 }
 0x574   :  { %v7590_v27 = vpop.eup %6397  ;;  %v1709_v33 = vmul.f32 1.442695, %v1698_v24  ;;  %v1939_v46 = vmul.f32 1.442695, %v1933_v51 }
 0x575   :  { %v1954_v38 = vsel %vm1185_vm13, %v7590_v27, 0.0 }
 0x576   :  { %6399 = vpow2.f32 %v1709_v33  ;;  %1955 = vadd.xlane.f32.xlu2 %v1954_v38 }
 0x577   :  { %6401 = vpow2.f32 %v1939_v46 }
 0x579   :  { %v1923_v63 = vpop.xlane.xlu2 %1922  ;;  %v7604_v17 = vpop.xlane.xlu0 %1931 }
 0x57a   :  { %v1935_v18 = vsub.f32 %v7482_v21, %v1923_v63 }
 0x57c   :  { %v7594_v43 = vpop.eup %6399  ;;  %v1943_v56 = vmul.f32 1.442695, %v1935_v18 }
 0x57d   :  { %v1726_v40 = vsel %vm1185_vm13, %v7594_v43, 0.0  ;;  %v7602_v53 = vpop.eup %6401 }
 0x57e   :  { %1727 = vadd.xlane.f32.xlu2 %v1726_v40  ;;  %v1951_v14 = vsel %vm1185_vm13, %v7602_v53, 0.0 }
 0x57f   :  { %1995 = vrot.lane.b32.xlu1 %v7257_v5, %s6701_s20 }
 0x581   :  { %v1926_v11 = vpop.xlane.xlu2 %1925 }
 0x582   :  { %v1936_v49 = vsub.f32 %v7493_v37, %v1926_v11 }
 0x584   :  { %v1945_v33 = vmul.f32 1.442695, %v1936_v49 }
 0x589   :  { %v1227_v47 = vpop.xlane.xlu1 %1226  ;;  %v1224_v35 = vpop.xlane.xlu2 %1223 }
 0x58a   :  { %6403 = vrcp.f32 %v1227_v47 }
 0x58b   :  { %6405 = vrcp.f32 %v1224_v35 }
 0x58c   :  { %6407 = vpow2.f32 %v1943_v56 }
 0x590   :  { %v6404_v19 = vpop.eup %6403 }
 0x591   :  { %v6406_v0 = vpop.eup %6405  ;;  %v1247_v5 = vmul.f32 %v6404_v19, %v7501_v55  ;;  %v1929_v52 = vpop.xlane.xlu2 %1928 }
 0x592   :  { %v1246_v48 = vmul.f32 %v6406_v0, %v7499_v54  ;;  %v7613_v23 = vpop.eup %6407  ;;  %v1233_v55 = vpop.xlane.xlu0 %1232  ;;  %v1767_v54 = vsel %vm1281_vm10, %v7472_v6, 0 }
 0x593   :  { %v1253_v9 = vpack.c.bf16 %v1247_v5, %v1247_v5  ;;  %v1957_v38 = vsel %vm1185_vm13, %v7613_v23, 0.0 }
 0x594   :  { %v1252_v39 = vpack.c.bf16 %v1246_v48, %v1246_v48  ;;  %1952 = vadd.xlane.f32.xlu0 %v1951_v14  ;;  %v1937_v48 = vsub.f32 %v7513_v57, %v1929_v52 }
 0x595   :  { %v1262_v21 = vunpack.c.l.b16 %v1253_v9 }
 0x596   :  { %v1261_v2 = vunpack.c.l.b16 %v1252_v39  ;;  %1997 = vrot.lane.b32.xlu2 %v7249_v29, %s6701_s20 }
 0x598   :  { %v1264_v22 = vpack.c.b16 %v1262_v21, %v1261_v2  ;;  %v1807_v21 = vsel %vm1281_vm10, %v7479_v13, 0  ;;  %v1947_v2 = vmul.f32 1.442695, %v1937_v48 }
 0x599   :  { %v1230_v24 = vpop.xlane.xlu2 %1229 }
 0x59a   :  { %5629 = vmatmul.msk.bf16.vlgmr.msra.gmra.mxu2 %vm1185_vm13, %v1264_v22  ;;  %6409 = vrcp.f32 %v1230_v24 }
 0x59b   :  { %1775 = vmatpush.bf16.msra.mxu2 %v1767_v54  ;;  %6411 = vrcp.f32 %v1233_v55 }
 0x59c   :  { %1958 = vadd.xlane.f32.xlu0 %v1957_v38  ;;  %6413 = vpow2.f32 %v1945_v33 }
 0x59f   :  { %1776 = vmatpush.bf16.msra.mxu2 %v7365_v58 }
 0x5a0   :  { %v6410_v29 = vpop.eup %6409 }
 0x5a1   :  { %v1236_v37 = vpop.xlane.xlu2 %1235  ;;  %v1473_v63 = vpop.xlane.xlu0 %1472  ;;  %v1248_v40 = vmul.f32 %v6410_v29, %v7518_v15 }
 0x5a2   :  { %v6412_v28 = vpop.eup %6411  ;;  %6415 = vrcp.f32 %v1236_v37 }
 0x5a3   :  { %v1254_v6 = vpack.c.bf16 %v1248_v40, %v1248_v40  ;;  %6417 = vrcp.f32 %v1473_v63  ;;  %v7622_v51 = vpop.eup %6413  ;;  %v1249_v11 = vmul.f32 %v6412_v28, %v7504_v60 }
 0x5a4   :  { %v1960_v18 = vsel %vm1185_vm13, %v7622_v51, 0.0 }
 0x5a5   :  { %v1263_v46 = vunpack.c.l.b16 %v1254_v6  ;;  %v1255_v58 = vpack.c.bf16 %v1249_v11, %v1249_v11 }
 0x5a7   :  { %v1265_v47 = vpack.c.b16 %v1263_v46, %v1263_v46  ;;  %v1306_v5 = vunpack.c.l.b16 %v1255_v58 }
 0x5a8   :  { %v6416_v35 = vpop.eup %6415 }
 0x5a9   :  { %v1250_v56 = vmul.f32 %v6416_v35, %v7523_v32  ;;  %v1476_v19 = vpop.xlane.xlu2 %1475  ;;  %1961 = vadd.xlane.f32.xlu1 %v1960_v18  ;;  %v6418_v15 = vpop.eup %6417 }
 0x5aa   :  { %5630 = vmatmul.msk.bf16.gmra.mxu2 %vm1185_vm13, %v1265_v47  ;;  %6419 = vrcp.f32 %v1476_v19  ;;  %v1495_v9 = vmul.f32 %v6418_v15, %v7526_v36  ;;  %v1938_v36 = vsub.f32 %v7485_v59, %v7604_v17 }
 0x5ab   :  { %v1256_v0 = vpack.c.bf16 %v1250_v56, %v1250_v56 }
 0x5ac   :  { %v1501_v32 = vpack.c.bf16 %v1495_v9, %v1495_v9  ;;  %v1949_v54 = vmul.f32 1.442695, %v1938_v36 }
 0x5ad   :  { %v1307_v60 = vunpack.c.l.b16 %v1256_v0 }
 0x5ae   :  { %v1510_v52 = vunpack.c.l.b16 %v1501_v32 }
 0x5af   :  { %v1309_v39 = vpack.c.b16 %v1307_v60, %v1306_v5 }
 0x5b0   :  { %v6420_v14 = vpop.eup %6419  ;;  %2037 = vrot.lane.b32.xlu0 %v7270_v3, %s6701_s20 }
 0x5b1   :  { %v1496_v49 = vmul.f32 %v6420_v14, %v7533_v31  ;;  %v1239_v22 = vpop.xlane.xlu2 %1238  ;;  %5631 = vmatmul.msk.bf16.vlgmr.msra.gmra.mxu3 %vm1185_vm13, %v1309_v39 }
 0x5b2   :  { %6421 = vrcp.f32 %v1239_v22  ;;  %1815 = vmatpush.bf16.msra.mxu3 %v1807_v21 }
 0x5b3   :  { %v1502_v57 = vpack.c.bf16 %v1496_v49, %v1496_v49  ;;  %6423 = vpow2.f32 %v1947_v2 }
 0x5b5   :  { %v1511_v55 = vunpack.c.l.b16 %v1502_v57 }
 0x5b7   :  { %v1513_v13 = vpack.c.b16 %v1511_v55, %v1510_v52 }
 0x5b8   :  { %v6422_v24 = vpop.eup %6421 }
 0x5b9   :  { %v1479_v33 = vpop.xlane.xlu2 %1478  ;;  %v1482_v31 = vpop.xlane.xlu1 %1481  ;;  %v1251_v38 = vmul.f32 %v6422_v24, %v7538_v20 }
 0x5ba   :  { %6425 = vrcp.f32 %v1479_v33  ;;  %5637 = vmatmul.msk.bf16.vlgmr.msrb.gmra.mxu2 %vm1185_vm13, %v1513_v13  ;;  %v7641_v3 = vpop.eup %6423 }
 0x5bb   :  { %v1257_v29 = vpack.c.bf16 %v1251_v38, %v1251_v38  ;;  %6427 = vrcp.f32 %v1482_v31  ;;  %v1963_v59 = vsel %vm1185_vm13, %v7641_v3, 0.0 }
 0x5bc   :  { %6429 = vpow2.f32 %v1949_v54 }
 0x5bd   :  { %v1308_v37 = vunpack.c.l.b16 %v1257_v29 }
 0x5bf   :  { %1964 = vadd.xlane.f32.xlu2 %v1963_v59  ;;  %v1310_v17 = vpack.c.b16 %v1308_v37, %v1308_v37 }
 0x5c0   :  { %v6426_v63 = vpop.eup %6425 }
 0x5c1   :  { %v1485_v40 = vpop.xlane.xlu2 %1484  ;;  %5632 = vmatmul.msk.bf16.gmra.mxu3 %vm1185_vm13, %v1310_v17  ;;  %v1497_v20 = vmul.f32 %v6426_v63, %v7544_v1  ;;  %v6428_v28 = vpop.eup %6427 }
 0x5c2   :  { %6431 = vrcp.f32 %v1485_v40  ;;  %2035 = vrot.lane.b32.xlu1 %v7280_v8, %s6701_s20  ;;  %v7649_v6 = vpop.eup %6429  ;;  %v1498_v46 = vmul.f32 %v6428_v28, %v7546_v12 }
 0x5c3   :  { %v1503_v11 = vpack.c.bf16 %v1497_v20, %v1497_v20  ;;  %v1966_v35 = vsel %vm1185_vm13, %v7649_v6, 0.0 }
 0x5c4   :  { %v1504_v56 = vpack.c.bf16 %v1498_v46, %v1498_v46 }
 0x5c5   :  { %v1512_v47 = vunpack.c.l.b16 %v1503_v11 }
 0x5c6   :  { %v1550_v0 = vunpack.c.l.b16 %v1504_v56 }
 0x5c7   :  { %1967 = vadd.xlane.f32.xlu2 %v1966_v35  ;;  %v1514_v18 = vpack.c.b16 %v1512_v47, %v1512_v47 }
 0x5c8   :  { %v6432_v58 = vpop.eup %6431 }
 0x5c9   :  { %v1499_v1 = vmul.f32 %v6432_v58, %v7553_v42  ;;  %v1713_v19 = vpop.xlane.xlu2 %1712  ;;  %v1716_v8 = vpop.xlane.xlu0 %1715 }
 0x5ca   :  { %6433 = vrcp.f32 %v1713_v19  ;;  %5638 = vmatmul.msk.bf16.gmra.mxu2 %vm1185_vm13, %v1514_v18 }
 0x5cb   :  { %v1505_v15 = vpack.c.bf16 %v1499_v1, %v1499_v1  ;;  %6435 = vrcp.f32 %v1716_v8 }
 0x5cd   :  { %v1551_v5 = vunpack.c.l.b16 %v1505_v15 }
 0x5cf   :  { %v1553_v12 = vpack.c.b16 %v1551_v5, %v1550_v0 }
 0x5d0   :  { %v6434_v48 = vpop.eup %6433 }
 0x5d1   :  { %v6436_v60 = vpop.eup %6435  ;;  %v1735_v9 = vmul.f32 %v6434_v48, %v7559_v45  ;;  %v1488_v39 = vpop.xlane.xlu2 %1487  ;;  %5639 = vmatmul.msk.bf16.vlgmr.msrb.gmra.mxu3 %vm1185_vm13, %v1553_v12 }
 0x5d2   :  { %v1719_v14 = vpop.xlane.xlu1 %1718  ;;  %v1736_v42 = vmul.f32 %v6436_v60, %v7563_v34  ;;  %6437 = vrcp.f32 %v1488_v39 }
 0x5d3   :  { %v1741_v21 = vpack.c.bf16 %v1735_v9, %v1735_v9  ;;  %6439 = vrcp.f32 %v1719_v14 }
 0x5d4   :  { %v1742_v2 = vpack.c.bf16 %v1736_v42, %v1736_v42 }
 0x5d5   :  { %v1750_v32 = vunpack.c.l.b16 %v1741_v21 }
 0x5d6   :  { %v1751_v49 = vunpack.c.l.b16 %v1742_v2 }
 0x5d8   :  { %v6438_v22 = vpop.eup %6437  ;;  %v1753_v57 = vpack.c.b16 %v1751_v49, %v1750_v32 }
 0x5d9   :  { %v6440_v36 = vpop.eup %6439  ;;  %v1722_v52 = vpop.xlane.xlu2 %1721  ;;  %v1500_v13 = vmul.f32 %v6438_v22, %v7569_v61 }
 0x5da   :  { %v1725_v55 = vpop.xlane.xlu1 %1724  ;;  %6441 = vrcp.f32 %v1722_v52  ;;  %5645 = vmatmul.msk.bf16.vlgmr.msra.gmra.mxu2 %vm1185_vm13, %v1753_v57  ;;  %v1737_v34 = vmul.f32 %v6440_v36, %v7572_v62 }
 0x5db   :  { %6443 = vrcp.f32 %v1725_v55  ;;  %v1506_v45 = vpack.c.bf16 %v1500_v13, %v1500_v13 }
 0x5dc   :  { %v1796_v24 = vpop.permute.xlu0 %1795  ;;  %v1743_v38 = vpack.c.bf16 %v1737_v34, %v1737_v34 }
 0x5dd   :  { %v1552_v54 = vunpack.c.l.b16 %v1506_v45  ;;  %1816 = vmatpush.bf16.msra.mxu3 %v1796_v24 }
 0x5de   :  { %v1752_v59 = vunpack.c.l.b16 %v1743_v38 }
 0x5df   :  { %v1554_v33 = vpack.c.b16 %v1552_v54, %v1552_v54 }
 0x5e0   :  { %v6442_v31 = vpop.eup %6441  ;;  %v1754_v40 = vpack.c.b16 %v1752_v59, %v1752_v59 }
 0x5e1   :  { %v6444_v29 = vpop.eup %6443  ;;  %5640 = vmatmul.msk.bf16.gmra.mxu3 %vm1185_vm13, %v1554_v33  ;;  %v1738_v37 = vmul.f32 %v6442_v31, %v7580_v26 }
 0x5e2   :  { %v1739_v61 = vmul.f32 %v6444_v29, %v7578_v50 }
 0x5e3   :  { %v1744_v17 = vpack.c.bf16 %v1738_v37, %v1738_v37 }
 0x5e4   :  { %v1745_v63 = vpack.c.bf16 %v1739_v61, %v1739_v61 }
 0x5e5   :  { %v1790_v62 = vunpack.c.l.b16 %v1744_v17 }
 0x5e6   :  { %v1791_v28 = vunpack.c.l.b16 %v1745_v63 }
 0x5e8   :  { %v1793_v11 = vpack.c.b16 %v1791_v28, %v1790_v62 }
 0x5e9   :  { %v1956_v20 = vpop.xlane.xlu2 %1955 }
 0x5ea   :  { %5646 = vmatmul.msk.bf16.gmra.mxu2 %vm1185_vm13, %v1754_v40 }
 0x5f1   :  { %v1728_v46 = vpop.xlane.xlu2 %1727  ;;  %5647 = vmatmul.msk.bf16.vlgmr.msra.gmra.mxu3 %vm1185_vm13, %v1793_v11  ;;  %v1996_v56 = vpop.permute.xlu1 %1995 }
 0x5f2   :  { %6445 = vrcp.f32 %v1728_v46 }
 0x5f3   :  { %6447 = vrcp.f32 %v1956_v20 }
 0x5f8   :  { %v6446_v47 = vpop.eup %6445 }
 0x5f9   :  { %v1998_v35 = vpop.permute.xlu2 %1997  ;;  %v1740_v26 = vmul.f32 %v6446_v47, %v7594_v43  ;;  %v6448_v8 = vpop.eup %6447 }
 0x5fa   :  { %v2007_v50 = vsel %vm1281_vm10, %v1998_v35, 0  ;;  %v1976_v15 = vmul.f32 %v6448_v8, %v7590_v27 }
 0x5fb   :  { %2015 = vmatpush.bf16.msrb.mxu2 %v2007_v50  ;;  %v1746_v18 = vpack.c.bf16 %v1740_v26, %v1740_v26 }
 0x5fc   :  { %v1982_v5 = vpack.c.bf16 %v1976_v15, %v1976_v15 }
 0x5fd   :  { %v1792_v58 = vunpack.c.l.b16 %v1746_v18 }
 0x5fe   :  { %v1991_v60 = vunpack.c.l.b16 %v1982_v5 }
 0x5ff   :  { %2016 = vmatpush.bf16.msrb.mxu2 %v1996_v56  ;;  %v1794_v1 = vpack.c.b16 %v1792_v58, %v1792_v58 }
 0x601   :  { %5648 = vmatmul.msk.bf16.gmra.mxu3 %vm1185_vm13, %v1794_v1 }
 0x607   :  { %v1953_v19 = vpop.xlane.xlu0 %1952 }
 0x608   :  { %6449 = vrcp.f32 %v1953_v19 }
 0x60e   :  { %v6450_v0 = vpop.eup %6449 }
 0x60f   :  { %v1975_v43 = vmul.f32 %v6450_v0, %v7602_v53  ;;  %v1959_v12 = vpop.xlane.xlu0 %1958 }
 0x610   :  { %6451 = vrcp.f32 %v1959_v12 }
 0x611   :  { %v1981_v48 = vpack.c.bf16 %v1975_v43, %v1975_v43 }
 0x613   :  { %v1990_v9 = vunpack.c.l.b16 %v1981_v48 }
 0x615   :  { %v1993_v39 = vpack.c.b16 %v1991_v60, %v1990_v9 }
 0x616   :  { %v6452_v14 = vpop.eup %6451 }
 0x617   :  { %5653 = vmatmul.msk.bf16.vlgmr.msrb.gmra.mxu2 %vm1185_vm13, %v1993_v39  ;;  %v1977_v42 = vmul.f32 %v6452_v14, %v7613_v23 }
 0x619   :  { %v1983_v2 = vpack.c.bf16 %v1977_v42, %v1977_v42 }
 0x61b   :  { %v1992_v32 = vunpack.c.l.b16 %v1983_v2 }
 0x61c   :  { %v1962_v57 = vpop.xlane.xlu1 %1961 }
 0x61d   :  { %v7674_v21 = vpop.f32.mrf.mxu2  ;;  %v1994_v53 = vpack.c.b16 %v1992_v32, %v1992_v32  ;;  %6453 = vrcp.f32 %v1962_v57 }
 0x622   :  { %v2038_v27 = vpop.permute.xlu0 %2037 }
 0x623   :  { %v2047_v49 = vsel %vm1281_vm10, %v2038_v27, 0  ;;  %v6454_v55 = vpop.eup %6453  ;;  %v6166_v27 = vld [vmem:[%s9262_s5 + $0x18] sm:$0xff] }
 0x624   :  { %2055 = vmatpush.bf16.msrb.mxu3 %v2047_v49  ;;  %v1978_v34 = vmul.f32 %v6454_v55, %v7622_v51  ;;  %2208 = vmatpush.bf16.msra.mxu0 %v6166_v27  ;;  %v6165_v49 = vld [vmem:[%s9262_s5 + $0x10] sm:$0xff] }
 0x625   :  { %v7677_v22 = vpop.f32.mrf.mxu2 }
 0x626   :  { %v1984_v54 = vpack.c.bf16 %v1978_v34, %v1978_v34 }
 0x627   :  { %5654 = vmatmul.msk.bf16.gmra.mxu2 %vm1185_vm13, %v1994_v53  ;;  %v6164_v53 = vld [vmem:[%s9262_s5 + $0x8] sm:$0xff] }
 0x628   :  { %v2030_v61 = vunpack.c.l.b16 %v1984_v54  ;;  %2209 = vmatpush.bf16.msra.mxu0 %v6165_v49 }
 0x62c   :  { %2210 = vmatpush.bf16.msra.mxu0 %v6164_v53 }
 0x62d   :  { %v7680_v36 = vpop.f32.mrf.mxu2 }
 0x632   :  { %v1965_v52 = vpop.xlane.xlu2 %1964 }
 0x633   :  { %6455 = vrcp.f32 %v1965_v52 }
 0x634   :  { %v2036_v23 = vpop.permute.xlu1 %2035  ;;  %v7682_v13 = vpop.f32.mrf.mxu3 }
 0x635   :  { %v1301_v45 = vpop.f32.mrf.mxu2  ;;  %2056 = vmatpush.bf16.msrb.mxu3 %v2036_v23 }
 0x639   :  { %v6456_v24 = vpop.eup %6455 }
 0x63a   :  { %v1979_v33 = vmul.f32 %v6456_v24, %v7641_v3  ;;  %v1968_v31 = vpop.xlane.xlu2 %1967  ;;  %v6163_v24 = vld [vmem:[%s9262_s5] sm:$0xff] }
 0x63b   :  { %6457 = vrcp.f32 %v1968_v31  ;;  %2211 = vmatpush.bf16.msra.mxu0 %v6163_v24 }
 0x63c   :  { %v1985_v38 = vpack.c.bf16 %v1979_v33, %v1979_v33  ;;  %v7686_v29 = vpop.f32.mrf.mxu3 }
 0x63d   :  { %v1538_v37 = vpop.f32.mrf.mxu2 }
 0x63e   :  { %v2031_v59 = vunpack.c.l.b16 %v1985_v38 }
 0x640   :  { %v2033_v17 = vpack.c.b16 %v2031_v59, %v2030_v61 }
 0x641   :  { %v6458_v63 = vpop.eup %6457 }
 0x642   :  { %5655 = vmatmul.msk.bf16.vlgmr.msrb.gmra.mxu3 %vm1185_vm13, %v2033_v17  ;;  %v1980_v40 = vmul.f32 %v6458_v63, %v7649_v6 }
 0x644   :  { %v7690_v20 = vpop.f32.mrf.mxu3  ;;  %v1986_v28 = vpack.c.bf16 %v1980_v40, %v1980_v40 }
 0x645   :  { %v1540_v51 = vpop.f32.mrf.mxu2 }
 0x646   :  { %v6247_v62 = vpack.i.bf16 %v1540_v51, %v1538_v37  ;;  %v2032_v11 = vunpack.c.l.b16 %v1986_v28 }
 0x648   :  { %6248 = vrot.lane.b32.xlu2 %v6247_v62, %s6700_s1  ;;  %v2034_v47 = vpack.c.b16 %v2032_v11, %v2032_v11 }
 0x64c   :  { %v1345_v3 = vpop.f32.mrf.mxu3 }
 0x64d   :  { %v1543_v46 = vpop.f32.mrf.mxu2 }
 0x652   :  { %5656 = vmatmul.msk.bf16.gmra.mxu3 %vm1185_vm13, %v2034_v47 }
 0x654   :  { %v1578_v35 = vpop.f32.mrf.mxu3 }
 0x655   :  { %v1545_v26 = vpop.f32.mrf.mxu2  ;;  %v6262_v50 = vpack.i.bf16 %v1578_v35, %v1543_v46 }
 0x657   :  { %6263 = vrot.lane.b32.xlu1 %v6262_v50, %s6700_s1 }
 0x65c   :  { %v1580_v18 = vpop.f32.mrf.mxu3 }
 0x65d   :  { %v1778_v6 = vpop.f32.mrf.mxu2 }
 0x664   :  { %v1583_v58 = vpop.f32.mrf.mxu3 }
 0x665   :  { %v6277_v56 = vpack.i.bf16 %v1583_v58, %v1580_v18  ;;  %v1780_v1 = vpop.f32.mrf.mxu2 }
 0x666   :  { %v6252_v19 = vpack.i.bf16 %v1780_v1, %v1778_v6 }
 0x667   :  { %6278 = vrot.lane.b32.xlu2 %v6277_v56, %s6700_s1 }
 0x668   :  { %6253 = vrot.lane.b32.xlu0 %v6252_v19, %s6699_s19 }
 0x66c   :  { %v1585_v8 = vpop.f32.mrf.mxu3 }
 0x66d   :  { %v1783_v15 = vpop.f32.mrf.mxu2 }
 0x674   :  { %v1818_v0 = vpop.f32.mrf.mxu3 }
 0x675   :  { %v1785_v5 = vpop.f32.mrf.mxu2  ;;  %v6267_v42 = vpack.i.bf16 %v1818_v0, %v1783_v15 }
 0x67c   :  { %v1820_v43 = vpop.f32.mrf.mxu3 }
 0x684   :  { %v1823_v12 = vpop.f32.mrf.mxu3 }
 0x685   :  { %v6282_v32 = vpack.i.bf16 %v1823_v12, %v1820_v43 }
 0x68c   :  { %v1825_v48 = vpop.f32.mrf.mxu3 }
 0x69a   :  { %v2018_v60 = vpop.f32.mrf.mxu2 }
 0x6a2   :  { %v2020_v9 = vpop.f32.mrf.mxu2  ;;  %v6249_v33 = vpop.permute.xlu2 %6248 }
 0x6a3   :  { %v6257_v39 = vpack.i.bf16 %v2020_v9, %v2018_v60  ;;  %v6251_v31 = vunpack.i.h.bf16 %v6249_v33  ;;  %v6250_v38 = vunpack.i.l.bf16 %v6249_v33 }
 0x6a5   :  { %6258 = vrot.lane.b32.xlu0 %v6257_v39, %s6697_s18  ;;  %v2140_v17 = vsel %vm1100_vm11, %v7677_v22, %v6251_v31  ;;  %v2139_v63 = vsel %vm1100_vm11, %v7674_v21, %v6250_v38 }
 0x6aa   :  { %v2023_v14 = vpop.f32.mrf.mxu2 }
 0x6ad   :  { %6268 = vrot.lane.b32.xlu0 %v6267_v42, %s6699_s19 }
 0x6b2   :  { %v2025_v2 = vpop.f32.mrf.mxu2 }
 0x6b5   :  { %6283 = vrot.lane.b32.xlu0 %v6282_v32, %s6699_s19 }
 0x6c1   :  { %v6279_v43 = vpop.permute.xlu2 %6278 }
 0x6c2   :  { %v6281_v48 = vunpack.i.h.bf16 %v6279_v43 }
 0x6c4   :  { %v2144_v39 = vsel %vm1100_vm11, %v7690_v20, %v6281_v48  ;;  %v2170_v20 = vld [vmem:[%s9259_s3 + $0x31] ss:$0 sm:$0xff] }
 0x6c5   :  { %v2058_v57 = vpop.f32.mrf.mxu3 }
 0x6c6   :  { %v6272_v52 = vpack.i.bf16 %v2058_v57, %v2023_v14 }
 0x6c8   :  { %6273 = vrot.lane.b32.xlu1 %v6272_v52, %s6697_s18 }
 0x6c9   :  { %v6264_v47 = vpop.permute.xlu1 %6263 }
 0x6ca   :  { %v6266_v26 = vunpack.i.h.bf16 %v6264_v47  ;;  %v6265_v22 = vunpack.i.l.bf16 %v6264_v47 }
 0x6cc   :  { %v2142_v6 = vsel %vm1100_vm11, %v7682_v13, %v6266_v26  ;;  %v2141_v58 = vsel %vm1100_vm11, %v7680_v36, %v6265_v22  ;;  %v6280_v13 = vunpack.i.l.bf16 %v6279_v43 }
 0x6cd   :  { %v2060_v55 = vpop.f32.mrf.mxu3 }
 0x6ce   :  { %v2143_v14 = vsel %vm1100_vm11, %v7686_v29, %v6280_v13 }
 0x6d5   :  { %v2063_v23 = vpop.f32.mrf.mxu3 }
 0x6d6   :  { %v6287_v45 = vpack.i.bf16 %v2063_v23, %v2060_v55 }
 0x6d8   :  { %6288 = vrot.lane.b32.xlu1 %v6287_v45, %s6697_s18 }
 0x6da   :  { %v6254_v54 = vpop.permute.xlu0 %6253 }
 0x6db   :  { %v6256_v37 = vunpack.i.h.bf16 %v6254_v54  ;;  %v6255_v61 = vunpack.i.l.bf16 %v6254_v54 }
 0x6dd   :  { %v2065_v34 = vpop.f32.mrf.mxu3  ;;  %v2147_v62 = vsel %vm2145_vm14, %v2140_v17, %v6256_v37  ;;  %v2146_v28 = vsel %vm2145_vm14, %v2139_v63, %v6255_v61 }
 0x717   :  { %v6259_v59 = vpop.permute.xlu0 %6258 }
 0x718   :  { %v6261_v40 = vunpack.i.h.bf16 %v6259_v59  ;;  %v6260_v51 = vunpack.i.l.bf16 %v6259_v59 }
 0x71a   :  { %v2153_v3 = vsel %vm2152_vm15, %v2146_v28, %v6260_v51  ;;  %v2154_v11 = vsel %vm2152_vm15, %v2147_v62, %v6261_v40 }
 0x71b   :  { %v2159_v46 = vpack.c.bf16 %v2154_v11, %v2153_v3 }
 0x71d   :  { %5673 = vmatmul.msk.bf16.vlgmr.msra.gmra.mxu0 %vm659_vm2, %v2159_v46 }
 0x71f   :  { %v6269_v35 = vpop.permute.xlu0 %6268 }
 0x720   :  { %v6271_v50 = vunpack.i.h.bf16 %v6269_v35  ;;  %v6270_v18 = vunpack.i.l.bf16 %v6269_v35 }
 0x722   :  { %v2149_v19 = vsel %vm2145_vm14, %v2142_v6, %v6271_v50  ;;  %v2148_v8 = vsel %vm2145_vm14, %v2141_v58, %v6270_v18 }
 0x727   :  { %v6284_v12 = vpop.permute.xlu0 %6283 }
 0x728   :  { %v6286_v60 = vunpack.i.h.bf16 %v6284_v12  ;;  %v6285_v9 = vunpack.i.l.bf16 %v6284_v12 }
 0x72a   :  { %v2151_v32 = vsel %vm2145_vm14, %v2144_v39, %v6286_v60  ;;  %v2150_v27 = vsel %vm2145_vm14, %v2143_v14, %v6285_v9 }
 0x73a   :  { %v6274_v21 = vpop.permute.xlu1 %6273 }
 0x73b   :  { %v6276_v56 = vunpack.i.h.bf16 %v6274_v21  ;;  %v6275_v1 = vunpack.i.l.bf16 %v6274_v21 }
 0x73d   :  { %v2155_v15 = vsel %vm2152_vm15, %v2148_v8, %v6275_v1  ;;  %v2156_v0 = vsel %vm2152_vm15, %v2149_v19, %v6276_v56 }
 0x73e   :  { %v2160_v5 = vpack.c.bf16 %v2156_v0, %v2155_v15 }
 0x740   :  { %5674 = vmatmul.msk.bf16.gmra.mxu0 %vm659_vm2, %v2160_v5 }
 0x74a   :  { %v6289_v36 = vpop.permute.xlu1 %6288 }
 0x74b   :  { %v6291_v42 = vunpack.i.h.bf16 %v6289_v36  ;;  %v6290_v2 = vunpack.i.l.bf16 %v6289_v36 }
 0x74d   :  { %v2157_v49 = vsel %vm2152_vm15, %v2150_v27, %v6290_v2  ;;  %v2158_v53 = vsel %vm2152_vm15, %v2151_v32, %v6291_v42  ;;  %v5703_v42 = vld [vmem:[%s9263_s6 + $0x30] sm:$0xf]  ;;  %v6174_v2 = vld [vmem:[%s9263_s6 + $0x34] sm:$0xf0]  ;;  %v6173_v32 = vld [vmem:[%s9263_s6 + $0x34] sm:$0xf] }
 0x74e   :  { %v2161_v57 = vpack.c.bf16 %v2158_v53, %v2157_v49  ;;  %v5704_v27 = vor.u32 %v6174_v2, %v5703_v42  ;;  %v5705_v49 = vld [vmem:[%s9263_s6 + $0x38] sm:$0xf0] }
 0x74f   :  { %v5708_v53 = vor.u32 %v6173_v32, %v5705_v49 }
 0x750   :  { %5675 = vmatmul.msk.bf16.gmra.mxu0 %vm659_vm2, %v2161_v57  ;;  %2451 = vmatpush.bf16.msra.mxu1 %v5704_v27  ;;  %v5695_v57 = vld [vmem:[%s9263_s6 + $0x20] sm:$0xf] }
 0x751   :  { %2475 = vmatpush.bf16.msra.mxu2 %v5708_v53 }
 0x79a   :  { %v2213_v52 = vpop.f32.mrf.mxu0 }
 0x79b   :  { %v2214_v55 = vadd.f32 %v2213_v52, %v2170_v20  ;;  %v6171_v52 = vld [vmem:[%s9263_s6 + $0x24] sm:$0xf] }
 0x79d   :  { %v7745_v29 = vadd.f32 %v2214_v55, %v7069_v44 }
 0x79f   :  { %v2236_v23 = vsel %vm659_vm2, %v7745_v29, 0.0 }
 0x7a0   :  { %2237 = vadd.xlane.f32.xlu2 %v2236_v23  ;;  %v5697_v23 = vld [vmem:[%s9263_s6 + $0x28] sm:$0xf0] }
 0x7a2   :  { %v2215_v45 = vpop.f32.mrf.mxu0 }
 0x7a3   :  { %v2216_v34 = vadd.f32 %v2215_v45, %v2170_v20  ;;  %v5700_v45 = vor.u32 %v6171_v52, %v5697_v23 }
 0x7a5   :  { %v7750_v24 = vadd.f32 %v2216_v34, %v7082_v7  ;;  %2476 = vmatpush.bf16.msra.mxu2 %v5700_v45  ;;  %v5687_v34 = vld [vmem:[%s9263_s6 + $0x10] sm:$0xf] }
 0x7a7   :  { %v2239_v54 = vsel %vm659_vm2, %v7750_v24, 0.0 }
 0x7a8   :  { %2240 = vadd.xlane.f32.xlu0 %v2239_v54  ;;  %v6170_v54 = vld [vmem:[%s9263_s6 + $0x14] sm:$0xf0] }
 0x7bd   :  { %v2218_v33 = vpop.f32.mrf.mxu0 }
 0x7be   :  { %v2219_v31 = vadd.f32 %v2218_v33, %v2170_v20  ;;  %v6169_v33 = vld [vmem:[%s9263_s6 + $0x14] sm:$0xf] }
 0x7c0   :  { %v7755_v38 = vadd.f32 %v2219_v31, %v7079_v4  ;;  %v5688_v31 = vor.u32 %v6170_v54, %v5687_v34 }
 0x7c2   :  { %v2242_v44 = vsel %vm659_vm2, %v7755_v38, 0.0 }
 0x7c3   :  { %2243 = vadd.xlane.f32.xlu1 %v2242_v44  ;;  %v5689_v44 = vld [vmem:[%s9263_s6 + $0x18] sm:$0xf0] }
 0x7c5   :  { %v2220_v37 = vpop.f32.mrf.mxu0 }
 0x7c6   :  { %v2221_v61 = vadd.f32 %v2220_v37, %v2170_v20 }
 0x7c8   :  { %v7760_v59 = vadd.f32 %v2221_v61, %v7091_v16  ;;  %v5692_v61 = vor.u32 %v6169_v33, %v5689_v44 }
 0x7ca   :  { %v2245_v7 = vsel %vm659_vm2, %v7760_v59, 0.0  ;;  %2477 = vmatpush.bf16.msra.mxu2 %v5692_v61 }
 0x7cb   :  { %2246 = vadd.xlane.f32.xlu2 %v2245_v7 }
 0x7cd   :  { %v2223_v17 = vpop.f32.mrf.mxu0 }
 0x7ce   :  { %v2224_v63 = vadd.f32 %v2223_v17, %v2170_v20  ;;  %v5679_v17 = vld [vmem:[%s9263_s6] sm:$0xf] }
 0x7d0   :  { %v7765_v40 = vadd.f32 %v2224_v63, %v7098_v25  ;;  %v6168_v63 = vld [vmem:[%s9263_s6 + $0x4] sm:$0xf0] }
 0x7d2   :  { %v2248_v4 = vsel %vm659_vm2, %v7765_v40, 0.0 }
 0x7d3   :  { %2249 = vadd.xlane.f32.xlu0 %v2248_v4  ;;  %v6167_v4 = vld [vmem:[%s9263_s6 + $0x4] sm:$0xf] }
 0x7d5   :  { %v2225_v51 = vpop.f32.mrf.mxu0 }
 0x7d6   :  { %v2226_v62 = vadd.f32 %v2225_v51, %v2170_v20  ;;  %v6172_v20 = vld [vmem:[%s9263_s6 + $0x24] sm:$0xf0] }
 0x7d7   :  { %v5696_v55 = vor.u32 %v6172_v20, %v5695_v57 }
 0x7d8   :  { %v7770_v28 = vadd.f32 %v2226_v62, %v7105_v30  ;;  %v5680_v62 = vor.u32 %v6168_v63, %v5679_v17 }
 0x7d9   :  { %2452 = vmatpush.bf16.msra.mxu1 %v5696_v55 }
 0x7da   :  { %v2251_v16 = vsel %vm659_vm2, %v7770_v28, 0.0 }
 0x7db   :  { %2252 = vadd.xlane.f32.xlu1 %v2251_v16  ;;  %v5681_v16 = vld [vmem:[%s9263_s6 + $0x8] sm:$0xf0] }
 0x7dd   :  { %2453 = vmatpush.bf16.msra.mxu1 %v5688_v31 }
 0x7e1   :  { %2454 = vmatpush.bf16.msra.mxu1 %v5680_v62 }
 0x813   :  { %v2238_v3 = vpop.xlane.xlu2 %2237 }
 0x814   :  { %v2254_v11 = vmul.f32 %v2238_v3, %v7013_v41  ;;  %v5684_v3 = vor.u32 %v6167_v4, %v5681_v16 }
 0x816   :  { %v7776_v46 = vsub.f32 %v7745_v29, %v2254_v11  ;;  %2478 = vmatpush.bf16.msra.mxu2 %v5684_v3 }
 0x818   :  { %v2266_v25 = vmul.f32 %v7776_v46, %v7776_v46 }
 0x81a   :  { %v2272_v47 = vsel %vm659_vm2, %v2266_v25, 0.0 }
 0x81b   :  { %v2241_v35 = vpop.xlane.xlu0 %2240  ;;  %2273 = vadd.xlane.f32.xlu2 %v2272_v47 }
 0x81c   :  { %v2255_v30 = vmul.f32 %v2241_v35, %v7013_v41 }
 0x81e   :  { %v7783_v26 = vsub.f32 %v7750_v24, %v2255_v30 }
 0x820   :  { %v2267_v22 = vmul.f32 %v7783_v26, %v7783_v26 }
 0x822   :  { %v2275_v50 = vsel %vm659_vm2, %v2267_v22, 0.0 }
 0x823   :  { %2276 = vadd.xlane.f32.xlu0 %v2275_v50 }
 0x836   :  { %v2244_v18 = vpop.xlane.xlu1 %2243 }
 0x837   :  { %v2256_v21 = vmul.f32 %v2244_v18, %v7013_v41 }
 0x839   :  { %v7790_v6 = vsub.f32 %v7755_v38, %v2256_v21 }
 0x83b   :  { %v2268_v58 = vmul.f32 %v7790_v6, %v7790_v6 }
 0x83d   :  { %v2278_v56 = vsel %vm659_vm2, %v2268_v58, 0.0 }
 0x83e   :  { %2279 = vadd.xlane.f32.xlu1 %v2278_v56  ;;  %v2247_v1 = vpop.xlane.xlu2 %2246 }
 0x83f   :  { %v2257_v19 = vmul.f32 %v2247_v1, %v7013_v41 }
 0x841   :  { %v7797_v8 = vsub.f32 %v7760_v59, %v2257_v19 }
 0x843   :  { %v2269_v15 = vmul.f32 %v7797_v8, %v7797_v8 }
 0x845   :  { %v2281_v0 = vsel %vm659_vm2, %v2269_v15, 0.0 }
 0x846   :  { %v2250_v5 = vpop.xlane.xlu0 %2249  ;;  %2282 = vadd.xlane.f32.xlu2 %v2281_v0 }
 0x847   :  { %v2258_v43 = vmul.f32 %v2250_v5, %v7013_v41 }
 0x849   :  { %v7804_v12 = vsub.f32 %v7765_v40, %v2258_v43  ;;  %v7870_v43 = vld [vmem:[%s9259_s3 + $0x26] ss:$0 sm:$0xff] }
 0x84b   :  { %v2270_v48 = vmul.f32 %v7804_v12, %v7804_v12 }
 0x84d   :  { %v2284_v13 = vsel %vm659_vm2, %v2270_v48, 0.0 }
 0x84e   :  { %v2253_v60 = vpop.xlane.xlu1 %2252  ;;  %2285 = vadd.xlane.f32.xlu0 %v2284_v13 }
 0x84f   :  { %v2259_v9 = vmul.f32 %v2253_v60, %v7013_v41 }
 0x851   :  { %v7811_v36 = vsub.f32 %v7770_v28, %v2259_v9 }
 0x853   :  { %v2271_v39 = vmul.f32 %v7811_v36, %v7811_v36 }
 0x855   :  { %v2287_v14 = vsel %vm659_vm2, %v2271_v39, 0.0  ;;  %v7877_v39 = vld [vmem:[%s9259_s3 + $0x27] ss:$0 sm:$0xff] }
 0x856   :  { %2288 = vadd.xlane.f32.xlu1 %v2287_v14 }
 0x88e   :  { %v2274_v37 = vpop.xlane.xlu2 %2273 }
 0x88f   :  { %v2290_v7 = vmul.f32 %v2274_v37, %v7013_v41 }
 0x891   :  { %v2296_v51 = vadd.f32 1e-05, %v2290_v7 }
 0x893   :  { %6459 = vrsqrt.f32 %v2296_v51  ;;  %vm2308_vm1 = vweird.f32 %v2296_v51 }
 0x896   :  { %v2277_v11 = vpop.xlane.xlu0 %2276 }
 0x897   :  { %v2291_v25 = vmul.f32 %v2277_v11, %v7013_v41 }
 0x899   :  { %v6460_v47 = vpop.eup %6459  ;;  %v2297_v35 = vadd.f32 1e-05, %v2291_v25 }
 0x89a   :  { %v2303_v30 = vmul.f32 %v6460_v47, %v2296_v51  ;;  %vm2309_vm0 = vweird.f32 %v6460_v47 }
 0x89b   :  { %6461 = vrsqrt.f32 %v2297_v35  ;;  %vm2310_vm3 = vmor %vm2308_vm1, %vm2309_vm0  ;;  %vm2318_vm5 = vweird.f32 %v2297_v35 }
 0x89c   :  { %v2304_v22 = vmul.f32 %v6460_v47, %v2303_v30 }
 0x89e   :  { %v2305_v50 = vmul.f32 0.5, %v2304_v22 }
 0x8a0   :  { %v2306_v18 = vsub.f32 1.5, %v2305_v50 }
 0x8a1   :  { %v6462_v21 = vpop.eup %6461 }
 0x8a2   :  { %v2307_v58 = vmul.f32 %v6460_v47, %v2306_v18  ;;  %v2313_v56 = vmul.f32 %v6462_v21, %v2297_v35  ;;  %vm2319_vm4 = vweird.f32 %v6462_v21 }
 0x8a3   :  { %vm2320_vm6 = vmor %vm2318_vm5, %vm2319_vm4 }
 0x8a4   :  { %v2314_v1 = vmul.f32 %v6462_v21, %v2313_v56  ;;  %v2311_v19 = vsel %vm2310_vm3, %v6460_v47, %v2307_v58 }
 0x8a5   :  { %v2362_v5 = vmul.f32 %v2311_v19, %v7776_v46 }
 0x8a6   :  { %v2315_v15 = vmul.f32 0.5, %v2314_v1 }
 0x8a7   :  { %v2368_v60 = vmul.f32 %v2362_v5, %v7870_v43 }
 0x8a8   :  { %v2316_v0 = vsub.f32 1.5, %v2315_v15 }
 0x8a9   :  { %v2374_v42 = vadd.f32 %v2368_v60, %v7877_v39 }
 0x8aa   :  { %v2317_v48 = vmul.f32 %v6462_v21, %v2316_v0 }
 0x8ac   :  { %v2321_v13 = vsel %vm2320_vm6, %v6462_v21, %v2317_v48 }
 0x8ad   :  { %v2363_v9 = vmul.f32 %v2321_v13, %v7783_v26 }
 0x8af   :  { %v2369_v46 = vmul.f32 %v2363_v9, %v7870_v43 }
 0x8b1   :  { %v2280_v14 = vpop.xlane.xlu1 %2279  ;;  %v2375_v2 = vadd.f32 %v2369_v46, %v7877_v39 }
 0x8b2   :  { %v2292_v32 = vmul.f32 %v2280_v14, %v7013_v41 }
 0x8b3   :  { %v2380_v27 = vpack.c.bf16 %v2375_v2, %v2374_v42 }
 0x8b4   :  { %v2298_v49 = vadd.f32 1e-05, %v2292_v32 }
 0x8b5   :  { %5709 = vmatmul.msk.bf16.vlgmr.msra.gmra.mxu1 %vm659_vm2, %v2380_v27  ;;  %5712 = vmatmul.msk.bf16.vlgmr.msra.gmra.mxu2 %vm659_vm2, %v2380_v27 }
 0x8b6   :  { %6463 = vrsqrt.f32 %v2298_v49  ;;  %vm2328_vm8 = vweird.f32 %v2298_v49 }
 0x8b9   :  { %v2283_v26 = vpop.xlane.xlu2 %2282 }
 0x8ba   :  { %v2293_v53 = vmul.f32 %v2283_v26, %v7013_v41  ;;  %v5676_v26 = vld [vmem:[%s9259_s3 + $0x32] ss:$8 sm:$0x3] }
 0x8bc   :  { %v6464_v57 = vpop.eup %6463  ;;  %v2299_v20 = vadd.f32 1e-05, %v2293_v53  ;;  %v6179_v53 = vld [vmem:[%s9264_s7 + $0x20] sm:$0xff] }
 0x8bd   :  { %v2323_v52 = vmul.f32 %v6464_v57, %v2298_v49  ;;  %vm2329_vm7 = vweird.f32 %v6464_v57  ;;  %v6189_v49 = vld [vmem:[%s9264_s7 + $0x70] sm:$0xff] }
 0x8be   :  { %6465 = vrsqrt.f32 %v2299_v20  ;;  %vm2330_vm9 = vmor %vm2328_vm8, %vm2329_vm7  ;;  %vm2338_vm0 = vweird.f32 %v2299_v20 }
 0x8bf   :  { %v2324_v55 = vmul.f32 %v6464_v57, %v2323_v52  ;;  %v6178_v52 = vld [vmem:[%s9264_s7 + $0x18] sm:$0xff] }
 0x8c1   :  { %v2325_v23 = vmul.f32 0.5, %v2324_v55  ;;  %v2286_v45 = vpop.xlane.xlu0 %2285 }
 0x8c2   :  { %v2294_v34 = vmul.f32 %v2286_v45, %v7013_v41 }
 0x8c3   :  { %v2326_v54 = vsub.f32 1.5, %v2325_v23  ;;  %v6187_v23 = vld [vmem:[%s9264_s7 + $0x60] sm:$0xff] }
 0x8c4   :  { %v6466_v33 = vpop.eup %6465  ;;  %v2300_v31 = vadd.f32 1e-05, %v2294_v34  ;;  %v6177_v34 = vld [vmem:[%s9264_s7 + $0x10] sm:$0xff] }
 0x8c5   :  { %v2327_v44 = vmul.f32 %v6464_v57, %v2326_v54  ;;  %v2333_v37 = vmul.f32 %v6466_v33, %v2299_v20  ;;  %vm2339_vm12 = vweird.f32 %v6466_v33  ;;  %v7928_v20 = vperm.slane %v5676_v26, 0 }
 0x8c6   :  { %6467 = vrsqrt.f32 %v2300_v31  ;;  %vm2340_vm1 = vmor %vm2338_vm0, %vm2339_vm12  ;;  %vm2348_vm4 = vweird.f32 %v2300_v31 }
 0x8c7   :  { %v2334_v61 = vmul.f32 %v6466_v33, %v2333_v37  ;;  %v2331_v7 = vsel %vm2330_vm9, %v6464_v57, %v2327_v44  ;;  %v6188_v57 = vld [vmem:[%s9264_s7 + $0x68] sm:$0xff] }
 0x8c8   :  { %v2364_v16 = vmul.f32 %v2331_v7, %v7790_v6 }
 0x8c9   :  { %v2335_v17 = vmul.f32 0.5, %v2334_v61  ;;  %v2289_v63 = vpop.xlane.xlu1 %2288  ;;  %v6176_v61 = vld [vmem:[%s9264_s7 + $0x8] sm:$0xff] }
 0x8ca   :  { %v2295_v4 = vmul.f32 %v2289_v63, %v7013_v41  ;;  %v2370_v22 = vmul.f32 %v2364_v16, %v7870_v43  ;;  %v6185_v63 = vld [vmem:[%s9264_s7 + $0x50] sm:$0xff] }
 0x8cb   :  { %v2336_v51 = vsub.f32 1.5, %v2335_v17 }
 0x8cc   :  { %v6468_v62 = vpop.eup %6467  ;;  %v2301_v3 = vadd.f32 1e-05, %v2295_v4  ;;  %v2376_v56 = vadd.f32 %v2370_v22, %v7877_v39 }
 0x8cd   :  { %v2337_v11 = vmul.f32 %v6466_v33, %v2336_v51  ;;  %v2343_v25 = vmul.f32 %v6468_v62, %v2300_v31  ;;  %vm2349_vm3 = vweird.f32 %v6468_v62  ;;  %v6186_v31 = vld [vmem:[%s9264_s7 + $0x58] sm:$0xff] }
 0x8ce   :  { %6469 = vrsqrt.f32 %v2301_v3  ;;  %vm2350_vm5 = vmor %vm2348_vm4, %vm2349_vm3  ;;  %vm2358_vm7 = vweird.f32 %v2301_v3 }
 0x8cf   :  { %v2341_v47 = vsel %vm2340_vm1, %v6466_v33, %v2337_v11  ;;  %v2344_v35 = vmul.f32 %v6468_v62, %v2343_v25  ;;  %v7943_v33 = vperm.slane %v5676_v26, 1  ;;  %v6184_v11 = vld [vmem:[%s9264_s7 + $0x48] sm:$0xff] }
 0x8d0   :  { %v2365_v30 = vmul.f32 %v2341_v47, %v7797_v8 }
 0x8d1   :  { %v2345_v50 = vmul.f32 0.5, %v2344_v35 }
 0x8d2   :  { %v2371_v18 = vmul.f32 %v2365_v30, %v7870_v43 }
 0x8d3   :  { %v2346_v21 = vsub.f32 1.5, %v2345_v50  ;;  %v6183_v50 = vld [vmem:[%s9264_s7 + $0x40] sm:$0xff] }
 0x8d4   :  { %v6470_v58 = vpop.eup %6469  ;;  %v2377_v6 = vadd.f32 %v2371_v18, %v7877_v39 }
 0x8d5   :  { %v2347_v1 = vmul.f32 %v6468_v62, %v2346_v21  ;;  %v2353_v19 = vmul.f32 %v6470_v58, %v2301_v3  ;;  %vm2359_vm6 = vweird.f32 %v6470_v58 }
 0x8d6   :  { %v2381_v15 = vpack.c.bf16 %v2377_v6, %v2376_v56  ;;  %vm2360_vm8 = vmor %vm2358_vm7, %vm2359_vm6 }
 0x8d7   :  { %v2354_v0 = vmul.f32 %v6470_v58, %v2353_v19  ;;  %v2351_v8 = vsel %vm2350_vm5, %v6468_v62, %v2347_v1  ;;  %v6175_v62 = vld [vmem:[%s9264_s7] sm:$0xff] }
 0x8d8   :  { %5710 = vmatmul.msk.bf16.gmra.mxu1 %vm659_vm2, %v2381_v15  ;;  %5713 = vmatmul.msk.bf16.gmra.mxu2 %vm659_vm2, %v2381_v15  ;;  %v2366_v13 = vmul.f32 %v2351_v8, %v7804_v12  ;;  %v6182_v12 = vld [vmem:[%s9264_s7 + $0x38] sm:$0xff] }
 0x8d9   :  { %v2355_v5 = vmul.f32 0.5, %v2354_v0  ;;  %2882 = vmatpush.bf16.msra.mxu3 %v6182_v12 }
 0x8da   :  { %v2372_v14 = vmul.f32 %v2366_v13, %v7870_v43 }
 0x8db   :  { %v2356_v48 = vsub.f32 1.5, %v2355_v5 }
 0x8dc   :  { %v2378_v2 = vadd.f32 %v2372_v14, %v7877_v39 }
 0x8dd   :  { %v2357_v60 = vmul.f32 %v6470_v58, %v2356_v48 }
 0x8df   :  { %v2361_v9 = vsel %vm2360_vm8, %v6470_v58, %v2357_v60 }
 0x8e0   :  { %v2367_v46 = vmul.f32 %v2361_v9, %v7811_v36  ;;  %v6181_v36 = vld [vmem:[%s9264_s7 + $0x30] sm:$0xff] }
 0x8e1   :  { %2883 = vmatpush.bf16.msra.mxu3 %v6181_v36 }
 0x8e2   :  { %v2373_v42 = vmul.f32 %v2367_v46, %v7870_v43  ;;  %v6190_v43 = vld [vmem:[%s9264_s7 + $0x78] sm:$0xff] }
 0x8e3   :  { %2906 = vmatpush.bf16.msrb.mxu0 %v6190_v43 }
 0x8e4   :  { %v2379_v32 = vadd.f32 %v2373_v42, %v7877_v39  ;;  %v6180_v39 = vld [vmem:[%s9264_s7 + $0x28] sm:$0xff] }
 0x8e5   :  { %2884 = vmatpush.bf16.msra.mxu3 %v6180_v39 }
 0x8e6   :  { %v2382_v27 = vpack.c.bf16 %v2379_v32, %v2378_v2 }
 0x8e7   :  { %2907 = vmatpush.bf16.msrb.mxu0 %v6189_v49 }
 0x8e8   :  { %5711 = vmatmul.msk.bf16.gmra.mxu1 %vm659_vm2, %v2382_v27  ;;  %5714 = vmatmul.msk.bf16.gmra.mxu2 %vm659_vm2, %v2382_v27 }
 0x8e9   :  { %2885 = vmatpush.bf16.msra.mxu3 %v6179_v53 }
 0x8eb   :  { %2908 = vmatpush.bf16.msrb.mxu0 %v6188_v57 }
 0x8ed   :  { %2886 = vmatpush.bf16.msra.mxu3 %v6178_v52 }
 0x8ef   :  { %2909 = vmatpush.bf16.msrb.mxu0 %v6187_v23 }
 0x8f1   :  { %2887 = vmatpush.bf16.msra.mxu3 %v6177_v34 }
 0x8f3   :  { %2910 = vmatpush.bf16.msrb.mxu0 %v6186_v31 }
 0x8f5   :  { %2888 = vmatpush.bf16.msra.mxu3 %v6176_v61 }
 0x8f7   :  { %2911 = vmatpush.bf16.msrb.mxu0 %v6185_v63 }
 0x8f9   :  { %2889 = vmatpush.bf16.msra.mxu3 %v6175_v62 }
 0x8fb   :  { %2912 = vmatpush.bf16.msrb.mxu0 %v6184_v11 }
 0x8ff   :  { %2913 = vmatpush.bf16.msrb.mxu0 %v6183_v50 }
 0x932   :  { %v2456_v55 = vpop.f32.mrf.mxu1 }
 0x933   :  { %v7937_v45 = vadd.f32 %v2456_v55, %v7928_v20 }
 0x935   :  { %v5715_v54 = vmul.f32 -1.702, %v7937_v45 }
 0x937   :  { %v2519_v44 = vmul.f32 1.442695, %v5715_v54 }
 0x938   :  { %v2480_v37 = vpop.f32.mrf.mxu2 }
 0x939   :  { %6471 = vpow2.f32 %v2519_v44  ;;  %v7952_v7 = vadd.f32 %v2480_v37, %v7943_v33 }
 0x93a   :  { %v2458_v17 = vpop.f32.mrf.mxu1 }
 0x93b   :  { %v5716_v4 = vmul.f32 -1.702, %v7952_v7  ;;  %v7959_v51 = vadd.f32 %v2458_v17, %v7928_v20 }
 0x93d   :  { %v2521_v16 = vmul.f32 1.442695, %v5716_v4  ;;  %v5717_v3 = vmul.f32 -1.702, %v7959_v51 }
 0x93f   :  { %v6472_v25 = vpop.eup %6471  ;;  %6473 = vpow2.f32 %v2521_v16  ;;  %v2523_v47 = vmul.f32 1.442695, %v5717_v3 }
 0x940   :  { %v2543_v35 = vadd.f32 1.0, %v6472_v25  ;;  %v2482_v30 = vpop.f32.mrf.mxu2 }
 0x941   :  { %6475 = vpow2.f32 %v2523_v47  ;;  %v7969_v22 = vadd.f32 %v2482_v30, %v7943_v33 }
 0x942   :  { %6477 = vrcp.f32 %v2543_v35  ;;  %v2564_v9 = vand.u32 2147483647, %v2543_v35  ;;  %v2566_v14 = vand.u32 2147483648, %v2543_v35  ;;  %vm2560_vm12 = vweird.f32 %v2543_v35 }
 0x943   :  { %v5718_v18 = vmul.f32 -1.702, %v7969_v22 }
 0x944   :  { %vm7986_vm0 = vcmp.eq.f32.partialorder %v2564_v9, 8.507059e+37  ;;  %v2567_v53 = vor.u32 1.1754944e-38, %v2566_v14 }
 0x945   :  { %v6474_v21 = vpop.eup %6473  ;;  %v2525_v58 = vmul.f32 1.442695, %v5718_v18 }
 0x946   :  { %v7975_v56 = vadd.f32 1.0, %v6474_v21 }
 0x947   :  { %v6476_v6 = vpop.eup %6475  ;;  %6479 = vpow2.f32 %v2525_v58 }
 0x948   :  { %v6478_v1 = vpop.eup %6477  ;;  %6481 = vrcp.f32 %v7975_v56  ;;  %v2545_v15 = vadd.f32 1.0, %v6476_v6  ;;  %vm2575_vm3 = vweird.f32 %v7975_v56  ;;  %v2579_v54 = vand.u32 2147483647, %v7975_v56 }
 0x949   :  { %v2556_v19 = vmul.f32 %v6478_v1, %v2543_v35  ;;  %vm2561_vm9 = vweird.f32 %v6478_v1  ;;  %v2581_v31 = vand.u32 2147483648, %v7975_v56 }
 0x94a   :  { %6483 = vrcp.f32 %v2545_v15  ;;  %v2594_v43 = vand.u32 2147483647, %v2545_v15  ;;  %v2596_v39 = vand.u32 2147483648, %v2545_v15  ;;  %vm7990_vm1 = vmor %vm2560_vm12, %vm2561_vm9  ;;  %vm2590_vm7 = vweird.f32 %v2545_v15 }
 0x94b   :  { %v2557_v0 = vsub.f32 1.0, %v2556_v19  ;;  %v2582_v58 = vor.u32 1.1754944e-38, %v2581_v31 }
 0x94c   :  { %vm2595_vm8 = vcmp.eq.f32.partialorder %v2594_v43, 8.507059e+37  ;;  %v2597_v63 = vor.u32 1.1754944e-38, %v2596_v39 }
 0x94d   :  { %v6480_v8 = vpop.eup %6479  ;;  %v2558_v48 = vmul.f32 %v6478_v1, %v2557_v0 }
 0x94e   :  { %v7978_v5 = vpop.eup %6481  ;;  %v7980_v13 = vadd.f32 1.0, %v6480_v8 }
 0x94f   :  { %v2571_v60 = vmul.f32 %v7978_v5, %v7975_v56  ;;  %v2559_v2 = vadd.f32 %v6478_v1, %v2558_v48  ;;  %vm2576_vm4 = vweird.f32 %v7978_v5 }
 0x950   :  { %6485 = vrcp.f32 %v7980_v13  ;;  %v6484_v46 = vpop.eup %6483  ;;  %vm8006_vm6 = vmor %vm2575_vm3, %vm2576_vm4  ;;  %v2609_v16 = vand.u32 2147483647, %v7980_v13  ;;  %v2611_v47 = vand.u32 2147483648, %v7980_v13 }
 0x951   :  { %v2572_v42 = vsub.f32 1.0, %v2571_v60  ;;  %v2586_v32 = vmul.f32 %v6484_v46, %v2545_v15  ;;  %v2563_v55 = vsel %vm7990_vm1, %v6478_v1, %v2559_v2  ;;  %vm2591_vm5 = vweird.f32 %v6484_v46 }
 0x952   :  { %v2568_v4 = vsel %vm7986_vm0, %v2567_v53, %v2563_v55  ;;  %vm2592_vm9 = vmor %vm2590_vm7, %vm2591_vm5  ;;  %vm2580_vm0 = vcmp.eq.f32.partialorder %v2579_v54, 8.507059e+37  ;;  %vm2605_vm1 = vweird.f32 %v7980_v13  ;;  %vm2610_vm4 = vcmp.eq.f32.partialorder %v2609_v16, 8.507059e+37 }
 0x953   :  { %v2573_v27 = vmul.f32 %v7978_v5, %v2572_v42  ;;  %v2587_v36 = vsub.f32 1.0, %v2586_v32  ;;  %v2735_v21 = vmul.f32 %v2568_v4, %v7937_v45 }
 0x955   :  { %v2461_v49 = vpop.f32.mrf.mxu1  ;;  %v2574_v23 = vadd.f32 %v7978_v5, %v2573_v27  ;;  %v2588_v34 = vmul.f32 %v6484_v46, %v2587_v36 }
 0x956   :  { %v7997_v57 = vadd.f32 %v2461_v49, %v7928_v20  ;;  %v6486_v52 = vpop.eup %6485 }
 0x957   :  { %v2601_v44 = vmul.f32 %v6486_v52, %v7980_v13  ;;  %v2589_v17 = vadd.f32 %v6484_v46, %v2588_v34  ;;  %v2578_v11 = vsel %vm8006_vm6, %v7978_v5, %v2574_v23  ;;  %vm2606_vm12 = vweird.f32 %v6486_v52 }
 0x958   :  { %v5719_v37 = vmul.f32 -1.702, %v7997_v57  ;;  %v2583_v0 = vsel %vm2580_vm0, %v2582_v58, %v2578_v11  ;;  %vm2607_vm3 = vmor %vm2605_vm1, %vm2606_vm12  ;;  %v2612_v5 = vor.u32 1.1754944e-38, %v2611_v47 }
 0x959   :  { %v2602_v62 = vsub.f32 1.0, %v2601_v44  ;;  %v2593_v25 = vsel %vm2592_vm9, %v6484_v46, %v2589_v17  ;;  %v2736_v13 = vmul.f32 %v2583_v0, %v7952_v7 }
 0x95a   :  { %v2527_v3 = vmul.f32 1.442695, %v5719_v37  ;;  %v2598_v30 = vsel %vm2595_vm8, %v2597_v63, %v2593_v25 }
 0x95b   :  { %v2485_v35 = vpop.f32.mrf.mxu2  ;;  %v2603_v50 = vmul.f32 %v6486_v52, %v2602_v62  ;;  %v2737_v56 = vmul.f32 %v2598_v30, %v7959_v51 }
 0x95c   :  { %6487 = vpow2.f32 %v2527_v3  ;;  %v8018_v18 = vadd.f32 %v2485_v35, %v7943_v33 }
 0x95d   :  { %v2463_v6 = vpop.f32.mrf.mxu1  ;;  %v2604_v1 = vadd.f32 %v6486_v52, %v2603_v50  ;;  %v2747_v8 = vpack.c.bf16 %v2737_v56, %v2735_v21 }
 0x95e   :  { %v5720_v19 = vmul.f32 -1.702, %v8018_v18  ;;  %v8025_v15 = vadd.f32 %v2463_v6, %v7928_v20 }
 0x95f   :  { %v2608_v48 = vsel %vm2607_vm3, %v6486_v52, %v2604_v1  ;;  %2890 = vmatmul.bf16.vlgmr.msra.gmra.mxu3 %v2747_v8 }
 0x960   :  { %v2529_v45 = vmul.f32 1.442695, %v5720_v19  ;;  %v5721_v60 = vmul.f32 -1.702, %v8025_v15  ;;  %v2613_v51 = vsel %vm2610_vm4, %v2612_v5, %v2608_v48 }
 0x961   :  { %v2738_v46 = vmul.f32 %v2613_v51, %v7969_v22 }
 0x962   :  { %v6488_v9 = vpop.eup %6487  ;;  %6489 = vpow2.f32 %v2529_v45  ;;  %v2531_v14 = vmul.f32 1.442695, %v5721_v60 }
 0x963   :  { %v2547_v42 = vadd.f32 1.0, %v6488_v9  ;;  %v2487_v2 = vpop.f32.mrf.mxu2  ;;  %v2748_v32 = vpack.c.bf16 %v2738_v46, %v2736_v13 }
 0x964   :  { %6491 = vpow2.f32 %v2531_v14  ;;  %v8032_v27 = vadd.f32 %v2487_v2, %v7943_v33 }
 0x965   :  { %6493 = vrcp.f32 %v2547_v42  ;;  %v2466_v12 = vpop.f32.mrf.mxu1  ;;  %2914 = vmatmul.bf16.vlgmr.msrb.gmra.mxu0 %v2748_v32  ;;  %v2624_v4 = vand.u32 2147483647, %v2547_v42  ;;  %v2626_v62 = vand.u32 2147483648, %v2547_v42  ;;  %vm2620_vm5 = vweird.f32 %v2547_v42 }
 0x966   :  { %v5722_v36 = vmul.f32 -1.702, %v8032_v27  ;;  %v8036_v43 = vadd.f32 %v2466_v12, %v7928_v20 }
 0x967   :  { %vm8063_vm6 = vcmp.eq.f32.partialorder %v2624_v4, 8.507059e+37  ;;  %v2627_v58 = vor.u32 1.1754944e-38, %v2626_v62 }
 0x968   :  { %v6490_v7 = vpop.eup %6489  ;;  %v2533_v39 = vmul.f32 1.442695, %v5722_v36  ;;  %v5723_v22 = vmul.f32 -1.702, %v8036_v43 }
 0x969   :  { %v8039_v49 = vadd.f32 1.0, %v6490_v7 }
 0x96a   :  { %v6492_v26 = vpop.eup %6491  ;;  %6495 = vpow2.f32 %v2533_v39  ;;  %v2535_v53 = vmul.f32 1.442695, %v5723_v22 }
 0x96b   :  { %v8041_v52 = vpop.eup %6493  ;;  %6497 = vrcp.f32 %v8039_v49  ;;  %v2490_v55 = vpop.f32.mrf.mxu2  ;;  %v2549_v34 = vadd.f32 1.0, %v6492_v26  ;;  %vm2635_vm8 = vweird.f32 %v8039_v49  ;;  %v2639_v0 = vand.u32 2147483647, %v8039_v49 }
 0x96c   :  { %v2616_v23 = vmul.f32 %v8041_v52, %v2547_v42  ;;  %6499 = vpow2.f32 %v2535_v53  ;;  %v8046_v54 = vadd.f32 %v2490_v55, %v7943_v33  ;;  %vm2621_vm7 = vweird.f32 %v8041_v52 }
 0x96d   :  { %v2468_v31 = vpop.f32.mrf.mxu1  ;;  %6501 = vrcp.f32 %v2549_v34  ;;  %v2654_v5 = vand.u32 2147483647, %v2549_v34  ;;  %v2656_v48 = vand.u32 2147483648, %v2549_v34  ;;  %vm8078_vm12 = vmor %vm2620_vm5, %vm2621_vm7  ;;  %v2641_v46 = vand.u32 2147483648, %v8039_v49 }
 0x96e   :  { %v2617_v44 = vsub.f32 1.0, %v2616_v23  ;;  %v5724_v37 = vmul.f32 -1.702, %v8046_v54  ;;  %v8050_v17 = vadd.f32 %v2468_v31, %v7928_v20  ;;  %vm2650_vm1 = vweird.f32 %v2549_v34 }
 0x96f   :  { %vm2655_vm4 = vcmp.eq.f32.partialorder %v2654_v5, 8.507059e+37  ;;  %v2657_v22 = vor.u32 1.1754944e-38, %v2656_v48 }
 0x970   :  { %v6496_v61 = vpop.eup %6495  ;;  %v2537_v3 = vmul.f32 1.442695, %v5724_v37  ;;  %v2618_v25 = vmul.f32 %v8041_v52, %v2617_v44  ;;  %v5725_v20 = vmul.f32 -1.702, %v8050_v17  ;;  %v2642_v37 = vor.u32 1.1754944e-38, %v2641_v46 }
 0x971   :  { %v8052_v63 = vpop.eup %6497  ;;  %v8054_v16 = vadd.f32 1.0, %v6496_v61 }
 0x972   :  { %v6500_v11 = vpop.eup %6499  ;;  %v2631_v47 = vmul.f32 %v8052_v63, %v8039_v49  ;;  %v2619_v1 = vadd.f32 %v8041_v52, %v2618_v25  ;;  %vm2636_vm9 = vweird.f32 %v8052_v63  ;;  %v2539_v45 = vmul.f32 1.442695, %v5725_v20 }
 0x973   :  { %6503 = vrcp.f32 %v8054_v16  ;;  %v6502_v35 = vpop.eup %6501  ;;  %v8060_v50 = vadd.f32 1.0, %v6500_v11  ;;  %v2492_v6 = vpop.f32.mrf.mxu2  ;;  %vm8092_vm3 = vmor %vm2635_vm8, %vm2636_vm9  ;;  %v2669_v53 = vand.u32 2147483647, %v8054_v16  ;;  %vm2665_vm8 = vweird.f32 %v8054_v16 }
 0x974   :  { %v2632_v30 = vsub.f32 1.0, %v2631_v47  ;;  %6505 = vpow2.f32 %v2537_v3  ;;  %v2646_v56 = vmul.f32 %v6502_v35, %v2549_v34  ;;  %v8075_v60 = vadd.f32 %v2492_v6, %v7943_v33 }
 0x975   :  { %6507 = vrcp.f32 %v8060_v50  ;;  %vm2651_vm0 = vweird.f32 %v6502_v35  ;;  %v2623_v32 = vsel %vm8078_vm12, %v8041_v52, %v2619_v1  ;;  %v2671_v52 = vand.u32 2147483648, %v8054_v16 }
 0x976   :  { %v2633_v19 = vmul.f32 %v8052_v63, %v2632_v30  ;;  %v2647_v8 = vsub.f32 1.0, %v2646_v56  ;;  %6509 = vpow2.f32 %v2539_v45  ;;  %v5726_v7 = vmul.f32 -1.702, %v8075_v60  ;;  %vm2652_vm5 = vmor %vm2650_vm1, %vm2651_vm0 }
 0x977   :  { %v2628_v49 = vsel %vm8063_vm6, %v2627_v58, %v2623_v32  ;;  %vm2640_vm6 = vcmp.eq.f32.partialorder %v2639_v0, 8.507059e+37  ;;  %v2672_v25 = vor.u32 1.1754944e-38, %v2671_v52  ;;  %vm2670_vm12 = vcmp.eq.f32.partialorder %v2669_v53, 8.507059e+37 }
 0x978   :  { %v2634_v13 = vadd.f32 %v8052_v63, %v2633_v19  ;;  %v2648_v14 = vmul.f32 %v6502_v35, %v2647_v8  ;;  %v2541_v4 = vmul.f32 1.442695, %v5726_v7  ;;  %v2739_v3 = vmul.f32 %v2628_v49, %v7997_v57 }
 0x979   :  { %v6504_v51 = vpop.eup %6503  ;;  %vm2680_vm1 = vweird.f32 %v8060_v50 }
 0x97a   :  { %v6506_v2 = vpop.eup %6505  ;;  %v2661_v33 = vmul.f32 %v6504_v51, %v8054_v16  ;;  %v2649_v12 = vadd.f32 %v6502_v35, %v2648_v14  ;;  %v2638_v55 = vsel %vm8092_vm3, %v8052_v63, %v2634_v13  ;;  %vm2666_vm7 = vweird.f32 %v6504_v51 }
 0x97b   :  { %v8096_v36 = vadd.f32 1.0, %v6506_v2  ;;  %v8099_v39 = vpop.eup %6507  ;;  %v2643_v63 = vsel %vm2640_vm6, %v2642_v37, %v2638_v55  ;;  %vm2667_vm9 = vmor %vm2665_vm8, %vm2666_vm7 }
 0x97c   :  { %v2662_v26 = vsub.f32 1.0, %v2661_v33  ;;  %v2653_v23 = vsel %vm2652_vm5, %v6502_v35, %v2649_v12  ;;  %v2676_v44 = vmul.f32 %v8099_v39, %v8060_v50  ;;  %v6510_v62 = vpop.eup %6509  ;;  %vm2681_vm0 = vweird.f32 %v8099_v39 }
 0x97d   :  { %6511 = vrcp.f32 %v8096_v36  ;;  %v2658_v34 = vsel %vm2655_vm4, %v2657_v22, %v2653_v23  ;;  %v2553_v47 = vadd.f32 1.0, %v6510_v62  ;;  %vm2682_vm3 = vmor %vm2680_vm1, %vm2681_vm0  ;;  %v2701_v22 = vand.u32 2147483648, %v8096_v36 }
 0x97e   :  { %v2663_v31 = vmul.f32 %v6504_v51, %v2662_v26  ;;  %v2741_v61 = vmul.f32 %v2658_v34, %v8025_v15  ;;  %6513 = vpow2.f32 %v2541_v4  ;;  %v2677_v30 = vsub.f32 1.0, %v2676_v44 }
 0x97f   :  { %6515 = vrcp.f32 %v2553_v47  ;;  %v2740_v15 = vmul.f32 %v2643_v63, %v8018_v18  ;;  %v2686_v18 = vand.u32 2147483648, %v8060_v50  ;;  %v2716_v9 = vand.u32 2147483648, %v2553_v47 }
 0x980   :  { %v2664_v11 = vadd.f32 %v6504_v51, %v2663_v31  ;;  %v2749_v20 = vpack.c.bf16 %v2741_v61, %v2739_v3  ;;  %v2678_v16 = vmul.f32 %v8099_v39, %v2677_v30  ;;  %v2714_v14 = vand.u32 2147483647, %v2553_v47 }
 0x981   :  { %v2687_v2 = vor.u32 1.1754944e-38, %v2686_v18  ;;  %vm2710_vm6 = vweird.f32 %v2553_v47  ;;  %v2717_v7 = vor.u32 1.1754944e-38, %v2716_v9  ;;  %v2702_v37 = vor.u32 1.1754944e-38, %v2701_v22 }
 0x982   :  { %v2668_v35 = vsel %vm2667_vm9, %v6504_v51, %v2664_v11  ;;  %2895 = vmatmul.bf16.gmra.mxu3 %v2749_v20  ;;  %v2679_v5 = vadd.f32 %v8099_v39, %v2678_v16  ;;  %vm2715_vm9 = vcmp.eq.f32.partialorder %v2714_v14, 8.507059e+37 }
 0x983   :  { %v6512_v21 = vpop.eup %6511  ;;  %v2673_v58 = vsel %vm2670_vm12, %v2672_v25, %v2668_v35  ;;  %vm2695_vm12 = vweird.f32 %v8096_v36  ;;  %v2785_v25 = vld [vmem:[%s9259_s3 + $0x33] ss:$0 sm:$0xff] }
 0x984   :  { %v2742_v57 = vmul.f32 %v2673_v58, %v8032_v27  ;;  %v2691_v56 = vmul.f32 %v6512_v21, %v8096_v36  ;;  %v6514_v1 = vpop.eup %6513  ;;  %v2684_v27 = vand.u32 2147483647, %v8060_v50  ;;  %v2683_v13 = vsel %vm2682_vm3, %v8099_v39, %v2679_v5 }
 0x985   :  { %v2554_v19 = vadd.f32 1.0, %v6514_v1  ;;  %v6516_v0 = vpop.eup %6515  ;;  %vm2696_vm7 = vweird.f32 %v6512_v21  ;;  %v2699_v39 = vand.u32 2147483647, %v8096_v36 }
 0x986   :  { %v2750_v6 = vpack.c.bf16 %v2742_v57, %v2740_v15  ;;  %v2692_v8 = vsub.f32 1.0, %v2691_v56  ;;  %v2706_v48 = vmul.f32 %v6516_v0, %v2553_v47  ;;  %vm2711_vm4 = vweird.f32 %v6516_v0  ;;  %vm2697_vm0 = vmor %vm2695_vm12, %vm2696_vm7 }
 0x987   :  { %6517 = vrcp.f32 %v2554_v19  ;;  %vm2685_vm5 = vcmp.eq.f32.partialorder %v2684_v27, 8.507059e+37  ;;  %vm2712_vm8 = vmor %vm2710_vm6, %vm2711_vm4  ;;  %v2731_v23 = vand.u32 2147483648, %v2554_v19  ;;  %v2729_v44 = vand.u32 2147483647, %v2554_v19 }
 0x988   :  { %2919 = vmatmul.bf16.gmra.mxu0 %v2750_v6  ;;  %v2707_v45 = vsub.f32 1.0, %v2706_v48  ;;  %v2693_v51 = vmul.f32 %v6512_v21, %v2692_v8  ;;  %v2688_v42 = vsel %vm2685_vm5, %v2687_v2, %v2683_v13  ;;  %vm2700_vm3 = vcmp.eq.f32.partialorder %v2699_v39, 8.507059e+37 }
 0x989   :  { %v2743_v49 = vmul.f32 %v2688_v42, %v8036_v43  ;;  %vm2725_vm4 = vweird.f32 %v2554_v19  ;;  %v2732_v36 = vor.u32 1.1754944e-38, %v2731_v23  ;;  %vm2730_vm6 = vcmp.eq.f32.partialorder %v2729_v44, 8.507059e+37 }
 0x98a   :  { %v2708_v46 = vmul.f32 %v6516_v0, %v2707_v45  ;;  %v2694_v12 = vadd.f32 %v6512_v21, %v2693_v51  ;;  %vm5049_vm7 = vcmask 1041409  }
 0x98c   :  { %v2709_v33 = vadd.f32 %v6516_v0, %v2708_v46  ;;  %v2698_v34 = vsel %vm2697_vm0, %v6512_v21, %v2694_v12 }
 0x98d   :  { %v6518_v32 = vpop.eup %6517  ;;  %v2703_v62 = vsel %vm2700_vm3, %v2702_v37, %v2698_v34 }
 0x98e   :  { %v2721_v50 = vmul.f32 %v6518_v32, %v2554_v19  ;;  %v2713_v26 = vsel %vm2712_vm8, %v6516_v0, %v2709_v33  ;;  %vm2726_vm1 = vweird.f32 %v6518_v32  ;;  %v2744_v11 = vmul.f32 %v2703_v62, %v8046_v54 }
 0x98f   :  { %v2718_v53 = vsel %vm2715_vm9, %v2717_v7, %v2713_v26  ;;  %vm2727_vm5 = vmor %vm2725_vm4, %vm2726_vm1 }
 0x990   :  { %v2722_v52 = vsub.f32 1.0, %v2721_v50  ;;  %v2745_v55 = vmul.f32 %v2718_v53, %v8050_v17 }
 0x992   :  { %v2723_v31 = vmul.f32 %v6518_v32, %v2722_v52  ;;  %v2751_v61 = vpack.c.bf16 %v2745_v55, %v2743_v49 }
 0x994   :  { %v2724_v4 = vadd.f32 %v6518_v32, %v2723_v31  ;;  %2900 = vmatmul.bf16.gmra.mxu3 %v2751_v61 }
 0x996   :  { %v2728_v3 = vsel %vm2727_vm5, %v6518_v32, %v2724_v4 }
 0x997   :  { %v2733_v43 = vsel %vm2730_vm6, %v2732_v36, %v2728_v3 }
 0x998   :  { %v2746_v17 = vmul.f32 %v2733_v43, %v8075_v60 }
 0x99a   :  { %v2752_v63 = vpack.c.bf16 %v2746_v17, %v2744_v11 }
 0x99c   :  { %2924 = vmatmul.bf16.gmra.mxu0 %v2752_v63 }
 0x9e2   :  { %v2891_v47 = vpop.f32.mrf.mxu3  ;;  %v2915_v35 = vpop.f32.mrf.mxu0 }
 0x9e3   :  { %v2892_v30 = vadd.f32 %v2891_v47, %v2785_v25 }
 0x9e5   :  { %v2916_v20 = vadd.f32 %v2915_v35, %v2892_v30 }
 0x9e7   :  { %v8136_v21 = vadd.f32 %v2916_v20, %v7745_v29 }
 0x9e9   :  { %v2938_v58 = vsel %vm659_vm2, %v8136_v21, 0.0 }
 0x9ea   :  { %v2893_v15 = vpop.f32.mrf.mxu3  ;;  %2939 = vadd.xlane.f32.xlu2 %v2938_v58  ;;  %v2917_v60 = vpop.f32.mrf.mxu0 }
 0x9eb   :  { %v2894_v54 = vadd.f32 %v2893_v15, %v2785_v25 }
 0x9ed   :  { %v2918_v57 = vadd.f32 %v2917_v60, %v2894_v54  ;;  %v5826_v60 = vld [vmem:[%s9261_s4 + $0x70] sm:$0xf] }
 0x9ef   :  { %v8141_v56 = vadd.f32 %v2918_v57, %v7750_v24  ;;  %v6198_v57 = vld [vmem:[%s9261_s4 + $0x74] sm:$0xf0] }
 0x9f1   :  { %v2941_v16 = vsel %vm659_vm2, %v8141_v56, 0.0 }
 0x9f2   :  { %2942 = vadd.xlane.f32.xlu0 %v2941_v16  ;;  %v6197_v16 = vld [vmem:[%s9261_s4 + $0x74] sm:$0xf] }
 0xa05   :  { %v2896_v6 = vpop.f32.mrf.mxu3  ;;  %v2920_v1 = vpop.f32.mrf.mxu0 }
 0xa06   :  { %v2897_v19 = vadd.f32 %v2896_v6, %v2785_v25  ;;  %v5827_v6 = vor.u32 %v6198_v57, %v5826_v60 }
 0xa08   :  { %v2921_v29 = vadd.f32 %v2920_v1, %v2897_v19  ;;  %v5828_v1 = vld [vmem:[%s9261_s4 + $0x78] sm:$0xf0]  ;;  %3154 = vmatpush.bf16.msrb.mxu1 %v5827_v6 }
 0xa09   :  { %v5831_v19 = vor.u32 %v6197_v16, %v5828_v1 }
 0xa0a   :  { %v8146_v0 = vadd.f32 %v2921_v29, %v7755_v38  ;;  %v5818_v29 = vld [vmem:[%s9261_s4 + $0x60] sm:$0xf] }
 0xa0b   :  { %3178 = vmatpush.bf16.msrb.mxu2 %v5831_v19 }
 0xa0c   :  { %v2944_v8 = vsel %vm659_vm2, %v8146_v0, 0.0 }
 0xa0d   :  { %v2898_v5 = vpop.f32.mrf.mxu3  ;;  %2945 = vadd.xlane.f32.xlu1 %v2944_v8  ;;  %v2922_v18 = vpop.f32.mrf.mxu0  ;;  %v6196_v8 = vld [vmem:[%s9261_s4 + $0x64] sm:$0xf0] }
 0xa0e   :  { %v2899_v48 = vadd.f32 %v2898_v5, %v2785_v25  ;;  %v6195_v5 = vld [vmem:[%s9261_s4 + $0x64] sm:$0xf] }
 0xa10   :  { %v2923_v24 = vadd.f32 %v2922_v18, %v2899_v48  ;;  %v5819_v18 = vor.u32 %v6196_v8, %v5818_v29 }
 0xa12   :  { %v8151_v27 = vadd.f32 %v2923_v24, %v7760_v59  ;;  %v5820_v24 = vld [vmem:[%s9261_s4 + $0x68] sm:$0xf0]  ;;  %3155 = vmatpush.bf16.msrb.mxu1 %v5819_v18 }
 0xa14   :  { %v5331_v45 = vrot.slane %v8151_v27, 7  ;;  %v2947_v51 = vsel %vm659_vm2, %v8151_v27, 0.0 }
 0xa15   :  { %2948 = vadd.xlane.f32.xlu2 %v2947_v51  ;;  %v5823_v51 = vor.u32 %v6195_v5, %v5820_v24 }
 0xa16   :  { %v5332_v38 = vsel %vm5049_vm7, %v5331_v45, %v8136_v21 }
 0xa17   :  { %v5334_v9 = vsel %vm659_vm2, %v5332_v38, 0.0  ;;  %v2901_v13 = vpop.f32.mrf.mxu3  ;;  %3179 = vmatpush.bf16.msrb.mxu2 %v5823_v51 }
 0xa18   :  { %5335 = vst [vmem:[%s9265_s11] sm:$0x3] %v5334_v9  ;;  %v2902_v46 = vadd.f32 %v2901_v13, %v2785_v25  ;;  %v5810_v9 = vld [vmem:[%s9261_s4 + $0x50] sm:$0xf]  ;;  %v6194_v13 = vld [vmem:[%s9261_s4 + $0x54] sm:$0xf0] }
 0xa19   :  { %v2925_v59 = vpop.f32.mrf.mxu0 }
 0xa1a   :  { %v2926_v14 = vadd.f32 %v2925_v59, %v2902_v46  ;;  %v5811_v46 = vor.u32 %v6194_v13, %v5810_v9  ;;  %v6193_v59 = vld [vmem:[%s9261_s4 + $0x54] sm:$0xf] }
 0xa1c   :  { %v8163_v2 = vadd.f32 %v2926_v14, %v7765_v40  ;;  %v5812_v14 = vld [vmem:[%s9261_s4 + $0x58] sm:$0xf0]  ;;  %3156 = vmatpush.bf16.msrb.mxu1 %v5811_v46 }
 0xa1e   :  { %v2950_v32 = vsel %vm659_vm2, %v8163_v2, 0.0 }
 0xa1f   :  { %v2903_v33 = vpop.f32.mrf.mxu3  ;;  %2951 = vadd.xlane.f32.xlu0 %v2950_v32  ;;  %v5815_v32 = vor.u32 %v6193_v59, %v5812_v14 }
 0xa20   :  { %v2904_v42 = vadd.f32 %v2903_v33, %v2785_v25  ;;  %v5802_v33 = vld [vmem:[%s9261_s4 + $0x40] sm:$0xf] }
 0xa21   :  { %v2927_v12 = vpop.f32.mrf.mxu0  ;;  %3180 = vmatpush.bf16.msrb.mxu2 %v5815_v32 }
 0xa22   :  { %v2928_v7 = vadd.f32 %v2927_v12, %v2904_v42  ;;  %v6192_v42 = vld [vmem:[%s9261_s4 + $0x44] sm:$0xf0]  ;;  %v6191_v12 = vld [vmem:[%s9261_s4 + $0x44] sm:$0xf] }
 0xa24   :  { %v8168_v50 = vadd.f32 %v2928_v7, %v7770_v28 }
 0xa26   :  { %v2953_v22 = vsel %vm659_vm2, %v8168_v50, 0.0 }
 0xa27   :  { %2954 = vadd.xlane.f32.xlu1 %v2953_v22  ;;  %v5803_v22 = vor.u32 %v6192_v42, %v5802_v33 }
 0xa29   :  { %3157 = vmatpush.bf16.msrb.mxu1 %v5803_v22 }
 0xa5d   :  { %v2940_v26 = vpop.xlane.xlu2 %2939 }
 0xa5e   :  { %v2956_v39 = vmul.f32 %v2940_v26, %v7013_v41  ;;  %v5804_v26 = vld [vmem:[%s9261_s4 + $0x48] sm:$0xf0] }
 0xa60   :  { %v8174_v40 = vsub.f32 %v8136_v21, %v2956_v39 }
 0xa62   :  { %v2968_v53 = vmul.f32 %v8174_v40, %v8174_v40 }
 0xa64   :  { %v2974_v52 = vsel %vm659_vm2, %v2968_v53, 0.0  ;;  %v5807_v53 = vor.u32 %v6191_v12, %v5804_v26 }
 0xa65   :  { %v2943_v49 = vpop.xlane.xlu0 %2942  ;;  %2975 = vadd.xlane.f32.xlu2 %v2974_v52 }
 0xa66   :  { %v2957_v28 = vmul.f32 %v2943_v49, %v7013_v41  ;;  %3181 = vmatpush.bf16.msrb.mxu2 %v5807_v53 }
 0xa68   :  { %v8181_v55 = vsub.f32 %v8141_v56, %v2957_v28 }
 0xa6a   :  { %v2969_v23 = vmul.f32 %v8181_v55, %v8181_v55 }
 0xa6c   :  { %v2977_v34 = vsel %vm659_vm2, %v2969_v23, 0.0 }
 0xa6d   :  { %2978 = vadd.xlane.f32.xlu0 %v2977_v34 }
 0xa80   :  { %v2946_v31 = vpop.xlane.xlu1 %2945 }
 0xa81   :  { %v2958_v44 = vmul.f32 %v2946_v31, %v7013_v41 }
 0xa83   :  { %v8188_v37 = vsub.f32 %v8146_v0, %v2958_v44 }
 0xa85   :  { %v2970_v61 = vmul.f32 %v8188_v37, %v8188_v37 }
 0xa87   :  { %v2980_v4 = vsel %vm659_vm2, %v2970_v61, 0.0 }
 0xa88   :  { %2981 = vadd.xlane.f32.xlu1 %v2980_v4  ;;  %v2949_v62 = vpop.xlane.xlu2 %2948 }
 0xa89   :  { %v2959_v36 = vmul.f32 %v2949_v62, %v7013_v41 }
 0xa8b   :  { %v8195_v3 = vsub.f32 %v8151_v27, %v2959_v36 }
 0xa8d   :  { %v2971_v43 = vmul.f32 %v8195_v3, %v8195_v3 }
 0xa8f   :  { %v2983_v11 = vsel %vm659_vm2, %v2971_v43, 0.0 }
 0xa90   :  { %2984 = vadd.xlane.f32.xlu2 %v2983_v11 }
 0xa92   :  { %v2952_v17 = vpop.xlane.xlu0 %2951 }
 0xa93   :  { %v2960_v63 = vmul.f32 %v2952_v17, %v7013_v41 }
 0xa95   :  { %v8202_v25 = vsub.f32 %v8163_v2, %v2960_v63  ;;  %v8268_v63 = vld [vmem:[%s9259_s3 + $0x34] ss:$0 sm:$0xff] }
 0xa97   :  { %v2972_v47 = vmul.f32 %v8202_v25, %v8202_v25 }
 0xa99   :  { %v2986_v35 = vsel %vm659_vm2, %v2972_v47, 0.0 }
 0xa9a   :  { %2987 = vadd.xlane.f32.xlu0 %v2986_v35  ;;  %v2955_v30 = vpop.xlane.xlu1 %2954 }
 0xa9b   :  { %v2961_v20 = vmul.f32 %v2955_v30, %v7013_v41 }
 0xa9d   :  { %v8209_v58 = vsub.f32 %v8168_v50, %v2961_v20 }
 0xa9f   :  { %v2973_v15 = vmul.f32 %v8209_v58, %v8209_v58 }
 0xaa1   :  { %v2989_v54 = vsel %vm659_vm2, %v2973_v15, 0.0  ;;  %v8275_v15 = vld [vmem:[%s9259_s3 + $0x35] ss:$0 sm:$0xff] }
 0xaa2   :  { %2990 = vadd.xlane.f32.xlu1 %v2989_v54 }
 0xad8   :  { %v2976_v48 = vpop.xlane.xlu2 %2975 }
 0xad9   :  { %v2992_v45 = vmul.f32 %v2976_v48, %v7013_v41 }
 0xadb   :  { %v2998_v38 = vadd.f32 1e-05, %v2992_v45 }
 0xadd   :  { %6519 = vrsqrt.f32 %v2998_v38  ;;  %vm3010_vm9 = vweird.f32 %v2998_v38 }
 0xae0   :  { %v2979_v7 = vpop.xlane.xlu0 %2978 }
 0xae1   :  { %v2993_v39 = vmul.f32 %v2979_v7, %v7013_v41 }
 0xae3   :  { %v6520_v52 = vpop.eup %6519  ;;  %v2999_v49 = vadd.f32 1e-05, %v2993_v39 }
 0xae4   :  { %v3005_v28 = vmul.f32 %v6520_v52, %v2998_v38  ;;  %vm3011_vm8 = vweird.f32 %v6520_v52 }
 0xae5   :  { %6521 = vrsqrt.f32 %v2999_v49  ;;  %vm3012_vm12 = vmor %vm3010_vm9, %vm3011_vm8  ;;  %vm3020_vm1 = vweird.f32 %v2999_v49 }
 0xae6   :  { %v3006_v23 = vmul.f32 %v6520_v52, %v3005_v28 }
 0xae8   :  { %v3007_v34 = vmul.f32 0.5, %v3006_v23 }
 0xaea   :  { %v3008_v31 = vsub.f32 1.5, %v3007_v34 }
 0xaeb   :  { %v6522_v44 = vpop.eup %6521 }
 0xaec   :  { %v3009_v61 = vmul.f32 %v6520_v52, %v3008_v31  ;;  %v3015_v4 = vmul.f32 %v6522_v44, %v2999_v49  ;;  %vm3021_vm0 = vweird.f32 %v6522_v44 }
 0xaed   :  { %vm3022_vm3 = vmor %vm3020_vm1, %vm3021_vm0 }
 0xaee   :  { %v3016_v62 = vmul.f32 %v6522_v44, %v3015_v4  ;;  %v3013_v36 = vsel %vm3012_vm12, %v6520_v52, %v3009_v61 }
 0xaef   :  { %v3064_v17 = vmul.f32 %v3013_v36, %v8174_v40 }
 0xaf0   :  { %v3017_v43 = vmul.f32 0.5, %v3016_v62 }
 0xaf1   :  { %v3070_v30 = vmul.f32 %v3064_v17, %v8268_v63 }
 0xaf2   :  { %v3018_v11 = vsub.f32 1.5, %v3017_v43 }
 0xaf3   :  { %v3076_v54 = vadd.f32 %v3070_v30, %v8275_v15 }
 0xaf4   :  { %v3019_v47 = vmul.f32 %v6522_v44, %v3018_v11 }
 0xaf6   :  { %v3023_v35 = vsel %vm3022_vm3, %v6522_v44, %v3019_v47 }
 0xaf7   :  { %v3065_v20 = vmul.f32 %v3023_v35, %v8181_v55 }
 0xaf9   :  { %v3071_v40 = vmul.f32 %v3065_v20, %v8268_v63 }
 0xafb   :  { %v3077_v60 = vadd.f32 %v3071_v40, %v8275_v15  ;;  %v2982_v57 = vpop.xlane.xlu1 %2981 }
 0xafc   :  { %v2994_v16 = vmul.f32 %v2982_v57, %v7013_v41 }
 0xafd   :  { %v3082_v6 = vpack.c.bf16 %v3077_v60, %v3076_v54 }
 0xafe   :  { %v3000_v1 = vadd.f32 1e-05, %v2994_v16 }
 0xaff   :  { %5832 = vmatmul.msk.bf16.vlgmr.msrb.gmra.mxu1 %vm659_vm2, %v3082_v6  ;;  %5835 = vmatmul.msk.bf16.vlgmr.msrb.gmra.mxu2 %vm659_vm2, %v3082_v6 }
 0xb00   :  { %6523 = vrsqrt.f32 %v3000_v1  ;;  %vm3030_vm5 = vweird.f32 %v3000_v1 }
 0xb03   :  { %v2985_v55 = vpop.xlane.xlu2 %2984 }
 0xb04   :  { %v2995_v19 = vmul.f32 %v2985_v55, %v7013_v41 }
 0xb06   :  { %v6524_v29 = vpop.eup %6523  ;;  %v3001_v8 = vadd.f32 1e-05, %v2995_v19 }
 0xb07   :  { %v3025_v5 = vmul.f32 %v6524_v29, %v3000_v1  ;;  %vm3031_vm4 = vweird.f32 %v6524_v29 }
 0xb08   :  { %6525 = vrsqrt.f32 %v3001_v8  ;;  %vm3032_vm6 = vmor %vm3030_vm5, %vm3031_vm4  ;;  %vm3040_vm9 = vweird.f32 %v3001_v8 }
 0xb09   :  { %v3026_v48 = vmul.f32 %v6524_v29, %v3025_v5 }
 0xb0b   :  { %v3027_v18 = vmul.f32 0.5, %v3026_v48 }
 0xb0d   :  { %v3028_v24 = vsub.f32 1.5, %v3027_v18  ;;  %v2988_v9 = vpop.xlane.xlu0 %2987 }
 0xb0e   :  { %v6526_v45 = vpop.eup %6525  ;;  %v2996_v13 = vmul.f32 %v2988_v9, %v7013_v41 }
 0xb0f   :  { %v3029_v51 = vmul.f32 %v6524_v29, %v3028_v24  ;;  %v3035_v38 = vmul.f32 %v6526_v45, %v3001_v8  ;;  %vm3041_vm8 = vweird.f32 %v6526_v45 }
 0xb10   :  { %v3002_v59 = vadd.f32 1e-05, %v2996_v13  ;;  %vm3042_vm12 = vmor %vm3040_vm9, %vm3041_vm8 }
 0xb11   :  { %v3036_v46 = vmul.f32 %v6526_v45, %v3035_v38  ;;  %v3033_v14 = vsel %vm3032_vm6, %v6524_v29, %v3029_v51 }
 0xb12   :  { %6527 = vrsqrt.f32 %v3002_v59  ;;  %v3066_v42 = vmul.f32 %v3033_v14, %v8188_v37  ;;  %vm3050_vm1 = vweird.f32 %v3002_v59 }
 0xb13   :  { %v3037_v32 = vmul.f32 0.5, %v3036_v46 }
 0xb14   :  { %v3072_v49 = vmul.f32 %v3066_v42, %v8268_v63 }
 0xb15   :  { %v3038_v33 = vsub.f32 1.5, %v3037_v32  ;;  %v2991_v7 = vpop.xlane.xlu1 %2990 }
 0xb16   :  { %v2997_v22 = vmul.f32 %v2991_v7, %v7013_v41  ;;  %v3078_v37 = vadd.f32 %v3072_v49, %v8275_v15 }
 0xb17   :  { %v3039_v12 = vmul.f32 %v6526_v45, %v3038_v33 }
 0xb18   :  { %v6528_v39 = vpop.eup %6527  ;;  %v3003_v52 = vadd.f32 1e-05, %v2997_v22 }
 0xb19   :  { %v3043_v26 = vsel %vm3042_vm12, %v6526_v45, %v3039_v12  ;;  %v3045_v28 = vmul.f32 %v6528_v39, %v3002_v59  ;;  %vm3051_vm0 = vweird.f32 %v6528_v39 }
 0xb1a   :  { %v3067_v53 = vmul.f32 %v3043_v26, %v8195_v3  ;;  %6529 = vrsqrt.f32 %v3003_v52  ;;  %vm3052_vm3 = vmor %vm3050_vm1, %vm3051_vm0  ;;  %vm3060_vm5 = vweird.f32 %v3003_v52 }
 0xb1b   :  { %v3046_v34 = vmul.f32 %v6528_v39, %v3045_v28 }
 0xb1c   :  { %v3073_v23 = vmul.f32 %v3067_v53, %v8268_v63 }
 0xb1d   :  { %v3047_v44 = vmul.f32 0.5, %v3046_v34 }
 0xb1e   :  { %v3079_v31 = vadd.f32 %v3073_v23, %v8275_v15 }
 0xb1f   :  { %v3048_v4 = vsub.f32 1.5, %v3047_v44 }
 0xb20   :  { %v3083_v61 = vpack.c.bf16 %v3079_v31, %v3078_v37  ;;  %v6530_v62 = vpop.eup %6529 }
 0xb21   :  { %v3049_v3 = vmul.f32 %v6528_v39, %v3048_v4  ;;  %v3055_v36 = vmul.f32 %v6530_v62, %v3003_v52  ;;  %vm3061_vm4 = vweird.f32 %v6530_v62 }
 0xb22   :  { %5833 = vmatmul.msk.bf16.gmra.mxu1 %vm659_vm2, %v3083_v61  ;;  %5836 = vmatmul.msk.bf16.gmra.mxu2 %vm659_vm2, %v3083_v61  ;;  %vm3062_vm6 = vmor %vm3060_vm5, %vm3061_vm4 }
 0xb23   :  { %v3056_v43 = vmul.f32 %v6530_v62, %v3055_v36  ;;  %v3053_v11 = vsel %vm3052_vm3, %v6528_v39, %v3049_v3 }
 0xb24   :  { %v3068_v35 = vmul.f32 %v3053_v11, %v8202_v25  ;;  %v5799_v25 = vld [vmem:[%s9259_s3 + $0x40] ss:$8 sm:$0x3] }
 0xb25   :  { %v3057_v17 = vmul.f32 0.5, %v3056_v43  ;;  %v3097_v55 = vperm.slane %v5799_v25, 0  ;;  %v8309_v9 = vperm.slane %v5799_v25, 1 }
 0xb26   :  { %v3074_v54 = vmul.f32 %v3068_v35, %v8268_v63 }
 0xb27   :  { %v3058_v47 = vsub.f32 1.5, %v3057_v17 }
 0xb28   :  { %v3080_v57 = vadd.f32 %v3074_v54, %v8275_v15 }
 0xb29   :  { %v3059_v30 = vmul.f32 %v6530_v62, %v3058_v47 }
 0xb2b   :  { %v3063_v20 = vsel %vm3062_vm6, %v6530_v62, %v3059_v30 }
 0xb2c   :  { %v3069_v40 = vmul.f32 %v3063_v20, %v8209_v58 }
 0xb2e   :  { %v3075_v60 = vmul.f32 %v3069_v40, %v8268_v63 }
 0xb30   :  { %v3081_v16 = vadd.f32 %v3075_v60, %v8275_v15 }
 0xb32   :  { %v3084_v6 = vpack.c.bf16 %v3081_v16, %v3080_v57 }
 0xb34   :  { %5834 = vmatmul.msk.bf16.gmra.mxu1 %vm659_vm2, %v3084_v6  ;;  %5837 = vmatmul.msk.bf16.gmra.mxu2 %vm659_vm2, %v3084_v6 }
 0xb7c   :  { %v3159_v1 = vpop.f32.mrf.mxu1 }
 0xb7d   :  { %v3160_v58 = vadd.f32 %v3159_v1, %v3097_v55 }
 0xb7f   :  { %v3198_v29 = vpack.c.bf16 %v3160_v58, %v3160_v58 }
 0xb81   :  { %v3213_v5 = vunpack.c.l.b16 %v3198_v29 }
 0xb82   :  { %v3183_v15 = vpop.f32.mrf.mxu2 }
 0xb83   :  { %v3184_v33 = vadd.f32 %v3183_v15, %v8309_v9 }
 0xb84   :  { %v3161_v19 = vpop.f32.mrf.mxu1 }
 0xb85   :  { %v3162_v8 = vadd.f32 %v3161_v19, %v3097_v55  ;;  %v3204_v26 = vpack.c.bf16 %v3184_v33, %v3184_v33 }
 0xb87   :  { %v3199_v63 = vpack.c.bf16 %v3162_v8, %v3162_v8  ;;  %v3389_v49 = vunpack.c.l.b16 %v3204_v26 }
 0xb89   :  { %v3214_v48 = vunpack.c.l.b16 %v3199_v63 }
 0xb8a   :  { %v3185_v24 = vpop.f32.mrf.mxu2 }
 0xb8b   :  { %v8305_v18 = vpack.c.b16 %v3214_v48, %v3213_v5  ;;  %v3186_v46 = vadd.f32 %v3185_v24, %v8309_v9 }
 0xb8d   :  { %3218 = vrot.lane.b32.xlu0 %v8305_v18, %s6696_s17  ;;  %v3205_v12 = vpack.c.bf16 %v3186_v46, %v3186_v46 }
 0xb8f   :  { %v3390_v53 = vunpack.c.l.b16 %v3205_v12 }
 0xb91   :  { %v8324_v23 = vpack.c.b16 %v3390_v53, %v3389_v49 }
 0xb9f   :  { %v3164_v45 = vpop.f32.mrf.mxu1 }
 0xba0   :  { %v3165_v51 = vadd.f32 %v3164_v45, %v3097_v55 }
 0xba2   :  { %v3200_v38 = vpack.c.bf16 %v3165_v51, %v3165_v51 }
 0xba4   :  { %v3215_v13 = vunpack.c.l.b16 %v3200_v38 }
 0xba5   :  { %v3188_v59 = vpop.f32.mrf.mxu2 }
 0xba6   :  { %v8312_v14 = vpack.c.b16 %v3215_v13, %v3215_v13  ;;  %v3189_v32 = vadd.f32 %v3188_v59, %v8309_v9 }
 0xba7   :  { %v3166_v7 = vpop.f32.mrf.mxu1 }
 0xba8   :  { %v3206_v42 = vpack.c.bf16 %v3189_v32, %v3189_v32  ;;  %3220 = vrot.lane.b32.xlu2 %v8312_v14, %s6696_s17  ;;  %v3167_v28 = vadd.f32 %v3166_v7, %v3097_v55 }
 0xbaa   :  { %v3391_v22 = vunpack.c.l.b16 %v3206_v42  ;;  %v3201_v37 = vpack.c.bf16 %v3167_v28, %v3167_v28 }
 0xbac   :  { %v8318_v39 = vpack.c.b16 %v3391_v22, %v3391_v22  ;;  %v3255_v61 = vunpack.c.l.b16 %v3201_v37 }
 0xbad   :  { %v3190_v47 = vpop.f32.mrf.mxu2 }
 0xbae   :  { %v3402_v52 = vsel %vm1281_vm10, %v8318_v39, 0  ;;  %v3191_v20 = vadd.f32 %v3190_v47, %v8309_v9 }
 0xbaf   :  { %3410 = vmatpush.bf16.msra.mxu1 %v3402_v52 }
 0xbb0   :  { %3472 = vrot.lane.b32.xlu2 %v8312_v14, %s6697_s18  ;;  %v3207_v54 = vpack.c.bf16 %v3191_v20, %v3191_v20 }
 0xbb1   :  { %v3169_v34 = vpop.f32.mrf.mxu1 }
 0xbb2   :  { %v3170_v31 = vadd.f32 %v3169_v34, %v3097_v55  ;;  %v3433_v57 = vunpack.c.l.b16 %v3207_v54 }
 0xbb3   :  { %3411 = vmatpush.bf16.msra.mxu1 %v8324_v23 }
 0xbb4   :  { %v3202_v44 = vpack.c.bf16 %v3170_v31, %v3170_v31 }
 0xbb6   :  { %v3256_v4 = vunpack.c.l.b16 %v3202_v44 }
 0xbb7   :  { %v3193_v35 = vpop.f32.mrf.mxu2 }
 0xbb8   :  { %v8327_v62 = vpack.c.b16 %v3256_v4, %v3255_v61  ;;  %v3194_v30 = vadd.f32 %v3193_v35, %v8309_v9 }
 0xbb9   :  { %v3171_v3 = vpop.f32.mrf.mxu1 }
 0xbba   :  { %v3172_v36 = vadd.f32 %v3171_v3, %v3097_v55  ;;  %3260 = vrot.lane.b32.xlu0 %v8327_v62, %s6696_s17  ;;  %v3208_v40 = vpack.c.bf16 %v3194_v30, %v3194_v30 }
 0xbbc   :  { %v3203_v43 = vpack.c.bf16 %v3172_v36, %v3172_v36  ;;  %v3434_v60 = vunpack.c.l.b16 %v3208_v40 }
 0xbbe   :  { %v3257_v11 = vunpack.c.l.b16 %v3203_v43  ;;  %v8377_v6 = vpack.c.b16 %v3434_v60, %v3433_v57 }
 0xbbf   :  { %v3195_v16 = vpop.f32.mrf.mxu2 }
 0xbc0   :  { %v8331_v17 = vpack.c.b16 %v3257_v11, %v3257_v11  ;;  %v3196_v25 = vadd.f32 %v3195_v16, %v8309_v9 }
 0xbc2   :  { %3262 = vrot.lane.b32.xlu1 %v8331_v17, %s6696_s17  ;;  %3466 = vrot.lane.b32.xlu0 %v8305_v18, %s6698_s2  ;;  %v3209_v1 = vpack.c.bf16 %v3196_v25, %v3196_v25 }
 0xbc3   :  { %3510 = vrot.lane.b32.xlu2 %v8331_v17, %s6697_s18 }
 0xbc4   :  { %v3435_v19 = vunpack.c.l.b16 %v3209_v1 }
 0xbc6   :  { %v8389_v29 = vpack.c.b16 %v3435_v19, %v3435_v19 }
 0xbc8   :  { %v3446_v15 = vsel %vm1281_vm10, %v8389_v29, 0 }
 0xbca   :  { %3470 = vrot.lane.b32.xlu1 %v8305_v18, %s6697_s18  ;;  %3508 = vrot.lane.b32.xlu0 %v8327_v62, %s6697_s18 }
 0xbcb   :  { %3712 = vrot.lane.b32.xlu2 %v8312_v14, %s6699_s19 }
 0xbd2   :  { %3710 = vrot.lane.b32.xlu0 %v8305_v18, %s6699_s19  ;;  %3468 = vrot.lane.b32.xlu1 %v8312_v14, %s6698_s2 }
 0xbd3   :  { %3706 = vrot.lane.b32.xlu2 %v8305_v18, %s6702_s21 }
 0xbda   :  { %3952 = vrot.lane.b32.xlu0 %v8312_v14, %s6700_s1  ;;  %3504 = vrot.lane.b32.xlu1 %v8327_v62, %s6698_s2 }
 0xbdb   :  { %3708 = vrot.lane.b32.xlu2 %v8312_v14, %s6702_s21 }
 0xbe2   :  { %3946 = vrot.lane.b32.xlu0 %v8305_v18, %s6701_s20  ;;  %3506 = vrot.lane.b32.xlu1 %v8331_v17, %s6698_s2 }
 0xbe3   :  { %3744 = vrot.lane.b32.xlu2 %v8327_v62, %s6702_s21 }
 0xbea   :  { %3988 = vrot.lane.b32.xlu0 %v8327_v62, %s6700_s1  ;;  %3748 = vrot.lane.b32.xlu1 %v8327_v62, %s6699_s19 }
 0xbeb   :  { %3984 = vrot.lane.b32.xlu2 %v8327_v62, %s6701_s20 }
 0xbf2   :  { %3750 = vrot.lane.b32.xlu0 %v8331_v17, %s6699_s19  ;;  %3950 = vrot.lane.b32.xlu1 %v8305_v18, %s6700_s1 }
 0xbf3   :  { %3636 = vrot.lane.b32.xlu2 %v8318_v39, %s6698_s2 }
 0xbfa   :  { %3674 = vrot.lane.b32.xlu0 %v8377_v6, %s6698_s2  ;;  %3948 = vrot.lane.b32.xlu1 %v8312_v14, %s6701_s20 }
 0xbfb   :  { %3746 = vrot.lane.b32.xlu2 %v8331_v17, %s6702_s21 }
 0xbff   :  { %v3219_v8 = vpop.permute.xlu0 %3218 }
 0xc00   :  { %v3229_v5 = vsel %vm1100_vm11, %v3219_v8, 0 }
 0xc02   :  { %v3221_v55 = vpop.permute.xlu2 %3220  ;;  %3990 = vrot.lane.b32.xlu1 %v8331_v17, %s6700_s1 }
 0xc03   :  { %v3232_v58 = vsel %vm1100_vm11, %v3221_v55, 0 }
 0xc04   :  { %3240 = vmatpush.bf16.xpose.msrb.mxu3 %v3232_v58 }
 0xc0a   :  { %v3473_v63 = vpop.permute.xlu2 %3472  ;;  %3634 = vrot.lane.b32.xlu1 %v8324_v23, %s6698_s2 }
 0xc0b   :  { %v3484_v48 = vsel %vm1100_vm11, %v3473_v63, 0 }
 0xc0c   :  { %3241 = vmatpush.bf16.xpose.msrb.mxu3 %v3229_v5  ;;  %3492 = vmatpush.bf16.xpose.msra.mxu2 %v3484_v48 }
 0xc12   :  { %3676 = vrot.lane.b32.xlu1 %v8389_v29, %s6698_s2 }
 0xc13   :  { %5838 = vmatmul.msk.bf16.vlgmr.msrb.gmra.mxu3 %vm1100_vm11, %v8305_v18 }
 0xc14   :  { %3454 = vmatpush.bf16.msra.mxu3 %v3446_v15 }
 0xc18   :  { %3455 = vmatpush.bf16.msra.mxu3 %v8377_v6 }
 0xc1d   :  { %v3511_v24 = vpop.permute.xlu2 %3510 }
 0xc1e   :  { %v3522_v7 = vsel %vm1100_vm11, %v3511_v24, 0 }
 0xc23   :  { %5839 = vmatmul.msk.bf16.gmra.mxu3 %vm1100_vm11, %v8312_v14 }
 0xc25   :  { %v3713_v45 = vpop.permute.xlu2 %3712 }
 0xc26   :  { %v3724_v14 = vsel %vm1100_vm11, %v3713_v45, 0 }
 0xc2c   :  { %v3261_v51 = vpop.permute.xlu0 %3260 }
 0xc2d   :  { %v3707_v38 = vpop.permute.xlu2 %3706  ;;  %v3271_v18 = vsel %vm1100_vm11, %v3261_v51, 0 }
 0xc34   :  { %v3263_v9 = vpop.permute.xlu1 %3262  ;;  %v3467_v13 = vpop.permute.xlu0 %3466 }
 0xc35   :  { %v3274_v46 = vsel %vm1100_vm11, %v3263_v9, 0  ;;  %v3709_v59 = vpop.permute.xlu2 %3708 }
 0xc36   :  { %3282 = vmatpush.bf16.xpose.msra.mxu0 %v3274_v46 }
 0xc3c   :  { %v3471_v32 = vpop.permute.xlu1 %3470  ;;  %v3509_v33 = vpop.permute.xlu0 %3508 }
 0xc3d   :  { %v3481_v42 = vsel %vm1100_vm11, %v3471_v32, 0  ;;  %v3745_v12 = vpop.permute.xlu2 %3744  ;;  %v3519_v49 = vsel %vm1100_vm11, %v3509_v33, 0 }
 0xc3e   :  { %3283 = vmatpush.bf16.xpose.msra.mxu0 %v3271_v18  ;;  %3493 = vmatpush.bf16.xpose.msra.mxu2 %v3481_v42 }
 0xc44   :  { %v3711_v22 = vpop.permute.xlu0 %3710  ;;  %v3469_v26 = vpop.permute.xlu1 %3468 }
 0xc45   :  { %v3721_v53 = vsel %vm1100_vm11, %v3711_v22, 0  ;;  %v3985_v52 = vpop.permute.xlu2 %3984  ;;  %5840 = vmatmul.msk.bf16.vlgmr.msra.gmra.mxu0 %vm1100_vm11, %v8327_v62  ;;  %5846 = vmatmul.msk.bf16.vlgmr.msra.gmra.mxu2 %vm1100_vm11, %v3467_v13 }
 0xc46   :  { %3530 = vmatpush.bf16.xpose.msrb.mxu0 %v3522_v7  ;;  %3732 = vmatpush.bf16.xpose.msrb.mxu2 %v3724_v14 }
 0xc4c   :  { %v3953_v28 = vpop.permute.xlu0 %3952  ;;  %v3505_v34 = vpop.permute.xlu1 %3504 }
 0xc4d   :  { %v3964_v37 = vsel %vm1100_vm11, %v3953_v28, 0  ;;  %v3637_v31 = vpop.permute.xlu2 %3636 }
 0xc4e   :  { %3531 = vmatpush.bf16.xpose.msrb.mxu0 %v3519_v49  ;;  %3733 = vmatpush.bf16.xpose.msrb.mxu2 %v3721_v53  ;;  %v3646_v44 = vsel %vm1281_vm10, %v3637_v31, 0 }
 0xc4f   :  { %3654 = vmatpush.bf16.msrb.mxu1 %v3646_v44 }
 0xc54   :  { %v3947_v61 = vpop.permute.xlu0 %3946  ;;  %v3507_v4 = vpop.permute.xlu1 %3506 }
 0xc55   :  { %5841 = vmatmul.msk.bf16.gmra.mxu0 %vm1100_vm11, %v8331_v17  ;;  %5847 = vmatmul.msk.bf16.gmra.mxu2 %vm1100_vm11, %v3469_v26  ;;  %v3747_v1 = vpop.permute.xlu2 %3746 }
 0xc56   :  { %3972 = vmatpush.bf16.xpose.msra.mxu2 %v3964_v37 }
 0xc5c   :  { %v3989_v62 = vpop.permute.xlu0 %3988  ;;  %v3749_v3 = vpop.permute.xlu1 %3748 }
 0xc5d   :  { %v3759_v30 = vsel %vm1100_vm11, %v3749_v3, 0  ;;  %v3999_v60 = vsel %vm1100_vm11, %v3989_v62, 0 }
 0xc64   :  { %v3751_v36 = vpop.permute.xlu0 %3750  ;;  %v3951_v43 = vpop.permute.xlu1 %3950 }
 0xc65   :  { %v3762_v11 = vsel %vm1100_vm11, %v3751_v36, 0  ;;  %v3961_v47 = vsel %vm1100_vm11, %v3951_v43, 0  ;;  %5848 = vmatmul.msk.bf16.vlgmr.msrb.gmra.mxu0 %vm1100_vm11, %v3505_v34  ;;  %5854 = vmatmul.msk.bf16.vlgmr.msrb.gmra.mxu2 %vm1100_vm11, %v3707_v38 }
 0xc66   :  { %3770 = vmatpush.bf16.xpose.msra.mxu0 %v3762_v11  ;;  %3973 = vmatpush.bf16.xpose.msra.mxu2 %v3961_v47 }
 0xc6c   :  { %v3949_v35 = vpop.permute.xlu1 %3948  ;;  %v3675_v25 = vpop.permute.xlu0 %3674 }
 0xc6e   :  { %3771 = vmatpush.bf16.xpose.msra.mxu0 %v3759_v30 }
 0xc74   :  { %v3991_v20 = vpop.permute.xlu1 %3990 }
 0xc75   :  { %v4002_v40 = vsel %vm1100_vm11, %v3991_v20, 0  ;;  %5849 = vmatmul.msk.bf16.gmra.mxu0 %vm1100_vm11, %v3507_v4  ;;  %5855 = vmatmul.msk.bf16.gmra.mxu2 %vm1100_vm11, %v3709_v59 }
 0xc76   :  { %4010 = vmatpush.bf16.xpose.msrb.mxu0 %v4002_v40 }
 0xc7c   :  { %v3635_v54 = vpop.permute.xlu1 %3634 }
 0xc7d   :  { %3655 = vmatpush.bf16.msrb.mxu1 %v3635_v54 }
 0xc7e   :  { %4011 = vmatpush.bf16.xpose.msrb.mxu0 %v3999_v60 }
 0xc84   :  { %v3677_v57 = vpop.permute.xlu1 %3676 }
 0xc85   :  { %v3686_v16 = vsel %vm1281_vm10, %v3677_v57, 0  ;;  %5856 = vmatmul.msk.bf16.vlgmr.msra.gmra.mxu0 %vm1100_vm11, %v3745_v12  ;;  %5862 = vmatmul.msk.bf16.vlgmr.msra.gmra.mxu2 %vm1100_vm11, %v3947_v61 }
 0xc86   :  { %3694 = vmatpush.bf16.msrb.mxu3 %v3686_v16 }
 0xc8a   :  { %3695 = vmatpush.bf16.msrb.mxu3 %v3675_v25 }
 0xc95   :  { %5857 = vmatmul.msk.bf16.gmra.mxu0 %vm1100_vm11, %v3747_v1  ;;  %5863 = vmatmul.msk.bf16.gmra.mxu2 %vm1100_vm11, %v3949_v35 }
 0xc96   :  { %v3243_v55 = vpop.f32.mrf.mxu3 }
 0xc97   :  { %v3294_v58 = vmul.f32 0.25, %v3243_v55 }
 0xc99   :  { %v8434_v19 = vadd.f32 %v3294_v58, %v7375_v10 }
 0xc9b   :  { %v3306_v8 = vsel %vm1185_vm13, %v8434_v19, -inf }
 0xc9c   :  { %3307 = vmax.xlane.f32.xlu0 %v3306_v8 }
 0xc9e   :  { %v3245_v63 = vpop.f32.mrf.mxu3 }
 0xc9f   :  { %v3295_v5 = vmul.f32 0.25, %v3245_v63 }
 0xca1   :  { %v8439_v48 = vadd.f32 %v3295_v5, %v7375_v10 }
 0xca3   :  { %v3309_v15 = vsel %vm1185_vm13, %v8439_v48, -inf }
 0xca4   :  { %3310 = vmax.xlane.f32.xlu2 %v3309_v15 }
 0xca5   :  { %5864 = vmatmul.msk.bf16.vlgmr.msrb.gmra.mxu0 %vm1100_vm11, %v3985_v52 }
 0xca6   :  { %v3248_v24 = vpop.f32.mrf.mxu3 }
 0xca7   :  { %v3296_v32 = vmul.f32 0.25, %v3248_v24 }
 0xca9   :  { %v8455_v7 = vadd.f32 %v3296_v32, %v7375_v10 }
 0xcab   :  { %v3312_v52 = vsel %vm1185_vm13, %v8455_v7, -inf }
 0xcae   :  { %v3250_v45 = vpop.f32.mrf.mxu3 }
 0xcc2   :  { %v3285_v51 = vpop.f32.mrf.mxu0 }
 0xcc3   :  { %v3297_v53 = vmul.f32 0.25, %v3285_v51 }
 0xcc5   :  { %v8465_v34 = vadd.f32 %v3297_v53, %v7375_v10 }
 0xcc7   :  { %v3315_v61 = vsel %vm1185_vm13, %v8465_v34, -inf }
 0xcc8   :  { %v3495_v38 = vpop.f32.mrf.mxu2 }
 0xcc9   :  { %v3542_v9 = vmul.f32 0.25, %v3495_v38 }
 0xcca   :  { %v3287_v13 = vpop.f32.mrf.mxu0 }
 0xccb   :  { %v8445_v46 = vadd.f32 %v3542_v9, %v7375_v10  ;;  %v3298_v59 = vmul.f32 0.25, %v3287_v13 }
 0xccd   :  { %v8448_v33 = vadd.f32 %v3298_v59, %v7375_v10  ;;  %v3554_v18 = vsel %vm1185_vm13, %v8445_v46, -inf }
 0xcce   :  { %3555 = vmax.xlane.f32.xlu1 %v3554_v18 }
 0xccf   :  { %v3318_v42 = vsel %vm1185_vm13, %v8448_v33, -inf }
 0xcd0   :  { %3319 = vmax.xlane.f32.xlu2 %v3318_v42  ;;  %v3497_v12 = vpop.f32.mrf.mxu2 }
 0xcd1   :  { %v3543_v14 = vmul.f32 0.25, %v3497_v12 }
 0xcd2   :  { %v3290_v22 = vpop.f32.mrf.mxu0 }
 0xcd3   :  { %v8458_v26 = vadd.f32 %v3543_v14, %v7375_v10  ;;  %v3299_v40 = vmul.f32 0.25, %v3290_v22 }
 0xcd5   :  { %v3557_v49 = vsel %vm1185_vm13, %v8458_v26, -inf  ;;  %v8485_v57 = vadd.f32 %v3299_v40, %v7375_v10 }
 0xcd6   :  { %3313 = vmax.xlane.f32.xlu1 %v3312_v52  ;;  %3558 = vmax.xlane.f32.xlu0 %v3557_v49 }
 0xcd7   :  { %v3321_v8 = vsel %vm1185_vm13, %v8485_v57, -inf }
 0xcd8   :  { %v3500_v28 = vpop.f32.mrf.mxu2 }
 0xcd9   :  { %v3544_v37 = vmul.f32 0.25, %v3500_v28 }
 0xcda   :  { %v3292_v31 = vpop.f32.mrf.mxu0 }
 0xcdb   :  { %v8468_v44 = vadd.f32 %v3544_v37, %v7375_v10 }
 0xcdd   :  { %v3560_v4 = vsel %vm1185_vm13, %v8468_v44, -inf }
 0xcde   :  { %3316 = vmax.xlane.f32.xlu0 %v3315_v61  ;;  %3561 = vmax.xlane.f32.xlu1 %v3560_v4 }
 0xce0   :  { %v3502_v62 = vpop.f32.mrf.mxu2 }
 0xce2   :  { %v3533_v3 = vpop.f32.mrf.mxu0 }
 0xce3   :  { %v3545_v36 = vmul.f32 0.25, %v3533_v3 }
 0xce5   :  { %v8475_v43 = vadd.f32 %v3545_v36, %v7375_v10 }
 0xce7   :  { %v3563_v11 = vsel %vm1185_vm13, %v8475_v43, -inf }
 0xce8   :  { %3564 = vmax.xlane.f32.xlu0 %v3563_v11  ;;  %v3735_v47 = vpop.f32.mrf.mxu2 }
 0xce9   :  { %v3782_v35 = vmul.f32 0.25, %v3735_v47 }
 0xcea   :  { %v3535_v30 = vpop.f32.mrf.mxu0 }
 0xceb   :  { %v8480_v20 = vadd.f32 %v3782_v35, %v7375_v10  ;;  %v3546_v38 = vmul.f32 0.25, %v3535_v30 }
 0xced   :  { %v3794_v54 = vsel %vm1185_vm13, %v8480_v20, -inf  ;;  %v8505_v59 = vadd.f32 %v3546_v38, %v7375_v10 }
 0xcee   :  { %3795 = vmax.xlane.f32.xlu2 %v3794_v54 }
 0xcef   :  { %v3566_v18 = vsel %vm1185_vm13, %v8505_v59, -inf }
 0xcf0   :  { %v3737_v60 = vpop.f32.mrf.mxu2 }
 0xcf1   :  { %v3783_v16 = vmul.f32 0.25, %v3737_v60 }
 0xcf2   :  { %v3538_v25 = vpop.f32.mrf.mxu0 }
 0xcf3   :  { %v8488_v1 = vadd.f32 %v3783_v16, %v7375_v10  ;;  %v3547_v55 = vmul.f32 0.25, %v3538_v25 }
 0xcf5   :  { %v8491_v58 = vadd.f32 %v3547_v55, %v7375_v10  ;;  %v3797_v63 = vsel %vm1185_vm13, %v8488_v1, -inf }
 0xcf6   :  { %3322 = vmax.xlane.f32.xlu2 %v3321_v8  ;;  %3798 = vmax.xlane.f32.xlu1 %v3797_v63 }
 0xcf7   :  { %v3569_v5 = vsel %vm1185_vm13, %v8491_v58, -inf }
 0xcf8   :  { %3570 = vmax.xlane.f32.xlu0 %v3569_v5  ;;  %v3740_v15 = vpop.f32.mrf.mxu2 }
 0xcf9   :  { %v3784_v24 = vmul.f32 0.25, %v3740_v15 }
 0xcfa   :  { %v3540_v45 = vpop.f32.mrf.mxu0 }
 0xcfb   :  { %v8500_v51 = vadd.f32 %v3784_v24, %v7375_v10 }
 0xcfd   :  { %v3800_v9 = vsel %vm1185_vm13, %v8500_v51, -inf }
 0xcfe   :  { %3801 = vmax.xlane.f32.xlu2 %v3800_v9 }
 0xd00   :  { %v3742_v13 = vpop.f32.mrf.mxu2 }
 0xd02   :  { %v3773_v32 = vpop.f32.mrf.mxu0 }
 0xd03   :  { %v3785_v53 = vmul.f32 0.25, %v3773_v32 }
 0xd05   :  { %v8515_v28 = vadd.f32 %v3785_v53, %v7375_v10 }
 0xd06   :  { %3567 = vmax.xlane.f32.xlu2 %v3566_v18 }
 0xd07   :  { %v3803_v3 = vsel %vm1185_vm13, %v8515_v28, -inf }
 0xd08   :  { %v3975_v42 = vpop.f32.mrf.mxu2 }
 0xd09   :  { %v4022_v12 = vmul.f32 0.25, %v3975_v42 }
 0xd0a   :  { %v3775_v14 = vpop.f32.mrf.mxu0 }
 0xd0b   :  { %v8510_v22 = vadd.f32 %v4022_v12, %v7375_v10  ;;  %v3786_v4 = vmul.f32 0.25, %v3775_v14 }
 0xd0d   :  { %v4034_v52 = vsel %vm1185_vm13, %v8510_v22, -inf  ;;  %v8525_v11 = vadd.f32 %v3786_v4, %v7375_v10 }
 0xd0e   :  { %4035 = vmax.xlane.f32.xlu1 %v4034_v52 }
 0xd0f   :  { %v3806_v60 = vsel %vm1185_vm13, %v8525_v11, -inf  ;;  %v3308_v63 = vpop.xlane.xlu0 %3307 }
 0xd10   :  { %v3977_v49 = vpop.f32.mrf.mxu2  ;;  %v3324_v45 = vsub.f32 %v8434_v19, %v3308_v63 }
 0xd11   :  { %v4023_v37 = vmul.f32 0.25, %v3977_v49 }
 0xd12   :  { %v3778_v31 = vpop.f32.mrf.mxu0  ;;  %v3330_v13 = vmul.f32 1.442695, %v3324_v45 }
 0xd13   :  { %v8518_v61 = vadd.f32 %v4023_v37, %v7375_v10  ;;  %v3787_v40 = vmul.f32 0.25, %v3778_v31 }
 0xd15   :  { %v4037_v62 = vsel %vm1185_vm13, %v8518_v61, -inf  ;;  %v8535_v25 = vadd.f32 %v3787_v40, %v7375_v10 }
 0xd16   :  { %4038 = vmax.xlane.f32.xlu0 %v4037_v62  ;;  %3804 = vmax.xlane.f32.xlu1 %v3803_v3 }
 0xd17   :  { %v3311_v55 = vpop.xlane.xlu2 %3310  ;;  %v3809_v24 = vsel %vm1185_vm13, %v8535_v25, -inf }
 0xd18   :  { %v3980_v36 = vpop.f32.mrf.mxu2  ;;  %v3325_v5 = vsub.f32 %v8439_v48, %v3311_v55 }
 0xd19   :  { %v4024_v47 = vmul.f32 0.25, %v3980_v36 }
 0xd1a   :  { %v3780_v35 = vpop.f32.mrf.mxu0  ;;  %v3332_v38 = vmul.f32 1.442695, %v3325_v5 }
 0xd1b   :  { %v8528_v30 = vadd.f32 %v4024_v47, %v7375_v10 }
 0xd1c   :  { %6531 = vpow2.f32 %v3332_v38 }
 0xd1d   :  { %v4040_v54 = vsel %vm1185_vm13, %v8528_v30, -inf  ;;  %6533 = vpow2.f32 %v3330_v13 }
 0xd1e   :  { %4041 = vmax.xlane.f32.xlu2 %v4040_v54  ;;  %3807 = vmax.xlane.f32.xlu0 %v3806_v60 }
 0xd20   :  { %v3982_v16 = vpop.f32.mrf.mxu2 }
 0xd22   :  { %v4013_v8 = vpop.f32.mrf.mxu0  ;;  %v8551_v12 = vpop.eup %6531 }
 0xd23   :  { %v4025_v15 = vmul.f32 0.25, %v4013_v8  ;;  %v8553_v14 = vpop.eup %6533  ;;  %v3345_v53 = vsel %vm1185_vm13, %v8551_v12, 0.0 }
 0xd24   :  { %v3342_v52 = vsel %vm1185_vm13, %v8553_v14, 0.0 }
 0xd25   :  { %v8542_v9 = vadd.f32 %v4025_v15, %v7375_v10 }
 0xd26   :  { %3810 = vmax.xlane.f32.xlu0 %v3809_v24 }
 0xd27   :  { %v4043_v48 = vsel %vm1185_vm13, %v8542_v9, -inf }
 0xd2a   :  { %v4015_v32 = vpop.f32.mrf.mxu0 }
 0xd2b   :  { %v4026_v18 = vmul.f32 0.25, %v4015_v32 }
 0xd2d   :  { %v8545_v42 = vadd.f32 %v4026_v18, %v7375_v10 }
 0xd2e   :  { %4044 = vmax.xlane.f32.xlu0 %v4043_v48 }
 0xd2f   :  { %v4046_v19 = vsel %vm1185_vm13, %v8545_v42, -inf }
 0xd30   :  { %4047 = vmax.xlane.f32.xlu1 %v4046_v19 }
 0xd36   :  { %3346 = vadd.xlane.f32.xlu0 %v3345_v53 }
 0xd38   :  { %3343 = vadd.xlane.f32.xlu1 %v3342_v52 }
 0xd41   :  { %v3556_v49 = vpop.xlane.xlu1 %3555 }
 0xd42   :  { %v3572_v37 = vsub.f32 %v8445_v46, %v3556_v49 }
 0xd43   :  { %v3320_v13 = vpop.xlane.xlu2 %3319 }
 0xd44   :  { %v3578_v31 = vmul.f32 1.442695, %v3572_v37 }
 0xd46   :  { %6535 = vpow2.f32 %v3578_v31 }
 0xd49   :  { %v3314_v4 = vpop.xlane.xlu1 %3313  ;;  %v3559_v62 = vpop.xlane.xlu0 %3558 }
 0xd4a   :  { %v3326_v3 = vsub.f32 %v8455_v7, %v3314_v4  ;;  %v3573_v36 = vsub.f32 %v8458_v26, %v3559_v62 }
 0xd4c   :  { %v8562_v47 = vpop.eup %6535  ;;  %v3334_v35 = vmul.f32 1.442695, %v3326_v3  ;;  %v3580_v40 = vmul.f32 1.442695, %v3573_v36 }
 0xd4d   :  { %v3590_v54 = vsel %vm1185_vm13, %v8562_v47, 0.0 }
 0xd4e   :  { %6537 = vpow2.f32 %v3334_v35  ;;  %3591 = vadd.xlane.f32.xlu2 %v3590_v54  ;;  %v3328_v35 = vsub.f32 %v8448_v33, %v3320_v13 }
 0xd4f   :  { %6539 = vpow2.f32 %v3580_v40 }
 0xd51   :  { %v3317_v60 = vpop.xlane.xlu0 %3316  ;;  %v3562_v46 = vpop.xlane.xlu1 %3561 }
 0xd52   :  { %v3327_v16 = vsub.f32 %v8465_v34, %v3317_v60  ;;  %v3574_v55 = vsub.f32 %v8468_v44, %v3562_v46  ;;  %v3338_v60 = vmul.f32 1.442695, %v3328_v35 }
 0xd54   :  { %v8568_v8 = vpop.eup %6537  ;;  %v3336_v7 = vmul.f32 1.442695, %v3327_v16  ;;  %v3582_v26 = vmul.f32 1.442695, %v3574_v55 }
 0xd55   :  { %v8570_v63 = vpop.eup %6539  ;;  %v3348_v5 = vsel %vm1185_vm13, %v8568_v8, 0.0 }
 0xd56   :  { %6541 = vpow2.f32 %v3336_v7  ;;  %3349 = vadd.xlane.f32.xlu2 %v3348_v5  ;;  %v3593_v15 = vsel %vm1185_vm13, %v8570_v63, 0.0 }
 0xd57   :  { %6543 = vpow2.f32 %v3582_v26  ;;  %3594 = vadd.xlane.f32.xlu1 %v3593_v15 }
 0xd5b   :  { %v3565_v38 = vpop.xlane.xlu0 %3564 }
 0xd5c   :  { %v8576_v24 = vpop.eup %6541  ;;  %v3575_v37 = vsub.f32 %v8475_v43, %v3565_v38 }
 0xd5d   :  { %v8578_v34 = vpop.eup %6543  ;;  %v3351_v44 = vsel %vm1185_vm13, %v8576_v24, 0.0 }
 0xd5e   :  { %v3596_v45 = vsel %vm1185_vm13, %v8578_v34, 0.0  ;;  %v3584_v62 = vmul.f32 1.442695, %v3575_v37 }
 0xd5f   :  { %3352 = vadd.xlane.f32.xlu1 %v3351_v44  ;;  %3597 = vadd.xlane.f32.xlu0 %v3596_v45 }
 0xd61   :  { %v3796_v48 = vpop.xlane.xlu2 %3795 }
 0xd62   :  { %v3812_v53 = vsub.f32 %v8480_v20, %v3796_v48 }
 0xd64   :  { %v3818_v52 = vmul.f32 1.442695, %v3812_v53 }
 0xd66   :  { %6545 = vpow2.f32 %v3818_v52 }
 0xd67   :  { %6547 = vpow2.f32 %v3584_v62 }
 0xd69   :  { %v3799_v32 = vpop.xlane.xlu1 %3798  ;;  %v3323_v43 = vpop.xlane.xlu2 %3322 }
 0xd6a   :  { %v3329_v33 = vsub.f32 %v8485_v57, %v3323_v43 }
 0xd6b   :  { %v3571_v18 = vpop.xlane.xlu0 %3570 }
 0xd6c   :  { %v8597_v36 = vpop.eup %6545  ;;  %v3577_v54 = vsub.f32 %v8491_v58, %v3571_v18  ;;  %v3340_v15 = vmul.f32 1.442695, %v3329_v33 }
 0xd6d   :  { %v3830_v20 = vsel %vm1185_vm13, %v8597_v36, 0.0  ;;  %v8604_v55 = vpop.eup %6547 }
 0xd6e   :  { %3874 = vrot.lane.b32.xlu2 %v8324_v23, %s6702_s21  ;;  %v3588_v46 = vmul.f32 1.442695, %v3577_v54  ;;  %v3599_v5 = vsel %vm1185_vm13, %v8604_v55, 0.0 }
 0xd71   :  { %v3802_v52 = vpop.xlane.xlu2 %3801 }
 0xd73   :  { %3916 = vrot.lane.b32.xlu0 %v8389_v29, %s6702_s21 }
 0xd78   :  { %3876 = vrot.lane.b32.xlu1 %v8318_v39, %s6702_s21 }
 0xd7b   :  { %3914 = vrot.lane.b32.xlu0 %v8377_v6, %s6702_s21 }
 0xd81   :  { %v8592_v19 = vpop.xlane.xlu1 %4035 }
 0xd89   :  { %v4039_v49 = vpop.xlane.xlu0 %4038  ;;  %v3805_v31 = vpop.xlane.xlu1 %3804 }
 0xd8a   :  { %v3815_v4 = vsub.f32 %v8515_v28, %v3805_v31  ;;  %v4053_v58 = vsub.f32 %v8518_v61, %v4039_v49  ;;  %v3813_v61 = vsub.f32 %v8488_v1, %v3799_v32 }
 0xd8c   :  { %v3824_v40 = vmul.f32 1.442695, %v3815_v4  ;;  %v3820_v37 = vmul.f32 1.442695, %v3813_v61 }
 0xd8e   :  { %6549 = vpow2.f32 %v3824_v40 }
 0xd8f   :  { %6551 = vpow2.f32 %v3338_v60  ;;  %v3568_v60 = vpop.xlane.xlu2 %3567 }
 0xd90   :  { %6553 = vpow2.f32 %v3588_v46 }
 0xd91   :  { %v3808_v3 = vpop.xlane.xlu0 %3807 }
 0xd92   :  { %v3816_v48 = vsub.f32 %v8525_v11, %v3808_v3  ;;  %v3814_v11 = vsub.f32 %v8500_v51, %v3802_v52 }
 0xd94   :  { %v8608_v26 = vpop.eup %6549  ;;  %v3826_v1 = vmul.f32 1.442695, %v3816_v48  ;;  %v3822_v54 = vmul.f32 1.442695, %v3814_v11 }
 0xd95   :  { %v8612_v44 = vpop.eup %6551  ;;  %v3839_v57 = vsel %vm1185_vm13, %v8608_v26, 0.0 }
 0xd96   :  { %v8618_v38 = vpop.eup %6553  ;;  %v3354_v18 = vsel %vm1185_vm13, %v8612_v44, 0.0 }
 0xd97   :  { %3831 = vadd.xlane.f32.xlu2 %v3830_v20  ;;  %v3605_v49 = vsel %vm1185_vm13, %v8618_v38, 0.0 }
 0xd99   :  { %v3811_v16 = vpop.xlane.xlu0 %3810 }
 0xd9a   :  { %v3817_v28 = vsub.f32 %v8535_v25, %v3811_v16  ;;  %v4060_v25 = vmul.f32 1.442695, %v4053_v58 }
 0xd9c   :  { %v3828_v7 = vmul.f32 1.442695, %v3817_v28  ;;  %v3576_v28 = vsub.f32 %v8505_v59, %v3568_v60  ;;  %v4052_v59 = vsub.f32 %v8510_v22, %v8592_v19 }
 0xd9e   :  { %6555 = vpow2.f32 %v3828_v7  ;;  %v4058_v52 = vmul.f32 1.442695, %v4052_v59 }
 0xd9f   :  { %3600 = vadd.xlane.f32.xlu2 %v3599_v5  ;;  %6557 = vpow2.f32 %v3340_v15 }
 0xda0   :  { %6559 = vpow2.f32 %v4060_v25  ;;  %v3586_v25 = vmul.f32 1.442695, %v3576_v28 }
 0xda1   :  { %v8614_v45 = vpop.xlane.xlu0 %4044 }
 0xda2   :  { %3840 = vadd.xlane.f32.xlu1 %v3839_v57 }
 0xda3   :  { %v8621_v13 = vpop.xlane.xlu1 %4047 }
 0xda4   :  { %v8626_v53 = vpop.eup %6555 }
 0xda5   :  { %3355 = vadd.xlane.f32.xlu0 %v3354_v18  ;;  %v8630_v31 = vpop.eup %6557  ;;  %v3845_v32 = vsel %vm1185_vm13, %v8626_v53, 0.0  ;;  %v4042_v18 = vpop.xlane.xlu2 %4041 }
 0xda6   :  { %v8634_v62 = vpop.eup %6559  ;;  %v3357_v35 = vsel %vm1185_vm13, %v8630_v31, 0.0  ;;  %v4054_v60 = vsub.f32 %v8528_v30, %v4042_v18 }
 0xda7   :  { %3606 = vadd.xlane.f32.xlu2 %v3605_v49  ;;  %v4073_v40 = vsel %vm1185_vm13, %v8634_v62, 0.0 }
 0xda8   :  { %v4062_v28 = vmul.f32 1.442695, %v4054_v60 }
 0xda9   :  { %v3347_v4 = vpop.xlane.xlu0 %3346 }
 0xdaa   :  { %3846 = vadd.xlane.f32.xlu1 %v3845_v32  ;;  %6561 = vrcp.f32 %v3347_v4 }
 0xdab   :  { %6563 = vpow2.f32 %v3820_v37  ;;  %v3344_v3 = vpop.xlane.xlu1 %3343 }
 0xdac   :  { %6565 = vrcp.f32 %v3344_v3 }
 0xdad   :  { %6567 = vpow2.f32 %v3826_v1  ;;  %3358 = vadd.xlane.f32.xlu0 %v3357_v35 }
 0xdae   :  { %6569 = vpow2.f32 %v3822_v54 }
 0xdaf   :  { %4074 = vadd.xlane.f32.xlu2 %v4073_v40  ;;  %6571 = vpow2.f32 %v3586_v25 }
 0xdb0   :  { %v6562_v20 = vpop.eup %6561  ;;  %6573 = vpow2.f32 %v4058_v52 }
 0xdb1   :  { %v8641_v43 = vpop.eup %6563  ;;  %v3367_v46 = vmul.f32 %v6562_v20, %v8551_v12 }
 0xdb2   :  { %v6566_v16 = vpop.eup %6565  ;;  %v3833_v58 = vsel %vm1185_vm13, %v8641_v43, 0.0 }
 0xdb3   :  { %v8644_v51 = vpop.eup %6567  ;;  %v3373_v33 = vpack.c.bf16 %v3367_v46, %v3367_v46  ;;  %v3366_v7 = vmul.f32 %v6566_v16, %v8553_v14 }
 0xdb4   :  { %v3842_v15 = vsel %vm1185_vm13, %v8644_v51, 0.0  ;;  %v8652_v61 = vpop.eup %6569 }
 0xdb5   :  { %v3372_v5 = vpack.c.bf16 %v3366_v7, %v3366_v7  ;;  %3834 = vadd.xlane.f32.xlu0 %v3833_v58  ;;  %v3382_v57 = vunpack.c.l.b16 %v3373_v33  ;;  %v3836_v14 = vsel %vm1185_vm13, %v8652_v61, 0.0  ;;  %v8659_v49 = vpop.eup %6571 }
 0xdb6   :  { %v3602_v1 = vsel %vm1185_vm13, %v8659_v49, 0.0  ;;  %v8665_v32 = vpop.eup %6573 }
 0xdb7   :  { %v3381_v12 = vunpack.c.l.b16 %v3372_v5  ;;  %3843 = vadd.xlane.f32.xlu2 %v3842_v15  ;;  %v4070_v19 = vsel %vm1185_vm13, %v8665_v32, 0.0  ;;  %v4055_v15 = vsub.f32 %v8542_v9, %v8614_v45 }
 0xdb9   :  { %v3384_v48 = vpack.c.b16 %v3382_v57, %v3381_v12 }
 0xdbb   :  { %5842 = vmatmul.msk.bf16.vlgmr.msra.gmra.mxu1 %vm1185_vm13, %v3384_v48 }
 0xdbd   :  { %3837 = vadd.xlane.f32.xlu0 %v3836_v14 }
 0xdc1   :  { %v3592_v37 = vpop.xlane.xlu2 %3591 }
 0xdc3   :  { %4114 = vrot.lane.b32.xlu1 %v8324_v23, %s6701_s20 }
 0xdc5   :  { %3603 = vadd.xlane.f32.xlu0 %v3602_v1 }
 0xdc9   :  { %v3350_v22 = vpop.xlane.xlu2 %3349 }
 0xdca   :  { %6575 = vrcp.f32 %v3350_v22  ;;  %v3595_v4 = vpop.xlane.xlu1 %3594 }
 0xdcb   :  { %6577 = vrcp.f32 %v3595_v4 }
 0xdcc   :  { %6579 = vrcp.f32 %v3592_v37 }
 0xdcd   :  { %4071 = vadd.xlane.f32.xlu0 %v4070_v19 }
 0xdcf   :  { %4116 = vrot.lane.b32.xlu2 %v8318_v39, %s6701_s20 }
 0xdd0   :  { %v6576_v11 = vpop.eup %6575 }
 0xdd1   :  { %v3368_v3 = vmul.f32 %v6576_v11, %v8568_v8  ;;  %v6578_v54 = vpop.eup %6577  ;;  %v3875_v9 = vpop.permute.xlu2 %3874 }
 0xdd2   :  { %v6580_v20 = vpop.eup %6579  ;;  %v3615_v46 = vmul.f32 %v6578_v54, %v8570_v63  ;;  %v3598_v33 = vpop.xlane.xlu0 %3597 }
 0xdd3   :  { %v3374_v23 = vpack.c.bf16 %v3368_v3, %v3368_v3  ;;  %v3614_v16 = vmul.f32 %v6580_v20, %v8562_v47  ;;  %v3353_v8 = vpop.xlane.xlu1 %3352  ;;  %6581 = vrcp.f32 %v3598_v33  ;;  %v4064_v47 = vmul.f32 1.442695, %v4055_v15 }
 0xdd4   :  { %v3621_v39 = vpack.c.bf16 %v3615_v46, %v3615_v46  ;;  %6583 = vpow2.f32 %v4062_v28 }
 0xdd5   :  { %v3383_v35 = vunpack.c.l.b16 %v3374_v23  ;;  %v3620_v7 = vpack.c.bf16 %v3614_v16, %v3614_v16  ;;  %6585 = vpow2.f32 %v4064_v47 }
 0xdd6   :  { %v3630_v58 = vunpack.c.l.b16 %v3621_v39 }
 0xdd7   :  { %v3385_v40 = vpack.c.b16 %v3383_v35, %v3383_v35  ;;  %v3629_v5 = vunpack.c.l.b16 %v3620_v7 }
 0xdd9   :  { %5843 = vmatmul.msk.bf16.gmra.mxu1 %vm1185_vm13, %v3385_v40  ;;  %v3632_v30 = vpack.c.b16 %v3630_v58, %v3629_v5  ;;  %v6582_v25 = vpop.eup %6581 }
 0xdda   :  { %v8680_v63 = vpop.eup %6583  ;;  %v3616_v12 = vmul.f32 %v6582_v25, %v8578_v34  ;;  %v4056_v34 = vsub.f32 %v8545_v42, %v8621_v13 }
 0xddb   :  { %v4076_v18 = vsel %vm1185_vm13, %v8680_v63, 0.0  ;;  %v8687_v59 = vpop.eup %6585 }
 0xddc   :  { %v3622_v48 = vpack.c.bf16 %v3616_v12, %v3616_v12  ;;  %v4079_v14 = vsel %vm1185_vm13, %v8687_v59, 0.0  ;;  %v4066_v37 = vmul.f32 1.442695, %v4056_v34 }
 0xdde   :  { %v3631_v45 = vunpack.c.l.b16 %v3622_v48  ;;  %6587 = vpow2.f32 %v4066_v37 }
 0xddf   :  { %6589 = vrcp.f32 %v3353_v8 }
 0xde0   :  { %v3633_v52 = vpack.c.b16 %v3631_v45, %v3631_v45 }
 0xde1   :  { %4156 = vrot.lane.b32.xlu0 %v8389_v29, %s6701_s20 }
 0xde4   :  { %v8694_v22 = vpop.eup %6587 }
 0xde5   :  { %v3917_v1 = vpop.permute.xlu0 %3916  ;;  %v4082_v19 = vsel %vm1185_vm13, %v8694_v22, 0.0  ;;  %v6590_v35 = vpop.eup %6589 }
 0xde6   :  { %v3369_v42 = vmul.f32 %v6590_v35, %v8576_v24  ;;  %v3926_v24 = vsel %vm1281_vm10, %v3917_v1, 0 }
 0xde8   :  { %v3375_v54 = vpack.c.bf16 %v3369_v42, %v3369_v42 }
 0xde9   :  { %5850 = vmatmul.msk.bf16.vlgmr.msrb.gmra.mxu1 %vm1185_vm13, %v3632_v30 }
 0xdea   :  { %v3877_v57 = vpop.permute.xlu1 %3876  ;;  %v3425_v28 = vunpack.c.l.b16 %v3375_v54 }
 0xdeb   :  { %v3886_v29 = vsel %vm1281_vm10, %v3877_v57, 0 }
 0xdec   :  { %3894 = vmatpush.bf16.msra.mxu1 %v3886_v29 }
 0xded   :  { %4077 = vadd.xlane.f32.xlu1 %v4076_v18  ;;  %v3915_v11 = vpop.permute.xlu0 %3914 }
 0xdf0   :  { %3895 = vmatpush.bf16.msra.mxu1 %v3875_v9 }
 0xdf8   :  { %4080 = vadd.xlane.f32.xlu2 %v4079_v14 }
 0xdf9   :  { %5851 = vmatmul.msk.bf16.gmra.mxu1 %vm1185_vm13, %v3633_v52 }
 0xe0a   :  { %v3832_v4 = vpop.xlane.xlu2 %3831 }
 0xe0b   :  { %4083 = vadd.xlane.f32.xlu0 %v4082_v19 }
 0xe12   :  { %v3601_v3 = vpop.xlane.xlu2 %3600 }
 0xe15   :  { %v8702_v33 = vpop.xlane.xlu1 %3840 }
 0xe18   :  { %v3356_v23 = vpop.xlane.xlu0 %3355 }
 0xe19   :  { %6591 = vrcp.f32 %v3356_v23 }
 0xe1a   :  { %v3607_v40 = vpop.xlane.xlu2 %3606 }
 0xe1d   :  { %v8708_v57 = vpop.xlane.xlu1 %3846 }
 0xe1f   :  { %v6592_v13 = vpop.eup %6591  ;;  %4154 = vrot.lane.b32.xlu0 %v8377_v6, %s6701_s20 }
 0xe20   :  { %v3370_v20 = vmul.f32 %v6592_v13, %v8612_v44  ;;  %v3359_v60 = vpop.xlane.xlu0 %3358 }
 0xe21   :  { %6593 = vrcp.f32 %v3359_v60 }
 0xe22   :  { %v3376_v46 = vpack.c.bf16 %v3370_v20, %v3370_v20  ;;  %v4075_v16 = vpop.xlane.xlu2 %4074  ;;  %6595 = vrcp.f32 %v3832_v4 }
 0xe24   :  { %v3426_v39 = vunpack.c.l.b16 %v3376_v46 }
 0xe26   :  { %v3428_v7 = vpack.c.b16 %v3426_v39, %v3425_v28 }
 0xe27   :  { %v6594_v8 = vpop.eup %6593 }
 0xe28   :  { %5844 = vmatmul.msk.bf16.vlgmr.msra.gmra.mxu3 %vm1185_vm13, %v3428_v7  ;;  %v3835_v58 = vpop.xlane.xlu0 %3834  ;;  %v6596_v6 = vpop.eup %6595  ;;  %v3371_v44 = vmul.f32 %v6594_v8, %v8630_v31 }
 0xe29   :  { %3934 = vmatpush.bf16.msra.mxu3 %v3926_v24  ;;  %6597 = vrcp.f32 %v3835_v58  ;;  %v3854_v15 = vmul.f32 %v6596_v6, %v8597_v36 }
 0xe2a   :  { %v3844_v5 = vpop.xlane.xlu2 %3843  ;;  %v3377_v30 = vpack.c.bf16 %v3371_v44, %v3371_v44 }
 0xe2b   :  { %v3860_v47 = vpack.c.bf16 %v3854_v15, %v3854_v15 }
 0xe2c   :  { %v3427_v9 = vunpack.c.l.b16 %v3377_v30 }
 0xe2d   :  { %3935 = vmatpush.bf16.msra.mxu3 %v3915_v11  ;;  %v3869_v31 = vunpack.c.l.b16 %v3860_v47 }
 0xe2e   :  { %v3429_v52 = vpack.c.b16 %v3427_v9, %v3427_v9 }
 0xe2f   :  { %v6598_v25 = vpop.eup %6597 }
 0xe30   :  { %v3855_v12 = vmul.f32 %v6598_v25, %v8641_v43  ;;  %v3838_v29 = vpop.xlane.xlu0 %3837 }
 0xe31   :  { %6599 = vrcp.f32 %v3838_v29 }
 0xe32   :  { %v3861_v18 = vpack.c.bf16 %v3855_v12, %v3855_v12  ;;  %v4117_v48 = vpop.permute.xlu2 %4116  ;;  %6601 = vrcp.f32 %v3601_v3 }
 0xe33   :  { %v4126_v45 = vsel %vm1281_vm10, %v4117_v48, 0 }
 0xe34   :  { %v3870_v14 = vunpack.c.l.b16 %v3861_v18  ;;  %4134 = vmatpush.bf16.msrb.mxu1 %v4126_v45 }
 0xe35   :  { %v4115_v37 = vpop.permute.xlu1 %4114 }
 0xe36   :  { %v3872_v36 = vpack.c.b16 %v3870_v14, %v3869_v31 }
 0xe37   :  { %v6600_v34 = vpop.eup %6599 }
 0xe38   :  { %5845 = vmatmul.msk.bf16.gmra.mxu3 %vm1185_vm13, %v3429_v52  ;;  %v3604_v1 = vpop.xlane.xlu0 %3603  ;;  %5858 = vmatmul.msk.bf16.vlgmr.msra.gmra.mxu1 %vm1185_vm13, %v3872_v36  ;;  %v6602_v43 = vpop.eup %6601  ;;  %v3856_v19 = vmul.f32 %v6600_v34, %v8652_v61 }
 0xe39   :  { %6603 = vrcp.f32 %v3604_v1  ;;  %4135 = vmatpush.bf16.msrb.mxu1 %v4115_v37  ;;  %v3617_v4 = vmul.f32 %v6602_v43, %v8604_v55  ;;  %v8717_v46 = vpop.f32.mrf.mxu1 }
 0xe3a   :  { %v3862_v11 = vpack.c.bf16 %v3856_v19, %v3856_v19  ;;  %6605 = vrcp.f32 %v3607_v40 }
 0xe3b   :  { %v3623_v23 = vpack.c.bf16 %v3617_v4, %v3617_v4 }
 0xe3c   :  { %v3871_v54 = vunpack.c.l.b16 %v3862_v11 }
 0xe3d   :  { %v3669_v20 = vunpack.c.l.b16 %v3623_v23 }
 0xe3e   :  { %v3873_v61 = vpack.c.b16 %v3871_v54, %v3871_v54 }
 0xe3f   :  { %v6604_v3 = vpop.eup %6603 }
 0xe40   :  { %v3618_v35 = vmul.f32 %v6604_v3, %v8659_v49  ;;  %v4072_v42 = vpop.xlane.xlu0 %4071  ;;  %v6606_v28 = vpop.eup %6605 }
 0xe41   :  { %6607 = vrcp.f32 %v4072_v42  ;;  %v3619_v49 = vmul.f32 %v6606_v28, %v8618_v38  ;;  %v8724_v58 = vpop.f32.mrf.mxu1 }
 0xe42   :  { %v3624_v13 = vpack.c.bf16 %v3618_v35, %v3618_v35  ;;  %6609 = vrcp.f32 %v4075_v16 }
 0xe43   :  { %v3625_v16 = vpack.c.bf16 %v3619_v49, %v3619_v49  ;;  %6611 = vrcp.f32 %v3844_v5 }
 0xe44   :  { %v3670_v60 = vunpack.c.l.b16 %v3624_v13  ;;  %6613 = vrcp.f32 %v8702_v33 }
 0xe45   :  { %v3671_v15 = vunpack.c.l.b16 %v3625_v16  ;;  %6615 = vrcp.f32 %v8708_v57 }
 0xe46   :  { %v3672_v39 = vpack.c.b16 %v3670_v60, %v3669_v20 }
 0xe47   :  { %v6608_v7 = vpop.eup %6607 }
 0xe48   :  { %5852 = vmatmul.msk.bf16.vlgmr.msrb.gmra.mxu3 %vm1185_vm13, %v3672_v39  ;;  %5859 = vmatmul.msk.bf16.gmra.mxu1 %vm1185_vm13, %v3873_v61  ;;  %v6610_v55 = vpop.eup %6609  ;;  %v4094_v40 = vmul.f32 %v6608_v7, %v8665_v32  ;;  %v3673_v32 = vpack.c.b16 %v3671_v15, %v3671_v15 }
 0xe49   :  { %v4095_v8 = vmul.f32 %v6610_v55, %v8634_v62  ;;  %v6612_v62 = vpop.eup %6611 }
 0xe4a   :  { %v4100_v24 = vpack.c.bf16 %v4094_v40, %v4094_v40  ;;  %v6614_v29 = vpop.eup %6613  ;;  %v3858_v5 = vmul.f32 %v6612_v62, %v8644_v51 }
 0xe4b   :  { %v4101_v6 = vpack.c.bf16 %v4095_v8, %v4095_v8  ;;  %v3857_v18 = vmul.f32 %v6614_v29, %v8608_v26  ;;  %v6616_v36 = vpop.eup %6615 }
 0xe4c   :  { %v4109_v44 = vunpack.c.l.b16 %v4100_v24  ;;  %v3864_v33 = vpack.c.bf16 %v3858_v5, %v3858_v5  ;;  %v3859_v51 = vmul.f32 %v6616_v36, %v8626_v53 }
 0xe4d   :  { %v4110_v25 = vunpack.c.l.b16 %v4101_v6  ;;  %v3863_v9 = vpack.c.bf16 %v3857_v18, %v3857_v18 }
 0xe4e   :  { %v3910_v31 = vunpack.c.l.b16 %v3864_v33  ;;  %v3865_v19 = vpack.c.bf16 %v3859_v51, %v3859_v51  ;;  %v6202_v51 = vld [vmem:[%s9262_s5 + $0x38] sm:$0xff] }
 0xe4f   :  { %v4112_v38 = vpack.c.b16 %v4110_v25, %v4109_v44  ;;  %v3909_v14 = vunpack.c.l.b16 %v3863_v9  ;;  %4326 = vmatpush.bf16.msrb.mxu2 %v6202_v51 }
 0xe50   :  { %v3911_v3 = vunpack.c.l.b16 %v3865_v19  ;;  %v6199_v19 = vld [vmem:[%s9262_s5 + $0x20] sm:$0xff] }
 0xe51   :  { %v3912_v52 = vpack.c.b16 %v3910_v31, %v3909_v14 }
 0xe52   :  { %v3913_v35 = vpack.c.b16 %v3911_v3, %v3911_v3 }
 0xe53   :  { %v4157_v30 = vpop.permute.xlu0 %4156 }
 0xe54   :  { %v4166_v47 = vsel %vm1281_vm10, %v4157_v30, 0 }
 0xe55   :  { %4174 = vmatpush.bf16.msrb.mxu3 %v4166_v47 }
 0xe56   :  { %v8728_v12 = vpop.f32.mrf.mxu1 }
 0xe58   :  { %5853 = vmatmul.msk.bf16.gmra.mxu3 %vm1185_vm13, %v3673_v32  ;;  %5866 = vmatmul.msk.bf16.vlgmr.msrb.gmra.mxu1 %vm1185_vm13, %v4112_v38 }
 0xe5e   :  { %v3420_v48 = vpop.f32.mrf.mxu1 }
 0xe60   :  { %v4078_v45 = vpop.xlane.xlu1 %4077 }
 0xe61   :  { %6617 = vrcp.f32 %v4078_v45 }
 0xe66   :  { %v3657_v34 = vpop.f32.mrf.mxu1 }
 0xe67   :  { %v6618_v37 = vpop.eup %6617 }
 0xe68   :  { %v4096_v1 = vmul.f32 %v6618_v37, %v8680_v63  ;;  %5860 = vmatmul.msk.bf16.vlgmr.msra.gmra.mxu3 %vm1185_vm13, %v3912_v52 }
 0xe6a   :  { %v4102_v26 = vpack.c.bf16 %v4096_v1, %v4096_v1 }
 0xe6b   :  { %v4081_v63 = vpop.xlane.xlu2 %4080 }
 0xe6c   :  { %v4111_v43 = vunpack.c.l.b16 %v4102_v26  ;;  %v6201_v26 = vld [vmem:[%s9262_s5 + $0x30] sm:$0xff] }
 0xe6d   :  { %4327 = vmatpush.bf16.msrb.mxu2 %v6201_v26 }
 0xe6e   :  { %v3659_v4 = vpop.f32.mrf.mxu1  ;;  %v4113_v11 = vpack.c.b16 %v4111_v43, %v4111_v43  ;;  %v6200_v43 = vld [vmem:[%s9262_s5 + $0x28] sm:$0xff] }
 0xe6f   :  { %v6292_v57 = vpack.i.bf16 %v3659_v4, %v3657_v34 }
 0xe70   :  { %5867 = vmatmul.msk.bf16.gmra.mxu1 %vm1185_vm13, %v4113_v11 }
 0xe71   :  { %6293 = vrot.lane.b32.xlu0 %v6292_v57, %s6700_s1  ;;  %4328 = vmatpush.bf16.msrb.mxu2 %v6200_v43 }
 0xe75   :  { %4329 = vmatpush.bf16.msrb.mxu2 %v6199_v19 }
 0xe76   :  { %v3662_v23 = vpop.f32.mrf.mxu1 }
 0xe78   :  { %5861 = vmatmul.msk.bf16.gmra.mxu3 %vm1185_vm13, %v3913_v35 }
 0xe79   :  { %3986 = vrot.lane.b32.xlu0 %v8331_v17, %s6701_s20 }
 0xe7e   :  { %v4084_v53 = vpop.xlane.xlu0 %4083  ;;  %v3664_v42 = vpop.f32.mrf.mxu1 }
 0xe7f   :  { %6619 = vrcp.f32 %v4084_v53 }
 0xe80   :  { %6621 = vrcp.f32 %v4081_v63 }
 0xe85   :  { %v6620_v13 = vpop.eup %6619 }
 0xe86   :  { %v6622_v54 = vpop.eup %6621  ;;  %v4098_v20 = vmul.f32 %v6620_v13, %v8694_v22 }
 0xe87   :  { %v4097_v60 = vmul.f32 %v6622_v54, %v8687_v59 }
 0xe88   :  { %v4104_v28 = vpack.c.bf16 %v4098_v20, %v4098_v20 }
 0xe89   :  { %v4103_v39 = vpack.c.bf16 %v4097_v60, %v4097_v60 }
 0xe8a   :  { %v4150_v61 = vunpack.c.l.b16 %v4104_v28 }
 0xe8b   :  { %v4149_v7 = vunpack.c.l.b16 %v4103_v39 }
 0xe8d   :  { %v4152_v49 = vpack.c.b16 %v4150_v61, %v4149_v7 }
 0xe91   :  { %v4155_v55 = vpop.permute.xlu0 %4154 }
 0xe92   :  { %4175 = vmatpush.bf16.msrb.mxu3 %v4155_v55 }
 0xe95   :  { %5868 = vmatmul.msk.bf16.vlgmr.msrb.gmra.mxu3 %vm1185_vm13, %v4152_v49 }
 0xeab   :  { %v8746_v17 = vpop.f32.mrf.mxu3 }
 0xeb3   :  { %v8748_v40 = vpop.f32.mrf.mxu3 }
 0xeb5   :  { %v3897_v8 = vpop.f32.mrf.mxu1 }
 0xebb   :  { %v8750_v16 = vpop.f32.mrf.mxu3 }
 0xebd   :  { %v3899_v24 = vpop.f32.mrf.mxu1 }
 0xebe   :  { %v6297_v22 = vpack.i.bf16 %v3899_v24, %v3897_v8 }
 0xec0   :  { %6298 = vrot.lane.b32.xlu2 %v6297_v22, %s6699_s19 }
 0xec3   :  { %v3464_v59 = vpop.f32.mrf.mxu3 }
 0xec5   :  { %v3902_v6 = vpop.f32.mrf.mxu1 }
 0xecb   :  { %v3697_v44 = vpop.f32.mrf.mxu3 }
 0xecc   :  { %v6307_v15 = vpack.i.bf16 %v3697_v44, %v3662_v23 }
 0xecd   :  { %v3904_v30 = vpop.f32.mrf.mxu1 }
 0xece   :  { %6308 = vrot.lane.b32.xlu0 %v6307_v15, %s6700_s1 }
 0xed3   :  { %v8754_v25 = vpop.f32.mrf.mxu3 }
 0xed5   :  { %v4137_v47 = vpop.f32.mrf.mxu1 }
 0xedb   :  { %v8756_v38 = vpop.f32.mrf.mxu3 }
 0xedc   :  { %v6322_v32 = vpack.i.bf16 %v8756_v38, %v8754_v25  ;;  %v5932_v25 = vld [vmem:[%s9263_s6 + $0x70] sm:$0xf]  ;;  %v6210_v38 = vld [vmem:[%s9263_s6 + $0x74] sm:$0xf0] }
 0xedd   :  { %v4139_v62 = vpop.f32.mrf.mxu1 }
 0xede   :  { %v6302_v29 = vpack.i.bf16 %v4139_v62, %v4137_v47 }
 0xee0   :  { %6303 = vrot.lane.b32.xlu1 %v6302_v29, %s6697_s18 }
 0xee3   :  { %v3704_v5 = vpop.f32.mrf.mxu3  ;;  %v6294_v18 = vpop.permute.xlu0 %6293 }
 0xee4   :  { %v6296_v11 = vunpack.i.h.bf16 %v6294_v18  ;;  %v6295_v57 = vunpack.i.l.bf16 %v6294_v18 }
 0xee6   :  { %v4259_v63 = vsel %vm1100_vm11, %v8724_v58, %v6296_v11  ;;  %v4258_v53 = vsel %vm1100_vm11, %v8717_v46, %v6295_v57 }
 0xeeb   :  { %v3937_v33 = vpop.f32.mrf.mxu3  ;;  %v3987_v48 = vpop.permute.xlu0 %3986 }
 0xeec   :  { %v6312_v9 = vpack.i.bf16 %v3937_v33, %v3902_v6  ;;  %5865 = vmatmul.msk.bf16.gmra.mxu0 %vm1100_vm11, %v3987_v48 }
 0xeed   :  { %v4142_v45 = vpop.f32.mrf.mxu1 }
 0xeee   :  { %6313 = vrot.lane.b32.xlu0 %v6312_v9, %s6699_s19 }
 0xef3   :  { %v8763_v31 = vpop.f32.mrf.mxu3 }
 0xef5   :  { %v4144_v14 = vpop.f32.mrf.mxu1 }
 0xefb   :  { %v8765_v36 = vpop.f32.mrf.mxu3 }
 0xefc   :  { %v6327_v52 = vpack.i.bf16 %v8765_v36, %v8763_v31  ;;  %v5924_v31 = vld [vmem:[%s9263_s6 + $0x60] sm:$0xf]  ;;  %v6208_v36 = vld [vmem:[%s9263_s6 + $0x64] sm:$0xf0] }
 0xf03   :  { %v3944_v34 = vpop.f32.mrf.mxu3 }
 0xf18   :  { %v4177_v37 = vpop.f32.mrf.mxu3 }
 0xf19   :  { %v6317_v1 = vpack.i.bf16 %v4177_v37, %v4142_v45 }
 0xf1a   :  { %v6299_v4 = vpop.permute.xlu2 %6298 }
 0xf1b   :  { %6318 = vrot.lane.b32.xlu2 %v6317_v1, %s6697_s18  ;;  %v6301_v3 = vunpack.i.h.bf16 %v6299_v4  ;;  %v6300_v23 = vunpack.i.l.bf16 %v6299_v4 }
 0xf1d   :  { %v4265_v54 = vsel %vm2145_vm14, %v4259_v63, %v6301_v3  ;;  %v4264_v20 = vsel %vm2145_vm14, %v4258_v53, %v6300_v23 }
 0xf40   :  { %v6309_v61 = vpop.permute.xlu0 %6308 }
 0xf41   :  { %v6311_v24 = vunpack.i.h.bf16 %v6309_v61  ;;  %v6310_v22 = vunpack.i.l.bf16 %v6309_v61 }
 0xf43   :  { %v4261_v15 = vsel %vm1100_vm11, %v8746_v17, %v6311_v24  ;;  %v4260_v30 = vsel %vm1100_vm11, %v8728_v12, %v6310_v22  ;;  %v8805_v17 = vld [vmem:[%s9259_s3 + $0x41] ss:$0 sm:$0xff] }
 0xf52   :  { %v6304_v35 = vpop.permute.xlu1 %6303 }
 0xf53   :  { %v6306_v42 = vunpack.i.h.bf16 %v6304_v35  ;;  %v6305_v13 = vunpack.i.l.bf16 %v6304_v35 }
 0xf55   :  { %v4270_v60 = vsel %vm2152_vm15, %v4264_v20, %v6305_v13  ;;  %v4271_v28 = vsel %vm2152_vm15, %v4265_v54, %v6306_v42 }
 0xf56   :  { %v4276_v39 = vpack.c.bf16 %v4271_v28, %v4270_v60 }
 0xf58   :  { %5894 = vmatmul.msk.bf16.vlgmr.msrb.gmra.mxu2 %vm659_vm2, %v4276_v39 }
 0xf60   :  { %v6314_v49 = vpop.permute.xlu0 %6313 }
 0xf61   :  { %v6316_v59 = vunpack.i.h.bf16 %v6314_v49  ;;  %v6315_v6 = vunpack.i.l.bf16 %v6314_v49 }
 0xf63   :  { %v4266_v29 = vsel %vm2145_vm14, %v4260_v30, %v6315_v6 }
 0xf69   :  { %v4018_v7 = vpop.f32.mrf.mxu0 }
 0xf6a   :  { %v4027_v55 = vmul.f32 0.25, %v4018_v7 }
 0xf6c   :  { %v4033_v58 = vadd.f32 %v4027_v55, %v7375_v10  ;;  %v4267_v10 = vsel %vm2145_vm14, %v4261_v15, %v6316_v59 }
 0xf6e   :  { %v4049_v46 = vsel %vm1185_vm13, %v4033_v58, -inf }
 0xf6f   :  { %4050 = vmax.xlane.f32.xlu0 %v4049_v46 }
 0xf71   :  { %v4020_v8 = vpop.f32.mrf.mxu0 }
 0xf75   :  { %v6319_v44 = vpop.permute.xlu2 %6318 }
 0xf76   :  { %v6321_v47 = vunpack.i.h.bf16 %v6319_v44  ;;  %v6320_v62 = vunpack.i.l.bf16 %v6319_v44 }
 0xf78   :  { %v4273_v5 = vsel %vm2152_vm15, %v4267_v10, %v6321_v47  ;;  %v4272_v18 = vsel %vm2152_vm15, %v4266_v29, %v6320_v62  ;;  %v5933_v10 = vor.u32 %v6210_v38, %v5932_v25  ;;  %v5934_v29 = vld [vmem:[%s9263_s6 + $0x78] sm:$0xf0] }
 0xf79   :  { %v4277_v33 = vpack.c.bf16 %v4273_v5, %v4272_v18  ;;  %v5925_v18 = vor.u32 %v6208_v36, %v5924_v31 }
 0xf7a   :  { %4570 = vmatpush.bf16.msra.mxu0 %v5933_v10 }
 0xf7b   :  { %5895 = vmatmul.msk.bf16.gmra.mxu2 %vm659_vm2, %v4277_v33  ;;  %v5926_v33 = vld [vmem:[%s9263_s6 + $0x68] sm:$0xf0] }
 0xf7e   :  { %4571 = vmatpush.bf16.msra.mxu0 %v5925_v18 }
 0xfdb   :  { %v4331_v48 = vpop.f32.mrf.mxu2 }
 0xfdc   :  { %v4332_v12 = vadd.f32 %v4331_v48, %v8805_v17 }
 0xfde   :  { %v8809_v9 = vadd.f32 %v4332_v12, %v8136_v21  ;;  %v5916_v12 = vld [vmem:[%s9263_s6 + $0x50] sm:$0xf] }
 0xfe0   :  { %v4354_v45 = vsel %vm659_vm2, %v8809_v9, 0.0 }
 0xfe1   :  { %4355 = vadd.xlane.f32.xlu1 %v4354_v45  ;;  %v6206_v45 = vld [vmem:[%s9263_s6 + $0x54] sm:$0xf0] }
 0xfe2   :  { %v4051_v14 = vpop.xlane.xlu0 %4050 }
 0xfe3   :  { %v4057_v34 = vsub.f32 %v4033_v58, %v4051_v14  ;;  %v4333_v37 = vpop.f32.mrf.mxu2  ;;  %v6205_v14 = vld [vmem:[%s9263_s6 + $0x54] sm:$0xf] }
 0xfe4   :  { %v4334_v1 = vadd.f32 %v4333_v37, %v8805_v17  ;;  %v5918_v37 = vld [vmem:[%s9263_s6 + $0x58] sm:$0xf0] }
 0xfe5   :  { %v4068_v51 = vmul.f32 1.442695, %v4057_v34  ;;  %v5917_v34 = vor.u32 %v6206_v45, %v5916_v12 }
 0xfe6   :  { %v4347_v26 = vadd.f32 %v4334_v1, %v8141_v56 }
 0xfe7   :  { %6623 = vpow2.f32 %v4068_v51  ;;  %v5921_v51 = vor.u32 %v6205_v14, %v5918_v37  ;;  %4572 = vmatpush.bf16.msra.mxu0 %v5917_v34 }
 0xfe8   :  { %v4357_v43 = vsel %vm659_vm2, %v4347_v26, 0.0 }
 0xfe9   :  { %4358 = vadd.xlane.f32.xlu2 %v4357_v43  ;;  %v5908_v43 = vld [vmem:[%s9263_s6 + $0x40] sm:$0xf] }
 0xfed   :  { %v6624_v19 = vpop.eup %6623 }
 0xfee   :  { %v4085_v21 = vsel %vm1185_vm13, %v6624_v19, 0.0 }
 0xff1   :  { %4086 = vadd.xlane.f32.xlu2 %v4085_v21  ;;  %v6203_v21 = vld [vmem:[%s9263_s6 + $0x44] sm:$0xf] }
 0xffe   :  { %v4336_v4 = vpop.f32.mrf.mxu2 }
 0xfff   :  { %v4337_v11 = vadd.f32 %v4336_v4, %v8805_v17 }
0x1001   :  { %v4348_v57 = vadd.f32 %v4337_v11, %v8146_v0 }
0x1003   :  { %v4360_v3 = vsel %vm659_vm2, %v4348_v57, 0.0 }
0x1004   :  { %4361 = vadd.xlane.f32.xlu0 %v4360_v3 }
0x1006   :  { %v4338_v23 = vpop.f32.mrf.mxu2 }
0x1007   :  { %v4339_v35 = vadd.f32 %v4338_v23, %v8805_v17 }
0x1009   :  { %v8822_v56 = vadd.f32 %v4339_v35, %v8151_v27 }
0x100b   :  { %v4363_v63 = vsel %vm659_vm2, %v8822_v56, 0.0 }
0x100c   :  { %4364 = vadd.xlane.f32.xlu1 %v4363_v63 }
0x1054   :  { %v4356_v53 = vpop.xlane.xlu1 %4355 }
0x1055   :  { %v4372_v42 = vmul.f32 %v4356_v53, %v7013_v41 }
0x1057   :  { %v8828_v13 = vsub.f32 %v8809_v9, %v4372_v42 }
0x1059   :  { %v4384_v0 = vmul.f32 %v8828_v13, %v8828_v13 }
0x105b   :  { %v4390_v54 = vsel %vm659_vm2, %v4384_v0, 0.0 }
0x105c   :  { %v4359_v20 = vpop.xlane.xlu2 %4358  ;;  %4391 = vadd.xlane.f32.xlu0 %v4390_v54 }
0x105d   :  { %v4373_v27 = vmul.f32 %v4359_v20, %v7013_v41 }
0x105f   :  { %v8834_v60 = vsub.f32 %v4347_v26, %v4373_v27 }
0x1061   :  { %v4385_v28 = vmul.f32 %v8834_v60, %v8834_v60 }
0x1063   :  { %v4393_v39 = vsel %vm659_vm2, %v4385_v28, 0.0 }
0x1064   :  { %v4087_v61 = vpop.xlane.xlu2 %4086  ;;  %4394 = vadd.xlane.f32.xlu1 %v4393_v39 }
0x1065   :  { %6625 = vrcp.f32 %v4087_v61 }
0x106b   :  { %v6626_v7 = vpop.eup %6625 }
0x106c   :  { %v4099_v55 = vmul.f32 %v6626_v7, %v6624_v19  ;;  %v6204_v19 = vld [vmem:[%s9263_s6 + $0x44] sm:$0xf0] }
0x106d   :  { %v5909_v11 = vor.u32 %v6204_v19, %v5908_v43 }
0x106e   :  { %v4105_v58 = vpack.c.bf16 %v4099_v55, %v4099_v55 }
0x106f   :  { %4573 = vmatpush.bf16.msra.mxu0 %v5909_v11 }
0x1070   :  { %v4151_v46 = vunpack.c.l.b16 %v4105_v58 }
0x1072   :  { %v4153_v49 = vpack.c.b16 %v4151_v46, %v4151_v46 }
0x1074   :  { %5869 = vmatmul.msk.bf16.gmra.mxu3 %vm1185_vm13, %v4153_v49  ;;  %v8915_v49 = vld [vmem:[%s9259_s3 + $0x36] ss:$0 sm:$0xff] }
0x1077   :  { %v4362_v8 = vpop.xlane.xlu0 %4361 }
0x1078   :  { %v4374_v24 = vmul.f32 %v4362_v8, %v7013_v41 }
0x107a   :  { %v8841_v22 = vsub.f32 %v4348_v57, %v4374_v24  ;;  %v5910_v57 = vld [vmem:[%s9263_s6 + $0x48] sm:$0xf0] }
0x107b   :  { %v5913_v3 = vor.u32 %v6203_v21, %v5910_v57 }
0x107c   :  { %v4386_v59 = vmul.f32 %v8841_v22, %v8841_v22 }
0x107d   :  { %6323 = vrot.lane.b32.xlu1 %v6322_v32, %s6700_s1  ;;  %v6209_v32 = vld [vmem:[%s9263_s6 + $0x74] sm:$0xf] }
0x107e   :  { %v4396_v6 = vsel %vm659_vm2, %v4386_v59, 0.0  ;;  %v5937_v5 = vor.u32 %v6209_v32, %v5934_v29 }
0x107f   :  { %4397 = vadd.xlane.f32.xlu2 %v4396_v6  ;;  %v4365_v44 = vpop.xlane.xlu1 %4364 }
0x1080   :  { %v4375_v15 = vmul.f32 %v4365_v44, %v7013_v41  ;;  %4594 = vmatpush.bf16.msra.mxu1 %v5937_v5  ;;  %v4179_v44 = vpop.f32.mrf.mxu3 }
0x1082   :  { %v8852_v30 = vsub.f32 %v8822_v56, %v4375_v15  ;;  %v8922_v15 = vld [vmem:[%s9259_s3 + $0x37] ss:$0 sm:$0xff] }
0x1084   :  { %v4387_v47 = vmul.f32 %v8852_v30, %v8852_v30 }
0x1086   :  { %v4399_v62 = vsel %vm659_vm2, %v4387_v47, 0.0 }
0x1087   :  { %4400 = vadd.xlane.f32.xlu0 %v4399_v62 }
0x1097   :  { %6328 = vrot.lane.b32.xlu2 %v6327_v52, %s6699_s19  ;;  %v6207_v52 = vld [vmem:[%s9263_s6 + $0x64] sm:$0xf] }
0x1098   :  { %v5929_v48 = vor.u32 %v6207_v52, %v5926_v33 }
0x109a   :  { %4595 = vmatpush.bf16.msra.mxu1 %v5929_v48 }
0x109e   :  { %4596 = vmatpush.bf16.msra.mxu1 %v5921_v51 }
0x10a2   :  { %4597 = vmatpush.bf16.msra.mxu1 %v5913_v3 }
0x10cf   :  { %v4392_v1 = vpop.xlane.xlu0 %4391 }
0x10d0   :  { %v4408_v26 = vmul.f32 %v4392_v1, %v7013_v41 }
0x10d2   :  { %v4414_v4 = vadd.f32 1e-05, %v4408_v26 }
0x10d4   :  { %6627 = vrsqrt.f32 %v4414_v4  ;;  %vm4426_vm13 = vweird.f32 %v4414_v4 }
0x10d7   :  { %v4395_v23 = vpop.xlane.xlu1 %4394 }
0x10d8   :  { %v4409_v35 = vmul.f32 %v4395_v23, %v7013_v41 }
0x10da   :  { %v6628_v63 = vpop.eup %6627  ;;  %v4415_v53 = vadd.f32 1e-05, %v4409_v35 }
0x10db   :  { %v4421_v42 = vmul.f32 %v6628_v63, %v4414_v4  ;;  %vm4427_vm10 = vweird.f32 %v6628_v63 }
0x10dc   :  { %6629 = vrsqrt.f32 %v4415_v53  ;;  %vm4428_vm8 = vmor %vm4426_vm13, %vm4427_vm10  ;;  %vm4436_vm12 = vweird.f32 %v4415_v53 }
0x10dd   :  { %v4422_v0 = vmul.f32 %v6628_v63, %v4421_v42 }
0x10df   :  { %v4423_v54 = vmul.f32 0.5, %v4422_v0  ;;  %v6217_v0 = vld [vmem:[%s9264_s7 + $0xb0] sm:$0xff] }
0x10e1   :  { %v4424_v20 = vsub.f32 1.5, %v4423_v54  ;;  %v6225_v54 = vld [vmem:[%s9264_s7 + $0xf0] sm:$0xff] }
0x10e2   :  { %v6630_v27 = vpop.eup %6629 }
0x10e3   :  { %v4425_v28 = vmul.f32 %v6628_v63, %v4424_v20  ;;  %v4431_v39 = vmul.f32 %v6630_v27, %v4415_v53  ;;  %vm4437_vm9 = vweird.f32 %v6630_v27 }
0x10e4   :  { %vm4438_vm0 = vmor %vm4436_vm12, %vm4437_vm9 }
0x10e5   :  { %v4432_v61 = vmul.f32 %v6630_v27, %v4431_v39  ;;  %v4429_v7 = vsel %vm4428_vm8, %v6628_v63, %v4425_v28 }
0x10e6   :  { %v4480_v46 = vmul.f32 %v4429_v7, %v8828_v13  ;;  %v6224_v7 = vld [vmem:[%s9264_s7 + $0xe8] sm:$0xff] }
0x10e7   :  { %v4433_v55 = vmul.f32 0.5, %v4432_v61  ;;  %v6216_v61 = vld [vmem:[%s9264_s7 + $0xa8] sm:$0xff] }
0x10e8   :  { %v4486_v59 = vmul.f32 %v4480_v46, %v8915_v49 }
0x10e9   :  { %v4434_v58 = vsub.f32 1.5, %v4433_v55 }
0x10ea   :  { %v4492_v47 = vadd.f32 %v4486_v59, %v8922_v15  ;;  %v5905_v59 = vld [vmem:[%s9259_s3 + $0x42] ss:$8 sm:$0x3] }
0x10eb   :  { %v4435_v8 = vmul.f32 %v6630_v27, %v4434_v58 }
0x10ed   :  { %v4439_v24 = vsel %vm4438_vm0, %v6630_v27, %v4435_v8 }
0x10ee   :  { %v4481_v6 = vmul.f32 %v4439_v24, %v8834_v60 }
0x10ef   :  { %v6324_v53 = vpop.permute.xlu1 %6323 }
0x10f0   :  { %v4487_v13 = vmul.f32 %v4481_v6, %v8915_v49  ;;  %v6326_v20 = vunpack.i.h.bf16 %v6324_v53  ;;  %v6325_v27 = vunpack.i.l.bf16 %v6324_v53 }
0x10f2   :  { %v4493_v62 = vadd.f32 %v4487_v13, %v8922_v15  ;;  %v4398_v25 = vpop.xlane.xlu2 %4397  ;;  %v4263_v58 = vsel %vm1100_vm11, %v8750_v16, %v6326_v20  ;;  %v4262_v46 = vsel %vm1100_vm11, %v8748_v40, %v6325_v27  ;;  %v6215_v40 = vld [vmem:[%s9264_s7 + $0xa0] sm:$0xff] }
0x10f3   :  { %v4410_v38 = vmul.f32 %v4398_v25, %v7013_v41  ;;  %v6223_v16 = vld [vmem:[%s9264_s7 + $0xe0] sm:$0xff]  ;;  %v8975_v25 = vperm.slane %v5905_v59, 0 }
0x10f4   :  { %v4498_v32 = vpack.c.bf16 %v4493_v62, %v4492_v47 }
0x10f5   :  { %v4416_v10 = vadd.f32 1e-05, %v4410_v38  ;;  %v8977_v38 = vperm.slane %v5905_v59, 1 }
0x10f6   :  { %5938 = vmatmul.msk.bf16.vlgmr.msra.gmra.mxu0 %vm659_vm2, %v4498_v32  ;;  %5941 = vmatmul.msk.bf16.vlgmr.msra.gmra.mxu1 %vm659_vm2, %v4498_v32 }
0x10f7   :  { %6631 = vrsqrt.f32 %v4416_v10  ;;  %v4182_v60 = vpop.f32.mrf.mxu3  ;;  %vm4446_vm3 = vweird.f32 %v4416_v10 }
0x10f8   :  { %v6332_v29 = vpack.i.bf16 %v4182_v60, %v4179_v44  ;;  %v6214_v60 = vld [vmem:[%s9264_s7 + $0x98] sm:$0xff] }
0x10fa   :  { %6333 = vrot.lane.b32.xlu0 %v6332_v29, %s6697_s18  ;;  %v4401_v5 = vpop.xlane.xlu0 %4400  ;;  %v6329_v42 = vpop.permute.xlu2 %6328  ;;  %v6222_v29 = vld [vmem:[%s9264_s7 + $0xd8] sm:$0xff] }
0x10fb   :  { %v4411_v31 = vmul.f32 %v4401_v5, %v7013_v41  ;;  %v6331_v28 = vunpack.i.h.bf16 %v6329_v42  ;;  %v6330_v39 = vunpack.i.l.bf16 %v6329_v42 }
0x10fd   :  { %v6632_v36 = vpop.eup %6631  ;;  %v4417_v52 = vadd.f32 1e-05, %v4411_v31  ;;  %v4268_v6 = vsel %vm2145_vm14, %v4262_v46, %v6330_v39  ;;  %v4269_v44 = vsel %vm2145_vm14, %v4263_v58, %v6331_v28 }
0x10fe   :  { %v4441_v18 = vmul.f32 %v6632_v36, %v4416_v10  ;;  %vm4447_vm1 = vweird.f32 %v6632_v36 }
0x10ff   :  { %6633 = vrsqrt.f32 %v4417_v52  ;;  %v4184_v33 = vpop.f32.mrf.mxu3  ;;  %vm4448_vm4 = vmor %vm4446_vm3, %vm4447_vm1  ;;  %vm4456_vm6 = vweird.f32 %v4417_v52 }
0x1100   :  { %v4442_v48 = vmul.f32 %v6632_v36, %v4441_v18  ;;  %v6213_v18 = vld [vmem:[%s9264_s7 + $0x90] sm:$0xff] }
0x1101   :  { %v6221_v33 = vld [vmem:[%s9264_s7 + $0xd0] sm:$0xff] }
0x1102   :  { %v4443_v12 = vmul.f32 0.5, %v4442_v48 }
0x1104   :  { %v4444_v45 = vsub.f32 1.5, %v4443_v12 }
0x1105   :  { %v6634_v14 = vpop.eup %6633 }
0x1106   :  { %v4445_v34 = vmul.f32 %v6632_v36, %v4444_v45  ;;  %v4451_v37 = vmul.f32 %v6634_v14, %v4417_v52  ;;  %vm4457_vm5 = vweird.f32 %v6634_v14 }
0x1107   :  { %vm4458_vm10 = vmor %vm4456_vm6, %vm4457_vm5 }
0x1108   :  { %v4452_v1 = vmul.f32 %v6634_v14, %v4451_v37  ;;  %v4449_v51 = vsel %vm4448_vm4, %v6632_v36, %v4445_v34  ;;  %v6212_v34 = vld [vmem:[%s9264_s7 + $0x88] sm:$0xff] }
0x1109   :  { %v4482_v19 = vmul.f32 %v4449_v51, %v8841_v22  ;;  %v6218_v22 = vld [vmem:[%s9264_s7 + $0xb8] sm:$0xff]  ;;  %v6220_v37 = vld [vmem:[%s9264_s7 + $0xc8] sm:$0xff] }
0x110a   :  { %v4453_v26 = vmul.f32 0.5, %v4452_v1  ;;  %5002 = vmatpush.bf16.msra.mxu3 %v6218_v22 }
0x110b   :  { %v4488_v57 = vmul.f32 %v4482_v19, %v8915_v49  ;;  %v6211_v19 = vld [vmem:[%s9264_s7 + $0x80] sm:$0xff] }
0x110c   :  { %v4454_v43 = vsub.f32 1.5, %v4453_v26 }
0x110d   :  { %v4494_v23 = vadd.f32 %v4488_v57, %v8922_v15 }
0x110e   :  { %v4455_v21 = vmul.f32 %v6634_v14, %v4454_v43  ;;  %5003 = vmatpush.bf16.msra.mxu3 %v6217_v0 }
0x1110   :  { %v4459_v4 = vsel %vm4458_vm10, %v6634_v14, %v4455_v21  ;;  %v6219_v21 = vld [vmem:[%s9264_s7 + $0xc0] sm:$0xff] }
0x1111   :  { %v4483_v11 = vmul.f32 %v4459_v4, %v8852_v30  ;;  %v6226_v30 = vld [vmem:[%s9264_s7 + $0xf8] sm:$0xff] }
0x1112   :  { %5022 = vmatpush.bf16.msra.mxu2 %v6226_v30  ;;  %5004 = vmatpush.bf16.msra.mxu3 %v6216_v61 }
0x1113   :  { %v4489_v3 = vmul.f32 %v4483_v11, %v8915_v49 }
0x1115   :  { %v4495_v35 = vadd.f32 %v4489_v3, %v8922_v15 }
0x1116   :  { %5023 = vmatpush.bf16.msra.mxu2 %v6225_v54  ;;  %5005 = vmatpush.bf16.msra.mxu3 %v6215_v40 }
0x1117   :  { %v4499_v63 = vpack.c.bf16 %v4495_v35, %v4494_v23 }
0x1119   :  { %5939 = vmatmul.msk.bf16.gmra.mxu0 %vm659_vm2, %v4499_v63  ;;  %5942 = vmatmul.msk.bf16.gmra.mxu1 %vm659_vm2, %v4499_v63 }
0x111a   :  { %5024 = vmatpush.bf16.msra.mxu2 %v6224_v7  ;;  %5006 = vmatpush.bf16.msra.mxu3 %v6214_v60 }
0x111e   :  { %5025 = vmatpush.bf16.msra.mxu2 %v6223_v16  ;;  %5007 = vmatpush.bf16.msra.mxu3 %v6213_v18 }
0x1122   :  { %5026 = vmatpush.bf16.msra.mxu2 %v6222_v29  ;;  %5008 = vmatpush.bf16.msra.mxu3 %v6212_v34 }
0x1126   :  { %5027 = vmatpush.bf16.msra.mxu2 %v6221_v33  ;;  %5009 = vmatpush.bf16.msra.mxu3 %v6211_v19 }
0x112a   :  { %5028 = vmatpush.bf16.msra.mxu2 %v6220_v37 }
0x112e   :  { %5029 = vmatpush.bf16.msra.mxu2 %v6219_v21 }
0x116c   :  { %v6334_v55 = vpop.permute.xlu0 %6333 }
0x116d   :  { %v6336_v8 = vunpack.i.h.bf16 %v6334_v55  ;;  %v6335_v24 = vunpack.i.l.bf16 %v6334_v55 }
0x116f   :  { %v4274_v13 = vsel %vm2152_vm15, %v4268_v6, %v6335_v24  ;;  %v4275_v47 = vsel %vm2152_vm15, %v4269_v44, %v6336_v8 }
0x1170   :  { %v4278_v62 = vpack.c.bf16 %v4275_v47, %v4274_v13 }
0x1172   :  { %5896 = vmatmul.msk.bf16.gmra.mxu2 %vm659_vm2, %v4278_v62 }
0x1173   :  { %v4575_v32 = vpop.f32.mrf.mxu0  ;;  %v4599_v10 = vpop.f32.mrf.mxu1 }
0x1174   :  { %v8987_v5 = vadd.f32 %v4575_v32, %v8975_v25  ;;  %v8990_v31 = vadd.f32 %v4599_v10, %v8977_v38 }
0x1176   :  { %v5944_v36 = vmul.f32 -1.702, %v8987_v5  ;;  %v5945_v52 = vmul.f32 -1.702, %v8990_v31 }
0x1178   :  { %v4638_v48 = vmul.f32 1.442695, %v5944_v36  ;;  %v4640_v12 = vmul.f32 1.442695, %v5945_v52 }
0x117a   :  { %6635 = vpow2.f32 %v4638_v48 }
0x117b   :  { %6637 = vpow2.f32 %v4640_v12  ;;  %v4577_v45 = vpop.f32.mrf.mxu0  ;;  %v4601_v14 = vpop.f32.mrf.mxu1 }
0x117c   :  { %v9007_v1 = vadd.f32 %v4577_v45, %v8975_v25  ;;  %v9010_v51 = vadd.f32 %v4601_v14, %v8977_v38 }
0x117e   :  { %v5946_v26 = vmul.f32 -1.702, %v9007_v1  ;;  %v5947_v43 = vmul.f32 -1.702, %v9010_v51 }
0x1180   :  { %v6636_v4 = vpop.eup %6635  ;;  %v4642_v11 = vmul.f32 1.442695, %v5946_v26  ;;  %v4644_v23 = vmul.f32 1.442695, %v5947_v43 }
0x1181   :  { %v6638_v57 = vpop.eup %6637  ;;  %v4662_v3 = vadd.f32 1.0, %v6636_v4 }
0x1182   :  { %v4663_v35 = vadd.f32 1.0, %v6638_v57  ;;  %6639 = vpow2.f32 %v4642_v11 }
0x1183   :  { %6641 = vrcp.f32 %v4662_v3  ;;  %v4683_v61 = vand.u32 2147483647, %v4662_v3  ;;  %v4685_v7 = vand.u32 2147483648, %v4662_v3  ;;  %vm4679_vm15 = vweird.f32 %v4662_v3 }
0x1184   :  { %6643 = vrcp.f32 %v4663_v35  ;;  %v4698_v8 = vand.u32 2147483647, %v4663_v35  ;;  %vm4694_vm8 = vweird.f32 %v4663_v35  ;;  %v4700_v44 = vand.u32 2147483648, %v4663_v35 }
0x1185   :  { %6645 = vpow2.f32 %v4644_v23  ;;  %vm9024_vm13 = vcmp.eq.f32.partialorder %v4683_v61, 8.507059e+37  ;;  %v4686_v40 = vor.u32 1.1754944e-38, %v4685_v7 }
0x1186   :  { %vm9036_vm0 = vcmp.eq.f32.partialorder %v4698_v8, 8.507059e+37  ;;  %v4701_v57 = vor.u32 1.1754944e-38, %v4700_v44 }
0x1188   :  { %v6640_v63 = vpop.eup %6639 }
0x1189   :  { %v6642_v22 = vpop.eup %6641  ;;  %v4664_v30 = vadd.f32 1.0, %v6640_v63 }
0x118a   :  { %v9020_v53 = vpop.eup %6643  ;;  %v4675_v42 = vmul.f32 %v6642_v22, %v4662_v3  ;;  %vm4680_vm11 = vweird.f32 %v6642_v22 }
0x118b   :  { %v6646_v0 = vpop.eup %6645  ;;  %v4690_v54 = vmul.f32 %v9020_v53, %v4663_v35  ;;  %6647 = vrcp.f32 %v4664_v30  ;;  %v4715_v59 = vand.u32 2147483648, %v4664_v30  ;;  %vm9028_vm9 = vmor %vm4679_vm15, %vm4680_vm11  ;;  %vm4695_vm12 = vweird.f32 %v9020_v53 }
0x118c   :  { %v4676_v20 = vsub.f32 1.0, %v4675_v42  ;;  %v4665_v27 = vadd.f32 1.0, %v6646_v0  ;;  %vm4709_vm1 = vweird.f32 %v4664_v30  ;;  %v4713_v36 = vand.u32 2147483647, %v4664_v30  ;;  %vm9041_vm4 = vmor %vm4694_vm8, %vm4695_vm12 }
0x118d   :  { %v4691_v28 = vsub.f32 1.0, %v4690_v54  ;;  %v4716_v52 = vor.u32 1.1754944e-38, %v4715_v59 }
0x118e   :  { %v4677_v39 = vmul.f32 %v6642_v22, %v4676_v20  ;;  %6649 = vrcp.f32 %v4665_v27  ;;  %v4728_v45 = vand.u32 2147483647, %v4665_v27  ;;  %v4730_v19 = vand.u32 2147483648, %v4665_v27 }
0x118f   :  { %v4692_v55 = vmul.f32 %v9020_v53, %v4691_v28  ;;  %vm4714_vm10 = vcmp.eq.f32.partialorder %v4713_v36, 8.507059e+37  ;;  %vm4724_vm11 = vweird.f32 %v4665_v27 }
0x1190   :  { %v4678_v46 = vadd.f32 %v6642_v22, %v4677_v39  ;;  %v4731_v0 = vor.u32 1.1754944e-38, %v4730_v19 }
0x1191   :  { %v6648_v58 = vpop.eup %6647  ;;  %v4693_v16 = vadd.f32 %v9020_v53, %v4692_v55 }
0x1192   :  { %v4705_v24 = vmul.f32 %v6648_v58, %v4664_v30  ;;  %v4682_v32 = vsel %vm9028_vm9, %v6642_v22, %v4678_v46  ;;  %vm4710_vm3 = vweird.f32 %v6648_v58 }
0x1193   :  { %v4687_v37 = vsel %vm9024_vm13, %v4686_v40, %v4682_v32  ;;  %v4697_v26 = vsel %vm9041_vm4, %v9020_v53, %v4693_v16  ;;  %vm4711_vm5 = vmor %vm4709_vm1, %vm4710_vm3  ;;  %vm4729_vm13 = vcmp.eq.f32.partialorder %v4728_v45, 8.507059e+37 }
0x1194   :  { %v6650_v13 = vpop.eup %6649  ;;  %v4706_v62 = vsub.f32 1.0, %v4705_v24  ;;  %v4854_v53 = vmul.f32 %v4687_v37, %v8987_v5  ;;  %v4702_v30 = vsel %vm9036_vm0, %v4701_v57, %v4697_v26 }
0x1195   :  { %v4720_v60 = vmul.f32 %v6650_v13, %v4665_v27  ;;  %vm4725_vm6 = vweird.f32 %v6650_v13  ;;  %v4855_v61 = vmul.f32 %v4702_v30, %v8990_v31 }
0x1196   :  { %v4707_v29 = vmul.f32 %v6648_v58, %v4706_v62  ;;  %v4580_v18 = vpop.f32.mrf.mxu0  ;;  %v4604_v33 = vpop.f32.mrf.mxu1  ;;  %vm4726_vm15 = vmor %vm4724_vm11, %vm4725_vm6 }
0x1197   :  { %v4721_v12 = vsub.f32 1.0, %v4720_v60  ;;  %v9046_v14 = vadd.f32 %v4580_v18, %v8975_v25  ;;  %v9049_v34 = vadd.f32 %v4604_v33, %v8977_v38 }
0x1198   :  { %v4708_v43 = vadd.f32 %v6648_v58, %v4707_v29 }
0x1199   :  { %v4722_v21 = vmul.f32 %v6650_v13, %v4721_v12  ;;  %v5948_v4 = vmul.f32 -1.702, %v9046_v14  ;;  %v5949_v11 = vmul.f32 -1.702, %v9049_v34 }
0x119a   :  { %v4712_v3 = vsel %vm4711_vm5, %v6648_v58, %v4708_v43 }
0x119b   :  { %v4717_v23 = vsel %vm4714_vm10, %v4716_v52, %v4712_v3  ;;  %v4723_v35 = vadd.f32 %v6650_v13, %v4722_v21  ;;  %v4646_v63 = vmul.f32 1.442695, %v5948_v4  ;;  %v4648_v22 = vmul.f32 1.442695, %v5949_v11 }
0x119c   :  { %v4856_v42 = vmul.f32 %v4717_v23, %v9007_v1 }
0x119d   :  { %v4727_v54 = vsel %vm4726_vm15, %v6650_v13, %v4723_v35  ;;  %6651 = vpow2.f32 %v4646_v63 }
0x119e   :  { %v4866_v20 = vpack.c.bf16 %v4856_v42, %v4854_v53  ;;  %v4732_v28 = vsel %vm4729_vm13, %v4731_v0, %v4727_v54  ;;  %6653 = vpow2.f32 %v4648_v22  ;;  %v4582_v27 = vpop.f32.mrf.mxu0  ;;  %v4606_v39 = vpop.f32.mrf.mxu1  ;;  %v6704_v53 = vmov 2.0  }
0x119f   :  { %v4857_v7 = vmul.f32 %v4732_v28, %v9010_v51  ;;  %v9066_v5 = vadd.f32 %v4582_v27, %v8975_v25  ;;  %v9069_v55 = vadd.f32 %v4606_v39, %v8977_v38 }
0x11a0   :  { %5010 = vmatmul.bf16.vlgmr.msra.gmra.mxu3 %v4866_v20 }
0x11a1   :  { %v4867_v1 = vpack.c.bf16 %v4857_v7, %v4855_v61  ;;  %v5950_v58 = vmul.f32 -1.702, %v9066_v5  ;;  %v5951_v46 = vmul.f32 -1.702, %v9069_v55 }
0x11a3   :  { %v6652_v8 = vpop.eup %6651  ;;  %v4650_v24 = vmul.f32 1.442695, %v5950_v58  ;;  %5030 = vmatmul.bf16.vlgmr.msra.gmra.mxu2 %v4867_v1  ;;  %v4652_v31 = vmul.f32 1.442695, %v5951_v46 }
0x11a4   :  { %v6654_v59 = vpop.eup %6653  ;;  %v4666_v6 = vadd.f32 1.0, %v6652_v8 }
0x11a5   :  { %v4667_v44 = vadd.f32 1.0, %v6654_v59  ;;  %6655 = vpow2.f32 %v4650_v24 }
0x11a6   :  { %6657 = vrcp.f32 %v4666_v6  ;;  %vm4739_vm9 = vweird.f32 %v4666_v6  ;;  %v4743_v12 = vand.u32 2147483647, %v4666_v6  ;;  %v4745_v45 = vand.u32 2147483648, %v4666_v6 }
0x11a7   :  { %6659 = vrcp.f32 %v4667_v44  ;;  %vm4754_vm12 = vweird.f32 %v4667_v44  ;;  %v4758_v26 = vand.u32 2147483647, %v4667_v44  ;;  %v4760_v11 = vand.u32 2147483648, %v4667_v44 }
0x11a8   :  { %6661 = vpow2.f32 %v4652_v31  ;;  %vm4744_vm4 = vcmp.eq.f32.partialorder %v4743_v12, 8.507059e+37  ;;  %v4746_v63 = vor.u32 1.1754944e-38, %v4745_v45 }
0x11a9   :  { %v4761_v39 = vor.u32 1.1754944e-38, %v4760_v11  ;;  %vm4759_vm13 = vcmp.eq.f32.partialorder %v4758_v26, 8.507059e+37 }
0x11ab   :  { %v6656_v51 = vpop.eup %6655 }
0x11ac   :  { %v6658_v13 = vpop.eup %6657  ;;  %v4668_v47 = vadd.f32 1.0, %v6656_v51 }
0x11ad   :  { %v6660_v40 = vpop.eup %6659  ;;  %v4735_v16 = vmul.f32 %v6658_v13, %v4666_v6  ;;  %vm4740_vm8 = vweird.f32 %v6658_v13 }
0x11ae   :  { %v6662_v62 = vpop.eup %6661  ;;  %v4750_v32 = vmul.f32 %v6660_v40, %v4667_v44  ;;  %6663 = vrcp.f32 %v4668_v47  ;;  %v4775_v19 = vand.u32 2147483648, %v4668_v47  ;;  %vm9073_vm0 = vmor %vm4739_vm9, %vm4740_vm8  ;;  %vm4755_vm1 = vweird.f32 %v6660_v40 }
0x11af   :  { %v4736_v10 = vsub.f32 1.0, %v4735_v16  ;;  %v4669_v60 = vadd.f32 1.0, %v6662_v62  ;;  %v4773_v35 = vand.u32 2147483647, %v4668_v47  ;;  %vm4769_vm5 = vweird.f32 %v4668_v47  ;;  %vm9080_vm6 = vmor %vm4754_vm12, %vm4755_vm1 }
0x11b0   :  { %v4751_v29 = vsub.f32 1.0, %v4750_v32  ;;  %v4776_v42 = vor.u32 1.1754944e-38, %v4775_v19 }
0x11b1   :  { %v4737_v36 = vmul.f32 %v6658_v13, %v4736_v10  ;;  %6665 = vrcp.f32 %v4669_v60  ;;  %v4788_v0 = vand.u32 2147483647, %v4669_v60  ;;  %v4790_v54 = vand.u32 2147483648, %v4669_v60 }
0x11b2   :  { %v4752_v18 = vmul.f32 %v6660_v40, %v4751_v29  ;;  %vm4774_vm15 = vcmp.eq.f32.partialorder %v4773_v35, 8.507059e+37  ;;  %vm4784_vm8 = vweird.f32 %v4669_v60  ;;  %6667 = vrcp.f32 %v6704_v53 }
0x11b3   :  { %v4738_v33 = vadd.f32 %v6658_v13, %v4737_v36  ;;  %v4791_v24 = vor.u32 1.1754944e-38, %v4790_v54  ;;  %vm4789_vm12 = vcmp.eq.f32.partialorder %v4788_v0, 8.507059e+37 }
0x11b4   :  { %v6664_v52 = vpop.eup %6663  ;;  %v4753_v4 = vadd.f32 %v6660_v40, %v4752_v18 }
0x11b5   :  { %v4765_v48 = vmul.f32 %v6664_v52, %v4668_v47  ;;  %v4742_v3 = vsel %vm9073_vm0, %v6658_v13, %v4738_v33  ;;  %vm4770_vm3 = vweird.f32 %v6664_v52  ;;  %vm5052_vm0 = vcmask 517120  }
0x11b6   :  { %v4747_v20 = vsel %vm4744_vm4, %v4746_v63, %v4742_v3  ;;  %v4757_v28 = vsel %vm9080_vm6, %v6660_v40, %v4753_v4  ;;  %vm4771_vm10 = vmor %vm4769_vm5, %vm4770_vm3 }
0x11b7   :  { %v6666_v37 = vpop.eup %6665  ;;  %v4766_v43 = vsub.f32 1.0, %v4765_v48  ;;  %v4858_v58 = vmul.f32 %v4747_v20, %v9046_v14  ;;  %v4762_v46 = vsel %vm4759_vm13, %v4761_v39, %v4757_v28 }
0x11b8   :  { %v4780_v57 = vmul.f32 %v6666_v37, %v4669_v60  ;;  %vm4785_vm11 = vweird.f32 %v6666_v37  ;;  %v4859_v44 = vmul.f32 %v4762_v46, %v9049_v34 }
0x11b9   :  { %v4767_v23 = vmul.f32 %v6664_v52, %v4766_v43  ;;  %vm4786_vm9 = vmor %vm4784_vm8, %vm4785_vm11 }
0x11ba   :  { %v4781_v22 = vsub.f32 1.0, %v4780_v57 }
0x11bb   :  { %v4768_v30 = vadd.f32 %v6664_v52, %v4767_v23 }
0x11bc   :  { %v4782_v27 = vmul.f32 %v6666_v37, %v4781_v22 }
0x11bd   :  { %v4772_v61 = vsel %vm4771_vm10, %v6664_v52, %v4768_v30 }
0x11be   :  { %v4777_v7 = vsel %vm4774_vm15, %v4776_v42, %v4772_v61  ;;  %v4783_v1 = vadd.f32 %v6666_v37, %v4782_v27  ;;  %v6668_v42 = vpop.eup %6667 }
0x11bf   :  { %v4860_v8 = vmul.f32 %v4777_v7, %v9066_v5  ;;  %v5161_v54 = vmul.f32 2.0, %v6668_v42  ;;  %vm5165_vm1 = vweird.f32 %v6668_v42 }
0x11c0   :  { %v4787_v59 = vsel %vm4786_vm9, %v6666_v37, %v4783_v1 }
0x11c1   :  { %v4792_v6 = vsel %vm4789_vm12, %v4791_v24, %v4787_v59  ;;  %v4868_v31 = vpack.c.bf16 %v4860_v8, %v4858_v58  ;;  %v5162_v28 = vsub.f32 1.0, %v5161_v54 }
0x11c2   :  { %v4861_v51 = vmul.f32 %v4792_v6, %v9069_v55 }
0x11c3   :  { %5014 = vmatmul.bf16.gmra.mxu3 %v4868_v31  ;;  %v5163_v39 = vmul.f32 %v6668_v42, %v5162_v28 }
0x11c4   :  { %v4869_v13 = vpack.c.bf16 %v4861_v51, %v4859_v44 }
0x11c5   :  { %v5164_v7 = vadd.f32 %v6668_v42, %v5163_v39 }
0x11c6   :  { %5034 = vmatmul.bf16.gmra.mxu2 %v4869_v13 }
0x11c7   :  { %v9119_v58 = vsel %vm5165_vm1, %v6668_v42, %v5164_v7  ;;  %v6231_v42 = vld [vmem:[%s9266_s9] sm:$0xff] }
0x11f5   :  { %v4341_v47 = vpop.f32.mrf.mxu2 }
0x11f6   :  { %v4342_v40 = vadd.f32 %v4341_v47, %v8805_v17 }
0x11f8   :  { %v4350_v14 = vadd.f32 %v4342_v40, %v8163_v2  ;;  %v4905_v2 = vld [vmem:[%s9259_s3 + $0x43] ss:$0 sm:$0xff] }
0x11fa   :  { %v4366_v5 = vsel %vm659_vm2, %v4350_v14, 0.0 }
0x11fb   :  { %4367 = vadd.xlane.f32.xlu1 %v4366_v5 }
0x11fd   :  { %v4343_v16 = vpop.f32.mrf.mxu2 }
0x11fe   :  { %v4344_v62 = vadd.f32 %v4343_v16, %v8805_v17 }
0x1200   :  { %v4351_v32 = vadd.f32 %v4344_v62, %v8168_v50 }
0x1202   :  { %v4369_v34 = vsel %vm659_vm2, %v4351_v32, 0.0 }
0x1203   :  { %4370 = vadd.xlane.f32.xlu2 %v4369_v34 }
0x1223   :  { %v5011_v55 = vpop.f32.mrf.mxu3 }
0x1224   :  { %v5012_v18 = vadd.f32 %v5011_v55, %v4905_v2 }
0x1226   :  { %v5031_v10 = vpop.f32.mrf.mxu2 }
0x1227   :  { %v5032_v17 = vadd.f32 %v5031_v10, %v5012_v18 }
0x1229   :  { %v5042_v37 = vadd.f32 %v5032_v17, %v8809_v9 }
0x122b   :  { %v5013_v60 = vpop.f32.mrf.mxu3 }
0x122e   :  { %v5033_v29 = vpop.f32.mrf.mxu2 }
0x1246   :  { %v5015_v36 = vpop.f32.mrf.mxu3 }
0x1249   :  { %v5035_v52 = vpop.f32.mrf.mxu2 }
0x124e   :  { %v5016_v33 = vpop.f32.mrf.mxu3 }
0x124f   :  { %v5017_v48 = vadd.f32 %v5016_v33, %v4905_v2 }
0x1251   :  { %v5036_v12 = vpop.f32.mrf.mxu2 }
0x1252   :  { %v5037_v45 = vadd.f32 %v5036_v12, %v5017_v48 }
0x1254   :  { %v5043_v50 = vadd.f32 %v5037_v45, %v8822_v56 }
0x1256   :  { %v5048_v26 = vrot.slane %v5043_v50, 7 }
0x1258   :  { %v5050_v43 = vsel %vm5049_vm7, %v5048_v26, %v5042_v37 }
0x1259   :  { %v5053_v19 = vsel %vm5052_vm0, %v5050_v43, 0.0  ;;  %v5336_v21 = vsel %vm659_vm2, %v5050_v43, 0.0 }
0x125a   :  { %5337 = vst [vmem:[%s9265_s11 + $0x2] sm:$0x3] %v5336_v21  ;;  %5054 = vadd.xlane.f32.xlu0 %v5053_v19  ;;  %v5154_v30 = vrot.slane %v5053_v19, 4 }
0x125c   :  { %v5155_v0 = vadd.f32 %v5154_v30, %v5053_v19  ;;  %v6234_v19 = vld [vmem:[%s9266_s9 + $0x18] sm:$0xff] }
0x125d   :  { %5287 = vmatpush.bf16.msrb.mxu1 %v6234_v19 }
0x125e   :  { %v5156_v20 = vrot.slane %v5155_v0, 2 }
0x1260   :  { %v5157_v27 = vadd.f32 %v5156_v20, %v5155_v0 }
0x1262   :  { %v5158_v61 = vrot.slane %v5157_v27, 1 }
0x1264   :  { %v5159_v1 = vadd.f32 %v5158_v61, %v5157_v27 }
0x1266   :  { %v5167_v46 = vmul.f32 %v9119_v58, %v5159_v1 }
0x1268   :  { %v5168_v8 = vperm.slane %v5167_v46, 0 }
0x126a   :  { %v9122_v24 = vsub.f32 %v5043_v50, %v5168_v8  ;;  %v9126_v6 = vsub.f32 %v5042_v37, %v5168_v8 }
0x126c   :  { %v5172_v59 = vmul.f32 %v9122_v24, %v9122_v24  ;;  %v5171_v44 = vmul.f32 %v9126_v6, %v9126_v6 }
0x126e   :  { %v4368_v4 = vpop.xlane.xlu1 %4367  ;;  %v5175_v31 = vrot.slane %v5172_v59, 7  ;;  %v5152_v59 = vld [vmem:[%s9259_s3 + $0x46] ss:$0 sm:$0xff] }
0x126f   :  { %v4376_v11 = vmul.f32 %v4368_v4, %v7013_v41 }
0x1270   :  { %v5176_v51 = vsel %vm5049_vm7, %v5175_v31, %v5171_v44 }
0x1271   :  { %v9108_v57 = vsub.f32 %v4350_v14, %v4376_v11  ;;  %v5178_v13 = vsel %vm5052_vm0, %v5176_v51, 0.0  ;;  %v6233_v11 = vld [vmem:[%s9266_s9 + $0x10] sm:$0xff] }
0x1272   :  { %v5179_v47 = vrot.slane %v5178_v13, 4  ;;  %5288 = vmatpush.bf16.msrb.mxu1 %v6233_v11 }
0x1273   :  { %v4388_v9 = vmul.f32 %v9108_v57, %v9108_v57 }
0x1274   :  { %v5180_v40 = vadd.f32 %v5179_v47, %v5178_v13  ;;  %v5153_v47 = vld [vmem:[%s9259_s3 + $0x47] ss:$0 sm:$0xff] }
0x1275   :  { %v4402_v56 = vsel %vm659_vm2, %v4388_v9, 0.0 }
0x1276   :  { %v4371_v3 = vpop.xlane.xlu2 %4370  ;;  %4403 = vadd.xlane.f32.xlu1 %v4402_v56  ;;  %v5181_v14 = vrot.slane %v5180_v40, 2 }
0x1277   :  { %v4377_v23 = vmul.f32 %v4371_v3, %v7013_v41 }
0x1278   :  { %v5182_v5 = vadd.f32 %v5181_v14, %v5180_v40 }
0x1279   :  { %v9114_v35 = vsub.f32 %v4351_v32, %v4377_v23 }
0x127a   :  { %v5183_v32 = vrot.slane %v5182_v5, 1 }
0x127b   :  { %v4389_v63 = vmul.f32 %v9114_v35, %v9114_v35 }
0x127c   :  { %v5184_v60 = vadd.f32 %v5183_v32, %v5182_v5 }
0x127d   :  { %v4405_v22 = vsel %vm659_vm2, %v4389_v63, 0.0  ;;  %v6232_v63 = vld [vmem:[%s9266_s9 + $0x8] sm:$0xff] }
0x127e   :  { %4406 = vadd.xlane.f32.xlu2 %v4405_v22  ;;  %v5185_v2 = vmul.f32 %v5184_v60, %v9119_v58  ;;  %5289 = vmatpush.bf16.msrb.mxu1 %v6232_v63 }
0x1280   :  { %v5186_v48 = vadd.f32 1e-05, %v5185_v2 }
0x1282   :  { %6669 = vrsqrt.f32 %v5186_v48  ;;  %vm5193_vm4 = vweird.f32 %v5186_v48  ;;  %5290 = vmatpush.bf16.msrb.mxu1 %v6231_v42 }
0x1288   :  { %v6670_v12 = vpop.eup %6669 }
0x1289   :  { %v5188_v17 = vmul.f32 %v6670_v12, %v5186_v48  ;;  %vm5194_vm3 = vweird.f32 %v6670_v12 }
0x128a   :  { %vm5195_vm5 = vmor %vm5193_vm4, %vm5194_vm3 }
0x12cd   :  { %v5055_v16 = vpop.xlane.xlu0 %5054 }
0x12ce   :  { %v5056_v62 = vmul.f32 %v5055_v16, %v7013_v41 }
0x12d0   :  { %v5058_v34 = vrot.slane %v5056_v62, 1  ;;  %v9133_v55 = vsub.f32 %v5042_v37, %v5056_v62  ;;  %v5189_v37 = vmul.f32 %v6670_v12, %v5188_v17 }
0x12d2   :  { %v9135_v10 = vsub.f32 %v5043_v50, %v5058_v34  ;;  %v5063_v36 = vmul.f32 %v9133_v55, %v9133_v55  ;;  %v5190_v43 = vmul.f32 0.5, %v5189_v37 }
0x12d4   :  { %v5064_v29 = vmul.f32 %v9135_v10, %v9135_v10  ;;  %v5191_v56 = vsub.f32 1.5, %v5190_v43 }
0x12d6   :  { %v5067_v52 = vrot.slane %v5064_v29, 7  ;;  %v5192_v53 = vmul.f32 %v6670_v12, %v5191_v56  ;;  %v5045_v56 = vld [vmem:[%s9259_s3 + $0x45] ss:$0 sm:$0xff] }
0x12d8   :  { %v5068_v18 = vsel %vm5049_vm7, %v5067_v52, %v5063_v36  ;;  %v5196_v20 = vsel %vm5195_vm5, %v6670_v12, %v5192_v53  ;;  %v6228_v12 = vld [vmem:[%s9267_s8 + $0x8] sm:$0xff] }
0x12d9   :  { %v5070_v33 = vsel %vm5052_vm0, %v5068_v18, 0.0  ;;  %v5197_v39 = vperm.slane %v5196_v20, 0  ;;  %v6229_v18 = vld [vmem:[%s9267_s8 + $0x10] sm:$0xff] }
0x12da   :  { %5071 = vadd.xlane.f32.xlu0 %v5070_v33 }
0x12db   :  { %v5199_v46 = vmul.f32 %v5197_v39, %v9122_v24  ;;  %v5198_v14 = vmul.f32 %v5197_v39, %v9126_v6 }
0x12dd   :  { %v5201_v51 = vmul.f32 %v5199_v46, %v5152_v59  ;;  %v5200_v32 = vmul.f32 %v5198_v14, %v5152_v59 }
0x12df   :  { %v5203_v16 = vadd.f32 %v5201_v51, %v5153_v47  ;;  %v5202_v29 = vadd.f32 %v5200_v32, %v5153_v47 }
0x12e1   :  { %v5240_v60 = vpack.c.bf16 %v5203_v16, %v5203_v16  ;;  %v5239_v36 = vpack.c.bf16 %v5202_v29, %v5202_v29 }
0x12e3   :  { %v5251_v2 = vunpack.c.l.b16 %v5239_v36 }
0x12e9   :  { %v4404_v45 = vpop.xlane.xlu1 %4403 }
0x12ea   :  { %v4412_v50 = vmul.f32 %v4404_v45, %v7013_v41  ;;  %v6227_v45 = vld [vmem:[%s9267_s8] sm:$0xff] }
0x12ec   :  { %v4418_v26 = vadd.f32 1e-05, %v4412_v50 }
0x12ee   :  { %6671 = vrsqrt.f32 %v4418_v26  ;;  %vm4466_vm10 = vweird.f32 %v4418_v26 }
0x12f1   :  { %v4407_v21 = vpop.xlane.xlu2 %4406 }
0x12f2   :  { %v4413_v4 = vmul.f32 %v4407_v21, %v7013_v41 }
0x12f4   :  { %v6672_v9 = vpop.eup %6671  ;;  %v4419_v3 = vadd.f32 1e-05, %v4413_v4 }
0x12f5   :  { %v4461_v23 = vmul.f32 %v6672_v9, %v4418_v26  ;;  %vm4467_vm6 = vweird.f32 %v6672_v9 }
0x12f6   :  { %6673 = vrsqrt.f32 %v4419_v3  ;;  %vm4468_vm11 = vmor %vm4466_vm10, %vm4467_vm6  ;;  %vm4476_vm13 = vweird.f32 %v4419_v3 }
0x12f7   :  { %v4462_v22 = vmul.f32 %v6672_v9, %v4461_v23 }
0x12f9   :  { %v4463_v30 = vmul.f32 0.5, %v4462_v22 }
0x12fb   :  { %v4464_v0 = vsub.f32 1.5, %v4463_v30 }
0x12fc   :  { %v6674_v54 = vpop.eup %6673 }
0x12fd   :  { %v4465_v28 = vmul.f32 %v6672_v9, %v4464_v0  ;;  %v4471_v27 = vmul.f32 %v6674_v54, %v4419_v3  ;;  %vm4477_vm15 = vweird.f32 %v6674_v54 }
0x12fe   :  { %vm4478_vm8 = vmor %vm4476_vm13, %vm4477_vm15 }
0x12ff   :  { %v4472_v61 = vmul.f32 %v6674_v54, %v4471_v27  ;;  %v4469_v7 = vsel %vm4468_vm11, %v6672_v9, %v4465_v28 }
0x1300   :  { %v4484_v31 = vmul.f32 %v4469_v7, %v9108_v57 }
0x1301   :  { %v4473_v1 = vmul.f32 0.5, %v4472_v61 }
0x1302   :  { %v4490_v24 = vmul.f32 %v4484_v31, %v8915_v49 }
0x1303   :  { %v4474_v8 = vsub.f32 1.5, %v4473_v1 }
0x1304   :  { %v4496_v57 = vadd.f32 %v4490_v24, %v8922_v15 }
0x1305   :  { %v4475_v44 = vmul.f32 %v6674_v54, %v4474_v8 }
0x1307   :  { %v4479_v13 = vsel %vm4478_vm8, %v6674_v54, %v4475_v44 }
0x1308   :  { %v4485_v40 = vmul.f32 %v4479_v13, %v9114_v35  ;;  %v5252_v35 = vunpack.c.l.b16 %v5240_v60 }
0x130a   :  { %v4491_v5 = vmul.f32 %v4485_v40, %v8915_v49  ;;  %v5253_v52 = vrot.slane %v5252_v35, 7 }
0x130c   :  { %v4497_v62 = vadd.f32 %v4491_v5, %v8922_v15  ;;  %v5254_v6 = vsel %vm5049_vm7, %v5253_v52, %v5251_v2  ;;  %v6230_v15 = vld [vmem:[%s9267_s8 + $0x18] sm:$0xff] }
0x130d   :  { %v5255_v49 = vpack.c.b16 %v5254_v6, %v5254_v6  ;;  %5143 = vmatpush.bf16.msrb.mxu0 %v6230_v15 }
0x130e   :  { %v4500_v34 = vpack.c.bf16 %v4497_v62, %v4496_v57 }
0x1310   :  { %5940 = vmatmul.msk.bf16.gmra.mxu0 %vm659_vm2, %v4500_v34  ;;  %5943 = vmatmul.msk.bf16.gmra.mxu1 %vm659_vm2, %v4500_v34 }
0x1311   :  { %5144 = vmatpush.bf16.msrb.mxu0 %v6229_v18 }
0x1315   :  { %5145 = vmatpush.bf16.msrb.mxu0 %v6228_v12 }
0x1319   :  { %5146 = vmatpush.bf16.msrb.mxu0 %v6227_v45 }
0x1320   :  { %6085 = vmatmul.msk.bf16.vlgmr.msrb.gmra.mxu1 %vm659_vm2, %v5255_v49 }
0x134d   :  { %v5072_v33 = vpop.xlane.xlu0 %5071 }
0x134e   :  { %v5073_v48 = vmul.f32 %v5072_v33, %v7013_v41  ;;  %v5044_v41 = vld [vmem:[%s9259_s3 + $0x44] ss:$0 sm:$0xff] }
0x1350   :  { %v5074_v17 = vadd.f32 1e-05, %v5073_v48 }
0x1352   :  { %6675 = vrsqrt.f32 %v5074_v17  ;;  %vm5081_vm12 = vweird.f32 %v5074_v17 }
0x1358   :  { %v6676_v50 = vpop.eup %6675 }
0x1359   :  { %v5076_v37 = vmul.f32 %v6676_v50, %v5074_v17  ;;  %vm5082_vm9 = vweird.f32 %v6676_v50 }
0x135a   :  { %vm5083_vm0 = vmor %vm5081_vm12, %vm5082_vm9 }
0x135b   :  { %v5077_v26 = vmul.f32 %v6676_v50, %v5076_v37 }
0x135d   :  { %v5078_v43 = vmul.f32 0.5, %v5077_v26 }
0x135f   :  { %v5079_v19 = vsub.f32 1.5, %v5078_v43 }
0x1361   :  { %v5080_v21 = vmul.f32 %v6676_v50, %v5079_v19 }
0x1363   :  { %v5084_v4 = vsel %vm5083_vm0, %v6676_v50, %v5080_v21 }
0x1364   :  { %v5086_v11 = vrot.slane %v5084_v4, 1  ;;  %v5089_v9 = vmul.f32 %v5084_v4, %v9133_v55 }
0x1366   :  { %v5090_v3 = vmul.f32 %v5086_v11, %v9135_v10  ;;  %v5091_v23 = vmul.f32 %v5089_v9, %v5044_v41 }
0x1368   :  { %v5092_v63 = vmul.f32 %v5090_v3, %v5044_v41  ;;  %v5093_v22 = vadd.f32 %v5091_v23, %v5045_v56 }
0x136a   :  { %v5094_v53 = vadd.f32 %v5092_v63, %v5045_v56  ;;  %v5095_v30 = vpack.c.bf16 %v5093_v22, %v5093_v22 }
0x136c   :  { %v5096_v42 = vpack.c.bf16 %v5094_v53, %v5094_v53  ;;  %v5107_v54 = vunpack.c.l.b16 %v5095_v30 }
0x136e   :  { %v5108_v0 = vunpack.c.l.b16 %v5096_v42 }
0x1370   :  { %v5109_v20 = vrot.slane %v5108_v0, 7 }
0x1372   :  { %v5110_v28 = vsel %vm5049_vm7, %v5109_v20, %v5107_v54 }
0x1373   :  { %v5111_v27 = vpack.c.b16 %v5110_v28, %v5110_v28 }
0x1375   :  { %6068 = vmatmul.msk.bf16.vlgmr.msrb.gmra.mxu0 %vm659_vm2, %v5111_v27 }
0x138d   :  { %v4585_v55 = vpop.f32.mrf.mxu0  ;;  %v4609_v39 = vpop.f32.mrf.mxu1 }
0x138e   :  { %v9200_v61 = vadd.f32 %v4585_v55, %v8975_v25  ;;  %v9203_v10 = vadd.f32 %v4609_v39, %v8977_v38 }
0x1390   :  { %v5952_v7 = vmul.f32 -1.702, %v9200_v61  ;;  %v5953_v1 = vmul.f32 -1.702, %v9203_v10 }
0x1392   :  { %v4654_v46 = vmul.f32 1.442695, %v5952_v7  ;;  %v4656_v8 = vmul.f32 1.442695, %v5953_v1 }
0x1394   :  { %6677 = vpow2.f32 %v4654_v46 }
0x1395   :  { %6679 = vpow2.f32 %v4656_v8  ;;  %v4587_v59 = vpop.f32.mrf.mxu0  ;;  %v4611_v31 = vpop.f32.mrf.mxu1 }
0x1396   :  { %v9208_v44 = vadd.f32 %v4587_v59, %v8975_v25  ;;  %v9211_v51 = vadd.f32 %v4611_v31, %v8977_v38 }
0x1398   :  { %v5954_v13 = vmul.f32 -1.702, %v9208_v44  ;;  %v5955_v47 = vmul.f32 -1.702, %v9211_v51 }
0x139a   :  { %v6678_v40 = vpop.eup %6677  ;;  %v4658_v24 = vmul.f32 1.442695, %v5954_v13  ;;  %v4660_v16 = vmul.f32 1.442695, %v5955_v47 }
0x139b   :  { %v6680_v14 = vpop.eup %6679  ;;  %v4670_v5 = vadd.f32 1.0, %v6678_v40 }
0x139c   :  { %v4671_v57 = vadd.f32 1.0, %v6680_v14  ;;  %6681 = vpow2.f32 %v4658_v24 }
0x139d   :  { %6683 = vrcp.f32 %v4670_v5  ;;  %v5292_v62 = vpop.f32.mrf.mxu1  ;;  %vm4799_vm7 = vweird.f32 %v4670_v5  ;;  %v4803_v12 = vand.u32 2147483647, %v4670_v5  ;;  %v4805_v17 = vand.u32 2147483648, %v4670_v5 }
0x139e   :  { %6685 = vrcp.f32 %v4671_v57  ;;  %5340 = vst [vmem:[%s9265_s11 + $0x6] sm:$0x3] %v5292_v62  ;;  %vm4814_vm1 = vweird.f32 %v4671_v57  ;;  %v4818_v50 = vand.u32 2147483647, %v4671_v57  ;;  %v4820_v21 = vand.u32 2147483648, %v4671_v57 }
0x139f   :  { %6687 = vpow2.f32 %v4660_v16  ;;  %vm4804_vm6 = vcmp.eq.f32.partialorder %v4803_v12, 8.507059e+37  ;;  %v4806_v56 = vor.u32 1.1754944e-38, %v4805_v17 }
0x13a0   :  { %v4821_v20 = vor.u32 1.1754944e-38, %v4820_v21  ;;  %vm4819_vm9 = vcmp.eq.f32.partialorder %v4818_v50, 8.507059e+37 }
0x13a2   :  { %v6682_v25 = vpop.eup %6681 }
0x13a3   :  { %v6684_v38 = vpop.eup %6683  ;;  %v4672_v32 = vadd.f32 1.0, %v6682_v25 }
0x13a4   :  { %v6686_v34 = vpop.eup %6685  ;;  %v4795_v60 = vmul.f32 %v6684_v38, %v4670_v5  ;;  %vm4800_vm2 = vweird.f32 %v6684_v38 }
0x13a5   :  { %v6688_v29 = vpop.eup %6687  ;;  %v4810_v35 = vmul.f32 %v6686_v34, %v4671_v57  ;;  %6689 = vrcp.f32 %v4672_v32  ;;  %v5294_v36 = vpop.f32.mrf.mxu1  ;;  %v4835_v26 = vand.u32 2147483648, %v4672_v32  ;;  %vm9218_vm3 = vmor %vm4799_vm7, %vm4800_vm2  ;;  %vm4815_vm4 = vweird.f32 %v6686_v34 }
0x13a6   :  { %v4796_v52 = vsub.f32 1.0, %v4795_v60  ;;  %v4673_v2 = vadd.f32 1.0, %v6688_v29  ;;  %v4833_v9 = vand.u32 2147483647, %v4672_v32  ;;  %vm4829_vm10 = vweird.f32 %v4672_v32  ;;  %vm9225_vm11 = vmor %vm4814_vm1, %vm4815_vm4  ;;  %v6236_v36 = vld [vmem:[%s9268_s10 + $0x8] sm:$0xff] }
0x13a7   :  { %v4811_v6 = vsub.f32 1.0, %v4810_v35  ;;  %v4836_v22 = vor.u32 1.1754944e-38, %v4835_v26  ;;  %vm5206_vm7 = vcmask 254976   ;;  %5322 = vmatpush.bf16.msrb.mxu3 %v6236_v36 }
0x13a8   :  { %v4797_v49 = vmul.f32 %v6684_v38, %v4796_v52  ;;  %6691 = vrcp.f32 %v4673_v2  ;;  %v4848_v53 = vand.u32 2147483647, %v4673_v2  ;;  %v4850_v30 = vand.u32 2147483648, %v4673_v2 }
0x13a9   :  { %v4812_v18 = vmul.f32 %v6686_v34, %v4811_v6  ;;  %vm4834_vm8 = vcmp.eq.f32.partialorder %v4833_v9, 8.507059e+37  ;;  %vm4844_vm12 = vweird.f32 %v4673_v2  ;;  %v6235_v6 = vld [vmem:[%s9268_s10] sm:$0xff] }
0x13aa   :  { %v4798_v33 = vadd.f32 %v6684_v38, %v4797_v49  ;;  %v4851_v46 = vor.u32 1.1754944e-38, %v4850_v30  ;;  %vm4849_vm2 = vcmp.eq.f32.partialorder %v4848_v53, 8.507059e+37 }
0x13ab   :  { %v6690_v15 = vpop.eup %6689  ;;  %v4813_v19 = vadd.f32 %v6686_v34, %v4812_v18  ;;  %5323 = vmatpush.bf16.msrb.mxu3 %v6235_v6 }
0x13ac   :  { %v4825_v48 = vmul.f32 %v6690_v15, %v4672_v32  ;;  %v4802_v4 = vsel %vm9218_vm3, %v6684_v38, %v4798_v33  ;;  %vm4830_vm5 = vweird.f32 %v6690_v15 }
0x13ad   :  { %v4807_v42 = vsel %vm4804_vm6, %v4806_v56, %v4802_v4  ;;  %v4817_v0 = vsel %vm9225_vm11, %v6686_v34, %v4813_v19  ;;  %vm4831_vm15 = vmor %vm4829_vm10, %vm4830_vm5 }
0x13ae   :  { %v6692_v45 = vpop.eup %6691  ;;  %v4826_v37 = vsub.f32 1.0, %v4825_v48  ;;  %v4862_v39 = vmul.f32 %v4807_v42, %v9200_v61  ;;  %v4822_v7 = vsel %vm4819_vm9, %v4821_v20, %v4817_v0 }
0x13af   :  { %v4840_v41 = vmul.f32 %v6692_v45, %v4673_v2  ;;  %vm4845_vm13 = vweird.f32 %v6692_v45  ;;  %v4863_v13 = vmul.f32 %v4822_v7, %v9203_v10 }
0x13b0   :  { %v4827_v11 = vmul.f32 %v6690_v15, %v4826_v37  ;;  %vm4846_vm0 = vmor %vm4844_vm12, %vm4845_vm13  ;;  %v5204_v37 = vld [vmem:[%s9259_s3 + $0x50] ss:$0 sm:$0xff] }
0x13b1   :  { %v4841_v3 = vsub.f32 1.0, %v4840_v41 }
0x13b2   :  { %v4828_v63 = vadd.f32 %v6690_v15, %v4827_v11 }
0x13b3   :  { %v4842_v54 = vmul.f32 %v6692_v45, %v4841_v3 }
0x13b4   :  { %v4832_v28 = vsel %vm4831_vm15, %v6690_v15, %v4828_v63 }
0x13b5   :  { %v4837_v27 = vsel %vm4834_vm8, %v4836_v22, %v4832_v28  ;;  %v4843_v55 = vadd.f32 %v6692_v45, %v4842_v54 }
0x13b6   :  { %v4864_v1 = vmul.f32 %v4837_v27, %v9208_v44 }
0x13b7   :  { %v4847_v8 = vsel %vm4846_vm0, %v6692_v45, %v4843_v55 }
0x13b8   :  { %v4852_v59 = vsel %vm4849_vm2, %v4851_v46, %v4847_v8  ;;  %v4870_v31 = vpack.c.bf16 %v4864_v1, %v4862_v39 }
0x13b9   :  { %v4865_v47 = vmul.f32 %v4852_v59, %v9211_v51 }
0x13ba   :  { %5018 = vmatmul.bf16.gmra.mxu3 %v4870_v31 }
0x13bb   :  { %v4871_v40 = vpack.c.bf16 %v4865_v47, %v4863_v13 }
0x13bd   :  { %5038 = vmatmul.bf16.gmra.mxu2 %v4871_v40 }
0x13f2   :  { %v5148_v24 = vpop.f32.mrf.mxu0 }
0x13f3   :  { %v5207_v14 = vsel %vm5206_vm7, %v5148_v24, 0.0  ;;  %v5338_v61 = vsel %vm2145_vm14, %v5148_v24, 0.0 }
0x13f4   :  { %v5208_v5 = vrot.slane %v5207_v14, 4  ;;  %5339 = vst [vmem:[%s9265_s11 + $0x4] sm:$0x3] %v5338_v61 }
0x13f6   :  { %v5209_v44 = vadd.f32 %v5208_v5, %v5207_v14 }
0x13f8   :  { %v5210_v16 = vrot.slane %v5209_v44, 2 }
0x13fa   :  { %v5211_v57 = vadd.f32 %v5210_v16, %v5209_v44  ;;  %v5150_v62 = vpop.f32.mrf.mxu0 }
0x13fc   :  { %v5212_v10 = vrot.slane %v5211_v57, 1 }
0x13fe   :  { %v5213_v25 = vadd.f32 %v5212_v10, %v5211_v57 }
0x1400   :  { %v5214_v51 = vmul.f32 %v5213_v25, %v9119_v58 }
0x1402   :  { %v5215_v38 = vsub.f32 %v5148_v24, %v5214_v51 }
0x1404   :  { %v5216_v32 = vmul.f32 %v5215_v38, %v5215_v38 }
0x1406   :  { %v5217_v34 = vsel %vm5206_vm7, %v5216_v32, 0.0 }
0x1407   :  { %v5218_v60 = vrot.slane %v5217_v34, 4 }
0x1409   :  { %v5219_v29 = vadd.f32 %v5218_v60, %v5217_v34 }
0x140b   :  { %v5220_v35 = vrot.slane %v5219_v29, 2 }
0x140d   :  { %v5221_v52 = vadd.f32 %v5220_v35, %v5219_v29 }
0x140f   :  { %v5222_v2 = vrot.slane %v5221_v52, 1 }
0x1411   :  { %v5223_v49 = vadd.f32 %v5222_v2, %v5221_v52 }
0x1413   :  { %v5224_v15 = vmul.f32 %v5223_v49, %v9119_v58  ;;  %v5205_v58 = vld [vmem:[%s9259_s3 + $0x51] ss:$0 sm:$0xff] }
0x1415   :  { %v5225_v18 = vadd.f32 1e-05, %v5224_v15 }
0x1417   :  { %6693 = vrsqrt.f32 %v5225_v18  ;;  %vm5232_vm3 = vweird.f32 %v5225_v18 }
0x141d   :  { %v6694_v33 = vpop.eup %6693 }
0x141e   :  { %v5227_v48 = vmul.f32 %v6694_v33, %v5225_v18  ;;  %vm5233_vm1 = vweird.f32 %v6694_v33 }
0x141f   :  { %vm5234_vm4 = vmor %vm5232_vm3, %vm5233_vm1 }
0x1420   :  { %v5228_v12 = vmul.f32 %v6694_v33, %v5227_v48 }
0x1422   :  { %v5229_v17 = vmul.f32 0.5, %v5228_v12 }
0x1424   :  { %v5230_v45 = vsub.f32 1.5, %v5229_v17 }
0x1426   :  { %v5231_v50 = vmul.f32 %v6694_v33, %v5230_v45 }
0x1428   :  { %v5235_v26 = vsel %vm5234_vm4, %v6694_v33, %v5231_v50 }
0x1429   :  { %v5236_v43 = vmul.f32 %v5235_v26, %v5215_v38 }
0x142b   :  { %v5237_v19 = vmul.f32 %v5236_v43, %v5204_v37 }
0x142d   :  { %v5238_v21 = vadd.f32 %v5237_v19, %v5205_v58 }
0x142f   :  { %v5296_v41 = vpack.c.bf16 %v5238_v21, %v5238_v21 }
0x1431   :  { %6094 = vmatmul.msk.bf16.vlgmr.msrb.gmra.mxu3 %vm2145_vm14, %v5296_v41 }
0x143d   :  { %v5019_v4 = vpop.f32.mrf.mxu3 }
0x1440   :  { %v5039_v11 = vpop.f32.mrf.mxu2 }
0x1445   :  { %v5020_v9 = vpop.f32.mrf.mxu3 }
0x1448   :  { %v5040_v56 = vpop.f32.mrf.mxu2 }
0x14b4   :  { %v5325_v3 = vpop.f32.mrf.mxu3 }
0x14b5   :  { %5341 = vst [vmem:[%s9265_s11 + $0x8] sm:$0x3] %v5325_v3 }
0x14bc   :  { %v5327_v23 = vpop.f32.mrf.mxu3 }

</bundles_post_ra>
